<compile_context>
chip_gen: v6e
topology: v6e:2x2x1
jax: 0.10.0
libtpu: 0.0.40
codegen_flags: <defaults>
</compile_context>

<pallas_src>
import functools

import jax
import jax.numpy as jnp
from jax.experimental import pallas as pl
from jax.experimental.pallas import tpu as pltpu

IN_FEATURES = 3 * 128 * 128   # 49152
H1 = 512
H2 = 256
OUT = 1
LEAKY_SLOPE = 0.2


def _disc_fused_kernel(x_ref, w1_ref, b1_ref, w2_ref, b2_ref, w3_ref, b3_ref,
                       o_ref, acc_ref, *, alpha):
    """Fused Discriminator forward for one M tile.

    Grid: (M tiles [parallel], layer-1 K tiles [arbitrary/reduction]).
    Layer-1 partial products accumulate in fp32 VMEM scratch; on the last K
    step the epilogue applies bias + LeakyReLU and runs the tiny layer-2 and
    layer-3 matmuls entirely in VMEM.
    """
    k = pl.program_id(1)

    @pl.when(k == 0)
    def _():
        acc_ref[...] = jnp.zeros_like(acc_ref)

    # x is streamed fp32 and cast to bf16 on the VPU (hides under the w1 DMA),
    # so the MXU runs bf16 x bf16 with fp32 accumulation.
    x_bf16 = x_ref[...].astype(jnp.bfloat16)
    acc_ref[...] += jnp.dot(x_bf16, w1_ref[...],
                            preferred_element_type=jnp.float32)

    @pl.when(k == pl.num_programs(1) - 1)
    def _():
        h1 = acc_ref[...] + b1_ref[...]
        h1 = jnp.where(h1 > 0, h1, alpha * h1)            # LeakyReLU(0.2)
        h2 = jnp.dot(h1, w2_ref[...], preferred_element_type=jnp.float32)
        h2 = h2 + b2_ref[...]
        h2 = jnp.where(h2 > 0, h2, alpha * h2)            # LeakyReLU(0.2)
        out = jnp.dot(h2, w3_ref[...], preferred_element_type=jnp.float32)
        out = out + b3_ref[...]
        o_ref[...] = out.astype(o_ref.dtype)


def _is_v7x():
    try:
        return "v7" in jax.devices()[0].device_kind.lower()
    except Exception:   # defensive: fall back to the v5e/v6e configuration
        return False


def _choose_tiling(m_rows):
    """Pick (tm, tk, padded_m, vmem_limit_bytes) from device VMEM and batch size."""
    v7x = _is_v7x()
    # v7x: 64 MiB physical VMEM, ~16us kernel -> fewer K steps (tk=12288) pays.
    # v5e/v6e: 128 MiB physical, HBM-bound at 36-63us -> tk=8192 is plenty.
    tk = 12288 if v7x else 8192
    budget = (48 if v7x else 96) * 1024 * 1024      # leave physical-VMEM headroom
    assert IN_FEATURES % tk == 0

    # Per-pipeline VMEM bytes (streamed operands are double-buffered by Pallas).
    w1_db = 2 * tk * H1 * 2                                   # bf16 w1 tiles
    resident = 2 * 4 * (H1 + H1 * H2 + H2 + H2 * 128 + 128)   # small params (lane-padded)
    per_row = (H1 * 4            # fp32 accumulator scratch
               + 2 * tk * 4      # fp32 x tiles (double-buffered)
               + 2 * 128 * 4)    # lane-padded output tile (double-buffered)
    tm_max = max(8, ((budget - w1_db - resident) // per_row) // 8 * 8)

    padded_m = -(-m_rows // 8) * 8          # pad ragged / tiny batches to 8 rows
    if padded_m <= tm_max:
        tm = padded_m                       # whole batch in one tile: w1 streamed once
    else:
        # TODO(synk): for batches beyond tm_max, an M-innermost grid with a
        # (num_m_tiles, tm, H1) accumulator would reuse each w1 K-block across
        # M tiles instead of re-streaming w1 per M tile.
        tm = tm_max
        padded_m = -(-m_rows // tm) * tm

    vmem_limit = w1_db + resident + tm * per_row + 4 * 1024 * 1024
    return tm, tk, padded_m, int(vmem_limit)


def discriminator_pallas(x_flat, kernel_params):
    """Full Discriminator forward: (M, 49152) fp32 -> (M, 1) fp32."""
    w1, b1, w2, b2, w3, b3 = kernel_params
    M, K = x_flat.shape
    assert K == IN_FEATURES and w1.shape == (K, H1)
    # bf16 at rest: the cast must NOT be re-done inside the hot path.
    assert w1.dtype == jnp.bfloat16

    tm, tk, padded_m, vmem_limit = _choose_tiling(M)
    if padded_m != M:
        x_flat = jnp.pad(x_flat, ((0, padded_m - M), (0, 0)))

    kernel = functools.partial(_disc_fused_kernel, alpha=LEAKY_SLOPE)

    bytes_accessed = (padded_m * K * 4                         # x (fp32, streamed)
                      + K * H1 * 2                             # w1 (bf16, streamed once)
                      + (H1 + H1 * H2 + H2 + H2 * OUT + OUT) * 4
                      + padded_m * OUT * 4)
    flops = 2 * padded_m * (K * H1 + H1 * H2 + H2 * OUT)

    out = pl.pallas_call(
        kernel,
        out_shape=jax.ShapeDtypeStruct((padded_m, OUT), jnp.float32),
        grid_spec=pltpu.PrefetchScalarGridSpec(
            num_scalar_prefetch=0,
            grid=(padded_m // tm, K // tk),
            in_specs=[
                pl.BlockSpec((tm, tk), lambda i, k: (i, k)),    # x   (fp32, streamed)
                pl.BlockSpec((tk, H1), lambda i, k: (k, 0)),    # w1  (bf16, streamed)
                pl.BlockSpec((1, H1), lambda i, k: (0, 0)),     # b1  (resident)
                pl.BlockSpec((H1, H2), lambda i, k: (0, 0)),    # w2  (resident)
                pl.BlockSpec((1, H2), lambda i, k: (0, 0)),     # b2  (resident)
                pl.BlockSpec((H2, OUT), lambda i, k: (0, 0)),   # w3  (resident)
                pl.BlockSpec((1, OUT), lambda i, k: (0, 0)),    # b3  (resident)
            ],
            out_specs=pl.BlockSpec((tm, OUT), lambda i, k: (i, 0)),
            scratch_shapes=[pltpu.VMEM((tm, H1), jnp.float32)],
        ),
        compiler_params=pltpu.CompilerParams(
            # M tiles independent (megacore-shardable); K is the reduction.
            dimension_semantics=("parallel", "arbitrary"),
            vmem_limit_bytes=vmem_limit,
        ),
        cost_estimate=pl.CostEstimate(
            flops=flops, transcendentals=0, bytes_accessed=bytes_accessed),
    )(x_flat, w1, b1, w2, b2, w3, b3)

    return out[:M] if padded_m != M else out


def init_params(key):
    """fp32 parameters matching the PyTorch module (weights stored (in, out))."""
    k1, k2, k3, k4, k5, k6 = jax.random.split(key, 6)
    w1 = jax.random.normal(k1, (IN_FEATURES, H1), jnp.float32) / jnp.sqrt(IN_FEATURES)
    b1 = jax.random.normal(k2, (H1,), jnp.float32) * 0.01
    w2 = jax.random.normal(k3, (H1, H2), jnp.float32) / jnp.sqrt(H1)
    b2 = jax.random.normal(k4, (H2,), jnp.float32) * 0.01
    w3 = jax.random.normal(k5, (H2, OUT), jnp.float32) / jnp.sqrt(H2)
    b3 = jax.random.normal(k6, (OUT,), jnp.float32) * 0.01
    return (w1, b1), (w2, b2), (w3, b3)


def prepare_params(params):
    """One-time conversion to the kernel's at-rest layout.

    Called OUTSIDE the jitted forward so the fp32->bf16 cast of the dominant
    49152x512 weight happens once, not on every forward call.
    """
    (w1, b1), (w2, b2), (w3, b3) = params
    return (w1.astype(jnp.bfloat16),
            b1.reshape(1, H1).astype(jnp.float32),
            w2.astype(jnp.float32),
            b2.reshape(1, H2).astype(jnp.float32),
            w3.astype(jnp.float32),
            b3.reshape(1, OUT).astype(jnp.float32))


@jax.jit
def discriminator_forward(img, kernel_params):
    x = img.reshape(-1, IN_FEATURES)                # img.view(-1, 3*128*128)
    return discriminator_pallas(x, kernel_params)   # (batch, 1)


def _reference_forward(img, params, *, bf16_layer1):
    """Pure-JAX reference. bf16_layer1 matches the kernel's layer-1 precision."""
    (w1, b1), (w2, b2), (w3, b3) = params
    x = img.reshape(-1, IN_FEATURES)
    if bf16_layer1:
        x = x.astype(jnp.bfloat16).astype(jnp.float32)
        w1 = w1.astype(jnp.bfloat16).astype(jnp.float32)
    h1 = x @ w1 + b1
    h1 = jnp.where(h1 > 0, h1, LEAKY_SLOPE * h1)
    h2 = h1 @ w2 + b2
    h2 = jnp.where(h2 > 0, h2, LEAKY_SLOPE * h2)
    return h2 @ w3 + b3


if __name__ == "__main__":
    key = jax.random.PRNGKey(0)
    k_img, k_params = jax.random.split(key)

    batch = 2
    img = jax.random.normal(k_img, (batch, 3, 128, 128), jnp.float32)  # NCHW
    params_f32 = init_params(k_params)
    kernel_params = prepare_params(params_f32)   # one-time bf16-at-rest conversion

    out = discriminator_forward(img, kernel_params)
    out = jax.block_until_ready(out)
    assert out.shape == (batch, 1), out.shape

    # Strict check against a reference using the same bf16 layer-1 precision.
    ref_bf16 = _reference_forward(img, params_f32, bf16_layer1=True)
    if not jnp.allclose(out, ref_bf16, atol=1e-2, rtol=1e-2):
        raise AssertionError(f"mismatch vs bf16-matched ref: {out} vs {ref_bf16}")

    # Looser check against the full-fp32 PyTorch-equivalent forward.
    ref_fp32 = _reference_forward(img, params_f32, bf16_layer1=False)
    if not jnp.allclose(out, ref_fp32, atol=5e-2, rtol=5e-2):
        raise AssertionError(f"mismatch vs fp32 ref: {out} vs {ref_fp32}")

    print("KERNEL_OK")
</pallas_src>

<mosaic_0001>
module attributes {stable_mosaic.version = 11 : i64} {
  func.func @_disc_fused_kernel(%arg0: i32, %arg1: i32, %arg2: memref<8x8192xf32, #tpu.memory_space<vmem>>, %arg3: memref<8192x512xbf16, #tpu.memory_space<vmem>>, %arg4: memref<1x512xf32, #tpu.memory_space<vmem>>, %arg5: memref<512x256xf32, #tpu.memory_space<vmem>>, %arg6: memref<1x256xf32, #tpu.memory_space<vmem>>, %arg7: memref<256x1xf32, #tpu.memory_space<vmem>>, %arg8: memref<1x1xf32, #tpu.memory_space<vmem>>, %arg9: memref<8x1xf32, #tpu.memory_space<vmem>>, %arg10: memref<8x512xf32, #tpu.memory_space<vmem>>) attributes {dimension_semantics = [#tpu.dimension_semantics<parallel>, #tpu.dimension_semantics<arbitrary>], iteration_bounds = array<i64: 1, 6>, scalar_prefetch = 0 : i64, scratch_operands = 1 : i64, tpu.core_type = #tpu.core_type<tc>, window_params = [{transform_indices = @transform_0, window_bounds = array<i64: 8, 8192>}, {transform_indices = @transform_1, window_bounds = array<i64: 8192, 512>}, {pipeline_mode = #tpu.pipeline_mode<synchronous>, transform_indices = @transform_2, window_bounds = array<i64: 1, 512>}, {pipeline_mode = #tpu.pipeline_mode<synchronous>, transform_indices = @transform_3, window_bounds = array<i64: 512, 256>}, {pipeline_mode = #tpu.pipeline_mode<synchronous>, transform_indices = @transform_4, window_bounds = array<i64: 1, 256>}, {pipeline_mode = #tpu.pipeline_mode<synchronous>, transform_indices = @transform_5, window_bounds = array<i64: 256, 1>}, {pipeline_mode = #tpu.pipeline_mode<synchronous>, transform_indices = @transform_6, window_bounds = array<i64: 1, 1>}, {transform_indices = @transform_7, window_bounds = array<i64: 8, 1>}]} {
    %c0_i32 = arith.constant 0 : i32
    %0 = arith.cmpi eq, %arg1, %c0_i32 : i32
    %1 = arith.extui %0 : i1 to i32
    %c0_i32_0 = arith.constant 0 : i32
    %2 = arith.cmpi ne, %1, %c0_i32_0 : i32
    scf.if %2 {
      %cst_9 = arith.constant 0.000000e+00 : f32
      %13 = vector.broadcast %cst_9 : f32 to vector<8x512xf32>
      %c0_10 = arith.constant 0 : index
      %c0_11 = arith.constant 0 : index
      %14 = vector.load %arg10[%c0_10, %c0_11] : memref<8x512xf32, #tpu.memory_space<vmem>>, vector<8x512xf32>
      tpu.vector_store %arg10[%c0_10, %c0_11], %13 {strides = array<i32>} : memref<8x512xf32, #tpu.memory_space<vmem>>, vector<8x512xf32>,
    } else {
    }
    %c0 = arith.constant 0 : index
    %c0_1 = arith.constant 0 : index
    %3 = vector.load %arg2[%c0, %c0_1] : memref<8x8192xf32, #tpu.memory_space<vmem>>, vector<8x8192xf32>
    %4 = arith.truncf %3 : vector<8x8192xf32> to vector<8x8192xbf16>
    %c0_2 = arith.constant 0 : index
    %c0_3 = arith.constant 0 : index
    %5 = vector.load %arg10[%c0_2, %c0_3] : memref<8x512xf32, #tpu.memory_space<vmem>>, vector<8x512xf32>
    %c0_4 = arith.constant 0 : index
    %c0_5 = arith.constant 0 : index
    %6 = vector.load %arg3[%c0_4, %c0_5] : memref<8192x512xbf16, #tpu.memory_space<vmem>>, vector<8192x512xbf16>
    %cst = arith.constant dense<0.000000e+00> : vector<8x512xf32>
    %7 = tpu.matmul %4, %6, %cst {dimension_numbers = #tpu.dot_dimension_numbers<[1], [0], [0], [1], [0, 0, 1, 1], [], []>} : vector<8x8192xbf16>, vector<8192x512xbf16>, vector<8x512xf32> -> vector<8x512xf32>
    %8 = arith.addf %5, %7 : vector<8x512xf32>
    %c0_6 = arith.constant 0 : index
    %c0_7 = arith.constant 0 : index
    %9 = vector.load %arg10[%c0_6, %c0_7] : memref<8x512xf32, #tpu.memory_space<vmem>>, vector<8x512xf32>
    tpu.vector_store %arg10[%c0_6, %c0_7], %8 {strides = array<i32>} : memref<8x512xf32, #tpu.memory_space<vmem>>, vector<8x512xf32>,
    %c5_i32 = arith.constant 5 : i32
    %10 = arith.cmpi eq, %arg1, %c5_i32 : i32
    %11 = arith.extui %10 : i1 to i32
    %c0_i32_8 = arith.constant 0 : i32
    %12 = arith.cmpi ne, %11, %c0_i32_8 : i32
    scf.if %12 {
      %c0_9 = arith.constant 0 : index
      %c0_10 = arith.constant 0 : index
      %13 = vector.load %arg10[%c0_9, %c0_10] : memref<8x512xf32, #tpu.memory_space<vmem>>, vector<8x512xf32>
      %c0_11 = arith.constant 0 : index
      %c0_12 = arith.constant 0 : index
      %14 = vector.load %arg4[%c0_11, %c0_12] : memref<1x512xf32, #tpu.memory_space<vmem>>, vector<1x512xf32>
      %15 = vector.broadcast %14 : vector<1x512xf32> to vector<8x512xf32>
      %16 = arith.addf %13, %15 : vector<8x512xf32>
      %cst_13 = arith.constant 0.000000e+00 : f32
      %17 = vector.broadcast %cst_13 : f32 to vector<8x512xf32>
      %18 = arith.cmpf ogt, %16, %17 : vector<8x512xf32>
      %cst_14 = arith.constant 2.000000e-01 : f32
      %19 = vector.broadcast %cst_14 : f32 to vector<8x512xf32>
      %20 = arith.mulf %19, %16 : vector<8x512xf32>
      %21 = arith.select %18, %16, %20 : vector<8x512xi1>, vector<8x512xf32>
      %c0_15 = arith.constant 0 : index
      %c0_16 = arith.constant 0 : index
      %22 = vector.load %arg5[%c0_15, %c0_16] : memref<512x256xf32, #tpu.memory_space<vmem>>, vector<512x256xf32>
      %cst_17 = arith.constant dense<0.000000e+00> : vector<8x256xf32>
      %23 = tpu.matmul %21, %22, %cst_17 {dimension_numbers = #tpu.dot_dimension_numbers<[1], [0], [0], [1], [0, 0, 1, 1], [], []>} : vector<8x512xf32>, vector<512x256xf32>, vector<8x256xf32> -> vector<8x256xf32>
      %c0_18 = arith.constant 0 : index
      %c0_19 = arith.constant 0 : index
      %24 = vector.load %arg6[%c0_18, %c0_19] : memref<1x256xf32, #tpu.memory_space<vmem>>, vector<1x256xf32>
      %25 = vector.broadcast %24 : vector<1x256xf32> to vector<8x256xf32>
      %26 = arith.addf %23, %25 : vector<8x256xf32>
      %cst_20 = arith.constant 0.000000e+00 : f32
      %27 = vector.broadcast %cst_20 : f32 to vector<8x256xf32>
      %28 = arith.cmpf ogt, %26, %27 : vector<8x256xf32>
      %cst_21 = arith.constant 2.000000e-01 : f32
      %29 = vector.broadcast %cst_21 : f32 to vector<8x256xf32>
      %30 = arith.mulf %29, %26 : vector<8x256xf32>
      %31 = arith.select %28, %26, %30 : vector<8x256xi1>, vector<8x256xf32>
      %c0_22 = arith.constant 0 : index
      %c0_23 = arith.constant 0 : index
      %32 = vector.load %arg7[%c0_22, %c0_23] : memref<256x1xf32, #tpu.memory_space<vmem>>, vector<256x1xf32>
      %cst_24 = arith.constant dense<0.000000e+00> : vector<8x1xf32>
      %33 = tpu.matmul %31, %32, %cst_24 {dimension_numbers = #tpu.dot_dimension_numbers<[1], [0], [0], [1], [0, 0, 1, 1], [], []>} : vector<8x256xf32>, vector<256x1xf32>, vector<8x1xf32> -> vector<8x1xf32>
      %c0_25 = arith.constant 0 : index
      %c0_26 = arith.constant 0 : index
      %34 = vector.load %arg8[%c0_25, %c0_26] : memref<1x1xf32, #tpu.memory_space<vmem>>, vector<1x1xf32>
      %35 = vector.broadcast %34 : vector<1x1xf32> to vector<8x1xf32>
      %36 = arith.addf %33, %35 : vector<8x1xf32>
      %c0_27 = arith.constant 0 : index
      %c0_28 = arith.constant 0 : index
      %37 = vector.load %arg9[%c0_27, %c0_28] : memref<8x1xf32, #tpu.memory_space<vmem>>, vector<8x1xf32>
      tpu.vector_store %arg9[%c0_27, %c0_28], %36 {strides = array<i32>} : memref<8x1xf32, #tpu.memory_space<vmem>>, vector<8x1xf32>,
    } else {
    }
    return
  }
  func.func @transform_0(%arg0: i32, %arg1: i32) -> (i32, i32) {
    %c0_i32 = arith.constant 0 : i32
    return %arg0, %arg1 : i32, i32
  }
  func.func @transform_1(%arg0: i32, %arg1: i32) -> (i32, i32) {
    %c0_i32 = arith.constant 0 : i32
    %c0_i32_0 = arith.constant 0 : i32
    return %arg1, %c0_i32 : i32, i32
  }
  func.func @transform_2(%arg0: i32, %arg1: i32) -> (i32, i32) {
    %c0_i32 = arith.constant 0 : i32
    %c0_i32_0 = arith.constant 0 : i32
    %c0_i32_1 = arith.constant 0 : i32
    return %c0_i32, %c0_i32_0 : i32, i32
  }
  func.func @transform_3(%arg0: i32, %arg1: i32) -> (i32, i32) {
    %c0_i32 = arith.constant 0 : i32
    %c0_i32_0 = arith.constant 0 : i32
    %c0_i32_1 = arith.constant 0 : i32
    return %c0_i32, %c0_i32_0 : i32, i32
  }
  func.func @transform_4(%arg0: i32, %arg1: i32) -> (i32, i32) {
    %c0_i32 = arith.constant 0 : i32
    %c0_i32_0 = arith.constant 0 : i32
    %c0_i32_1 = arith.constant 0 : i32
    return %c0_i32, %c0_i32_0 : i32, i32
  }
  func.func @transform_5(%arg0: i32, %arg1: i32) -> (i32, i32) {
    %c0_i32 = arith.constant 0 : i32
    %c0_i32_0 = arith.constant 0 : i32
    %c0_i32_1 = arith.constant 0 : i32
    return %c0_i32, %c0_i32_0 : i32, i32
  }
  func.func @transform_6(%arg0: i32, %arg1: i32) -> (i32, i32) {
    %c0_i32 = arith.constant 0 : i32
    %c0_i32_0 = arith.constant 0 : i32
    %c0_i32_1 = arith.constant 0 : i32
    return %c0_i32, %c0_i32_0 : i32, i32
  }
  func.func @transform_7(%arg0: i32, %arg1: i32) -> (i32, i32) {
    %c0_i32 = arith.constant 0 : i32
    %c0_i32_0 = arith.constant 0 : i32
    return %arg0, %c0_i32 : i32, i32
  }
}

</mosaic_0001>

<bundles_post_ra>
// kernel: discriminator_forward.1
= control target key start
LH: loop header
LB: loop body
LE: loop exit
PB: predicated region body
PF: predicated region fallthrough
CT: control target
= control target key end

     0   :  { %s24302_s0 = inlined_call_operand.vmem [shape: f32[8,49152], index: 0, kind: input, shape index: {}]   ;;  %s24303_s1 = inlined_call_operand.hbm [shape: bf16[49152,512], index: 1, kind: input, shape index: {}]   ;;  %s24304_s2 = inlined_call_operand.hbm [shape: f32[1,512], index: 2, kind: input, shape index: {}]   ;;  %s24305_s3 = inlined_call_operand.hbm [shape: f32[512,256], index: 3, kind: input, shape index: {}]   ;;  %s24306_s4 = inlined_call_operand.hbm [shape: f32[1,256], index: 4, kind: input, shape index: {}]   ;;  %s24307_s5 = inlined_call_operand.vmem [shape: f32[256,1], index: 5, kind: input, shape index: {}]   ;;  %s24308_s6 = inlined_call_operand.<no memory space> [shape: f32[1,1], index: 6, kind: input, shape index: {}]   ;;  %s24309_s7 = inlined_call_operand.vmem [shape: f32[8,1], index: 7, kind: output, shape index: {}]  }
   0x1   :  { %v12_v0 = vstv %s24308_s6 }
   0x2   :  { %13 = vst [vmem:[#allocation3] sm:$0x1] %v12_v0 }
   0x3   :  { %14 = vsyncpa [#allocation5], 0 }
   0x4   :  { %16 = vsyncpa [#allocation5 + $0x1], 0 }
   0x5   :  { %17 = vsyncpa [#allocation7], 0 }
   0x6   :  { %18 = vsyncpa [#allocation10], 0  ;;  %s21496_s26 = smov 0   ;;  %s21498_s27 = smov 0  }
   0x7   :  { %s21500_s28 = smov 0   ;;  %s21502_s29 = smov 0  }
   0x8   :  { %s21504_s30 = smov 0   ;;  %s21506_s8 = smov 0  }
   0x9 LB: > { %s16011_s6 = sadd.s32 4294967295, %s21444_s8   ;;  %p84_p0 = scmp.ne.s32.totalorder %s21428_s27, %s21424_s26  ;;  %s21444_s8 = sphi %s21506_s8, %s24_s8   ;;  %s21440_s30 = sphi %s21504_s30, %s24385_s30   ;;  %s21436_s29 = sphi %s21502_s29, %s24384_s29   ;;  %s21432_s28 = sphi %s21500_s28, %s24383_s28   ;;  %s21428_s27 = sphi %s21498_s27, %s24382_s27   ;;  %s21424_s26 = sphi %s21496_s26, %s24381_s26  }
   0xa   : > { %p21526_p1 = scmp.eq.s32.totalorder %s16011_s6, 0  ;;  %p16012_p2 = scmp.ge.s32.totalorder %s21444_s8, 1 }
   0xb   : > { %p226_p3 = scmp.lt.s32.totalorder %s21444_s8, 7  ;;  %s21446_s12 = smov [#allocation6]  }
   0xc   : > { %s24334_s9 = scalar_select %p21526_p1, 1, 0 }
   0xd   : > { %p21534_p4 = por %p21526_p1, %p84_p0  ;;  %p21538_p5 = pnand %p16012_p2, %p226_p3 }
   0xe   : > { %s239_s13 = sshll.u32 %s21446_s12, 4  ;;  %s21447_s14 = smov [#allocation8]   ;;  %s240_s13 = int_to_ptr.vmem [resolvable:$true] %s239_s13 }
   0xf   : > { %s24335_s10 = scalar_select %p21534_p4, 1, 0 }
  0x10   : > { %s24336_s11 = scalar_select %p21538_p5, 1, 0 }
  0x11   : > { %p18133_p6 = pneg %p21538_p5  ;;  %s249_s15 = sshll.u32 %s21447_s14, 4  ;;  %s250_s15 = int_to_ptr.vmem [resolvable:$true] %s249_s15 }
  0x12   : > { %s21448_s17 = smov [#allocation9]   ;;  %s21291_s19 = scalar_lea.vmem %s240_s13, 64 }
  0x13   : > { %p21546_p7 = pnand %p18133_p6, %p21526_p1  ;;  %s263_s18 = sshll.u32 %s21448_s17, 4  ;;  %s264_s18 = int_to_ptr.vmem [resolvable:$true] %s263_s18 }
  0x14   : > { %p21292_p9 = scmp.ne.s32.totalorder %s240_s13, %s21291_s19  ;;  %p21299_p12 = scmp.lt.s32.totalorder %s240_s13, %s240_s13 }
  0x15   : > { %p21282_p8 = pneg %p21546_p7  ;;  %p21300_p13 = scmp.lt.s32.totalorder %s21291_s19, %s21291_s19 }
  0x17   : > { %p21294_p10 = pnand %p21292_p9, %p21282_p8  ;;  %p21301_p0 = por %p21300_p13, %p21299_p12 }
  0x19   : > { %p21295_p11 = pneg %p21294_p10 }
  0x1b   : > { %p21302_p2 = pnand %p21301_p0, %p21295_p11 }
  0x1d   : > { %21305 = shalt.err (!%p21302_p2)
}
  0x1e   : > { %18136 = dma.hbm_to_vmem [thread:$0]  (!%p21546_p7), %s24304_s2, 64, %s240_s13, [#allocation7]  }
  0x1f   : > { %s21317_s22 = scalar_lea.vmem %s250_s15, 16384  ;;  %p21325_p9 = scmp.lt.s32.totalorder %s250_s15, %s250_s15 }
  0x20   : > { %p21318_p3 = scmp.ne.s32.totalorder %s250_s15, %s21317_s22  ;;  %p21326_p10 = scmp.lt.s32.totalorder %s21317_s22, %s21317_s22 }
  0x22   : > { %p21320_p6 = pnand %p21318_p3, %p21282_p8  ;;  %p21327_p4 = por %p21326_p10, %p21325_p9 }
  0x24   : > { %p21321_p1 = pneg %p21320_p6 }
  0x26   : > { %p21328_p5 = pnand %p21327_p4, %p21321_p1 }
  0x28   : > { %21331 = shalt.err (!%p21328_p5)
}
  0x29   : > { %s24314_s23 = smov 256   ;;  %s21450_s24 = smov 16  }
  0x2a   : > { %18139 = dma.hbm_to_vmem [thread:$0]  (!%p21546_p7), %s24305_s3, 16384, %s250_s15, [#allocation7], %s24314_s23, %s24314_s23, %s21450_s24  }
  0x2b   : > { %s21343_s6 = scalar_lea.vmem %s264_s18, 32  ;;  %p21351_p4 = scmp.lt.s32.totalorder %s264_s18, %s264_s18 }
  0x2c   : > { %p21344_p11 = scmp.ne.s32.totalorder %s264_s18, %s21343_s6  ;;  %p21352_p5 = scmp.lt.s32.totalorder %s21343_s6, %s21343_s6 }
  0x2e   : > { %p21346_p12 = pnand %p21344_p11, %p21282_p8  ;;  %p21353_p13 = por %p21352_p5, %p21351_p4 }
  0x30   : > { %p21347_p1 = pneg %p21346_p12 }
  0x32   : > { %p21354_p0 = pnand %p21353_p13, %p21347_p1 }
  0x34   : > { %21357 = shalt.err (!%p21354_p0)
}
  0x35   : > { %18142 = dma.hbm_to_vmem [thread:$0]  (!%p21546_p7), %s24306_s4, 32, %s264_s18, [#allocation10]  }
  0x36   : > { %s33_s14 = sadd.s32 1, %s21440_s30  ;;  %p78_p8 = scmp.ne.s32.totalorder %s21432_s28, %s21428_s27 }
  0x37   : > { %p34_p2 = scmp.ge.s32.totalorder %s33_s14, 6  ;;  %p79_p3 = scmp.eq.s32.totalorder %s21444_s8, 0 }
  0x38   : > { %s71_s15 = sadd.s32 1, %s21432_s28  ;;  %s293_s16 = sand.u32 1, %s21432_s28  }
  0x39   : > { %s24387_s14 = smov (%p34_p2, %s33_s14), 0  ;;  %p80_p6 = por %p79_p3, %p78_p8 }
  0x3a   : > { %p18150_p9 = scmp.lt.s32.totalorder %s21444_s8, 6  ;;  %s68_s17 = ssub.s32 %s21440_s30, %s24387_s14 }
  0x3b   : > { %s16017_s19 = sshll.u32 %s293_s16, 14  ;;  %p69_p10 = scmp.eq.s32.totalorder %s68_s17, 0 }
  0x3c   : > { %s18083_s20 = sshll.u32 %s21440_s30, 18  ;;  %s297_s21 = scalar_lea.vmem [#allocation4], %s16017_s19 }
  0x3d   : > { %s305_s22 = sshll.u32 %s297_s21, 4  ;;  %s304_s6 = scalar_lea.hbm %s24303_s1, %s18083_s20  ;;  %s306_s22 = int_to_ptr.vmem [resolvable:$true] %s305_s22 }
  0x3e   : > { %s21592_s25 = scalar_select %p69_p10, %s21432_s28, %s71_s15  }
  0x3f   : > { %p21597_p7 = pnand %p18150_p9, %p80_p6  ;;  %s294_s13 = scalar_lea.sflag [#allocation5], %s293_s16 }
  0x40   : > { %s21371_s23 = scalar_lea.vmem %s306_s22, 262144  ;;  %s21451_s17 = smov [#allocation4]  }
  0x41   : > { %p21360_p11 = pneg %p21597_p7  ;;  %p21372_p12 = scmp.ne.s32.totalorder %s306_s22, %s21371_s23 }
  0x42   : > { %s21376_s15 = sshll.u32 %s21451_s17, 4  ;;  %s21377_s15 = int_to_ptr.vmem [resolvable:$false] %s21376_s15 }
  0x43   : > { %p21374_p1 = pnand %p21372_p12, %p21360_p11  ;;  %s21378_s19 = scalar_lea.vmem %s21377_s15, 524288 }
  0x44   : > { %p21379_p5 = scmp.lt.s32.totalorder %s306_s22, %s21377_s15  ;;  %p21380_p13 = scmp.lt.s32.totalorder %s21378_s19, %s21371_s23 }
  0x45   : > { %p21375_p4 = pneg %p21374_p1 }
  0x46   : > { %p21381_p0 = por %p21380_p13, %p21379_p5 }
  0x48   : > { %p21382_p8 = pnand %p21381_p0, %p21375_p4 }
  0x4a   : > { %21385 = shalt.err (!%p21382_p8)
}
  0x4b   : > { %s24339_s20 = smov 256   ;;  %p24340_p2 = scmp.ne.s32.totalorder %s24336_s11, 0 }
  0x4c   : > { %18146 = dma.hbm_to_vmem [thread:$0]  (!%p21597_p7), %s304_s6, 262144, %s306_s22, %s294_s13, %s24339_s20, %s24339_s20, %s21450_s24  }
  0x4d   : > { %317 = sbr.rel (%p24340_p2) target bundleno = 2821 (0xb05), region = 48 }
  0x52   : > { %s319_s16 = sand.u32 1, %s21428_s27   ;;  %p24341_p3 = scmp.ne.s32.totalorder %s24335_s10, 0 }
  0x53   : > { %s16022_s21 = sshll.u32 %s319_s16, 14  ;;  %s320_s18 = scalar_lea.sflag [#allocation5], %s319_s16 }
  0x54   : > { %s21611_s26 = scalar_lea.vmem [#allocation4], %s16022_s21 }
  0x55   : > { %21411 = dma.done.wait (%p24341_p3), %s320_s18, 262144  }
  0x56   : > { %21413 = vsyncadd (%p24341_p3), %s320_s18, 4294705152  ;;  %p24342_p6 = scmp.ne.s32.totalorder %s24334_s9, 0 }
  0x58   : > { %21415 = dma.done.wait (%p24342_p6), [#allocation7], 16448  }
  0x59   : > { %21417 = vsyncadd (%p24342_p6), [#allocation7], 4294950848 }
  0x5a   : > { %21419 = dma.done.wait (%p24342_p6), [#allocation10], 32  }
  0x5b   : > { %21421 = vsyncadd (%p24342_p6), [#allocation10], 4294967264  ;;  %s16026_s11 = sshll.u32 %s21436_s29, 6  ;;  %p16028_p10 = scmp.ne.s32.totalorder %s21436_s29, 0 }
  0x5c   : > { %p377_p9 = scmp.lt.s32.totalorder %s16026_s11, 383 }
  0x5d   : > { %392 = sbr.rel (%p16028_p10) target bundleno = 101 (0x65), region = 68 }
  0x5e   : > { %s24389_s11 = smov (!%p377_p9, %s16026_s11), 383 }
  0x5f   : > { %s16027_s23 = sshll.u32 %s24389_s11, 3 }
  0x60   : > { %s21629_s22 = scalar_lea.vmem %s24302_s0, %s16027_s23 }
  0x62   : > { %v21452_v1 = vmov 0.0  }
  0x63   : > { %393 = vst [vmem:[#allocation2 + $0x10] sm:$0xff] %v21452_v1  ;;  %394 = vst [vmem:[#allocation2] sm:$0xff] %v21452_v1 }
  0x64   : > { %395 = vst [vmem:[#allocation2 + $0x18] sm:$0xff] %v21452_v1  ;;  %396 = vst [vmem:[#allocation2 + $0x8] sm:$0xff] %v21452_v1 }
  0x65 PF: > { %v18208_v2 = vld [vmem:[%s21611_s26 + $0xe4] ss:$16 sps:$4 sm:$0xff]   ;;  %v18212_v4 = vld [vmem:[%s21611_s26 + $0xe0] ss:$16 sps:$4 sm:$0xff]   ;;  %p18077_p7 = scmp.ne.s32.totalorder %s21436_s29, 5 }
  0x66   : > { %v18210_v3 = vld [vmem:[%s21611_s26 + $0x2e4] ss:$16 sps:$4 sm:$0xff]   ;;  %12817 = vmatprep.subr.bf16.mxu0 %v18208_v2  ;;  %v18213_v5 = vld [vmem:[%s21611_s26 + $0x2e0] ss:$16 sps:$4 sm:$0xff]  }
  0x67   : > { %12858 = vmatprep.subr.bf16.mxu1 %v18210_v3  ;;  %v18214_v6 = vld [vmem:[%s21611_s26 + $0xc4] ss:$16 sps:$4 sm:$0xff]   ;;  %12818 = vmatpush1.bf16.msra.mxu0 %v18212_v4  ;;  %v18218_v8 = vld [vmem:[%s21611_s26 + $0xc0] ss:$16 sps:$4 sm:$0xff]  }
  0x68   : > { %12859 = vmatpush1.bf16.msra.mxu1 %v18213_v5  ;;  %v18216_v7 = vld [vmem:[%s21611_s26 + $0x2c4] ss:$16 sps:$4 sm:$0xff]   ;;  %12819 = vmatprep.subr.bf16.mxu0 %v18214_v6  ;;  %v18219_v9 = vld [vmem:[%s21611_s26 + $0x2c0] ss:$16 sps:$4 sm:$0xff]  }
  0x69   : > { %12860 = vmatprep.subr.bf16.mxu1 %v18216_v7  ;;  %v18220_v10 = vld [vmem:[%s21611_s26 + $0xa4] ss:$16 sps:$4 sm:$0xff]   ;;  %v18224_v12 = vld [vmem:[%s21611_s26 + $0xa0] ss:$16 sps:$4 sm:$0xff]  }
  0x6a   : > { %v18222_v11 = vld [vmem:[%s21611_s26 + $0x2a4] ss:$16 sps:$4 sm:$0xff]   ;;  %v18225_v13 = vld [vmem:[%s21611_s26 + $0x2a0] ss:$16 sps:$4 sm:$0xff]  }
  0x6b   : > { %12820 = vmatpush1.bf16.msra.mxu0 %v18218_v8  ;;  %v18226_v14 = vld [vmem:[%s21611_s26 + $0x84] ss:$16 sps:$4 sm:$0xff]   ;;  %v18230_v16 = vld [vmem:[%s21611_s26 + $0x80] ss:$16 sps:$4 sm:$0xff]  }
  0x6c   : > { %12861 = vmatpush1.bf16.msra.mxu1 %v18219_v9  ;;  %12821 = vmatprep.subr.bf16.mxu0 %v18220_v10  ;;  %v18228_v15 = vld [vmem:[%s21611_s26 + $0x284] ss:$16 sps:$4 sm:$0xff]   ;;  %v18231_v17 = vld [vmem:[%s21611_s26 + $0x280] ss:$16 sps:$4 sm:$0xff]  }
  0x6d   : > { %12862 = vmatprep.subr.bf16.mxu1 %v18222_v11  ;;  %v18232_v18 = vld [vmem:[%s21611_s26 + $0x64] ss:$16 sps:$4 sm:$0xff]   ;;  %v18236_v20 = vld [vmem:[%s21611_s26 + $0x60] ss:$16 sps:$4 sm:$0xff]  }
  0x6e   : > { %v18234_v19 = vld [vmem:[%s21611_s26 + $0x264] ss:$16 sps:$4 sm:$0xff]   ;;  %v18237_v21 = vld [vmem:[%s21611_s26 + $0x260] ss:$16 sps:$4 sm:$0xff]  }
  0x6f   : > { %12822 = vmatpush1.bf16.msra.mxu0 %v18224_v12  ;;  %v18238_v22 = vld [vmem:[%s21611_s26 + $0x44] ss:$16 sps:$4 sm:$0xff]   ;;  %v18242_v24 = vld [vmem:[%s21611_s26 + $0x40] ss:$16 sps:$4 sm:$0xff]  }
  0x70   : > { %12863 = vmatpush1.bf16.msra.mxu1 %v18225_v13  ;;  %12823 = vmatprep.subr.bf16.mxu0 %v18226_v14  ;;  %v18240_v23 = vld [vmem:[%s21611_s26 + $0x244] ss:$16 sps:$4 sm:$0xff]   ;;  %v18243_v25 = vld [vmem:[%s21611_s26 + $0x240] ss:$16 sps:$4 sm:$0xff]  }
  0x71   : > { %12864 = vmatprep.subr.bf16.mxu1 %v18228_v15  ;;  %v18244_v26 = vld [vmem:[%s21611_s26 + $0x24] ss:$16 sps:$4 sm:$0xff]   ;;  %v18248_v28 = vld [vmem:[%s21611_s26 + $0x20] ss:$16 sps:$4 sm:$0xff]  }
  0x72   : > { %v18246_v27 = vld [vmem:[%s21611_s26 + $0x224] ss:$16 sps:$4 sm:$0xff]   ;;  %v18249_v29 = vld [vmem:[%s21611_s26 + $0x220] ss:$16 sps:$4 sm:$0xff]  }
  0x73   : > { %12824 = vmatpush1.bf16.msra.mxu0 %v18230_v16  ;;  %v18250_v30 = vld [vmem:[%s21611_s26 + $0x4] ss:$16 sps:$4 sm:$0xff]   ;;  %v18254_v32 = vld [vmem:[%s21611_s26] ss:$16 sps:$4 sm:$0xff]  }
  0x74   : > { %12865 = vmatpush1.bf16.msra.mxu1 %v18231_v17  ;;  %12825 = vmatprep.subr.bf16.mxu0 %v18232_v18  ;;  %v18252_v31 = vld [vmem:[%s21611_s26 + $0x204] ss:$16 sps:$4 sm:$0xff]   ;;  %v18255_v33 = vld [vmem:[%s21611_s26 + $0x200] ss:$16 sps:$4 sm:$0xff]  }
  0x75   : > { %12866 = vmatprep.subr.bf16.mxu1 %v18234_v19  ;;  %v18256_v34 = vld [vmem:[%s21611_s26 + $0x1e4] ss:$16 sps:$4 sm:$0xff]   ;;  %v18260_v36 = vld [vmem:[%s21611_s26 + $0x1e0] ss:$16 sps:$4 sm:$0xff]  }
  0x76   : > { %v18258_v35 = vld [vmem:[%s21611_s26 + $0x3e4] ss:$16 sps:$4 sm:$0xff]   ;;  %v18261_v37 = vld [vmem:[%s21611_s26 + $0x3e0] ss:$16 sps:$4 sm:$0xff]  }
  0x77   : > { %12826 = vmatpush1.bf16.msra.mxu0 %v18236_v20  ;;  %v18262_v38 = vld [vmem:[%s21611_s26 + $0x1c4] ss:$16 sps:$4 sm:$0xff]   ;;  %v18266_v40 = vld [vmem:[%s21611_s26 + $0x1c0] ss:$16 sps:$4 sm:$0xff]  }
  0x78   : > { %12867 = vmatpush1.bf16.msra.mxu1 %v18237_v21  ;;  %12827 = vmatprep.subr.bf16.mxu0 %v18238_v22  ;;  %v18264_v39 = vld [vmem:[%s21611_s26 + $0x3c4] ss:$16 sps:$4 sm:$0xff]   ;;  %v18267_v41 = vld [vmem:[%s21611_s26 + $0x3c0] ss:$16 sps:$4 sm:$0xff]  }
  0x79   : > { %12868 = vmatprep.subr.bf16.mxu1 %v18240_v23  ;;  %v18268_v42 = vld [vmem:[%s21611_s26 + $0x1a4] ss:$16 sps:$4 sm:$0xff]   ;;  %v18272_v44 = vld [vmem:[%s21611_s26 + $0x1a0] ss:$16 sps:$4 sm:$0xff]  }
  0x7a   : > { %v18270_v43 = vld [vmem:[%s21611_s26 + $0x3a4] ss:$16 sps:$4 sm:$0xff]   ;;  %v18273_v45 = vld [vmem:[%s21611_s26 + $0x3a0] ss:$16 sps:$4 sm:$0xff]  }
  0x7b   : > { %12828 = vmatpush1.bf16.msra.mxu0 %v18242_v24  ;;  %v18274_v46 = vld [vmem:[%s21611_s26 + $0x184] ss:$16 sps:$4 sm:$0xff]   ;;  %v18278_v49 = vld [vmem:[%s21611_s26 + $0x180] ss:$16 sps:$4 sm:$0xff]  }
  0x7c   : > { %12869 = vmatpush1.bf16.msra.mxu1 %v18243_v25  ;;  %12829 = vmatprep.subr.bf16.mxu0 %v18244_v26  ;;  %v18276_v47 = vld [vmem:[%s21611_s26 + $0x384] ss:$16 sps:$4 sm:$0xff]   ;;  %v18279_v50 = vld [vmem:[%s21611_s26 + $0x380] ss:$16 sps:$4 sm:$0xff]  }
  0x7d   : > { %12870 = vmatprep.subr.bf16.mxu1 %v18246_v27  ;;  %v398_v48 = vld [vmem:[%s21629_s22 + $0x8] sm:$0xff]  ;;  %v400_v52 = vld [vmem:[%s21629_s22 + $0x18] sm:$0xff]  ;;  %v18284_v56 = vld [vmem:[%s21611_s26 + $0x160] ss:$16 sps:$4 sm:$0xff]  }
  0x7e   : > { %v21681_v51 = vpack.c.bf16 %v398_v48, %v398_v48  ;;  %v18280_v53 = vld [vmem:[%s21611_s26 + $0x164] ss:$16 sps:$4 sm:$0xff]   ;;  %v21685_v54 = vpack.c.bf16 %v400_v52, %v400_v52  ;;  %v18285_v57 = vld [vmem:[%s21611_s26 + $0x360] ss:$16 sps:$4 sm:$0xff]  }
  0x7f   : > { %12830 = vmatpush1.bf16.msra.mxu0 %v18248_v28  ;;  %v18282_v55 = vld [vmem:[%s21611_s26 + $0x364] ss:$16 sps:$4 sm:$0xff]   ;;  %v18290_v60 = vld [vmem:[%s21611_s26 + $0x140] ss:$16 sps:$4 sm:$0xff]  }
  0x80   : > { %12871 = vmatpush1.bf16.msra.mxu1 %v18249_v29  ;;  %12831 = vmatprep.subr.bf16.mxu0 %v18250_v30  ;;  %v18286_v58 = vld [vmem:[%s21611_s26 + $0x144] ss:$16 sps:$4 sm:$0xff]   ;;  %v18291_v61 = vld [vmem:[%s21611_s26 + $0x340] ss:$16 sps:$4 sm:$0xff]  }
  0x81   : > { %12872 = vmatprep.subr.bf16.mxu1 %v18252_v31  ;;  %12849 = vmatprep.mubr.bf16.mxu0 %v21681_v51  ;;  %v18288_v59 = vld [vmem:[%s21611_s26 + $0x344] ss:$16 sps:$4 sm:$0xff]   ;;  %v18296_v0 = vld [vmem:[%s21611_s26 + $0x120] ss:$16 sps:$4 sm:$0xff]  }
  0x82   : > { %12890 = vmatprep.mubr.bf16.mxu1 %v21685_v54  ;;  %v18292_v62 = vld [vmem:[%s21611_s26 + $0x124] ss:$16 sps:$4 sm:$0xff]   ;;  %v18297_v1 = vld [vmem:[%s21611_s26 + $0x320] ss:$16 sps:$4 sm:$0xff]  }
  0x83   : > { %12832 = vmatpush1.bf16.msra.mxu0 %v18254_v32  ;;  %v18294_v63 = vld [vmem:[%s21611_s26 + $0x324] ss:$16 sps:$4 sm:$0xff]   ;;  %v18302_v4 = vld [vmem:[%s21611_s26 + $0x100] ss:$16 sps:$4 sm:$0xff]  }
  0x84   : > { %12873 = vmatpush1.bf16.msra.mxu1 %v18255_v33  ;;  %12833 = vmatprep.subr.bf16.mxu0 %v18256_v34  ;;  %v18298_v2 = vld [vmem:[%s21611_s26 + $0x104] ss:$16 sps:$4 sm:$0xff]   ;;  %v18303_v5 = vld [vmem:[%s21611_s26 + $0x300] ss:$16 sps:$4 sm:$0xff]  }
  0x85   : > { %12874 = vmatprep.subr.bf16.mxu1 %v18258_v35  ;;  %v18300_v3 = vld [vmem:[%s21611_s26 + $0x304] ss:$16 sps:$4 sm:$0xff]   ;;  %v18304_v12 = vld [vmem:[%s21611_s26 + $0x4e0] ss:$16 sps:$4 sm:$0xff]  }
  0x86   : > { %v397_v6 = vld [vmem:[%s21629_s22] sm:$0xff]  ;;  %v399_v7 = vld [vmem:[%s21629_s22 + $0x10] sm:$0xff] }
  0x87   : > { %12834 = vmatpush2.bf16.msra.mxu0 %v18260_v36  ;;  %v18306_v8 = vld [vmem:[%s21611_s26 + $0x4e4] ss:$16 sps:$4 sm:$0xff]   ;;  %v21708_v10 = vpack.c.bf16 %v397_v6, %v397_v6  ;;  %v21710_v11 = vpack.c.bf16 %v399_v7, %v399_v7  ;;  %v18307_v13 = vld [vmem:[%s21611_s26 + $0x6e0] ss:$16 sps:$4 sm:$0xff]  }
  0x88   : > { %12875 = vmatpush2.bf16.msra.mxu1 %v18261_v37  ;;  %12835 = vmatprep.subr.bf16.mxu0 %v18262_v38  ;;  %v18309_v9 = vld [vmem:[%s21611_s26 + $0x6e4] ss:$16 sps:$4 sm:$0xff]   ;;  %v18310_v16 = vld [vmem:[%s21611_s26 + $0x4c0] ss:$16 sps:$4 sm:$0xff]  }
  0x89   : > { %12876 = vmatprep.subr.bf16.mxu1 %v18264_v39  ;;  %v18312_v14 = vld [vmem:[%s21611_s26 + $0x4c4] ss:$16 sps:$4 sm:$0xff]   ;;  %v18313_v17 = vld [vmem:[%s21611_s26 + $0x6c0] ss:$16 sps:$4 sm:$0xff]  }
  0x8a   : > { %v18315_v15 = vld [vmem:[%s21611_s26 + $0x6c4] ss:$16 sps:$4 sm:$0xff]   ;;  %v18316_v20 = vld [vmem:[%s21611_s26 + $0x4a0] ss:$16 sps:$4 sm:$0xff]  }
  0x8b   : > { %12836 = vmatpush2.bf16.msra.mxu0 %v18266_v40  ;;  %v18318_v18 = vld [vmem:[%s21611_s26 + $0x4a4] ss:$16 sps:$4 sm:$0xff]   ;;  %v18319_v21 = vld [vmem:[%s21611_s26 + $0x6a0] ss:$16 sps:$4 sm:$0xff]  }
  0x8c   : > { %12877 = vmatpush2.bf16.msra.mxu1 %v18267_v41  ;;  %12837 = vmatprep.subr.bf16.mxu0 %v18268_v42  ;;  %v18321_v19 = vld [vmem:[%s21611_s26 + $0x6a4] ss:$16 sps:$4 sm:$0xff]   ;;  %v18322_v24 = vld [vmem:[%s21611_s26 + $0x480] ss:$16 sps:$4 sm:$0xff]  }
  0x8d   : > { %12878 = vmatprep.subr.bf16.mxu1 %v18270_v43  ;;  %v18324_v22 = vld [vmem:[%s21611_s26 + $0x484] ss:$16 sps:$4 sm:$0xff]   ;;  %v18325_v25 = vld [vmem:[%s21611_s26 + $0x680] ss:$16 sps:$4 sm:$0xff]  }
  0x8e   : > { %v18327_v23 = vld [vmem:[%s21611_s26 + $0x684] ss:$16 sps:$4 sm:$0xff]   ;;  %v18328_v28 = vld [vmem:[%s21611_s26 + $0x460] ss:$16 sps:$4 sm:$0xff]  }
  0x8f   : > { %12838 = vmatpush2.bf16.msra.mxu0 %v18272_v44  ;;  %v18330_v26 = vld [vmem:[%s21611_s26 + $0x464] ss:$16 sps:$4 sm:$0xff]   ;;  %v18331_v29 = vld [vmem:[%s21611_s26 + $0x660] ss:$16 sps:$4 sm:$0xff]  }
  0x90   : > { %12879 = vmatpush2.bf16.msra.mxu1 %v18273_v45  ;;  %12839 = vmatprep.subr.bf16.mxu0 %v18274_v46  ;;  %v18333_v27 = vld [vmem:[%s21611_s26 + $0x664] ss:$16 sps:$4 sm:$0xff]   ;;  %v18334_v32 = vld [vmem:[%s21611_s26 + $0x440] ss:$16 sps:$4 sm:$0xff]  }
  0x91   : > { %12880 = vmatprep.subr.bf16.mxu1 %v18276_v47  ;;  %v18336_v30 = vld [vmem:[%s21611_s26 + $0x444] ss:$16 sps:$4 sm:$0xff]   ;;  %v18337_v33 = vld [vmem:[%s21611_s26 + $0x640] ss:$16 sps:$4 sm:$0xff]  }
  0x92   : > { %v18339_v31 = vld [vmem:[%s21611_s26 + $0x644] ss:$16 sps:$4 sm:$0xff]   ;;  %v18340_v37 = vld [vmem:[%s21611_s26 + $0x420] ss:$16 sps:$4 sm:$0xff]  }
  0x93   : > { %12840 = vmatpush2.bf16.msra.mxu0 %v18278_v49  ;;  %v18342_v34 = vld [vmem:[%s21611_s26 + $0x424] ss:$16 sps:$4 sm:$0xff]   ;;  %v18343_v38 = vld [vmem:[%s21611_s26 + $0x620] ss:$16 sps:$4 sm:$0xff]  }
  0x94   : > { %12881 = vmatpush2.bf16.msra.mxu1 %v18279_v50  ;;  %12841 = vmatprep.subr.bf16.mxu0 %v18280_v53  ;;  %v18345_v35 = vld [vmem:[%s21611_s26 + $0x624] ss:$16 sps:$4 sm:$0xff]   ;;  %v18346_v44 = vld [vmem:[%s21611_s26 + $0x400] ss:$16 sps:$4 sm:$0xff]  }
  0x95   : > { %12882 = vmatprep.subr.bf16.mxu1 %v18282_v55  ;;  %v402_v36 = vld [vmem:[%s21629_s22 + $0x28] sm:$0xff]  ;;  %v404_v40 = vld [vmem:[%s21629_s22 + $0x38] sm:$0xff]  ;;  %v18349_v45 = vld [vmem:[%s21611_s26 + $0x600] ss:$16 sps:$4 sm:$0xff]  }
  0x96   : > { %v21741_v39 = vpack.c.bf16 %v402_v36, %v402_v36  ;;  %v18348_v41 = vld [vmem:[%s21611_s26 + $0x404] ss:$16 sps:$4 sm:$0xff]   ;;  %v21745_v42 = vpack.c.bf16 %v404_v40, %v404_v40  ;;  %v18352_v48 = vld [vmem:[%s21611_s26 + $0x5e0] ss:$16 sps:$4 sm:$0xff]  }
  0x97   : > { %12842 = vmatpush2.bf16.msra.mxu0 %v18284_v56  ;;  %v18351_v43 = vld [vmem:[%s21611_s26 + $0x604] ss:$16 sps:$4 sm:$0xff]   ;;  %v18355_v49 = vld [vmem:[%s21611_s26 + $0x7e0] ss:$16 sps:$4 sm:$0xff]  }
  0x98   : > { %12883 = vmatpush2.bf16.msra.mxu1 %v18285_v57  ;;  %12843 = vmatprep.subr.bf16.mxu0 %v18286_v58  ;;  %v18354_v46 = vld [vmem:[%s21611_s26 + $0x5e4] ss:$16 sps:$4 sm:$0xff]   ;;  %v18358_v53 = vld [vmem:[%s21611_s26 + $0x5c0] ss:$16 sps:$4 sm:$0xff]  }
  0x99   : > { %12884 = vmatprep.subr.bf16.mxu1 %v18288_v59  ;;  %v18357_v47 = vld [vmem:[%s21611_s26 + $0x7e4] ss:$16 sps:$4 sm:$0xff]   ;;  %v18361_v55 = vld [vmem:[%s21611_s26 + $0x7c0] ss:$16 sps:$4 sm:$0xff]  }
  0x9a   : > { %v18360_v50 = vld [vmem:[%s21611_s26 + $0x5c4] ss:$16 sps:$4 sm:$0xff]   ;;  %v18364_v58 = vld [vmem:[%s21611_s26 + $0x5a0] ss:$16 sps:$4 sm:$0xff]  }
  0x9b   : > { %12844 = vmatpush2.bf16.msra.mxu0 %v18290_v60  ;;  %v18363_v52 = vld [vmem:[%s21611_s26 + $0x7c4] ss:$16 sps:$4 sm:$0xff]   ;;  %v18367_v59 = vld [vmem:[%s21611_s26 + $0x7a0] ss:$16 sps:$4 sm:$0xff]  }
  0x9c   : > { %12885 = vmatpush2.bf16.msra.mxu1 %v18291_v61  ;;  %12845 = vmatprep.subr.bf16.mxu0 %v18292_v62  ;;  %v18366_v56 = vld [vmem:[%s21611_s26 + $0x5a4] ss:$16 sps:$4 sm:$0xff]   ;;  %v18370_v62 = vld [vmem:[%s21611_s26 + $0x580] ss:$16 sps:$4 sm:$0xff]  }
  0x9d   : > { %12886 = vmatprep.subr.bf16.mxu1 %v18294_v63  ;;  %v18369_v57 = vld [vmem:[%s21611_s26 + $0x7a4] ss:$16 sps:$4 sm:$0xff]   ;;  %v18373_v63 = vld [vmem:[%s21611_s26 + $0x780] ss:$16 sps:$4 sm:$0xff]  }
  0x9e   : > { %v18372_v60 = vld [vmem:[%s21611_s26 + $0x584] ss:$16 sps:$4 sm:$0xff]   ;;  %v18382_v6 = vld [vmem:[%s21611_s26 + $0x540] ss:$16 sps:$4 sm:$0xff]  }
  0x9f   : > { %12846 = vmatpush2.bf16.msra.mxu0 %v18296_v0  ;;  %v18375_v61 = vld [vmem:[%s21611_s26 + $0x784] ss:$16 sps:$4 sm:$0xff]   ;;  %v18385_v7 = vld [vmem:[%s21611_s26 + $0x740] ss:$16 sps:$4 sm:$0xff]  }
  0xa0   : > { %12887 = vmatpush2.bf16.msra.mxu1 %v18297_v1  ;;  %12847 = vmatprep.subr.bf16.mxu0 %v18298_v2  ;;  %v18378_v0 = vld [vmem:[%s21611_s26 + $0x564] ss:$16 sps:$4 sm:$0xff]   ;;  %v18376_v2 = vld [vmem:[%s21611_s26 + $0x560] ss:$16 sps:$4 sm:$0xff]  }
  0xa1   : > { %12888 = vmatprep.subr.bf16.mxu1 %v18300_v3  ;;  %v18381_v1 = vld [vmem:[%s21611_s26 + $0x764] ss:$16 sps:$4 sm:$0xff]   ;;  %v18379_v3 = vld [vmem:[%s21611_s26 + $0x760] ss:$16 sps:$4 sm:$0xff]  }
  0xa2   : > { %v18412_v36 = vld [vmem:[%s21611_s26 + $0x8a0] ss:$16 sps:$4 sm:$0xff]   ;;  %v18423_v40 = vld [vmem:[%s21611_s26 + $0xa84] ss:$16 sps:$4 sm:$0xff]  }
  0xa3   : > { %12848 = vmatpush2.bf16.msra.mxu0 %v18302_v4  ;;  %v18384_v4 = vld [vmem:[%s21611_s26 + $0x544] ss:$16 sps:$4 sm:$0xff]  }
  0xa4   : > { %12889 = vmatpush2.bf16.msra.mxu1 %v18303_v5  ;;  %12899 = vmatprep.subr.bf16.mxu0 %v18306_v8  ;;  %v18387_v5 = vld [vmem:[%s21611_s26 + $0x744] ss:$16 sps:$4 sm:$0xff]  }
  0xa5   : > { %12940 = vmatprep.subr.bf16.mxu1 %v18309_v9  ;;  %v18390_v8 = vld [vmem:[%s21611_s26 + $0x524] ss:$16 sps:$4 sm:$0xff]  }
  0xa6   : > { %12850 = vmatmul.mubr.bf16.vlgmr.msra.gmra.mxu0 %v21708_v10  ;;  %v18393_v9 = vld [vmem:[%s21611_s26 + $0x724] ss:$16 sps:$4 sm:$0xff]  }
  0xa7   : > { %12891 = vmatmul.mubr.bf16.vlgmr.msra.gmra.mxu1 %v21710_v11  ;;  %12900 = vmatpush1.bf16.msra.mxu0 %v18304_v12  ;;  %v18388_v12 = vld [vmem:[%s21611_s26 + $0x520] ss:$16 sps:$4 sm:$0xff]  }
  0xa8   : > { %12941 = vmatpush1.bf16.msra.mxu1 %v18307_v13  ;;  %12901 = vmatprep.subr.bf16.mxu0 %v18312_v14  ;;  %v18391_v13 = vld [vmem:[%s21611_s26 + $0x720] ss:$16 sps:$4 sm:$0xff]   ;;  %v18396_v14 = vld [vmem:[%s21611_s26 + $0x504] ss:$16 sps:$4 sm:$0xff]  }
  0xa9   : > { %12942 = vmatprep.subr.bf16.mxu1 %v18315_v15  ;;  %12931 = vmatprep.mubr.bf16.mxu0 %v21741_v39  ;;  %v18399_v15 = vld [vmem:[%s21611_s26 + $0x704] ss:$16 sps:$4 sm:$0xff]  }
  0xaa   : > { %12972 = vmatprep.mubr.bf16.mxu1 %v21745_v42 }
  0xab   : > { %12902 = vmatpush1.bf16.msra.mxu0 %v18310_v16  ;;  %v18394_v16 = vld [vmem:[%s21611_s26 + $0x500] ss:$16 sps:$4 sm:$0xff]  }
  0xac   : > { %12943 = vmatpush1.bf16.msra.mxu1 %v18313_v17  ;;  %12903 = vmatprep.subr.bf16.mxu0 %v18318_v18  ;;  %v18397_v17 = vld [vmem:[%s21611_s26 + $0x700] ss:$16 sps:$4 sm:$0xff]  }
  0xad   : > { %12944 = vmatprep.subr.bf16.mxu1 %v18321_v19  ;;  %v401_v18 = vld [vmem:[%s21629_s22 + $0x20] sm:$0xff]  ;;  %v403_v19 = vld [vmem:[%s21629_s22 + $0x30] sm:$0xff] }
  0xaf   : > { %12904 = vmatpush1.bf16.msra.mxu0 %v18316_v20  ;;  %v18402_v20 = vld [vmem:[%s21611_s26 + $0x8e4] ss:$16 sps:$4 sm:$0xff]  }
  0xb0   : > { %12945 = vmatpush1.bf16.msra.mxu1 %v18319_v21  ;;  %12905 = vmatprep.subr.bf16.mxu0 %v18324_v22  ;;  %v18405_v21 = vld [vmem:[%s21611_s26 + $0xae4] ss:$16 sps:$4 sm:$0xff]   ;;  %v21788_v22 = vpack.c.bf16 %v401_v18, %v401_v18  ;;  %v18472_v18 = vld [vmem:[%s21611_s26 + $0x960] ss:$16 sps:$4 sm:$0xff]  }
  0xb1   : > { %12946 = vmatprep.subr.bf16.mxu1 %v18327_v23  ;;  %v21790_v23 = vpack.c.bf16 %v403_v19, %v403_v19  ;;  %v18475_v19 = vld [vmem:[%s21611_s26 + $0xb60] ss:$16 sps:$4 sm:$0xff]  }
  0xb3   : > { %12906 = vmatpush1.bf16.msra.mxu0 %v18322_v24  ;;  %v18400_v24 = vld [vmem:[%s21611_s26 + $0x8e0] ss:$16 sps:$4 sm:$0xff]  }
  0xb4   : > { %12947 = vmatpush1.bf16.msra.mxu1 %v18325_v25  ;;  %12907 = vmatprep.subr.bf16.mxu0 %v18330_v26  ;;  %v18403_v25 = vld [vmem:[%s21611_s26 + $0xae0] ss:$16 sps:$4 sm:$0xff]   ;;  %v18408_v26 = vld [vmem:[%s21611_s26 + $0x8c4] ss:$16 sps:$4 sm:$0xff]  }
  0xb5   : > { %12948 = vmatprep.subr.bf16.mxu1 %v18333_v27  ;;  %v18411_v27 = vld [vmem:[%s21611_s26 + $0xac4] ss:$16 sps:$4 sm:$0xff]  }
  0xb7   : > { %12908 = vmatpush1.bf16.msra.mxu0 %v18328_v28  ;;  %v406_v28 = vld [vmem:[%s21629_s22 + $0x48] sm:$0xff] }
  0xb8   : > { %12949 = vmatpush1.bf16.msra.mxu1 %v18331_v29  ;;  %12909 = vmatprep.subr.bf16.mxu0 %v18336_v30  ;;  %v18406_v29 = vld [vmem:[%s21611_s26 + $0x8c0] ss:$16 sps:$4 sm:$0xff]  }
  0xb9   : > { %12950 = vmatprep.subr.bf16.mxu1 %v18339_v31  ;;  %v18409_v30 = vld [vmem:[%s21611_s26 + $0xac0] ss:$16 sps:$4 sm:$0xff]   ;;  %v21801_v31 = vpack.c.bf16 %v406_v28, %v406_v28 }
  0xba   : > { %v18484_v28 = vld [vmem:[%s21611_s26 + $0x920] ss:$16 sps:$4 sm:$0xff]  }
  0xbb   : > { %12910 = vmatpush1.bf16.msra.mxu0 %v18334_v32  ;;  %v408_v32 = vld [vmem:[%s21629_s22 + $0x58] sm:$0xff] }
  0xbc   : > { %12951 = vmatpush1.bf16.msra.mxu1 %v18337_v33  ;;  %12911 = vmatprep.subr.bf16.mxu0 %v18342_v34  ;;  %v18414_v33 = vld [vmem:[%s21611_s26 + $0x8a4] ss:$16 sps:$4 sm:$0xff]   ;;  %v21805_v34 = vpack.c.bf16 %v408_v32, %v408_v32 }
  0xbd   : > { %12952 = vmatprep.subr.bf16.mxu1 %v18345_v35  ;;  %v18417_v35 = vld [vmem:[%s21611_s26 + $0xaa4] ss:$16 sps:$4 sm:$0xff]  }
  0xbe   : > { %v18495_v32 = vld [vmem:[%s21611_s26 + $0xb04] ss:$16 sps:$4 sm:$0xff]  }
  0xbf   : > { %12912 = vmatpush1.bf16.msra.mxu0 %v18340_v37  ;;  %v18415_v37 = vld [vmem:[%s21611_s26 + $0xaa0] ss:$16 sps:$4 sm:$0xff]  }
  0xc0   : > { %12953 = vmatpush1.bf16.msra.mxu1 %v18343_v38  ;;  %12913 = vmatprep.subr.bf16.mxu0 %v18348_v41  ;;  %v18420_v38 = vld [vmem:[%s21611_s26 + $0x884] ss:$16 sps:$4 sm:$0xff]   ;;  %v18418_v41 = vld [vmem:[%s21611_s26 + $0x880] ss:$16 sps:$4 sm:$0xff]  }
  0xc1   : > { %12954 = vmatprep.subr.bf16.mxu1 %v18351_v43  ;;  %v18421_v43 = vld [vmem:[%s21611_s26 + $0xa80] ss:$16 sps:$4 sm:$0xff]  }
  0xc3   : > { %12914 = vmatpush1.bf16.msra.mxu0 %v18346_v44  ;;  %v18426_v44 = vld [vmem:[%s21611_s26 + $0x864] ss:$16 sps:$4 sm:$0xff]  }
  0xc4   : > { %12955 = vmatpush1.bf16.msra.mxu1 %v18349_v45  ;;  %12915 = vmatprep.subr.bf16.mxu0 %v18354_v46  ;;  %v18429_v45 = vld [vmem:[%s21611_s26 + $0xa64] ss:$16 sps:$4 sm:$0xff]   ;;  %v18424_v46 = vld [vmem:[%s21611_s26 + $0x860] ss:$16 sps:$4 sm:$0xff]  }
  0xc5   : > { %12956 = vmatprep.subr.bf16.mxu1 %v18357_v47  ;;  %v18427_v47 = vld [vmem:[%s21611_s26 + $0xa60] ss:$16 sps:$4 sm:$0xff]  }
  0xc7   : > { %12916 = vmatpush2.bf16.msra.mxu0 %v18352_v48  ;;  %v18432_v48 = vld [vmem:[%s21611_s26 + $0x844] ss:$16 sps:$4 sm:$0xff]  }
  0xc8   : > { %12957 = vmatpush2.bf16.msra.mxu1 %v18355_v49  ;;  %12917 = vmatprep.subr.bf16.mxu0 %v18360_v50  ;;  %v18435_v49 = vld [vmem:[%s21611_s26 + $0xa44] ss:$16 sps:$4 sm:$0xff]   ;;  %v18430_v50 = vld [vmem:[%s21611_s26 + $0x840] ss:$16 sps:$4 sm:$0xff]  }
  0xc9   : > { %12958 = vmatprep.subr.bf16.mxu1 %v18363_v52  ;;  %v18433_v52 = vld [vmem:[%s21611_s26 + $0xa40] ss:$16 sps:$4 sm:$0xff]  }
  0xcb   : > { %12918 = vmatpush2.bf16.msra.mxu0 %v18358_v53  ;;  %v18438_v53 = vld [vmem:[%s21611_s26 + $0x824] ss:$16 sps:$4 sm:$0xff]  }
  0xcc   : > { %12959 = vmatpush2.bf16.msra.mxu1 %v18361_v55  ;;  %12919 = vmatprep.subr.bf16.mxu0 %v18366_v56  ;;  %v18441_v55 = vld [vmem:[%s21611_s26 + $0xa24] ss:$16 sps:$4 sm:$0xff]   ;;  %v18436_v56 = vld [vmem:[%s21611_s26 + $0x820] ss:$16 sps:$4 sm:$0xff]  }
  0xcd   : > { %12960 = vmatprep.subr.bf16.mxu1 %v18369_v57  ;;  %v18439_v57 = vld [vmem:[%s21611_s26 + $0xa20] ss:$16 sps:$4 sm:$0xff]  }
  0xcf   : > { %12920 = vmatpush2.bf16.msra.mxu0 %v18364_v58  ;;  %v18444_v58 = vld [vmem:[%s21611_s26 + $0x804] ss:$16 sps:$4 sm:$0xff]  }
  0xd0   : > { %12961 = vmatpush2.bf16.msra.mxu1 %v18367_v59  ;;  %12921 = vmatprep.subr.bf16.mxu0 %v18372_v60  ;;  %v18447_v59 = vld [vmem:[%s21611_s26 + $0xa04] ss:$16 sps:$4 sm:$0xff]   ;;  %v18442_v60 = vld [vmem:[%s21611_s26 + $0x800] ss:$16 sps:$4 sm:$0xff]  }
  0xd1   : > { %12962 = vmatprep.subr.bf16.mxu1 %v18375_v61  ;;  %v18445_v61 = vld [vmem:[%s21611_s26 + $0xa00] ss:$16 sps:$4 sm:$0xff]  }
  0xd3   : > { %12922 = vmatpush2.bf16.msra.mxu0 %v18370_v62  ;;  %v18450_v62 = vld [vmem:[%s21611_s26 + $0x9e4] ss:$16 sps:$4 sm:$0xff]  }
  0xd4   : > { %12963 = vmatpush2.bf16.msra.mxu1 %v18373_v63  ;;  %12923 = vmatprep.subr.bf16.mxu0 %v18378_v0  ;;  %v18453_v63 = vld [vmem:[%s21611_s26 + $0xbe4] ss:$16 sps:$4 sm:$0xff]   ;;  %v18448_v0 = vld [vmem:[%s21611_s26 + $0x9e0] ss:$16 sps:$4 sm:$0xff]  }
  0xd5   : > { %12964 = vmatprep.subr.bf16.mxu1 %v18381_v1  ;;  %v18451_v1 = vld [vmem:[%s21611_s26 + $0xbe0] ss:$16 sps:$4 sm:$0xff]  }
  0xd7   : > { %12924 = vmatpush2.bf16.msra.mxu0 %v18376_v2  ;;  %v18456_v2 = vld [vmem:[%s21611_s26 + $0x9c4] ss:$16 sps:$4 sm:$0xff]  }
  0xd8   : > { %12965 = vmatpush2.bf16.msra.mxu1 %v18379_v3  ;;  %12925 = vmatprep.subr.bf16.mxu0 %v18384_v4  ;;  %v18459_v3 = vld [vmem:[%s21611_s26 + $0xbc4] ss:$16 sps:$4 sm:$0xff]   ;;  %v18454_v4 = vld [vmem:[%s21611_s26 + $0x9c0] ss:$16 sps:$4 sm:$0xff]  }
  0xd9   : > { %12966 = vmatprep.subr.bf16.mxu1 %v18387_v5  ;;  %v18457_v5 = vld [vmem:[%s21611_s26 + $0xbc0] ss:$16 sps:$4 sm:$0xff]  }
  0xdb   : > { %12926 = vmatpush2.bf16.msra.mxu0 %v18382_v6  ;;  %v18462_v6 = vld [vmem:[%s21611_s26 + $0x9a4] ss:$16 sps:$4 sm:$0xff]  }
  0xdc   : > { %12967 = vmatpush2.bf16.msra.mxu1 %v18385_v7  ;;  %12927 = vmatprep.subr.bf16.mxu0 %v18390_v8  ;;  %v18465_v7 = vld [vmem:[%s21611_s26 + $0xba4] ss:$16 sps:$4 sm:$0xff]   ;;  %v18460_v8 = vld [vmem:[%s21611_s26 + $0x9a0] ss:$16 sps:$4 sm:$0xff]  }
  0xdd   : > { %12968 = vmatprep.subr.bf16.mxu1 %v18393_v9  ;;  %v18463_v9 = vld [vmem:[%s21611_s26 + $0xba0] ss:$16 sps:$4 sm:$0xff]  }
  0xdf   : > { %12928 = vmatpush2.bf16.msra.mxu0 %v18388_v12  ;;  %v18468_v12 = vld [vmem:[%s21611_s26 + $0x984] ss:$16 sps:$4 sm:$0xff]  }
  0xe0   : > { %12969 = vmatpush2.bf16.msra.mxu1 %v18391_v13  ;;  %12929 = vmatprep.subr.bf16.mxu0 %v18396_v14  ;;  %v18471_v13 = vld [vmem:[%s21611_s26 + $0xb84] ss:$16 sps:$4 sm:$0xff]   ;;  %v18466_v14 = vld [vmem:[%s21611_s26 + $0x980] ss:$16 sps:$4 sm:$0xff]  }
  0xe1   : > { %12970 = vmatprep.subr.bf16.mxu1 %v18399_v15  ;;  %v18469_v15 = vld [vmem:[%s21611_s26 + $0xb80] ss:$16 sps:$4 sm:$0xff]  }
  0xe3   : > { %12930 = vmatpush2.bf16.msra.mxu0 %v18394_v16  ;;  %v18474_v16 = vld [vmem:[%s21611_s26 + $0x964] ss:$16 sps:$4 sm:$0xff]  }
  0xe4   : > { %12971 = vmatpush2.bf16.msra.mxu1 %v18397_v17  ;;  %12981 = vmatprep.subr.bf16.mxu0 %v18402_v20  ;;  %v18477_v17 = vld [vmem:[%s21611_s26 + $0xb64] ss:$16 sps:$4 sm:$0xff]  }
  0xe5   : > { %13022 = vmatprep.subr.bf16.mxu1 %v18405_v21  ;;  %v18480_v20 = vld [vmem:[%s21611_s26 + $0x944] ss:$16 sps:$4 sm:$0xff]  }
  0xe6   : > { %12932 = vmatmul.mubr.bf16.vlgmr.msra.gmra.mxu0 %v21788_v22  ;;  %v18483_v21 = vld [vmem:[%s21611_s26 + $0xb44] ss:$16 sps:$4 sm:$0xff]  }
  0xe7   : > { %12973 = vmatmul.mubr.bf16.vlgmr.msra.gmra.mxu1 %v21790_v23  ;;  %12982 = vmatpush1.bf16.msra.mxu0 %v18400_v24  ;;  %v18478_v24 = vld [vmem:[%s21611_s26 + $0x940] ss:$16 sps:$4 sm:$0xff]  }
  0xe8   : > { %13023 = vmatpush1.bf16.msra.mxu1 %v18403_v25  ;;  %12983 = vmatprep.subr.bf16.mxu0 %v18408_v26  ;;  %v18481_v25 = vld [vmem:[%s21611_s26 + $0xb40] ss:$16 sps:$4 sm:$0xff]   ;;  %v18486_v26 = vld [vmem:[%s21611_s26 + $0x924] ss:$16 sps:$4 sm:$0xff]  }
  0xe9   : > { %13024 = vmatprep.subr.bf16.mxu1 %v18411_v27  ;;  %13013 = vmatprep.mubr.bf16.mxu0 %v21801_v31  ;;  %v18489_v27 = vld [vmem:[%s21611_s26 + $0xb24] ss:$16 sps:$4 sm:$0xff]  }
  0xea   : > { %13054 = vmatprep.mubr.bf16.mxu1 %v21805_v34 }
  0xeb   : > { %12984 = vmatpush1.bf16.msra.mxu0 %v18406_v29  ;;  %v18487_v29 = vld [vmem:[%s21611_s26 + $0xb20] ss:$16 sps:$4 sm:$0xff]  }
  0xec   : > { %13025 = vmatpush1.bf16.msra.mxu1 %v18409_v30  ;;  %12985 = vmatprep.subr.bf16.mxu0 %v18414_v33  ;;  %v18492_v30 = vld [vmem:[%s21611_s26 + $0x904] ss:$16 sps:$4 sm:$0xff]   ;;  %v18490_v33 = vld [vmem:[%s21611_s26 + $0x900] ss:$16 sps:$4 sm:$0xff]  }
  0xed   : > { %13026 = vmatprep.subr.bf16.mxu1 %v18417_v35  ;;  %v18493_v35 = vld [vmem:[%s21611_s26 + $0xb00] ss:$16 sps:$4 sm:$0xff]  }
  0xef   : > { %12986 = vmatpush1.bf16.msra.mxu0 %v18412_v36  ;;  %v405_v36 = vld [vmem:[%s21629_s22 + $0x40] sm:$0xff] }
  0xf0   : > { %13027 = vmatpush1.bf16.msra.mxu1 %v18415_v37  ;;  %12987 = vmatprep.subr.bf16.mxu0 %v18420_v38  ;;  %v407_v37 = vld [vmem:[%s21629_s22 + $0x50] sm:$0xff] }
  0xf1   : > { %13028 = vmatprep.subr.bf16.mxu1 %v18423_v40  ;;  %v18498_v38 = vld [vmem:[%s21611_s26 + $0xce4] ss:$16 sps:$4 sm:$0xff]  }
  0xf2   : > { %v18501_v40 = vld [vmem:[%s21611_s26 + $0xee4] ss:$16 sps:$4 sm:$0xff]  }
  0xf3   : > { %12988 = vmatpush1.bf16.msra.mxu0 %v18418_v41  ;;  %v18496_v41 = vld [vmem:[%s21611_s26 + $0xce0] ss:$16 sps:$4 sm:$0xff]  }
  0xf4   : > { %13029 = vmatpush1.bf16.msra.mxu1 %v18421_v43  ;;  %12989 = vmatprep.subr.bf16.mxu0 %v18426_v44  ;;  %v18499_v43 = vld [vmem:[%s21611_s26 + $0xee0] ss:$16 sps:$4 sm:$0xff]   ;;  %v21870_v44 = vpack.c.bf16 %v405_v36, %v405_v36 }
  0xf5   : > { %13030 = vmatprep.subr.bf16.mxu1 %v18429_v45  ;;  %v21872_v45 = vpack.c.bf16 %v407_v37, %v407_v37  ;;  %v18562_v36 = vld [vmem:[%s21611_s26 + $0xd80] ss:$16 sps:$4 sm:$0xff]  }
  0xf6   : > { %v18565_v37 = vld [vmem:[%s21611_s26 + $0xf80] ss:$16 sps:$4 sm:$0xff]  }
  0xf7   : > { %12990 = vmatpush1.bf16.msra.mxu0 %v18424_v46  ;;  %v410_v46 = vld [vmem:[%s21629_s22 + $0x68] sm:$0xff] }
  0xf8   : > { %13031 = vmatpush1.bf16.msra.mxu1 %v18427_v47  ;;  %12991 = vmatprep.subr.bf16.mxu0 %v18432_v48  ;;  %v412_v47 = vld [vmem:[%s21629_s22 + $0x78] sm:$0xff] }
  0xf9   : > { %13032 = vmatprep.subr.bf16.mxu1 %v18435_v49  ;;  %v18504_v48 = vld [vmem:[%s21611_s26 + $0xcc4] ss:$16 sps:$4 sm:$0xff]  }
  0xfa   : > { %v18507_v49 = vld [vmem:[%s21611_s26 + $0xec4] ss:$16 sps:$4 sm:$0xff]  }
  0xfb   : > { %12992 = vmatpush1.bf16.msra.mxu0 %v18430_v50  ;;  %v21878_v50 = vpack.c.bf16 %v410_v46, %v410_v46  ;;  %v18576_v46 = vld [vmem:[%s21611_s26 + $0xd44] ss:$16 sps:$4 sm:$0xff]  }
  0xfc   : > { %13033 = vmatpush1.bf16.msra.mxu1 %v18433_v52  ;;  %12993 = vmatprep.subr.bf16.mxu0 %v18438_v53  ;;  %v21880_v52 = vpack.c.bf16 %v412_v47, %v412_v47  ;;  %v18502_v53 = vld [vmem:[%s21611_s26 + $0xcc0] ss:$16 sps:$4 sm:$0xff]   ;;  %v18579_v47 = vld [vmem:[%s21611_s26 + $0xf44] ss:$16 sps:$4 sm:$0xff]  }
  0xfd   : > { %13034 = vmatprep.subr.bf16.mxu1 %v18441_v55  ;;  %v18505_v55 = vld [vmem:[%s21611_s26 + $0xec0] ss:$16 sps:$4 sm:$0xff]  }
  0xff   : > { %12994 = vmatpush1.bf16.msra.mxu0 %v18436_v56  ;;  %v18510_v56 = vld [vmem:[%s21611_s26 + $0xca4] ss:$16 sps:$4 sm:$0xff]  }
 0x100   : > { %13035 = vmatpush1.bf16.msra.mxu1 %v18439_v57  ;;  %12995 = vmatprep.subr.bf16.mxu0 %v18444_v58  ;;  %v18513_v57 = vld [vmem:[%s21611_s26 + $0xea4] ss:$16 sps:$4 sm:$0xff]   ;;  %v18508_v58 = vld [vmem:[%s21611_s26 + $0xca0] ss:$16 sps:$4 sm:$0xff]  }
 0x101   : > { %13036 = vmatprep.subr.bf16.mxu1 %v18447_v59  ;;  %v18511_v59 = vld [vmem:[%s21611_s26 + $0xea0] ss:$16 sps:$4 sm:$0xff]  }
 0x103   : > { %12996 = vmatpush1.bf16.msra.mxu0 %v18442_v60  ;;  %v18516_v60 = vld [vmem:[%s21611_s26 + $0xc84] ss:$16 sps:$4 sm:$0xff]  }
 0x104   : > { %13037 = vmatpush1.bf16.msra.mxu1 %v18445_v61  ;;  %12997 = vmatprep.subr.bf16.mxu0 %v18450_v62  ;;  %v18519_v61 = vld [vmem:[%s21611_s26 + $0xe84] ss:$16 sps:$4 sm:$0xff]   ;;  %v18514_v62 = vld [vmem:[%s21611_s26 + $0xc80] ss:$16 sps:$4 sm:$0xff]  }
 0x105   : > { %13038 = vmatprep.subr.bf16.mxu1 %v18453_v63  ;;  %v18517_v63 = vld [vmem:[%s21611_s26 + $0xe80] ss:$16 sps:$4 sm:$0xff]  }
 0x107   : > { %12998 = vmatpush2.bf16.msra.mxu0 %v18448_v0  ;;  %v18522_v0 = vld [vmem:[%s21611_s26 + $0xc64] ss:$16 sps:$4 sm:$0xff]  }
 0x108   : > { %13039 = vmatpush2.bf16.msra.mxu1 %v18451_v1  ;;  %12999 = vmatprep.subr.bf16.mxu0 %v18456_v2  ;;  %v18525_v1 = vld [vmem:[%s21611_s26 + $0xe64] ss:$16 sps:$4 sm:$0xff]   ;;  %v18520_v2 = vld [vmem:[%s21611_s26 + $0xc60] ss:$16 sps:$4 sm:$0xff]  }
 0x109   : > { %13040 = vmatprep.subr.bf16.mxu1 %v18459_v3  ;;  %v18523_v3 = vld [vmem:[%s21611_s26 + $0xe60] ss:$16 sps:$4 sm:$0xff]  }
 0x10b   : > { %13000 = vmatpush2.bf16.msra.mxu0 %v18454_v4  ;;  %v18528_v4 = vld [vmem:[%s21611_s26 + $0xc44] ss:$16 sps:$4 sm:$0xff]  }
 0x10c   : > { %13041 = vmatpush2.bf16.msra.mxu1 %v18457_v5  ;;  %13001 = vmatprep.subr.bf16.mxu0 %v18462_v6  ;;  %v18531_v5 = vld [vmem:[%s21611_s26 + $0xe44] ss:$16 sps:$4 sm:$0xff]   ;;  %v18526_v6 = vld [vmem:[%s21611_s26 + $0xc40] ss:$16 sps:$4 sm:$0xff]  }
 0x10d   : > { %13042 = vmatprep.subr.bf16.mxu1 %v18465_v7  ;;  %v18529_v7 = vld [vmem:[%s21611_s26 + $0xe40] ss:$16 sps:$4 sm:$0xff]  }
 0x10f   : > { %13002 = vmatpush2.bf16.msra.mxu0 %v18460_v8  ;;  %v18534_v8 = vld [vmem:[%s21611_s26 + $0xc24] ss:$16 sps:$4 sm:$0xff]  }
 0x110   : > { %13043 = vmatpush2.bf16.msra.mxu1 %v18463_v9  ;;  %13003 = vmatprep.subr.bf16.mxu0 %v18468_v12  ;;  %v18537_v9 = vld [vmem:[%s21611_s26 + $0xe24] ss:$16 sps:$4 sm:$0xff]   ;;  %v18532_v12 = vld [vmem:[%s21611_s26 + $0xc20] ss:$16 sps:$4 sm:$0xff]  }
 0x111   : > { %13044 = vmatprep.subr.bf16.mxu1 %v18471_v13  ;;  %v18535_v13 = vld [vmem:[%s21611_s26 + $0xe20] ss:$16 sps:$4 sm:$0xff]  }
 0x113   : > { %13004 = vmatpush2.bf16.msra.mxu0 %v18466_v14  ;;  %v18540_v14 = vld [vmem:[%s21611_s26 + $0xc04] ss:$16 sps:$4 sm:$0xff]  }
 0x114   : > { %13045 = vmatpush2.bf16.msra.mxu1 %v18469_v15  ;;  %13005 = vmatprep.subr.bf16.mxu0 %v18474_v16  ;;  %v18543_v15 = vld [vmem:[%s21611_s26 + $0xe04] ss:$16 sps:$4 sm:$0xff]   ;;  %v18538_v16 = vld [vmem:[%s21611_s26 + $0xc00] ss:$16 sps:$4 sm:$0xff]  }
 0x115   : > { %13046 = vmatprep.subr.bf16.mxu1 %v18477_v17  ;;  %v18541_v17 = vld [vmem:[%s21611_s26 + $0xe00] ss:$16 sps:$4 sm:$0xff]  }
 0x117   : > { %13006 = vmatpush2.bf16.msra.mxu0 %v18472_v18  ;;  %v18546_v18 = vld [vmem:[%s21611_s26 + $0xde4] ss:$16 sps:$4 sm:$0xff]  }
 0x118   : > { %13047 = vmatpush2.bf16.msra.mxu1 %v18475_v19  ;;  %13007 = vmatprep.subr.bf16.mxu0 %v18480_v20  ;;  %v18549_v19 = vld [vmem:[%s21611_s26 + $0xfe4] ss:$16 sps:$4 sm:$0xff]   ;;  %v18544_v20 = vld [vmem:[%s21611_s26 + $0xde0] ss:$16 sps:$4 sm:$0xff]  }
 0x119   : > { %13048 = vmatprep.subr.bf16.mxu1 %v18483_v21  ;;  %v18547_v21 = vld [vmem:[%s21611_s26 + $0xfe0] ss:$16 sps:$4 sm:$0xff]  }
 0x11b   : > { %13008 = vmatpush2.bf16.msra.mxu0 %v18478_v24  ;;  %v18552_v24 = vld [vmem:[%s21611_s26 + $0xdc4] ss:$16 sps:$4 sm:$0xff]  }
 0x11c   : > { %13049 = vmatpush2.bf16.msra.mxu1 %v18481_v25  ;;  %13009 = vmatprep.subr.bf16.mxu0 %v18486_v26  ;;  %v18555_v25 = vld [vmem:[%s21611_s26 + $0xfc4] ss:$16 sps:$4 sm:$0xff]   ;;  %v18550_v26 = vld [vmem:[%s21611_s26 + $0xdc0] ss:$16 sps:$4 sm:$0xff]  }
 0x11d   : > { %13050 = vmatprep.subr.bf16.mxu1 %v18489_v27  ;;  %v18553_v27 = vld [vmem:[%s21611_s26 + $0xfc0] ss:$16 sps:$4 sm:$0xff]  }
 0x11f   : > { %13010 = vmatpush2.bf16.msra.mxu0 %v18484_v28  ;;  %v18558_v28 = vld [vmem:[%s21611_s26 + $0xda4] ss:$16 sps:$4 sm:$0xff]  }
 0x120   : > { %13051 = vmatpush2.bf16.msra.mxu1 %v18487_v29  ;;  %13011 = vmatprep.subr.bf16.mxu0 %v18492_v30  ;;  %v18561_v29 = vld [vmem:[%s21611_s26 + $0xfa4] ss:$16 sps:$4 sm:$0xff]   ;;  %v18556_v30 = vld [vmem:[%s21611_s26 + $0xda0] ss:$16 sps:$4 sm:$0xff]  }
 0x121   : > { %13052 = vmatprep.subr.bf16.mxu1 %v18495_v32  ;;  %v18559_v32 = vld [vmem:[%s21611_s26 + $0xfa0] ss:$16 sps:$4 sm:$0xff]  }
 0x123   : > { %13012 = vmatpush2.bf16.msra.mxu0 %v18490_v33  ;;  %v18564_v33 = vld [vmem:[%s21611_s26 + $0xd84] ss:$16 sps:$4 sm:$0xff]  }
 0x124   : > { %13053 = vmatpush2.bf16.msra.mxu1 %v18493_v35  ;;  %13063 = vmatprep.subr.bf16.mxu0 %v18498_v38  ;;  %v18567_v35 = vld [vmem:[%s21611_s26 + $0xf84] ss:$16 sps:$4 sm:$0xff]  }
 0x125   : > { %13104 = vmatprep.subr.bf16.mxu1 %v18501_v40  ;;  %v18570_v38 = vld [vmem:[%s21611_s26 + $0xd64] ss:$16 sps:$4 sm:$0xff]  }
 0x126   : > { %13014 = vmatmul.mubr.bf16.vlgmr.msra.gmra.mxu0 %v21870_v44  ;;  %v18573_v40 = vld [vmem:[%s21611_s26 + $0xf64] ss:$16 sps:$4 sm:$0xff]  }
 0x127   : > { %13055 = vmatmul.mubr.bf16.vlgmr.msra.gmra.mxu1 %v21872_v45  ;;  %13064 = vmatpush1.bf16.msra.mxu0 %v18496_v41  ;;  %v18568_v41 = vld [vmem:[%s21611_s26 + $0xd60] ss:$16 sps:$4 sm:$0xff]  }
 0x128   : > { %13105 = vmatpush1.bf16.msra.mxu1 %v18499_v43  ;;  %13065 = vmatprep.subr.bf16.mxu0 %v18504_v48  ;;  %v18571_v43 = vld [vmem:[%s21611_s26 + $0xf60] ss:$16 sps:$4 sm:$0xff]  }
 0x129   : > { %13106 = vmatprep.subr.bf16.mxu1 %v18507_v49  ;;  %13095 = vmatprep.mubr.bf16.mxu0 %v21878_v50  ;;  %v18574_v48 = vld [vmem:[%s21611_s26 + $0xd40] ss:$16 sps:$4 sm:$0xff]  }
 0x12a   : > { %13136 = vmatprep.mubr.bf16.mxu1 %v21880_v52  ;;  %v18577_v49 = vld [vmem:[%s21611_s26 + $0xf40] ss:$16 sps:$4 sm:$0xff]  }
 0x12b   : > { %13066 = vmatpush1.bf16.msra.mxu0 %v18502_v53  ;;  %v18582_v53 = vld [vmem:[%s21611_s26 + $0xd24] ss:$16 sps:$4 sm:$0xff]  }
 0x12c   : > { %13107 = vmatpush1.bf16.msra.mxu1 %v18505_v55  ;;  %13067 = vmatprep.subr.bf16.mxu0 %v18510_v56  ;;  %v18585_v55 = vld [vmem:[%s21611_s26 + $0xf24] ss:$16 sps:$4 sm:$0xff]   ;;  %v18580_v56 = vld [vmem:[%s21611_s26 + $0xd20] ss:$16 sps:$4 sm:$0xff]  }
 0x12d   : > { %13108 = vmatprep.subr.bf16.mxu1 %v18513_v57  ;;  %v18583_v57 = vld [vmem:[%s21611_s26 + $0xf20] ss:$16 sps:$4 sm:$0xff]  }
 0x12f   : > { %13068 = vmatpush1.bf16.msra.mxu0 %v18508_v58  ;;  %v18588_v58 = vld [vmem:[%s21611_s26 + $0xd04] ss:$16 sps:$4 sm:$0xff]  }
 0x130   : > { %13109 = vmatpush1.bf16.msra.mxu1 %v18511_v59  ;;  %13069 = vmatprep.subr.bf16.mxu0 %v18516_v60  ;;  %v18591_v59 = vld [vmem:[%s21611_s26 + $0xf04] ss:$16 sps:$4 sm:$0xff]   ;;  %v18586_v60 = vld [vmem:[%s21611_s26 + $0xd00] ss:$16 sps:$4 sm:$0xff]  }
 0x131   : > { %13110 = vmatprep.subr.bf16.mxu1 %v18519_v61  ;;  %v18589_v61 = vld [vmem:[%s21611_s26 + $0xf00] ss:$16 sps:$4 sm:$0xff]  }
 0x133   : > { %13070 = vmatpush1.bf16.msra.mxu0 %v18514_v62  ;;  %v409_v62 = vld [vmem:[%s21629_s22 + $0x60] sm:$0xff] }
 0x134   : > { %13111 = vmatpush1.bf16.msra.mxu1 %v18517_v63  ;;  %13071 = vmatprep.subr.bf16.mxu0 %v18522_v0  ;;  %v411_v63 = vld [vmem:[%s21629_s22 + $0x70] sm:$0xff] }
 0x135   : > { %13112 = vmatprep.subr.bf16.mxu1 %v18525_v1  ;;  %v18594_v0 = vld [vmem:[%s21611_s26 + $0x10e4] ss:$16 sps:$4 sm:$0xff]  }
 0x136   : > { %v18597_v1 = vld [vmem:[%s21611_s26 + $0x12e4] ss:$16 sps:$4 sm:$0xff]  }
 0x137   : > { %13072 = vmatpush1.bf16.msra.mxu0 %v18520_v2  ;;  %v18592_v2 = vld [vmem:[%s21611_s26 + $0x10e0] ss:$16 sps:$4 sm:$0xff]  }
 0x138   : > { %13113 = vmatpush1.bf16.msra.mxu1 %v18523_v3  ;;  %13073 = vmatprep.subr.bf16.mxu0 %v18528_v4  ;;  %v18595_v3 = vld [vmem:[%s21611_s26 + $0x12e0] ss:$16 sps:$4 sm:$0xff]   ;;  %v21950_v4 = vpack.c.bf16 %v409_v62, %v409_v62  ;;  %v18642_v62 = vld [vmem:[%s21611_s26 + $0x11e4] ss:$16 sps:$4 sm:$0xff]  }
 0x139   : > { %13114 = vmatprep.subr.bf16.mxu1 %v18531_v5  ;;  %v21952_v5 = vpack.c.bf16 %v411_v63, %v411_v63  ;;  %v18645_v63 = vld [vmem:[%s21611_s26 + $0x13e4] ss:$16 sps:$4 sm:$0xff]  }
 0x13b   : > { %13074 = vmatpush1.bf16.msra.mxu0 %v18526_v6  ;;  %v414_v6 = vld [vmem:[%s21629_s22 + $0x88] sm:$0xff] }
 0x13c   : > { %13115 = vmatpush1.bf16.msra.mxu1 %v18529_v7  ;;  %13075 = vmatprep.subr.bf16.mxu0 %v18534_v8  ;;  %v416_v7 = vld [vmem:[%s21629_s22 + $0x98] sm:$0xff] }
 0x13d   : > { %13116 = vmatprep.subr.bf16.mxu1 %v18537_v9  ;;  %v18600_v8 = vld [vmem:[%s21611_s26 + $0x10c4] ss:$16 sps:$4 sm:$0xff]  }
 0x13e   : > { %v18603_v9 = vld [vmem:[%s21611_s26 + $0x12c4] ss:$16 sps:$4 sm:$0xff]  }
 0x13f   : > { %13076 = vmatpush1.bf16.msra.mxu0 %v18532_v12  ;;  %v21958_v12 = vpack.c.bf16 %v414_v6, %v414_v6  ;;  %v18646_v6 = vld [vmem:[%s21611_s26 + $0x11c0] ss:$16 sps:$4 sm:$0xff]  }
 0x140   : > { %13117 = vmatpush1.bf16.msra.mxu1 %v18535_v13  ;;  %13077 = vmatprep.subr.bf16.mxu0 %v18540_v14  ;;  %v21960_v13 = vpack.c.bf16 %v416_v7, %v416_v7  ;;  %v18649_v7 = vld [vmem:[%s21611_s26 + $0x13c0] ss:$16 sps:$4 sm:$0xff]  }
 0x141   : > { %13118 = vmatprep.subr.bf16.mxu1 %v18543_v15 }
 0x143   : > { %13078 = vmatpush1.bf16.msra.mxu0 %v18538_v16  ;;  %v18598_v16 = vld [vmem:[%s21611_s26 + $0x10c0] ss:$16 sps:$4 sm:$0xff]  }
 0x144   : > { %13119 = vmatpush1.bf16.msra.mxu1 %v18541_v17  ;;  %13079 = vmatprep.subr.bf16.mxu0 %v18546_v18  ;;  %v18601_v17 = vld [vmem:[%s21611_s26 + $0x12c0] ss:$16 sps:$4 sm:$0xff]  }
 0x145   : > { %13120 = vmatprep.subr.bf16.mxu1 %v18549_v19  ;;  %v18606_v19 = vld [vmem:[%s21611_s26 + $0x10a4] ss:$16 sps:$4 sm:$0xff]  }
 0x147   : > { %13080 = vmatpush2.bf16.msra.mxu0 %v18544_v20 }
 0x148   : > { %13121 = vmatpush2.bf16.msra.mxu1 %v18547_v21  ;;  %13081 = vmatprep.subr.bf16.mxu0 %v18552_v24  ;;  %v18609_v24 = vld [vmem:[%s21611_s26 + $0x12a4] ss:$16 sps:$4 sm:$0xff]  }
 0x149   : > { %13122 = vmatprep.subr.bf16.mxu1 %v18555_v25 }
 0x14b   : > { %13082 = vmatpush2.bf16.msra.mxu0 %v18550_v26 }
 0x14c   : > { %13123 = vmatpush2.bf16.msra.mxu1 %v18553_v27  ;;  %13083 = vmatprep.subr.bf16.mxu0 %v18558_v28  ;;  %v18604_v28 = vld [vmem:[%s21611_s26 + $0x10a0] ss:$16 sps:$4 sm:$0xff]  }
 0x14d   : > { %13124 = vmatprep.subr.bf16.mxu1 %v18561_v29  ;;  %v18607_v29 = vld [vmem:[%s21611_s26 + $0x12a0] ss:$16 sps:$4 sm:$0xff]  }
 0x14f   : > { %13084 = vmatpush2.bf16.msra.mxu0 %v18556_v30  ;;  %v18612_v30 = vld [vmem:[%s21611_s26 + $0x1084] ss:$16 sps:$4 sm:$0xff]  }
 0x150   : > { %13125 = vmatpush2.bf16.msra.mxu1 %v18559_v32  ;;  %13085 = vmatprep.subr.bf16.mxu0 %v18564_v33 }
 0x151   : > { %13126 = vmatprep.subr.bf16.mxu1 %v18567_v35  ;;  %v18615_v35 = vld [vmem:[%s21611_s26 + $0x1284] ss:$16 sps:$4 sm:$0xff]  }
 0x153   : > { %13086 = vmatpush2.bf16.msra.mxu0 %v18562_v36  ;;  %v18610_v36 = vld [vmem:[%s21611_s26 + $0x1080] ss:$16 sps:$4 sm:$0xff]  }
 0x154   : > { %13127 = vmatpush2.bf16.msra.mxu1 %v18565_v37  ;;  %13087 = vmatprep.subr.bf16.mxu0 %v18570_v38  ;;  %v18613_v37 = vld [vmem:[%s21611_s26 + $0x1280] ss:$16 sps:$4 sm:$0xff]   ;;  %v18618_v38 = vld [vmem:[%s21611_s26 + $0x1064] ss:$16 sps:$4 sm:$0xff]  }
 0x155   : > { %13128 = vmatprep.subr.bf16.mxu1 %v18573_v40  ;;  %v18621_v40 = vld [vmem:[%s21611_s26 + $0x1264] ss:$16 sps:$4 sm:$0xff]  }
 0x157   : > { %13088 = vmatpush2.bf16.msra.mxu0 %v18568_v41  ;;  %v18616_v41 = vld [vmem:[%s21611_s26 + $0x1060] ss:$16 sps:$4 sm:$0xff]  }
 0x158   : > { %13129 = vmatpush2.bf16.msra.mxu1 %v18571_v43  ;;  %13089 = vmatprep.subr.bf16.mxu0 %v18576_v46  ;;  %v18619_v43 = vld [vmem:[%s21611_s26 + $0x1260] ss:$16 sps:$4 sm:$0xff]   ;;  %v18624_v46 = vld [vmem:[%s21611_s26 + $0x1044] ss:$16 sps:$4 sm:$0xff]  }
 0x159   : > { %13130 = vmatprep.subr.bf16.mxu1 %v18579_v47  ;;  %v18627_v47 = vld [vmem:[%s21611_s26 + $0x1244] ss:$16 sps:$4 sm:$0xff]  }
 0x15b   : > { %13090 = vmatpush2.bf16.msra.mxu0 %v18574_v48  ;;  %v18622_v48 = vld [vmem:[%s21611_s26 + $0x1040] ss:$16 sps:$4 sm:$0xff]  }
 0x15c   : > { %13131 = vmatpush2.bf16.msra.mxu1 %v18577_v49  ;;  %13091 = vmatprep.subr.bf16.mxu0 %v18582_v53  ;;  %v18625_v49 = vld [vmem:[%s21611_s26 + $0x1240] ss:$16 sps:$4 sm:$0xff]   ;;  %v18630_v53 = vld [vmem:[%s21611_s26 + $0x1024] ss:$16 sps:$4 sm:$0xff]  }
 0x15d   : > { %13132 = vmatprep.subr.bf16.mxu1 %v18585_v55  ;;  %v18633_v55 = vld [vmem:[%s21611_s26 + $0x1224] ss:$16 sps:$4 sm:$0xff]  }
 0x15f   : > { %13092 = vmatpush2.bf16.msra.mxu0 %v18580_v56  ;;  %v18628_v56 = vld [vmem:[%s21611_s26 + $0x1020] ss:$16 sps:$4 sm:$0xff]  }
 0x160   : > { %13133 = vmatpush2.bf16.msra.mxu1 %v18583_v57  ;;  %13093 = vmatprep.subr.bf16.mxu0 %v18588_v58  ;;  %v18631_v57 = vld [vmem:[%s21611_s26 + $0x1220] ss:$16 sps:$4 sm:$0xff]   ;;  %v18636_v58 = vld [vmem:[%s21611_s26 + $0x1004] ss:$16 sps:$4 sm:$0xff]  }
 0x161   : > { %13134 = vmatprep.subr.bf16.mxu1 %v18591_v59  ;;  %v18639_v59 = vld [vmem:[%s21611_s26 + $0x1204] ss:$16 sps:$4 sm:$0xff]  }
 0x163   : > { %13094 = vmatpush2.bf16.msra.mxu0 %v18586_v60  ;;  %v18634_v60 = vld [vmem:[%s21611_s26 + $0x1000] ss:$16 sps:$4 sm:$0xff]  }
 0x164   : > { %13135 = vmatpush2.bf16.msra.mxu1 %v18589_v61  ;;  %13145 = vmatprep.subr.bf16.mxu0 %v18594_v0  ;;  %v18637_v61 = vld [vmem:[%s21611_s26 + $0x1200] ss:$16 sps:$4 sm:$0xff]  }
 0x165   : > { %13186 = vmatprep.subr.bf16.mxu1 %v18597_v1  ;;  %v18640_v0 = vld [vmem:[%s21611_s26 + $0x11e0] ss:$16 sps:$4 sm:$0xff]  }
 0x166   : > { %v12851_v14 = vpop.f32.mrf.mxu0  ;;  %13096 = vmatmul.mubr.bf16.vlgmr.msra.gmra.mxu0 %v21950_v4  ;;  %v18643_v1 = vld [vmem:[%s21611_s26 + $0x13e0] ss:$16 sps:$4 sm:$0xff]  }
 0x167   : > { %v12892_v15 = vpop.f32.mrf.mxu1  ;;  %13137 = vmatmul.mubr.bf16.vlgmr.msra.gmra.mxu1 %v21952_v5  ;;  %13146 = vmatpush1.bf16.msra.mxu0 %v18592_v2  ;;  %v18648_v2 = vld [vmem:[%s21611_s26 + $0x11c4] ss:$16 sps:$4 sm:$0xff]  }
 0x168   : > { %v21966_v18 = vadd.f32 %v12892_v15, %v12851_v14  ;;  %13187 = vmatpush1.bf16.msra.mxu1 %v18595_v3  ;;  %v12853_v20 = vpop.f32.mrf.mxu0  ;;  %13147 = vmatprep.subr.bf16.mxu0 %v18600_v8  ;;  %v18651_v3 = vld [vmem:[%s21611_s26 + $0x13c4] ss:$16 sps:$4 sm:$0xff]   ;;  %v18652_v14 = vld [vmem:[%s21611_s26 + $0x11a0] ss:$16 sps:$4 sm:$0xff]  }
 0x169   : > { %v12894_v21 = vpop.f32.mrf.mxu1  ;;  %13188 = vmatprep.subr.bf16.mxu1 %v18603_v9  ;;  %13177 = vmatprep.mubr.bf16.mxu0 %v21958_v12  ;;  %v18654_v8 = vld [vmem:[%s21611_s26 + $0x11a4] ss:$16 sps:$4 sm:$0xff]   ;;  %v18655_v15 = vld [vmem:[%s21611_s26 + $0x13a0] ss:$16 sps:$4 sm:$0xff]  }
 0x16a   : > { %v21970_v25 = vadd.f32 %v12894_v21, %v12853_v20  ;;  %13218 = vmatprep.mubr.bf16.mxu1 %v21960_v13  ;;  %v12855_v26 = vpop.f32.mrf.mxu0  ;;  %v18657_v9 = vld [vmem:[%s21611_s26 + $0x13a4] ss:$16 sps:$4 sm:$0xff]   ;;  %v18661_v20 = vld [vmem:[%s21611_s26 + $0x1380] ss:$16 sps:$4 sm:$0xff]  }
 0x16b   : > { %v12896_v27 = vpop.f32.mrf.mxu1  ;;  %13148 = vmatpush1.bf16.msra.mxu0 %v18598_v16  ;;  %v18660_v16 = vld [vmem:[%s21611_s26 + $0x1184] ss:$16 sps:$4 sm:$0xff]   ;;  %v18664_v26 = vld [vmem:[%s21611_s26 + $0x1160] ss:$16 sps:$4 sm:$0xff]  }
 0x16c   : > { %13189 = vmatpush1.bf16.msra.mxu1 %v18601_v17  ;;  %v12856_v32 = vpop.f32.mrf.mxu0  ;;  %13149 = vmatprep.subr.bf16.mxu0 %v18606_v19  ;;  %v18663_v17 = vld [vmem:[%s21611_s26 + $0x1384] ss:$16 sps:$4 sm:$0xff]   ;;  %v18658_v19 = vld [vmem:[%s21611_s26 + $0x1180] ss:$16 sps:$4 sm:$0xff]  }
 0x16d   : > { %v12897_v33 = vpop.f32.mrf.mxu1  ;;  %13190 = vmatprep.subr.bf16.mxu1 %v18609_v24  ;;  %v18666_v21 = vld [vmem:[%s21611_s26 + $0x1164] ss:$16 sps:$4 sm:$0xff]   ;;  %v18667_v27 = vld [vmem:[%s21611_s26 + $0x1360] ss:$16 sps:$4 sm:$0xff]  }
 0x16e   : > { %v18669_v24 = vld [vmem:[%s21611_s26 + $0x1364] ss:$16 sps:$4 sm:$0xff]   ;;  %v18673_v32 = vld [vmem:[%s21611_s26 + $0x1340] ss:$16 sps:$4 sm:$0xff]  }
 0x16f   : > { %13150 = vmatpush1.bf16.msra.mxu0 %v18604_v28  ;;  %v18672_v28 = vld [vmem:[%s21611_s26 + $0x1144] ss:$16 sps:$4 sm:$0xff]  }
 0x170   : > { %13191 = vmatpush1.bf16.msra.mxu1 %v18607_v29  ;;  %13151 = vmatprep.subr.bf16.mxu0 %v18612_v30  ;;  %v18675_v29 = vld [vmem:[%s21611_s26 + $0x1344] ss:$16 sps:$4 sm:$0xff]   ;;  %v18670_v30 = vld [vmem:[%s21611_s26 + $0x1140] ss:$16 sps:$4 sm:$0xff]  }
 0x171   : > { %13192 = vmatprep.subr.bf16.mxu1 %v18615_v35  ;;  %v18678_v33 = vld [vmem:[%s21611_s26 + $0x1124] ss:$16 sps:$4 sm:$0xff]  }
 0x172   : > { %v18681_v35 = vld [vmem:[%s21611_s26 + $0x1324] ss:$16 sps:$4 sm:$0xff]  }
 0x173   : > { %13152 = vmatpush1.bf16.msra.mxu0 %v18610_v36  ;;  %v18676_v36 = vld [vmem:[%s21611_s26 + $0x1120] ss:$16 sps:$4 sm:$0xff]  }
 0x174   : > { %13193 = vmatpush1.bf16.msra.mxu1 %v18613_v37  ;;  %13153 = vmatprep.subr.bf16.mxu0 %v18618_v38  ;;  %v18679_v37 = vld [vmem:[%s21611_s26 + $0x1320] ss:$16 sps:$4 sm:$0xff]   ;;  %v18684_v38 = vld [vmem:[%s21611_s26 + $0x1104] ss:$16 sps:$4 sm:$0xff]  }
 0x175   : > { %13194 = vmatprep.subr.bf16.mxu1 %v18621_v40  ;;  %v18687_v40 = vld [vmem:[%s21611_s26 + $0x1304] ss:$16 sps:$4 sm:$0xff]  }
 0x177   : > { %13154 = vmatpush1.bf16.msra.mxu0 %v18616_v41  ;;  %v18682_v41 = vld [vmem:[%s21611_s26 + $0x1100] ss:$16 sps:$4 sm:$0xff]  }
 0x178   : > { %13195 = vmatpush1.bf16.msra.mxu1 %v18619_v43  ;;  %13155 = vmatprep.subr.bf16.mxu0 %v18624_v46  ;;  %v18685_v43 = vld [vmem:[%s21611_s26 + $0x1300] ss:$16 sps:$4 sm:$0xff]  }
 0x179   : > { %13196 = vmatprep.subr.bf16.mxu1 %v18627_v47  ;;  %v413_v46 = vld [vmem:[%s21629_s22 + $0x80] sm:$0xff]  ;;  %v415_v47 = vld [vmem:[%s21629_s22 + $0x90] sm:$0xff] }
 0x17b   : > { %13156 = vmatpush1.bf16.msra.mxu0 %v18622_v48  ;;  %v18690_v48 = vld [vmem:[%s21611_s26 + $0x14e4] ss:$16 sps:$4 sm:$0xff]  }
 0x17c   : > { %13197 = vmatpush1.bf16.msra.mxu1 %v18625_v49  ;;  %13157 = vmatprep.subr.bf16.mxu0 %v18630_v53  ;;  %v18693_v49 = vld [vmem:[%s21611_s26 + $0x16e4] ss:$16 sps:$4 sm:$0xff]   ;;  %v22032_v53 = vpack.c.bf16 %v413_v46, %v413_v46  ;;  %v18724_v46 = vld [vmem:[%s21611_s26 + $0x1420] ss:$16 sps:$4 sm:$0xff]  }
 0x17d   : > { %13198 = vmatprep.subr.bf16.mxu1 %v18633_v55  ;;  %v22034_v55 = vpack.c.bf16 %v415_v47, %v415_v47  ;;  %v18727_v47 = vld [vmem:[%s21611_s26 + $0x1620] ss:$16 sps:$4 sm:$0xff]  }
 0x17f   : > { %13158 = vmatpush1.bf16.msra.mxu0 %v18628_v56  ;;  %v418_v56 = vld [vmem:[%s21629_s22 + $0xa8] sm:$0xff] }
 0x180   : > { %13199 = vmatpush1.bf16.msra.mxu1 %v18631_v57  ;;  %13159 = vmatprep.subr.bf16.mxu0 %v18636_v58  ;;  %v420_v57 = vld [vmem:[%s21629_s22 + $0xb8] sm:$0xff]  ;;  %v18688_v58 = vld [vmem:[%s21611_s26 + $0x14e0] ss:$16 sps:$4 sm:$0xff]  }
 0x181   : > { %13200 = vmatprep.subr.bf16.mxu1 %v18639_v59  ;;  %v18691_v59 = vld [vmem:[%s21611_s26 + $0x16e0] ss:$16 sps:$4 sm:$0xff]  }
 0x183   : > { %13160 = vmatpush1.bf16.msra.mxu0 %v18634_v60  ;;  %v18696_v60 = vld [vmem:[%s21611_s26 + $0x14c4] ss:$16 sps:$4 sm:$0xff]  }
 0x184   : > { %13201 = vmatpush1.bf16.msra.mxu1 %v18637_v61  ;;  %13161 = vmatprep.subr.bf16.mxu0 %v18642_v62  ;;  %v18699_v61 = vld [vmem:[%s21611_s26 + $0x16c4] ss:$16 sps:$4 sm:$0xff]   ;;  %v18694_v62 = vld [vmem:[%s21611_s26 + $0x14c0] ss:$16 sps:$4 sm:$0xff]  }
 0x185   : > { %13202 = vmatprep.subr.bf16.mxu1 %v18645_v63  ;;  %v18697_v63 = vld [vmem:[%s21611_s26 + $0x16c0] ss:$16 sps:$4 sm:$0xff]  }
 0x187   : > { %13162 = vmatpush2.bf16.msra.mxu0 %v18640_v0  ;;  %v22044_v0 = vpack.c.bf16 %v418_v56, %v418_v56  ;;  %v18730_v56 = vld [vmem:[%s21611_s26 + $0x1400] ss:$16 sps:$4 sm:$0xff]  }
 0x188   : > { %13203 = vmatpush2.bf16.msra.mxu1 %v18643_v1  ;;  %13163 = vmatprep.subr.bf16.mxu0 %v18648_v2  ;;  %v22046_v1 = vpack.c.bf16 %v420_v57, %v420_v57  ;;  %v18733_v57 = vld [vmem:[%s21611_s26 + $0x1600] ss:$16 sps:$4 sm:$0xff]  }
 0x189   : > { %13204 = vmatprep.subr.bf16.mxu1 %v18651_v3 }
 0x18b   : > { %13164 = vmatpush2.bf16.msra.mxu0 %v18646_v6 }
 0x18c   : > { %13205 = vmatpush2.bf16.msra.mxu1 %v18649_v7  ;;  %13165 = vmatprep.subr.bf16.mxu0 %v18654_v8 }
 0x18d   : > { %13206 = vmatprep.subr.bf16.mxu1 %v18657_v9  ;;  %v18702_v9 = vld [vmem:[%s21611_s26 + $0x14a4] ss:$16 sps:$4 sm:$0xff]  }
 0x18f   : > { %13166 = vmatpush2.bf16.msra.mxu0 %v18652_v14  ;;  %v18705_v14 = vld [vmem:[%s21611_s26 + $0x16a4] ss:$16 sps:$4 sm:$0xff]  }
 0x190   : > { %13207 = vmatpush2.bf16.msra.mxu1 %v18655_v15  ;;  %13167 = vmatprep.subr.bf16.mxu0 %v18660_v16 }
 0x191   : > { %13208 = vmatprep.subr.bf16.mxu1 %v18663_v17  ;;  %v18700_v17 = vld [vmem:[%s21611_s26 + $0x14a0] ss:$16 sps:$4 sm:$0xff]  }
 0x193   : > { %13168 = vmatpush2.bf16.msra.mxu0 %v18658_v19  ;;  %v18703_v19 = vld [vmem:[%s21611_s26 + $0x16a0] ss:$16 sps:$4 sm:$0xff]  }
 0x194   : > { %13209 = vmatpush2.bf16.msra.mxu1 %v18661_v20  ;;  %13169 = vmatprep.subr.bf16.mxu0 %v18666_v21 }
 0x195   : > { %13210 = vmatprep.subr.bf16.mxu1 %v18669_v24 }
 0x197   : > { %13170 = vmatpush2.bf16.msra.mxu0 %v18664_v26 }
 0x198   : > { %13211 = vmatpush2.bf16.msra.mxu1 %v18667_v27  ;;  %13171 = vmatprep.subr.bf16.mxu0 %v18672_v28  ;;  %v18711_v27 = vld [vmem:[%s21611_s26 + $0x1684] ss:$16 sps:$4 sm:$0xff]   ;;  %v18706_v28 = vld [vmem:[%s21611_s26 + $0x1480] ss:$16 sps:$4 sm:$0xff]  }
 0x199   : > { %13212 = vmatprep.subr.bf16.mxu1 %v18675_v29  ;;  %v18709_v29 = vld [vmem:[%s21611_s26 + $0x1680] ss:$16 sps:$4 sm:$0xff]  }
 0x19b   : > { %13172 = vmatpush2.bf16.msra.mxu0 %v18670_v30  ;;  %v18714_v30 = vld [vmem:[%s21611_s26 + $0x1464] ss:$16 sps:$4 sm:$0xff]  }
 0x19c   : > { %13213 = vmatpush2.bf16.msra.mxu1 %v18673_v32  ;;  %13173 = vmatprep.subr.bf16.mxu0 %v18678_v33  ;;  %v18717_v32 = vld [vmem:[%s21611_s26 + $0x1664] ss:$16 sps:$4 sm:$0xff]   ;;  %v18712_v33 = vld [vmem:[%s21611_s26 + $0x1460] ss:$16 sps:$4 sm:$0xff]  }
 0x19d   : > { %13214 = vmatprep.subr.bf16.mxu1 %v18681_v35  ;;  %v18715_v35 = vld [vmem:[%s21611_s26 + $0x1660] ss:$16 sps:$4 sm:$0xff]  }
 0x19f   : > { %13174 = vmatpush2.bf16.msra.mxu0 %v18676_v36  ;;  %v18720_v36 = vld [vmem:[%s21611_s26 + $0x1444] ss:$16 sps:$4 sm:$0xff]  }
 0x1a0   : > { %13215 = vmatpush2.bf16.msra.mxu1 %v18679_v37  ;;  %13175 = vmatprep.subr.bf16.mxu0 %v18684_v38  ;;  %v18723_v37 = vld [vmem:[%s21611_s26 + $0x1644] ss:$16 sps:$4 sm:$0xff]   ;;  %v18718_v38 = vld [vmem:[%s21611_s26 + $0x1440] ss:$16 sps:$4 sm:$0xff]  }
 0x1a1   : > { %13216 = vmatprep.subr.bf16.mxu1 %v18687_v40  ;;  %v18721_v40 = vld [vmem:[%s21611_s26 + $0x1640] ss:$16 sps:$4 sm:$0xff]  }
 0x1a3   : > { %13176 = vmatpush2.bf16.msra.mxu0 %v18682_v41  ;;  %v18726_v41 = vld [vmem:[%s21611_s26 + $0x1424] ss:$16 sps:$4 sm:$0xff]  }
 0x1a4   : > { %13217 = vmatpush2.bf16.msra.mxu1 %v18685_v43  ;;  %13227 = vmatprep.subr.bf16.mxu0 %v18690_v48  ;;  %v18729_v43 = vld [vmem:[%s21611_s26 + $0x1624] ss:$16 sps:$4 sm:$0xff]  }
 0x1a5   : > { %13268 = vmatprep.subr.bf16.mxu1 %v18693_v49  ;;  %v18732_v48 = vld [vmem:[%s21611_s26 + $0x1404] ss:$16 sps:$4 sm:$0xff]  }
 0x1a6   : > { %v12933_v2 = vpop.f32.mrf.mxu0  ;;  %13178 = vmatmul.mubr.bf16.vlgmr.msra.gmra.mxu0 %v22032_v53  ;;  %v18735_v49 = vld [vmem:[%s21611_s26 + $0x1604] ss:$16 sps:$4 sm:$0xff]  }
 0x1a7   : > { %v12974_v3 = vpop.f32.mrf.mxu1  ;;  %13219 = vmatmul.mubr.bf16.vlgmr.msra.gmra.mxu1 %v22034_v55  ;;  %v12934_v6 = vadd.f32 %v12933_v2, %v21966_v18  ;;  %13228 = vmatpush1.bf16.msra.mxu0 %v18688_v58  ;;  %v18738_v58 = vld [vmem:[%s21611_s26 + $0x15e4] ss:$16 sps:$4 sm:$0xff]   ;;  %v18742_v2 = vld [vmem:[%s21611_s26 + $0x15c0] ss:$16 sps:$4 sm:$0xff]  }
 0x1a8   : > { %13269 = vmatpush1.bf16.msra.mxu1 %v18691_v59  ;;  %v12935_v7 = vpop.f32.mrf.mxu0  ;;  %13229 = vmatprep.subr.bf16.mxu0 %v18696_v60  ;;  %v18741_v59 = vld [vmem:[%s21611_s26 + $0x17e4] ss:$16 sps:$4 sm:$0xff]   ;;  %v18736_v60 = vld [vmem:[%s21611_s26 + $0x15e0] ss:$16 sps:$4 sm:$0xff]  }
 0x1a9   : > { %v12976_v8 = vpop.f32.mrf.mxu1  ;;  %13270 = vmatprep.subr.bf16.mxu1 %v18699_v61  ;;  %v22053_v15 = vadd.f32 %v12974_v3, %v12934_v6  ;;  %v12936_v16 = vadd.f32 %v12935_v7, %v21970_v25  ;;  %13259 = vmatprep.mubr.bf16.mxu0 %v22044_v0  ;;  %v18708_v25 = vld [vmem:[%s21611_s26 + $0x1484] ss:$16 sps:$4 sm:$0xff]   ;;  %v18739_v61 = vld [vmem:[%s21611_s26 + $0x17e0] ss:$16 sps:$4 sm:$0xff]  }
 0x1aa   : > { %13300 = vmatprep.mubr.bf16.mxu1 %v22046_v1  ;;  %v12937_v18 = vpop.f32.mrf.mxu0  ;;  %v18745_v3 = vld [vmem:[%s21611_s26 + $0x17c0] ss:$16 sps:$4 sm:$0xff]   ;;  %v18750_v6 = vld [vmem:[%s21611_s26 + $0x15a4] ss:$16 sps:$4 sm:$0xff]  }
 0x1ab   : > { %v12978_v20 = vpop.f32.mrf.mxu1  ;;  %v22060_v21 = vadd.f32 %v12976_v8, %v12936_v16  ;;  %13230 = vmatpush1.bf16.msra.mxu0 %v18694_v62  ;;  %v18744_v62 = vld [vmem:[%s21611_s26 + $0x15c4] ss:$16 sps:$4 sm:$0xff]   ;;  %v18748_v8 = vld [vmem:[%s21611_s26 + $0x15a0] ss:$16 sps:$4 sm:$0xff]  }
 0x1ac   : > { %13271 = vmatpush1.bf16.msra.mxu1 %v18697_v63  ;;  %v12938_v24 = vpop.f32.mrf.mxu0  ;;  %13231 = vmatprep.subr.bf16.mxu0 %v18702_v9  ;;  %v18747_v63 = vld [vmem:[%s21611_s26 + $0x17c4] ss:$16 sps:$4 sm:$0xff]   ;;  %v18751_v9 = vld [vmem:[%s21611_s26 + $0x17a0] ss:$16 sps:$4 sm:$0xff]  }
 0x1ad   : > { %v12979_v26 = vpop.f32.mrf.mxu1  ;;  %13272 = vmatprep.subr.bf16.mxu1 %v18705_v14  ;;  %v18753_v7 = vld [vmem:[%s21611_s26 + $0x17a4] ss:$16 sps:$4 sm:$0xff]   ;;  %v18760_v24 = vld [vmem:[%s21611_s26 + $0x1560] ss:$16 sps:$4 sm:$0xff]  }
 0x1ae   : > { %v18756_v14 = vld [vmem:[%s21611_s26 + $0x1584] ss:$16 sps:$4 sm:$0xff]   ;;  %v18763_v26 = vld [vmem:[%s21611_s26 + $0x1760] ss:$16 sps:$4 sm:$0xff]  }
 0x1af   : > { %13232 = vmatpush1.bf16.msra.mxu0 %v18700_v17  ;;  %v18759_v16 = vld [vmem:[%s21611_s26 + $0x1784] ss:$16 sps:$4 sm:$0xff]   ;;  %v18754_v17 = vld [vmem:[%s21611_s26 + $0x1580] ss:$16 sps:$4 sm:$0xff]  }
 0x1b0   : > { %13273 = vmatpush1.bf16.msra.mxu1 %v18703_v19  ;;  %13233 = vmatprep.subr.bf16.mxu0 %v18708_v25  ;;  %v18757_v19 = vld [vmem:[%s21611_s26 + $0x1780] ss:$16 sps:$4 sm:$0xff]   ;;  %v18762_v18 = vld [vmem:[%s21611_s26 + $0x1564] ss:$16 sps:$4 sm:$0xff]  }
 0x1b1   : > { %13274 = vmatprep.subr.bf16.mxu1 %v18711_v27  ;;  %v18765_v20 = vld [vmem:[%s21611_s26 + $0x1764] ss:$16 sps:$4 sm:$0xff]  }
 0x1b2   : > { %v18768_v25 = vld [vmem:[%s21611_s26 + $0x1544] ss:$16 sps:$4 sm:$0xff]  }
 0x1b3   : > { %13234 = vmatpush1.bf16.msra.mxu0 %v18706_v28  ;;  %v18771_v27 = vld [vmem:[%s21611_s26 + $0x1744] ss:$16 sps:$4 sm:$0xff]   ;;  %v18766_v28 = vld [vmem:[%s21611_s26 + $0x1540] ss:$16 sps:$4 sm:$0xff]  }
 0x1b4   : > { %13275 = vmatpush1.bf16.msra.mxu1 %v18709_v29  ;;  %13235 = vmatprep.subr.bf16.mxu0 %v18714_v30  ;;  %v18769_v29 = vld [vmem:[%s21611_s26 + $0x1740] ss:$16 sps:$4 sm:$0xff]   ;;  %v18774_v30 = vld [vmem:[%s21611_s26 + $0x1524] ss:$16 sps:$4 sm:$0xff]  }
 0x1b5   : > { %13276 = vmatprep.subr.bf16.mxu1 %v18717_v32  ;;  %v18777_v32 = vld [vmem:[%s21611_s26 + $0x1724] ss:$16 sps:$4 sm:$0xff]  }
 0x1b7   : > { %13236 = vmatpush1.bf16.msra.mxu0 %v18712_v33  ;;  %v18772_v33 = vld [vmem:[%s21611_s26 + $0x1520] ss:$16 sps:$4 sm:$0xff]  }
 0x1b8   : > { %13277 = vmatpush1.bf16.msra.mxu1 %v18715_v35  ;;  %13237 = vmatprep.subr.bf16.mxu0 %v18720_v36  ;;  %v18775_v35 = vld [vmem:[%s21611_s26 + $0x1720] ss:$16 sps:$4 sm:$0xff]   ;;  %v18780_v36 = vld [vmem:[%s21611_s26 + $0x1504] ss:$16 sps:$4 sm:$0xff]  }
 0x1b9   : > { %13278 = vmatprep.subr.bf16.mxu1 %v18723_v37  ;;  %v18783_v37 = vld [vmem:[%s21611_s26 + $0x1704] ss:$16 sps:$4 sm:$0xff]  }
 0x1bb   : > { %13238 = vmatpush1.bf16.msra.mxu0 %v18718_v38  ;;  %v18778_v38 = vld [vmem:[%s21611_s26 + $0x1500] ss:$16 sps:$4 sm:$0xff]  }
 0x1bc   : > { %13279 = vmatpush1.bf16.msra.mxu1 %v18721_v40  ;;  %13239 = vmatprep.subr.bf16.mxu0 %v18726_v41  ;;  %v18781_v40 = vld [vmem:[%s21611_s26 + $0x1700] ss:$16 sps:$4 sm:$0xff]  }
 0x1bd   : > { %13280 = vmatprep.subr.bf16.mxu1 %v18729_v43  ;;  %v417_v41 = vld [vmem:[%s21629_s22 + $0xa0] sm:$0xff]  ;;  %v419_v43 = vld [vmem:[%s21629_s22 + $0xb0] sm:$0xff] }
 0x1bf   : > { %13240 = vmatpush1.bf16.msra.mxu0 %v18724_v46  ;;  %v18786_v46 = vld [vmem:[%s21611_s26 + $0x18e4] ss:$16 sps:$4 sm:$0xff]  }
 0x1c0   : > { %13281 = vmatpush1.bf16.msra.mxu1 %v18727_v47  ;;  %13241 = vmatprep.subr.bf16.mxu0 %v18732_v48  ;;  %v18789_v47 = vld [vmem:[%s21611_s26 + $0x1ae4] ss:$16 sps:$4 sm:$0xff]   ;;  %v22118_v48 = vpack.c.bf16 %v417_v41, %v417_v41  ;;  %v18814_v41 = vld [vmem:[%s21611_s26 + $0x1840] ss:$16 sps:$4 sm:$0xff]  }
 0x1c1   : > { %13282 = vmatprep.subr.bf16.mxu1 %v18735_v49  ;;  %v22120_v49 = vpack.c.bf16 %v419_v43, %v419_v43  ;;  %v18817_v43 = vld [vmem:[%s21611_s26 + $0x1a40] ss:$16 sps:$4 sm:$0xff]  }
 0x1c3   : > { %13242 = vmatpush1.bf16.msra.mxu0 %v18730_v56  ;;  %v422_v56 = vld [vmem:[%s21629_s22 + $0xc8] sm:$0xff] }
 0x1c4   : > { %13283 = vmatpush1.bf16.msra.mxu1 %v18733_v57  ;;  %13243 = vmatprep.subr.bf16.mxu0 %v18738_v58  ;;  %v424_v57 = vld [vmem:[%s21629_s22 + $0xd8] sm:$0xff]  ;;  %v18784_v58 = vld [vmem:[%s21611_s26 + $0x18e0] ss:$16 sps:$4 sm:$0xff]  }
 0x1c5   : > { %13284 = vmatprep.subr.bf16.mxu1 %v18741_v59  ;;  %v18787_v59 = vld [vmem:[%s21611_s26 + $0x1ae0] ss:$16 sps:$4 sm:$0xff]  }
 0x1c7   : > { %13244 = vmatpush2.bf16.msra.mxu0 %v18736_v60  ;;  %v18792_v60 = vld [vmem:[%s21611_s26 + $0x18c4] ss:$16 sps:$4 sm:$0xff]  }
 0x1c8   : > { %13285 = vmatpush2.bf16.msra.mxu1 %v18739_v61  ;;  %13245 = vmatprep.subr.bf16.mxu0 %v18744_v62  ;;  %v18795_v61 = vld [vmem:[%s21611_s26 + $0x1ac4] ss:$16 sps:$4 sm:$0xff]   ;;  %v18790_v62 = vld [vmem:[%s21611_s26 + $0x18c0] ss:$16 sps:$4 sm:$0xff]  }
 0x1c9   : > { %13286 = vmatprep.subr.bf16.mxu1 %v18747_v63  ;;  %v18793_v63 = vld [vmem:[%s21611_s26 + $0x1ac0] ss:$16 sps:$4 sm:$0xff]  }
 0x1cb   : > { %13246 = vmatpush2.bf16.msra.mxu0 %v18742_v2  ;;  %v22130_v2 = vpack.c.bf16 %v422_v56, %v422_v56  ;;  %v18820_v56 = vld [vmem:[%s21611_s26 + $0x1820] ss:$16 sps:$4 sm:$0xff]  }
 0x1cc   : > { %13287 = vmatpush2.bf16.msra.mxu1 %v18745_v3  ;;  %13247 = vmatprep.subr.bf16.mxu0 %v18750_v6  ;;  %v22132_v3 = vpack.c.bf16 %v424_v57, %v424_v57  ;;  %v18823_v57 = vld [vmem:[%s21611_s26 + $0x1a20] ss:$16 sps:$4 sm:$0xff]  }
 0x1cd   : > { %13288 = vmatprep.subr.bf16.mxu1 %v18753_v7 }
 0x1cf   : > { %13248 = vmatpush2.bf16.msra.mxu0 %v18748_v8 }
 0x1d0   : > { %13289 = vmatpush2.bf16.msra.mxu1 %v18751_v9  ;;  %13249 = vmatprep.subr.bf16.mxu0 %v18756_v14 }
 0x1d1   : > { %13290 = vmatprep.subr.bf16.mxu1 %v18759_v16  ;;  %v18798_v16 = vld [vmem:[%s21611_s26 + $0x18a4] ss:$16 sps:$4 sm:$0xff]  }
 0x1d3   : > { %13250 = vmatpush2.bf16.msra.mxu0 %v18754_v17  ;;  %v18801_v17 = vld [vmem:[%s21611_s26 + $0x1aa4] ss:$16 sps:$4 sm:$0xff]  }
 0x1d4   : > { %13291 = vmatpush2.bf16.msra.mxu1 %v18757_v19  ;;  %13251 = vmatprep.subr.bf16.mxu0 %v18762_v18 }
 0x1d5   : > { %13292 = vmatprep.subr.bf16.mxu1 %v18765_v20  ;;  %v18796_v20 = vld [vmem:[%s21611_s26 + $0x18a0] ss:$16 sps:$4 sm:$0xff]  }
 0x1d7   : > { %13252 = vmatpush2.bf16.msra.mxu0 %v18760_v24  ;;  %v18799_v24 = vld [vmem:[%s21611_s26 + $0x1aa0] ss:$16 sps:$4 sm:$0xff]  }
 0x1d8   : > { %13293 = vmatpush2.bf16.msra.mxu1 %v18763_v26  ;;  %13253 = vmatprep.subr.bf16.mxu0 %v18768_v25 }
 0x1d9   : > { %13294 = vmatprep.subr.bf16.mxu1 %v18771_v27 }
 0x1db   : > { %13254 = vmatpush2.bf16.msra.mxu0 %v18766_v28 }
 0x1dc   : > { %13295 = vmatpush2.bf16.msra.mxu1 %v18769_v29  ;;  %13255 = vmatprep.subr.bf16.mxu0 %v18774_v30  ;;  %v18807_v29 = vld [vmem:[%s21611_s26 + $0x1a84] ss:$16 sps:$4 sm:$0xff]   ;;  %v18802_v30 = vld [vmem:[%s21611_s26 + $0x1880] ss:$16 sps:$4 sm:$0xff]  }
 0x1dd   : > { %13296 = vmatprep.subr.bf16.mxu1 %v18777_v32  ;;  %v18805_v32 = vld [vmem:[%s21611_s26 + $0x1a80] ss:$16 sps:$4 sm:$0xff]  }
 0x1df   : > { %13256 = vmatpush2.bf16.msra.mxu0 %v18772_v33  ;;  %v18810_v33 = vld [vmem:[%s21611_s26 + $0x1864] ss:$16 sps:$4 sm:$0xff]  }
 0x1e0   : > { %13297 = vmatpush2.bf16.msra.mxu1 %v18775_v35  ;;  %13257 = vmatprep.subr.bf16.mxu0 %v18780_v36  ;;  %v18813_v35 = vld [vmem:[%s21611_s26 + $0x1a64] ss:$16 sps:$4 sm:$0xff]   ;;  %v18808_v36 = vld [vmem:[%s21611_s26 + $0x1860] ss:$16 sps:$4 sm:$0xff]  }
 0x1e1   : > { %13298 = vmatprep.subr.bf16.mxu1 %v18783_v37  ;;  %v18811_v37 = vld [vmem:[%s21611_s26 + $0x1a60] ss:$16 sps:$4 sm:$0xff]  }
 0x1e3   : > { %13258 = vmatpush2.bf16.msra.mxu0 %v18778_v38  ;;  %v18816_v38 = vld [vmem:[%s21611_s26 + $0x1844] ss:$16 sps:$4 sm:$0xff]  }
 0x1e4   : > { %13299 = vmatpush2.bf16.msra.mxu1 %v18781_v40  ;;  %13309 = vmatprep.subr.bf16.mxu0 %v18786_v46  ;;  %v18819_v40 = vld [vmem:[%s21611_s26 + $0x1a44] ss:$16 sps:$4 sm:$0xff]  }
 0x1e5   : > { %13350 = vmatprep.subr.bf16.mxu1 %v18789_v47  ;;  %v18822_v46 = vld [vmem:[%s21611_s26 + $0x1824] ss:$16 sps:$4 sm:$0xff]  }
 0x1e6   : > { %v13015_v6 = vpop.f32.mrf.mxu0  ;;  %13260 = vmatmul.mubr.bf16.vlgmr.msra.gmra.mxu0 %v22118_v48  ;;  %v18825_v47 = vld [vmem:[%s21611_s26 + $0x1a24] ss:$16 sps:$4 sm:$0xff]  }
 0x1e7   : > { %v13056_v7 = vpop.f32.mrf.mxu1  ;;  %13301 = vmatmul.mubr.bf16.vlgmr.msra.gmra.mxu1 %v22120_v49  ;;  %v13016_v8 = vadd.f32 %v13015_v6, %v22053_v15  ;;  %13310 = vmatpush1.bf16.msra.mxu0 %v18784_v58  ;;  %v18828_v58 = vld [vmem:[%s21611_s26 + $0x1804] ss:$16 sps:$4 sm:$0xff]   ;;  %v18832_v6 = vld [vmem:[%s21611_s26 + $0x19e0] ss:$16 sps:$4 sm:$0xff]  }
 0x1e8   : > { %13351 = vmatpush1.bf16.msra.mxu1 %v18787_v59  ;;  %v13017_v9 = vpop.f32.mrf.mxu0  ;;  %13311 = vmatprep.subr.bf16.mxu0 %v18792_v60  ;;  %v18831_v59 = vld [vmem:[%s21611_s26 + $0x1a04] ss:$16 sps:$4 sm:$0xff]   ;;  %v18826_v60 = vld [vmem:[%s21611_s26 + $0x1800] ss:$16 sps:$4 sm:$0xff]  }
 0x1e9   : > { %v13058_v14 = vpop.f32.mrf.mxu1  ;;  %13352 = vmatprep.subr.bf16.mxu1 %v18795_v61  ;;  %v22139_v19 = vadd.f32 %v13056_v7, %v13016_v8  ;;  %v13018_v18 = vadd.f32 %v13017_v9, %v22060_v21  ;;  %13341 = vmatprep.mubr.bf16.mxu0 %v22130_v2  ;;  %v18804_v21 = vld [vmem:[%s21611_s26 + $0x1884] ss:$16 sps:$4 sm:$0xff]   ;;  %v18829_v61 = vld [vmem:[%s21611_s26 + $0x1a00] ss:$16 sps:$4 sm:$0xff]  }
 0x1ea   : > { %13382 = vmatprep.mubr.bf16.mxu1 %v22132_v3  ;;  %v13019_v15 = vpop.f32.mrf.mxu0  ;;  %v18835_v7 = vld [vmem:[%s21611_s26 + $0x1be0] ss:$16 sps:$4 sm:$0xff]   ;;  %v18840_v8 = vld [vmem:[%s21611_s26 + $0x19c4] ss:$16 sps:$4 sm:$0xff]  }
 0x1eb   : > { %v13060_v26 = vpop.f32.mrf.mxu1  ;;  %v22146_v25 = vadd.f32 %v13058_v14, %v13018_v18  ;;  %13312 = vmatpush1.bf16.msra.mxu0 %v18790_v62  ;;  %v18834_v62 = vld [vmem:[%s21611_s26 + $0x19e4] ss:$16 sps:$4 sm:$0xff]   ;;  %v18838_v14 = vld [vmem:[%s21611_s26 + $0x19c0] ss:$16 sps:$4 sm:$0xff]  }
 0x1ec   : > { %13353 = vmatpush1.bf16.msra.mxu1 %v18793_v63  ;;  %v13020_v27 = vpop.f32.mrf.mxu0  ;;  %13313 = vmatprep.subr.bf16.mxu0 %v18798_v16  ;;  %v18837_v63 = vld [vmem:[%s21611_s26 + $0x1be4] ss:$16 sps:$4 sm:$0xff]   ;;  %v18841_v16 = vld [vmem:[%s21611_s26 + $0x1bc0] ss:$16 sps:$4 sm:$0xff]  }
 0x1ed   : > { %v13061_v28 = vpop.f32.mrf.mxu1  ;;  %13354 = vmatprep.subr.bf16.mxu1 %v18801_v17  ;;  %v18843_v9 = vld [vmem:[%s21611_s26 + $0x1bc4] ss:$16 sps:$4 sm:$0xff]   ;;  %v18850_v27 = vld [vmem:[%s21611_s26 + $0x1980] ss:$16 sps:$4 sm:$0xff]  }
 0x1ee   : > { %v18846_v17 = vld [vmem:[%s21611_s26 + $0x19a4] ss:$16 sps:$4 sm:$0xff]   ;;  %v18853_v28 = vld [vmem:[%s21611_s26 + $0x1b80] ss:$16 sps:$4 sm:$0xff]  }
 0x1ef   : > { %13314 = vmatpush1.bf16.msra.mxu0 %v18796_v20  ;;  %v18849_v18 = vld [vmem:[%s21611_s26 + $0x1ba4] ss:$16 sps:$4 sm:$0xff]   ;;  %v18844_v20 = vld [vmem:[%s21611_s26 + $0x19a0] ss:$16 sps:$4 sm:$0xff]  }
 0x1f0   : > { %13355 = vmatpush1.bf16.msra.mxu1 %v18799_v24  ;;  %13315 = vmatprep.subr.bf16.mxu0 %v18804_v21  ;;  %v18847_v24 = vld [vmem:[%s21611_s26 + $0x1ba0] ss:$16 sps:$4 sm:$0xff]   ;;  %v18852_v15 = vld [vmem:[%s21611_s26 + $0x1984] ss:$16 sps:$4 sm:$0xff]  }
 0x1f1   : > { %13356 = vmatprep.subr.bf16.mxu1 %v18807_v29  ;;  %v18855_v26 = vld [vmem:[%s21611_s26 + $0x1b84] ss:$16 sps:$4 sm:$0xff]  }
 0x1f2   : > { %v18858_v21 = vld [vmem:[%s21611_s26 + $0x1964] ss:$16 sps:$4 sm:$0xff]  }
 0x1f3   : > { %13316 = vmatpush1.bf16.msra.mxu0 %v18802_v30  ;;  %v18861_v29 = vld [vmem:[%s21611_s26 + $0x1b64] ss:$16 sps:$4 sm:$0xff]   ;;  %v18856_v30 = vld [vmem:[%s21611_s26 + $0x1960] ss:$16 sps:$4 sm:$0xff]  }
 0x1f4   : > { %13357 = vmatpush1.bf16.msra.mxu1 %v18805_v32  ;;  %13317 = vmatprep.subr.bf16.mxu0 %v18810_v33  ;;  %v18859_v32 = vld [vmem:[%s21611_s26 + $0x1b60] ss:$16 sps:$4 sm:$0xff]   ;;  %v18864_v33 = vld [vmem:[%s21611_s26 + $0x1944] ss:$16 sps:$4 sm:$0xff]  }
 0x1f5   : > { %13358 = vmatprep.subr.bf16.mxu1 %v18813_v35  ;;  %v18867_v35 = vld [vmem:[%s21611_s26 + $0x1b44] ss:$16 sps:$4 sm:$0xff]  }
 0x1f7   : > { %13318 = vmatpush1.bf16.msra.mxu0 %v18808_v36  ;;  %v18862_v36 = vld [vmem:[%s21611_s26 + $0x1940] ss:$16 sps:$4 sm:$0xff]  }
 0x1f8   : > { %13359 = vmatpush1.bf16.msra.mxu1 %v18811_v37  ;;  %13319 = vmatprep.subr.bf16.mxu0 %v18816_v38  ;;  %v18865_v37 = vld [vmem:[%s21611_s26 + $0x1b40] ss:$16 sps:$4 sm:$0xff]   ;;  %v18870_v38 = vld [vmem:[%s21611_s26 + $0x1924] ss:$16 sps:$4 sm:$0xff]  }
 0x1f9   : > { %13360 = vmatprep.subr.bf16.mxu1 %v18819_v40  ;;  %v18873_v40 = vld [vmem:[%s21611_s26 + $0x1b24] ss:$16 sps:$4 sm:$0xff]  }
 0x1fb   : > { %13320 = vmatpush1.bf16.msra.mxu0 %v18814_v41  ;;  %v18868_v41 = vld [vmem:[%s21611_s26 + $0x1920] ss:$16 sps:$4 sm:$0xff]  }
 0x1fc   : > { %13361 = vmatpush1.bf16.msra.mxu1 %v18817_v43  ;;  %13321 = vmatprep.subr.bf16.mxu0 %v18822_v46  ;;  %v18871_v43 = vld [vmem:[%s21611_s26 + $0x1b20] ss:$16 sps:$4 sm:$0xff]   ;;  %v18876_v46 = vld [vmem:[%s21611_s26 + $0x1904] ss:$16 sps:$4 sm:$0xff]  }
 0x1fd   : > { %13362 = vmatprep.subr.bf16.mxu1 %v18825_v47  ;;  %v18879_v47 = vld [vmem:[%s21611_s26 + $0x1b04] ss:$16 sps:$4 sm:$0xff]  }
 0x1ff   : > { %13322 = vmatpush1.bf16.msra.mxu0 %v18820_v56  ;;  %v18874_v56 = vld [vmem:[%s21611_s26 + $0x1900] ss:$16 sps:$4 sm:$0xff]  }
 0x200   : > { %13363 = vmatpush1.bf16.msra.mxu1 %v18823_v57  ;;  %13323 = vmatprep.subr.bf16.mxu0 %v18828_v58  ;;  %v18877_v57 = vld [vmem:[%s21611_s26 + $0x1b00] ss:$16 sps:$4 sm:$0xff]  }
 0x201   : > { %13364 = vmatprep.subr.bf16.mxu1 %v18831_v59  ;;  %v421_v58 = vld [vmem:[%s21629_s22 + $0xc0] sm:$0xff]  ;;  %v423_v59 = vld [vmem:[%s21629_s22 + $0xd0] sm:$0xff] }
 0x203   : > { %13324 = vmatpush1.bf16.msra.mxu0 %v18826_v60  ;;  %v18882_v60 = vld [vmem:[%s21611_s26 + $0x1ce4] ss:$16 sps:$4 sm:$0xff]  }
 0x204   : > { %13365 = vmatpush1.bf16.msra.mxu1 %v18829_v61  ;;  %13325 = vmatprep.subr.bf16.mxu0 %v18834_v62  ;;  %v18885_v61 = vld [vmem:[%s21611_s26 + $0x1ee4] ss:$16 sps:$4 sm:$0xff]   ;;  %v22204_v62 = vpack.c.bf16 %v421_v58, %v421_v58  ;;  %v18904_v58 = vld [vmem:[%s21611_s26 + $0x1c60] ss:$16 sps:$4 sm:$0xff]  }
 0x205   : > { %13366 = vmatprep.subr.bf16.mxu1 %v18837_v63  ;;  %v22206_v63 = vpack.c.bf16 %v423_v59, %v423_v59  ;;  %v18907_v59 = vld [vmem:[%s21611_s26 + $0x1e60] ss:$16 sps:$4 sm:$0xff]  }
 0x207   : > { %13326 = vmatpush2.bf16.msra.mxu0 %v18832_v6  ;;  %v426_v6 = vld [vmem:[%s21629_s22 + $0xe8] sm:$0xff] }
 0x208   : > { %13367 = vmatpush2.bf16.msra.mxu1 %v18835_v7  ;;  %13327 = vmatprep.subr.bf16.mxu0 %v18840_v8  ;;  %v428_v7 = vld [vmem:[%s21629_s22 + $0xf8] sm:$0xff]  ;;  %v18880_v8 = vld [vmem:[%s21611_s26 + $0x1ce0] ss:$16 sps:$4 sm:$0xff]  }
 0x209   : > { %13368 = vmatprep.subr.bf16.mxu1 %v18843_v9  ;;  %v18883_v9 = vld [vmem:[%s21611_s26 + $0x1ee0] ss:$16 sps:$4 sm:$0xff]  }
 0x20b   : > { %13328 = vmatpush2.bf16.msra.mxu0 %v18838_v14  ;;  %v18888_v14 = vld [vmem:[%s21611_s26 + $0x1cc4] ss:$16 sps:$4 sm:$0xff]  }
 0x20c   : > { %13369 = vmatpush2.bf16.msra.mxu1 %v18841_v16  ;;  %13329 = vmatprep.subr.bf16.mxu0 %v18846_v17  ;;  %v18891_v16 = vld [vmem:[%s21611_s26 + $0x1ec4] ss:$16 sps:$4 sm:$0xff]   ;;  %v18886_v17 = vld [vmem:[%s21611_s26 + $0x1cc0] ss:$16 sps:$4 sm:$0xff]  }
 0x20d   : > { %13370 = vmatprep.subr.bf16.mxu1 %v18849_v18  ;;  %v18889_v18 = vld [vmem:[%s21611_s26 + $0x1ec0] ss:$16 sps:$4 sm:$0xff]  }
 0x20f   : > { %13330 = vmatpush2.bf16.msra.mxu0 %v18844_v20  ;;  %v22216_v20 = vpack.c.bf16 %v426_v6, %v426_v6  ;;  %v18910_v6 = vld [vmem:[%s21611_s26 + $0x1c40] ss:$16 sps:$4 sm:$0xff]  }
 0x210   : > { %13371 = vmatpush2.bf16.msra.mxu1 %v18847_v24  ;;  %13331 = vmatprep.subr.bf16.mxu0 %v18852_v15  ;;  %v22218_v24 = vpack.c.bf16 %v428_v7, %v428_v7  ;;  %v18913_v7 = vld [vmem:[%s21611_s26 + $0x1e40] ss:$16 sps:$4 sm:$0xff]  }
 0x211   : > { %13372 = vmatprep.subr.bf16.mxu1 %v18855_v26 }
 0x213   : > { %13332 = vmatpush2.bf16.msra.mxu0 %v18850_v27 }
 0x214   : > { %13373 = vmatpush2.bf16.msra.mxu1 %v18853_v28  ;;  %13333 = vmatprep.subr.bf16.mxu0 %v18858_v21 }
 0x215   : > { %13374 = vmatprep.subr.bf16.mxu1 %v18861_v29  ;;  %v18894_v29 = vld [vmem:[%s21611_s26 + $0x1ca4] ss:$16 sps:$4 sm:$0xff]  }
 0x217   : > { %13334 = vmatpush2.bf16.msra.mxu0 %v18856_v30  ;;  %v18897_v30 = vld [vmem:[%s21611_s26 + $0x1ea4] ss:$16 sps:$4 sm:$0xff]  }
 0x218   : > { %13375 = vmatpush2.bf16.msra.mxu1 %v18859_v32  ;;  %13335 = vmatprep.subr.bf16.mxu0 %v18864_v33 }
 0x219   : > { %13376 = vmatprep.subr.bf16.mxu1 %v18867_v35  ;;  %v18892_v35 = vld [vmem:[%s21611_s26 + $0x1ca0] ss:$16 sps:$4 sm:$0xff]  }
 0x21b   : > { %13336 = vmatpush2.bf16.msra.mxu0 %v18862_v36  ;;  %v18895_v36 = vld [vmem:[%s21611_s26 + $0x1ea0] ss:$16 sps:$4 sm:$0xff]  }
 0x21c   : > { %13377 = vmatpush2.bf16.msra.mxu1 %v18865_v37  ;;  %13337 = vmatprep.subr.bf16.mxu0 %v18870_v38 }
 0x21d   : > { %13378 = vmatprep.subr.bf16.mxu1 %v18873_v40 }
 0x21f   : > { %13338 = vmatpush2.bf16.msra.mxu0 %v18868_v41 }
 0x220   : > { %13379 = vmatpush2.bf16.msra.mxu1 %v18871_v43  ;;  %13339 = vmatprep.subr.bf16.mxu0 %v18876_v46  ;;  %v18903_v43 = vld [vmem:[%s21611_s26 + $0x1e84] ss:$16 sps:$4 sm:$0xff]   ;;  %v18898_v46 = vld [vmem:[%s21611_s26 + $0x1c80] ss:$16 sps:$4 sm:$0xff]  }
 0x221   : > { %13380 = vmatprep.subr.bf16.mxu1 %v18879_v47  ;;  %v18901_v47 = vld [vmem:[%s21611_s26 + $0x1e80] ss:$16 sps:$4 sm:$0xff]  }
 0x223   : > { %13340 = vmatpush2.bf16.msra.mxu0 %v18874_v56  ;;  %v18906_v56 = vld [vmem:[%s21611_s26 + $0x1c64] ss:$16 sps:$4 sm:$0xff]  }
 0x224   : > { %13381 = vmatpush2.bf16.msra.mxu1 %v18877_v57  ;;  %13391 = vmatprep.subr.bf16.mxu0 %v18882_v60  ;;  %v18909_v57 = vld [vmem:[%s21611_s26 + $0x1e64] ss:$16 sps:$4 sm:$0xff]  }
 0x225   : > { %13432 = vmatprep.subr.bf16.mxu1 %v18885_v61  ;;  %v18912_v60 = vld [vmem:[%s21611_s26 + $0x1c44] ss:$16 sps:$4 sm:$0xff]  }
 0x226   : > { %v13097_v15 = vpop.f32.mrf.mxu0  ;;  %13342 = vmatmul.mubr.bf16.vlgmr.msra.gmra.mxu0 %v22204_v62  ;;  %v18915_v61 = vld [vmem:[%s21611_s26 + $0x1e44] ss:$16 sps:$4 sm:$0xff]  }
 0x227   : > { %v13138_v26 = vpop.f32.mrf.mxu1  ;;  %13383 = vmatmul.mubr.bf16.vlgmr.msra.gmra.mxu1 %v22206_v63  ;;  %v13098_v27 = vadd.f32 %v13097_v15, %v22139_v19  ;;  %13392 = vmatpush1.bf16.msra.mxu0 %v18880_v8  ;;  %v18918_v8 = vld [vmem:[%s21611_s26 + $0x1c24] ss:$16 sps:$4 sm:$0xff]   ;;  %v18922_v15 = vld [vmem:[%s21611_s26 + $0x1c00] ss:$16 sps:$4 sm:$0xff]  }
 0x228   : > { %13433 = vmatpush1.bf16.msra.mxu1 %v18883_v9  ;;  %v13099_v28 = vpop.f32.mrf.mxu0  ;;  %13393 = vmatprep.subr.bf16.mxu0 %v18888_v14  ;;  %v18921_v9 = vld [vmem:[%s21611_s26 + $0x1e24] ss:$16 sps:$4 sm:$0xff]   ;;  %v18916_v14 = vld [vmem:[%s21611_s26 + $0x1c20] ss:$16 sps:$4 sm:$0xff]  }
 0x229   : > { %v13140_v21 = vpop.f32.mrf.mxu1  ;;  %13434 = vmatprep.subr.bf16.mxu1 %v18891_v16  ;;  %v22225_v32 = vadd.f32 %v13138_v26, %v13098_v27  ;;  %v13100_v33 = vadd.f32 %v13099_v28, %v22146_v25  ;;  %13423 = vmatprep.mubr.bf16.mxu0 %v22216_v20  ;;  %v18900_v25 = vld [vmem:[%s21611_s26 + $0x1c84] ss:$16 sps:$4 sm:$0xff]   ;;  %v18919_v16 = vld [vmem:[%s21611_s26 + $0x1e20] ss:$16 sps:$4 sm:$0xff]  }
 0x22a   : > { %13464 = vmatprep.mubr.bf16.mxu1 %v22218_v24  ;;  %v13101_v19 = vpop.f32.mrf.mxu0  ;;  %v18925_v26 = vld [vmem:[%s21611_s26 + $0x1e00] ss:$16 sps:$4 sm:$0xff]   ;;  %v18930_v27 = vld [vmem:[%s21611_s26 + $0x1de4] ss:$16 sps:$4 sm:$0xff]  }
 0x22b   : > { %v13142_v37 = vpop.f32.mrf.mxu1  ;;  %v22232_v38 = vadd.f32 %v13140_v21, %v13100_v33  ;;  %13394 = vmatpush1.bf16.msra.mxu0 %v18886_v17  ;;  %v18924_v17 = vld [vmem:[%s21611_s26 + $0x1c04] ss:$16 sps:$4 sm:$0xff]   ;;  %v18928_v21 = vld [vmem:[%s21611_s26 + $0x1de0] ss:$16 sps:$4 sm:$0xff]  }
 0x22c   : > { %13435 = vmatpush1.bf16.msra.mxu1 %v18889_v18  ;;  %v13102_v40 = vpop.f32.mrf.mxu0  ;;  %13395 = vmatprep.subr.bf16.mxu0 %v18894_v29  ;;  %v18927_v18 = vld [vmem:[%s21611_s26 + $0x1e04] ss:$16 sps:$4 sm:$0xff]   ;;  %v18931_v29 = vld [vmem:[%s21611_s26 + $0x1fe0] ss:$16 sps:$4 sm:$0xff]  }
 0x22d   : > { %v13143_v41 = vpop.f32.mrf.mxu1  ;;  %13436 = vmatprep.subr.bf16.mxu1 %v18897_v30  ;;  %v18933_v28 = vld [vmem:[%s21611_s26 + $0x1fe4] ss:$16 sps:$4 sm:$0xff]   ;;  %v18940_v40 = vld [vmem:[%s21611_s26 + $0x1da0] ss:$16 sps:$4 sm:$0xff]  }
 0x22e   : > { %v18936_v30 = vld [vmem:[%s21611_s26 + $0x1dc4] ss:$16 sps:$4 sm:$0xff]   ;;  %v18943_v41 = vld [vmem:[%s21611_s26 + $0x1fa0] ss:$16 sps:$4 sm:$0xff]  }
 0x22f   : > { %13396 = vmatpush1.bf16.msra.mxu0 %v18892_v35  ;;  %v18939_v33 = vld [vmem:[%s21611_s26 + $0x1fc4] ss:$16 sps:$4 sm:$0xff]   ;;  %v18934_v35 = vld [vmem:[%s21611_s26 + $0x1dc0] ss:$16 sps:$4 sm:$0xff]  }
 0x230   : > { %13437 = vmatpush1.bf16.msra.mxu1 %v18895_v36  ;;  %13397 = vmatprep.subr.bf16.mxu0 %v18900_v25  ;;  %v18937_v36 = vld [vmem:[%s21611_s26 + $0x1fc0] ss:$16 sps:$4 sm:$0xff]   ;;  %v18942_v19 = vld [vmem:[%s21611_s26 + $0x1da4] ss:$16 sps:$4 sm:$0xff]  }
 0x231   : > { %13438 = vmatprep.subr.bf16.mxu1 %v18903_v43  ;;  %v18945_v37 = vld [vmem:[%s21611_s26 + $0x1fa4] ss:$16 sps:$4 sm:$0xff]  }
 0x232   : > { %v18948_v25 = vld [vmem:[%s21611_s26 + $0x1d84] ss:$16 sps:$4 sm:$0xff]  }
 0x233   : > { %13398 = vmatpush1.bf16.msra.mxu0 %v18898_v46  ;;  %v18951_v43 = vld [vmem:[%s21611_s26 + $0x1f84] ss:$16 sps:$4 sm:$0xff]   ;;  %v18946_v46 = vld [vmem:[%s21611_s26 + $0x1d80] ss:$16 sps:$4 sm:$0xff]  }
 0x234   : > { %13439 = vmatpush1.bf16.msra.mxu1 %v18901_v47  ;;  %13399 = vmatprep.subr.bf16.mxu0 %v18906_v56  ;;  %v18949_v47 = vld [vmem:[%s21611_s26 + $0x1f80] ss:$16 sps:$4 sm:$0xff]   ;;  %v18954_v56 = vld [vmem:[%s21611_s26 + $0x1d64] ss:$16 sps:$4 sm:$0xff]  }
 0x235   : > { %13440 = vmatprep.subr.bf16.mxu1 %v18909_v57  ;;  %v18957_v57 = vld [vmem:[%s21611_s26 + $0x1f64] ss:$16 sps:$4 sm:$0xff]  }
 0x237   : > { %13400 = vmatpush1.bf16.msra.mxu0 %v18904_v58  ;;  %v18952_v58 = vld [vmem:[%s21611_s26 + $0x1d60] ss:$16 sps:$4 sm:$0xff]  }
 0x238   : > { %13441 = vmatpush1.bf16.msra.mxu1 %v18907_v59  ;;  %13401 = vmatprep.subr.bf16.mxu0 %v18912_v60  ;;  %v18955_v59 = vld [vmem:[%s21611_s26 + $0x1f60] ss:$16 sps:$4 sm:$0xff]   ;;  %v18960_v60 = vld [vmem:[%s21611_s26 + $0x1d44] ss:$16 sps:$4 sm:$0xff]  }
 0x239   : > { %13442 = vmatprep.subr.bf16.mxu1 %v18915_v61  ;;  %v18963_v61 = vld [vmem:[%s21611_s26 + $0x1f44] ss:$16 sps:$4 sm:$0xff]  }
 0x23b   : > { %13402 = vmatpush1.bf16.msra.mxu0 %v18910_v6  ;;  %v18958_v6 = vld [vmem:[%s21611_s26 + $0x1d40] ss:$16 sps:$4 sm:$0xff]  }
 0x23c   : > { %13443 = vmatpush1.bf16.msra.mxu1 %v18913_v7  ;;  %13403 = vmatprep.subr.bf16.mxu0 %v18918_v8  ;;  %v18961_v7 = vld [vmem:[%s21611_s26 + $0x1f40] ss:$16 sps:$4 sm:$0xff]   ;;  %v18966_v8 = vld [vmem:[%s21611_s26 + $0x1d24] ss:$16 sps:$4 sm:$0xff]  }
 0x23d   : > { %13444 = vmatprep.subr.bf16.mxu1 %v18921_v9  ;;  %v18969_v9 = vld [vmem:[%s21611_s26 + $0x1f24] ss:$16 sps:$4 sm:$0xff]  }
 0x23f   : > { %13404 = vmatpush1.bf16.msra.mxu0 %v18916_v14  ;;  %v18964_v14 = vld [vmem:[%s21611_s26 + $0x1d20] ss:$16 sps:$4 sm:$0xff]  }
 0x240   : > { %13445 = vmatpush1.bf16.msra.mxu1 %v18919_v16  ;;  %13405 = vmatprep.subr.bf16.mxu0 %v18924_v17  ;;  %v18967_v16 = vld [vmem:[%s21611_s26 + $0x1f20] ss:$16 sps:$4 sm:$0xff]   ;;  %v18972_v17 = vld [vmem:[%s21611_s26 + $0x1d04] ss:$16 sps:$4 sm:$0xff]  }
 0x241   : > { %13446 = vmatprep.subr.bf16.mxu1 %v18927_v18  ;;  %v18975_v18 = vld [vmem:[%s21611_s26 + $0x1f04] ss:$16 sps:$4 sm:$0xff]  }
 0x243   : > { %13406 = vmatpush1.bf16.msra.mxu0 %v18922_v15  ;;  %v18970_v15 = vld [vmem:[%s21611_s26 + $0x1d00] ss:$16 sps:$4 sm:$0xff]  }
 0x244   : > { %13447 = vmatpush1.bf16.msra.mxu1 %v18925_v26  ;;  %13407 = vmatprep.subr.bf16.mxu0 %v18930_v27  ;;  %v18973_v26 = vld [vmem:[%s21611_s26 + $0x1f00] ss:$16 sps:$4 sm:$0xff]  }
 0x245   : > { %13448 = vmatprep.subr.bf16.mxu1 %v18933_v28  ;;  %v425_v27 = vld [vmem:[%s21629_s22 + $0xe0] sm:$0xff]  ;;  %v427_v28 = vld [vmem:[%s21629_s22 + $0xf0] sm:$0xff] }
 0x247   : > { %13408 = vmatpush2.bf16.msra.mxu0 %v18928_v21  ;;  %v18978_v21 = vld [vmem:[%s21611_s26 + $0x20e4] ss:$16 sps:$4 sm:$0xff]  }
 0x248   : > { %13449 = vmatpush2.bf16.msra.mxu1 %v18931_v29  ;;  %13409 = vmatprep.subr.bf16.mxu0 %v18936_v30  ;;  %v18981_v29 = vld [vmem:[%s21611_s26 + $0x22e4] ss:$16 sps:$4 sm:$0xff]   ;;  %v22290_v30 = vpack.c.bf16 %v425_v27, %v425_v27  ;;  %v18994_v27 = vld [vmem:[%s21611_s26 + $0x2080] ss:$16 sps:$4 sm:$0xff]  }
 0x249   : > { %13450 = vmatprep.subr.bf16.mxu1 %v18939_v33  ;;  %v22292_v33 = vpack.c.bf16 %v427_v28, %v427_v28  ;;  %v18997_v28 = vld [vmem:[%s21611_s26 + $0x2280] ss:$16 sps:$4 sm:$0xff]  }
 0x24b   : > { %13410 = vmatpush2.bf16.msra.mxu0 %v18934_v35  ;;  %v430_v35 = vld [vmem:[%s21629_s22 + $0x108] sm:$0xff] }
 0x24c   : > { %13451 = vmatpush2.bf16.msra.mxu1 %v18937_v36  ;;  %13411 = vmatprep.subr.bf16.mxu0 %v18942_v19  ;;  %v432_v36 = vld [vmem:[%s21629_s22 + $0x118] sm:$0xff]  ;;  %v18976_v19 = vld [vmem:[%s21611_s26 + $0x20e0] ss:$16 sps:$4 sm:$0xff]  }
 0x24d   : > { %13452 = vmatprep.subr.bf16.mxu1 %v18945_v37  ;;  %v18979_v37 = vld [vmem:[%s21611_s26 + $0x22e0] ss:$16 sps:$4 sm:$0xff]  }
 0x24f   : > { %13412 = vmatpush2.bf16.msra.mxu0 %v18940_v40  ;;  %v18984_v40 = vld [vmem:[%s21611_s26 + $0x20c4] ss:$16 sps:$4 sm:$0xff]  }
 0x250   : > { %13453 = vmatpush2.bf16.msra.mxu1 %v18943_v41  ;;  %13413 = vmatprep.subr.bf16.mxu0 %v18948_v25  ;;  %v18987_v41 = vld [vmem:[%s21611_s26 + $0x22c4] ss:$16 sps:$4 sm:$0xff]   ;;  %v18982_v25 = vld [vmem:[%s21611_s26 + $0x20c0] ss:$16 sps:$4 sm:$0xff]  }
 0x251   : > { %13454 = vmatprep.subr.bf16.mxu1 %v18951_v43  ;;  %v18985_v43 = vld [vmem:[%s21611_s26 + $0x22c0] ss:$16 sps:$4 sm:$0xff]  }
 0x253   : > { %13414 = vmatpush2.bf16.msra.mxu0 %v18946_v46  ;;  %v22302_v46 = vpack.c.bf16 %v430_v35, %v430_v35  ;;  %v19000_v35 = vld [vmem:[%s21611_s26 + $0x2060] ss:$16 sps:$4 sm:$0xff]  }
 0x254   : > { %13455 = vmatpush2.bf16.msra.mxu1 %v18949_v47  ;;  %13415 = vmatprep.subr.bf16.mxu0 %v18954_v56  ;;  %v22304_v47 = vpack.c.bf16 %v432_v36, %v432_v36  ;;  %v19003_v36 = vld [vmem:[%s21611_s26 + $0x2260] ss:$16 sps:$4 sm:$0xff]  }
 0x255   : > { %13456 = vmatprep.subr.bf16.mxu1 %v18957_v57 }
 0x257   : > { %13416 = vmatpush2.bf16.msra.mxu0 %v18952_v58 }
 0x258   : > { %13457 = vmatpush2.bf16.msra.mxu1 %v18955_v59  ;;  %13417 = vmatprep.subr.bf16.mxu0 %v18960_v60 }
 0x259   : > { %13458 = vmatprep.subr.bf16.mxu1 %v18963_v61  ;;  %v18990_v61 = vld [vmem:[%s21611_s26 + $0x20a4] ss:$16 sps:$4 sm:$0xff]  }
 0x25b   : > { %13418 = vmatpush2.bf16.msra.mxu0 %v18958_v6  ;;  %v18993_v6 = vld [vmem:[%s21611_s26 + $0x22a4] ss:$16 sps:$4 sm:$0xff]  }
 0x25c   : > { %13459 = vmatpush2.bf16.msra.mxu1 %v18961_v7  ;;  %13419 = vmatprep.subr.bf16.mxu0 %v18966_v8 }
 0x25d   : > { %13460 = vmatprep.subr.bf16.mxu1 %v18969_v9  ;;  %v18988_v9 = vld [vmem:[%s21611_s26 + $0x20a0] ss:$16 sps:$4 sm:$0xff]  }
 0x25f   : > { %13420 = vmatpush2.bf16.msra.mxu0 %v18964_v14  ;;  %v18991_v14 = vld [vmem:[%s21611_s26 + $0x22a0] ss:$16 sps:$4 sm:$0xff]  }
 0x260   : > { %13461 = vmatpush2.bf16.msra.mxu1 %v18967_v16  ;;  %13421 = vmatprep.subr.bf16.mxu0 %v18972_v17 }
 0x261   : > { %13462 = vmatprep.subr.bf16.mxu1 %v18975_v18 }
 0x263   : > { %13422 = vmatpush2.bf16.msra.mxu0 %v18970_v15 }
 0x264   : > { %13463 = vmatpush2.bf16.msra.mxu1 %v18973_v26  ;;  %13473 = vmatprep.subr.bf16.mxu0 %v18978_v21  ;;  %v18999_v26 = vld [vmem:[%s21611_s26 + $0x2284] ss:$16 sps:$4 sm:$0xff]  }
 0x265   : > { %13514 = vmatprep.subr.bf16.mxu1 %v18981_v29  ;;  %v19002_v21 = vld [vmem:[%s21611_s26 + $0x2064] ss:$16 sps:$4 sm:$0xff]  }
 0x266   : > { %v13179_v56 = vpop.f32.mrf.mxu0  ;;  %13424 = vmatmul.mubr.bf16.vlgmr.msra.gmra.mxu0 %v22290_v30  ;;  %v19005_v29 = vld [vmem:[%s21611_s26 + $0x2264] ss:$16 sps:$4 sm:$0xff]  }
 0x267   : > { %v13220_v57 = vpop.f32.mrf.mxu1  ;;  %13465 = vmatmul.mubr.bf16.vlgmr.msra.gmra.mxu1 %v22292_v33  ;;  %v13180_v58 = vadd.f32 %v13179_v56, %v22225_v32  ;;  %13474 = vmatpush1.bf16.msra.mxu0 %v18976_v19  ;;  %v19008_v19 = vld [vmem:[%s21611_s26 + $0x2044] ss:$16 sps:$4 sm:$0xff]   ;;  %v19012_v56 = vld [vmem:[%s21611_s26 + $0x2020] ss:$16 sps:$4 sm:$0xff]  }
 0x268   : > { %13515 = vmatpush1.bf16.msra.mxu1 %v18979_v37  ;;  %v13181_v59 = vpop.f32.mrf.mxu0  ;;  %13475 = vmatprep.subr.bf16.mxu0 %v18984_v40  ;;  %v19011_v37 = vld [vmem:[%s21611_s26 + $0x2244] ss:$16 sps:$4 sm:$0xff]   ;;  %v19006_v40 = vld [vmem:[%s21611_s26 + $0x2040] ss:$16 sps:$4 sm:$0xff]  }
 0x269   : > { %v13222_v60 = vpop.f32.mrf.mxu1  ;;  %13516 = vmatprep.subr.bf16.mxu1 %v18987_v41  ;;  %v22311_v7 = vadd.f32 %v13220_v57, %v13180_v58  ;;  %v13182_v8 = vadd.f32 %v13181_v59, %v22232_v38  ;;  %13505 = vmatprep.mubr.bf16.mxu0 %v22302_v46  ;;  %v18996_v38 = vld [vmem:[%s21611_s26 + $0x2084] ss:$16 sps:$4 sm:$0xff]   ;;  %v19009_v41 = vld [vmem:[%s21611_s26 + $0x2240] ss:$16 sps:$4 sm:$0xff]  }
 0x26a   : > { %13546 = vmatprep.mubr.bf16.mxu1 %v22304_v47  ;;  %v13183_v32 = vpop.f32.mrf.mxu0  ;;  %v19015_v57 = vld [vmem:[%s21611_s26 + $0x2220] ss:$16 sps:$4 sm:$0xff]   ;;  %v19020_v58 = vld [vmem:[%s21611_s26 + $0x2004] ss:$16 sps:$4 sm:$0xff]  }
 0x26b   : > { %v13224_v16 = vpop.f32.mrf.mxu1  ;;  %v22318_v17 = vadd.f32 %v13222_v60, %v13182_v8  ;;  %13476 = vmatpush1.bf16.msra.mxu0 %v18982_v25  ;;  %v19014_v25 = vld [vmem:[%s21611_s26 + $0x2024] ss:$16 sps:$4 sm:$0xff]   ;;  %v19018_v60 = vld [vmem:[%s21611_s26 + $0x2000] ss:$16 sps:$4 sm:$0xff]  }
 0x26c   : > { %13517 = vmatpush1.bf16.msra.mxu1 %v18985_v43  ;;  %v13184_v18 = vpop.f32.mrf.mxu0  ;;  %13477 = vmatprep.subr.bf16.mxu0 %v18990_v61  ;;  %v19017_v43 = vld [vmem:[%s21611_s26 + $0x2224] ss:$16 sps:$4 sm:$0xff]   ;;  %v19021_v61 = vld [vmem:[%s21611_s26 + $0x2200] ss:$16 sps:$4 sm:$0xff]  }
 0x26d   : > { %v13225_v15 = vpop.f32.mrf.mxu1  ;;  %13518 = vmatprep.subr.bf16.mxu1 %v18993_v6  ;;  %v19023_v59 = vld [vmem:[%s21611_s26 + $0x2204] ss:$16 sps:$4 sm:$0xff]   ;;  %v19030_v18 = vld [vmem:[%s21611_s26 + $0x21c0] ss:$16 sps:$4 sm:$0xff]  }
 0x26e   : > { %v19026_v6 = vld [vmem:[%s21611_s26 + $0x21e4] ss:$16 sps:$4 sm:$0xff]   ;;  %v19033_v15 = vld [vmem:[%s21611_s26 + $0x23c0] ss:$16 sps:$4 sm:$0xff]  }
 0x26f   : > { %13478 = vmatpush1.bf16.msra.mxu0 %v18988_v9  ;;  %v19029_v8 = vld [vmem:[%s21611_s26 + $0x23e4] ss:$16 sps:$4 sm:$0xff]   ;;  %v19024_v9 = vld [vmem:[%s21611_s26 + $0x21e0] ss:$16 sps:$4 sm:$0xff]  }
 0x270   : > { %13519 = vmatpush1.bf16.msra.mxu1 %v18991_v14  ;;  %13479 = vmatprep.subr.bf16.mxu0 %v18996_v38  ;;  %v19027_v14 = vld [vmem:[%s21611_s26 + $0x23e0] ss:$16 sps:$4 sm:$0xff]   ;;  %v19032_v32 = vld [vmem:[%s21611_s26 + $0x21c4] ss:$16 sps:$4 sm:$0xff]  }
 0x271   : > { %13520 = vmatprep.subr.bf16.mxu1 %v18999_v26  ;;  %v19035_v16 = vld [vmem:[%s21611_s26 + $0x23c4] ss:$16 sps:$4 sm:$0xff]  }
 0x272   : > { %v19038_v38 = vld [vmem:[%s21611_s26 + $0x21a4] ss:$16 sps:$4 sm:$0xff]  }
 0x273   : > { %13480 = vmatpush1.bf16.msra.mxu0 %v18994_v27  ;;  %v19041_v26 = vld [vmem:[%s21611_s26 + $0x23a4] ss:$16 sps:$4 sm:$0xff]   ;;  %v19036_v27 = vld [vmem:[%s21611_s26 + $0x21a0] ss:$16 sps:$4 sm:$0xff]  }
 0x274   : > { %13521 = vmatpush1.bf16.msra.mxu1 %v18997_v28  ;;  %13481 = vmatprep.subr.bf16.mxu0 %v19002_v21  ;;  %v19039_v28 = vld [vmem:[%s21611_s26 + $0x23a0] ss:$16 sps:$4 sm:$0xff]   ;;  %v19044_v21 = vld [vmem:[%s21611_s26 + $0x2184] ss:$16 sps:$4 sm:$0xff]  }
 0x275   : > { %13522 = vmatprep.subr.bf16.mxu1 %v19005_v29  ;;  %v19047_v29 = vld [vmem:[%s21611_s26 + $0x2384] ss:$16 sps:$4 sm:$0xff]  }
 0x277   : > { %13482 = vmatpush1.bf16.msra.mxu0 %v19000_v35  ;;  %v19042_v35 = vld [vmem:[%s21611_s26 + $0x2180] ss:$16 sps:$4 sm:$0xff]  }
 0x278   : > { %13523 = vmatpush1.bf16.msra.mxu1 %v19003_v36  ;;  %13483 = vmatprep.subr.bf16.mxu0 %v19008_v19  ;;  %v19045_v36 = vld [vmem:[%s21611_s26 + $0x2380] ss:$16 sps:$4 sm:$0xff]   ;;  %v19050_v19 = vld [vmem:[%s21611_s26 + $0x2164] ss:$16 sps:$4 sm:$0xff]  }
 0x279   : > { %13524 = vmatprep.subr.bf16.mxu1 %v19011_v37  ;;  %v19053_v37 = vld [vmem:[%s21611_s26 + $0x2364] ss:$16 sps:$4 sm:$0xff]  }
 0x27b   : > { %13484 = vmatpush1.bf16.msra.mxu0 %v19006_v40  ;;  %v19048_v40 = vld [vmem:[%s21611_s26 + $0x2160] ss:$16 sps:$4 sm:$0xff]  }
 0x27c   : > { %13525 = vmatpush1.bf16.msra.mxu1 %v19009_v41  ;;  %13485 = vmatprep.subr.bf16.mxu0 %v19014_v25  ;;  %v19051_v41 = vld [vmem:[%s21611_s26 + $0x2360] ss:$16 sps:$4 sm:$0xff]   ;;  %v19056_v25 = vld [vmem:[%s21611_s26 + $0x2144] ss:$16 sps:$4 sm:$0xff]  }
 0x27d   : > { %13526 = vmatprep.subr.bf16.mxu1 %v19017_v43  ;;  %v19059_v43 = vld [vmem:[%s21611_s26 + $0x2344] ss:$16 sps:$4 sm:$0xff]  }
 0x27f   : > { %13486 = vmatpush1.bf16.msra.mxu0 %v19012_v56  ;;  %v19054_v56 = vld [vmem:[%s21611_s26 + $0x2140] ss:$16 sps:$4 sm:$0xff]  }
 0x280   : > { %13527 = vmatpush1.bf16.msra.mxu1 %v19015_v57  ;;  %13487 = vmatprep.subr.bf16.mxu0 %v19020_v58  ;;  %v19057_v57 = vld [vmem:[%s21611_s26 + $0x2340] ss:$16 sps:$4 sm:$0xff]   ;;  %v19062_v58 = vld [vmem:[%s21611_s26 + $0x2124] ss:$16 sps:$4 sm:$0xff]  }
 0x281   : > { %13528 = vmatprep.subr.bf16.mxu1 %v19023_v59  ;;  %v19065_v59 = vld [vmem:[%s21611_s26 + $0x2324] ss:$16 sps:$4 sm:$0xff]  }
 0x283   : > { %13488 = vmatpush1.bf16.msra.mxu0 %v19018_v60  ;;  %v19060_v60 = vld [vmem:[%s21611_s26 + $0x2120] ss:$16 sps:$4 sm:$0xff]  }
 0x284   : > { %13529 = vmatpush1.bf16.msra.mxu1 %v19021_v61  ;;  %13489 = vmatprep.subr.bf16.mxu0 %v19026_v6  ;;  %v19063_v61 = vld [vmem:[%s21611_s26 + $0x2320] ss:$16 sps:$4 sm:$0xff]   ;;  %v19068_v6 = vld [vmem:[%s21611_s26 + $0x2104] ss:$16 sps:$4 sm:$0xff]  }
 0x285   : > { %13530 = vmatprep.subr.bf16.mxu1 %v19029_v8  ;;  %v19071_v8 = vld [vmem:[%s21611_s26 + $0x2304] ss:$16 sps:$4 sm:$0xff]  }
 0x287   : > { %13490 = vmatpush2.bf16.msra.mxu0 %v19024_v9  ;;  %v19066_v9 = vld [vmem:[%s21611_s26 + $0x2100] ss:$16 sps:$4 sm:$0xff]  }
 0x288   : > { %13531 = vmatpush2.bf16.msra.mxu1 %v19027_v14  ;;  %13491 = vmatprep.subr.bf16.mxu0 %v19032_v32  ;;  %v19069_v14 = vld [vmem:[%s21611_s26 + $0x2300] ss:$16 sps:$4 sm:$0xff]  }
 0x289   : > { %13532 = vmatprep.subr.bf16.mxu1 %v19035_v16  ;;  %v429_v32 = vld [vmem:[%s21629_s22 + $0x100] sm:$0xff]  ;;  %v431_v16 = vld [vmem:[%s21629_s22 + $0x110] sm:$0xff] }
 0x28b   : > { %13492 = vmatpush2.bf16.msra.mxu0 %v19030_v18  ;;  %v19074_v18 = vld [vmem:[%s21611_s26 + $0x24e4] ss:$16 sps:$4 sm:$0xff]  }
 0x28c   : > { %13533 = vmatpush2.bf16.msra.mxu1 %v19033_v15  ;;  %13493 = vmatprep.subr.bf16.mxu0 %v19038_v38  ;;  %v19077_v15 = vld [vmem:[%s21611_s26 + $0x26e4] ss:$16 sps:$4 sm:$0xff]   ;;  %v22376_v38 = vpack.c.bf16 %v429_v32, %v429_v32 }
 0x28d   : > { %13534 = vmatprep.subr.bf16.mxu1 %v19041_v26  ;;  %v22378_v26 = vpack.c.bf16 %v431_v16, %v431_v16 }
 0x28f   : > { %13494 = vmatpush2.bf16.msra.mxu0 %v19036_v27  ;;  %v434_v27 = vld [vmem:[%s21629_s22 + $0x128] sm:$0xff] }
 0x290   : > { %13535 = vmatpush2.bf16.msra.mxu1 %v19039_v28  ;;  %13495 = vmatprep.subr.bf16.mxu0 %v19044_v21  ;;  %v436_v28 = vld [vmem:[%s21629_s22 + $0x138] sm:$0xff]  ;;  %v19072_v21 = vld [vmem:[%s21611_s26 + $0x24e0] ss:$16 sps:$4 sm:$0xff]  }
 0x291   : > { %13536 = vmatprep.subr.bf16.mxu1 %v19047_v29  ;;  %v19075_v29 = vld [vmem:[%s21611_s26 + $0x26e0] ss:$16 sps:$4 sm:$0xff]  }
 0x293   : > { %13496 = vmatpush2.bf16.msra.mxu0 %v19042_v35  ;;  %v19080_v35 = vld [vmem:[%s21611_s26 + $0x24c4] ss:$16 sps:$4 sm:$0xff]  }
 0x294   : > { %13537 = vmatpush2.bf16.msra.mxu1 %v19045_v36  ;;  %13497 = vmatprep.subr.bf16.mxu0 %v19050_v19  ;;  %v19083_v36 = vld [vmem:[%s21611_s26 + $0x26c4] ss:$16 sps:$4 sm:$0xff]   ;;  %v19078_v19 = vld [vmem:[%s21611_s26 + $0x24c0] ss:$16 sps:$4 sm:$0xff]  }
 0x295   : > { %13538 = vmatprep.subr.bf16.mxu1 %v19053_v37  ;;  %v19081_v37 = vld [vmem:[%s21611_s26 + $0x26c0] ss:$16 sps:$4 sm:$0xff]  }
 0x297   : > { %13498 = vmatpush2.bf16.msra.mxu0 %v19048_v40  ;;  %v22388_v40 = vpack.c.bf16 %v434_v27, %v434_v27  ;;  %v19090_v27 = vld [vmem:[%s21611_s26 + $0x2480] ss:$16 sps:$4 sm:$0xff]  }
 0x298   : > { %13539 = vmatpush2.bf16.msra.mxu1 %v19051_v41  ;;  %13499 = vmatprep.subr.bf16.mxu0 %v19056_v25  ;;  %v22390_v41 = vpack.c.bf16 %v436_v28, %v436_v28  ;;  %v19093_v28 = vld [vmem:[%s21611_s26 + $0x2680] ss:$16 sps:$4 sm:$0xff]  }
 0x299   : > { %13540 = vmatprep.subr.bf16.mxu1 %v19059_v43 }
 0x29b   : > { %13500 = vmatpush2.bf16.msra.mxu0 %v19054_v56 }
 0x29c   : > { %13541 = vmatpush2.bf16.msra.mxu1 %v19057_v57  ;;  %13501 = vmatprep.subr.bf16.mxu0 %v19062_v58 }
 0x29d   : > { %13542 = vmatprep.subr.bf16.mxu1 %v19065_v59  ;;  %v19086_v59 = vld [vmem:[%s21611_s26 + $0x24a4] ss:$16 sps:$4 sm:$0xff]  }
 0x29f   : > { %13502 = vmatpush2.bf16.msra.mxu0 %v19060_v60  ;;  %v19089_v60 = vld [vmem:[%s21611_s26 + $0x26a4] ss:$16 sps:$4 sm:$0xff]  }
 0x2a0   : > { %13543 = vmatpush2.bf16.msra.mxu1 %v19063_v61  ;;  %13503 = vmatprep.subr.bf16.mxu0 %v19068_v6 }
 0x2a1   : > { %13544 = vmatprep.subr.bf16.mxu1 %v19071_v8  ;;  %v19084_v8 = vld [vmem:[%s21611_s26 + $0x24a0] ss:$16 sps:$4 sm:$0xff]  }
 0x2a3   : > { %13504 = vmatpush2.bf16.msra.mxu0 %v19066_v9  ;;  %v19087_v9 = vld [vmem:[%s21611_s26 + $0x26a0] ss:$16 sps:$4 sm:$0xff]  }
 0x2a4   : > { %13545 = vmatpush2.bf16.msra.mxu1 %v19069_v14  ;;  %13555 = vmatprep.subr.bf16.mxu0 %v19074_v18 }
 0x2a5   : > { %13596 = vmatprep.subr.bf16.mxu1 %v19077_v15  ;;  %v19095_v15 = vld [vmem:[%s21611_s26 + $0x2684] ss:$16 sps:$4 sm:$0xff]  }
 0x2a6   : > { %v13261_v25 = vpop.f32.mrf.mxu0  ;;  %13506 = vmatmul.mubr.bf16.vlgmr.msra.gmra.mxu0 %v22376_v38 }
 0x2a7   : > { %v13302_v43 = vpop.f32.mrf.mxu1  ;;  %13547 = vmatmul.mubr.bf16.vlgmr.msra.gmra.mxu1 %v22378_v26  ;;  %v13262_v56 = vadd.f32 %v13261_v25, %v22311_v7  ;;  %13556 = vmatpush1.bf16.msra.mxu0 %v19072_v21  ;;  %v19098_v21 = vld [vmem:[%s21611_s26 + $0x2464] ss:$16 sps:$4 sm:$0xff]   ;;  %v19102_v25 = vld [vmem:[%s21611_s26 + $0x2440] ss:$16 sps:$4 sm:$0xff]  }
 0x2a8   : > { %13597 = vmatpush1.bf16.msra.mxu1 %v19075_v29  ;;  %v13263_v57 = vpop.f32.mrf.mxu0  ;;  %13557 = vmatprep.subr.bf16.mxu0 %v19080_v35  ;;  %v19101_v29 = vld [vmem:[%s21611_s26 + $0x2664] ss:$16 sps:$4 sm:$0xff]   ;;  %v19096_v35 = vld [vmem:[%s21611_s26 + $0x2460] ss:$16 sps:$4 sm:$0xff]  }
 0x2a9   : > { %v13304_v58 = vpop.f32.mrf.mxu1  ;;  %13598 = vmatprep.subr.bf16.mxu1 %v19083_v36  ;;  %v22397_v61 = vadd.f32 %v13302_v43, %v13262_v56  ;;  %v13264_v6 = vadd.f32 %v13263_v57, %v22318_v17  ;;  %13587 = vmatprep.mubr.bf16.mxu0 %v22388_v40  ;;  %v19092_v17 = vld [vmem:[%s21611_s26 + $0x2484] ss:$16 sps:$4 sm:$0xff]   ;;  %v19099_v36 = vld [vmem:[%s21611_s26 + $0x2660] ss:$16 sps:$4 sm:$0xff]  }
 0x2aa   : > { %13628 = vmatprep.mubr.bf16.mxu1 %v22390_v41  ;;  %v13265_v7 = vpop.f32.mrf.mxu0  ;;  %v19105_v43 = vld [vmem:[%s21611_s26 + $0x2640] ss:$16 sps:$4 sm:$0xff]   ;;  %v19110_v56 = vld [vmem:[%s21611_s26 + $0x2424] ss:$16 sps:$4 sm:$0xff]  }
 0x2ab   : > { %v13306_v14 = vpop.f32.mrf.mxu1  ;;  %v22404_v32 = vadd.f32 %v13304_v58, %v13264_v6  ;;  %13558 = vmatpush1.bf16.msra.mxu0 %v19078_v19  ;;  %v19104_v19 = vld [vmem:[%s21611_s26 + $0x2444] ss:$16 sps:$4 sm:$0xff]   ;;  %v19108_v58 = vld [vmem:[%s21611_s26 + $0x2420] ss:$16 sps:$4 sm:$0xff]  }
 0x2ac   : > { %13599 = vmatpush1.bf16.msra.mxu1 %v19081_v37  ;;  %v13266_v16 = vpop.f32.mrf.mxu0  ;;  %13559 = vmatprep.subr.bf16.mxu0 %v19086_v59  ;;  %v19107_v37 = vld [vmem:[%s21611_s26 + $0x2644] ss:$16 sps:$4 sm:$0xff]   ;;  %v19111_v59 = vld [vmem:[%s21611_s26 + $0x2620] ss:$16 sps:$4 sm:$0xff]  }
 0x2ad   : > { %v13307_v18 = vpop.f32.mrf.mxu1  ;;  %13600 = vmatprep.subr.bf16.mxu1 %v19089_v60  ;;  %v19113_v57 = vld [vmem:[%s21611_s26 + $0x2624] ss:$16 sps:$4 sm:$0xff]   ;;  %v19120_v16 = vld [vmem:[%s21611_s26 + $0x25e0] ss:$16 sps:$4 sm:$0xff]  }
 0x2ae   : > { %v19116_v60 = vld [vmem:[%s21611_s26 + $0x2404] ss:$16 sps:$4 sm:$0xff]   ;;  %v19123_v18 = vld [vmem:[%s21611_s26 + $0x27e0] ss:$16 sps:$4 sm:$0xff]  }
 0x2af   : > { %13560 = vmatpush1.bf16.msra.mxu0 %v19084_v8  ;;  %v19119_v6 = vld [vmem:[%s21611_s26 + $0x2604] ss:$16 sps:$4 sm:$0xff]   ;;  %v19114_v8 = vld [vmem:[%s21611_s26 + $0x2400] ss:$16 sps:$4 sm:$0xff]  }
 0x2b0   : > { %13601 = vmatpush1.bf16.msra.mxu1 %v19087_v9  ;;  %13561 = vmatprep.subr.bf16.mxu0 %v19092_v17  ;;  %v19117_v9 = vld [vmem:[%s21611_s26 + $0x2600] ss:$16 sps:$4 sm:$0xff]   ;;  %v19122_v7 = vld [vmem:[%s21611_s26 + $0x25e4] ss:$16 sps:$4 sm:$0xff]  }
 0x2b1   : > { %13602 = vmatprep.subr.bf16.mxu1 %v19095_v15  ;;  %v19125_v14 = vld [vmem:[%s21611_s26 + $0x27e4] ss:$16 sps:$4 sm:$0xff]  }
 0x2b2   : > { %v19128_v17 = vld [vmem:[%s21611_s26 + $0x25c4] ss:$16 sps:$4 sm:$0xff]  }
 0x2b3   : > { %13562 = vmatpush1.bf16.msra.mxu0 %v19090_v27  ;;  %v19131_v15 = vld [vmem:[%s21611_s26 + $0x27c4] ss:$16 sps:$4 sm:$0xff]   ;;  %v19126_v27 = vld [vmem:[%s21611_s26 + $0x25c0] ss:$16 sps:$4 sm:$0xff]  }
 0x2b4   : > { %13603 = vmatpush1.bf16.msra.mxu1 %v19093_v28  ;;  %13563 = vmatprep.subr.bf16.mxu0 %v19098_v21  ;;  %v19129_v28 = vld [vmem:[%s21611_s26 + $0x27c0] ss:$16 sps:$4 sm:$0xff]   ;;  %v19134_v21 = vld [vmem:[%s21611_s26 + $0x25a4] ss:$16 sps:$4 sm:$0xff]  }
 0x2b5   : > { %13604 = vmatprep.subr.bf16.mxu1 %v19101_v29  ;;  %v19137_v29 = vld [vmem:[%s21611_s26 + $0x27a4] ss:$16 sps:$4 sm:$0xff]  }
 0x2b7   : > { %13564 = vmatpush1.bf16.msra.mxu0 %v19096_v35  ;;  %v19132_v35 = vld [vmem:[%s21611_s26 + $0x25a0] ss:$16 sps:$4 sm:$0xff]  }
 0x2b8   : > { %13605 = vmatpush1.bf16.msra.mxu1 %v19099_v36  ;;  %13565 = vmatprep.subr.bf16.mxu0 %v19104_v19  ;;  %v19135_v36 = vld [vmem:[%s21611_s26 + $0x27a0] ss:$16 sps:$4 sm:$0xff]   ;;  %v19140_v19 = vld [vmem:[%s21611_s26 + $0x2584] ss:$16 sps:$4 sm:$0xff]  }
 0x2b9   : > { %13606 = vmatprep.subr.bf16.mxu1 %v19107_v37  ;;  %v19143_v37 = vld [vmem:[%s21611_s26 + $0x2784] ss:$16 sps:$4 sm:$0xff]  }
 0x2bb   : > { %13566 = vmatpush1.bf16.msra.mxu0 %v19102_v25  ;;  %v19138_v25 = vld [vmem:[%s21611_s26 + $0x2580] ss:$16 sps:$4 sm:$0xff]  }
 0x2bc   : > { %13607 = vmatpush1.bf16.msra.mxu1 %v19105_v43  ;;  %13567 = vmatprep.subr.bf16.mxu0 %v19110_v56  ;;  %v19141_v43 = vld [vmem:[%s21611_s26 + $0x2780] ss:$16 sps:$4 sm:$0xff]   ;;  %v19146_v56 = vld [vmem:[%s21611_s26 + $0x2564] ss:$16 sps:$4 sm:$0xff]  }
 0x2bd   : > { %13608 = vmatprep.subr.bf16.mxu1 %v19113_v57  ;;  %v19149_v57 = vld [vmem:[%s21611_s26 + $0x2764] ss:$16 sps:$4 sm:$0xff]  }
 0x2bf   : > { %13568 = vmatpush1.bf16.msra.mxu0 %v19108_v58  ;;  %v19144_v58 = vld [vmem:[%s21611_s26 + $0x2560] ss:$16 sps:$4 sm:$0xff]  }
 0x2c0   : > { %13609 = vmatpush1.bf16.msra.mxu1 %v19111_v59  ;;  %13569 = vmatprep.subr.bf16.mxu0 %v19116_v60  ;;  %v19147_v59 = vld [vmem:[%s21611_s26 + $0x2760] ss:$16 sps:$4 sm:$0xff]   ;;  %v19152_v60 = vld [vmem:[%s21611_s26 + $0x2544] ss:$16 sps:$4 sm:$0xff]  }
 0x2c1   : > { %13610 = vmatprep.subr.bf16.mxu1 %v19119_v6  ;;  %v19155_v6 = vld [vmem:[%s21611_s26 + $0x2744] ss:$16 sps:$4 sm:$0xff]  }
 0x2c3   : > { %13570 = vmatpush1.bf16.msra.mxu0 %v19114_v8  ;;  %v19150_v8 = vld [vmem:[%s21611_s26 + $0x2540] ss:$16 sps:$4 sm:$0xff]  }
 0x2c4   : > { %13611 = vmatpush1.bf16.msra.mxu1 %v19117_v9  ;;  %13571 = vmatprep.subr.bf16.mxu0 %v19122_v7  ;;  %v19153_v9 = vld [vmem:[%s21611_s26 + $0x2740] ss:$16 sps:$4 sm:$0xff]   ;;  %v19158_v7 = vld [vmem:[%s21611_s26 + $0x2524] ss:$16 sps:$4 sm:$0xff]  }
 0x2c5   : > { %13612 = vmatprep.subr.bf16.mxu1 %v19125_v14  ;;  %v19161_v14 = vld [vmem:[%s21611_s26 + $0x2724] ss:$16 sps:$4 sm:$0xff]  }
 0x2c7   : > { %13572 = vmatpush2.bf16.msra.mxu0 %v19120_v16  ;;  %v19156_v16 = vld [vmem:[%s21611_s26 + $0x2520] ss:$16 sps:$4 sm:$0xff]  }
 0x2c8   : > { %13613 = vmatpush2.bf16.msra.mxu1 %v19123_v18  ;;  %13573 = vmatprep.subr.bf16.mxu0 %v19128_v17  ;;  %v19159_v18 = vld [vmem:[%s21611_s26 + $0x2720] ss:$16 sps:$4 sm:$0xff]   ;;  %v19164_v17 = vld [vmem:[%s21611_s26 + $0x2504] ss:$16 sps:$4 sm:$0xff]  }
 0x2c9   : > { %13614 = vmatprep.subr.bf16.mxu1 %v19131_v15  ;;  %v19167_v15 = vld [vmem:[%s21611_s26 + $0x2704] ss:$16 sps:$4 sm:$0xff]  }
 0x2cb   : > { %13574 = vmatpush2.bf16.msra.mxu0 %v19126_v27  ;;  %v19162_v27 = vld [vmem:[%s21611_s26 + $0x2500] ss:$16 sps:$4 sm:$0xff]  }
 0x2cc   : > { %13615 = vmatpush2.bf16.msra.mxu1 %v19129_v28  ;;  %13575 = vmatprep.subr.bf16.mxu0 %v19134_v21  ;;  %v19165_v28 = vld [vmem:[%s21611_s26 + $0x2700] ss:$16 sps:$4 sm:$0xff]  }
 0x2cd   : > { %13616 = vmatprep.subr.bf16.mxu1 %v19137_v29  ;;  %v433_v21 = vld [vmem:[%s21629_s22 + $0x120] sm:$0xff]  ;;  %v435_v29 = vld [vmem:[%s21629_s22 + $0x130] sm:$0xff] }
 0x2cf   : > { %13576 = vmatpush2.bf16.msra.mxu0 %v19132_v35  ;;  %v19170_v35 = vld [vmem:[%s21611_s26 + $0x28e4] ss:$16 sps:$4 sm:$0xff]  }
 0x2d0   : > { %13617 = vmatpush2.bf16.msra.mxu1 %v19135_v36  ;;  %13577 = vmatprep.subr.bf16.mxu0 %v19140_v19  ;;  %v19173_v36 = vld [vmem:[%s21611_s26 + $0x2ae4] ss:$16 sps:$4 sm:$0xff]   ;;  %v22462_v19 = vpack.c.bf16 %v433_v21, %v433_v21 }
 0x2d1   : > { %13618 = vmatprep.subr.bf16.mxu1 %v19143_v37  ;;  %v22464_v37 = vpack.c.bf16 %v435_v29, %v435_v29  ;;  %v19180_v29 = vld [vmem:[%s21611_s26 + $0x28a0] ss:$16 sps:$4 sm:$0xff]  }
 0x2d3   : > { %13578 = vmatpush2.bf16.msra.mxu0 %v19138_v25  ;;  %v438_v25 = vld [vmem:[%s21629_s22 + $0x148] sm:$0xff] }
 0x2d4   : > { %13619 = vmatpush2.bf16.msra.mxu1 %v19141_v43  ;;  %13579 = vmatprep.subr.bf16.mxu0 %v19146_v56  ;;  %v440_v43 = vld [vmem:[%s21629_s22 + $0x158] sm:$0xff]  ;;  %v19168_v56 = vld [vmem:[%s21611_s26 + $0x28e0] ss:$16 sps:$4 sm:$0xff]  }
 0x2d5   : > { %13620 = vmatprep.subr.bf16.mxu1 %v19149_v57  ;;  %v19171_v57 = vld [vmem:[%s21611_s26 + $0x2ae0] ss:$16 sps:$4 sm:$0xff]  }
 0x2d7   : > { %13580 = vmatpush2.bf16.msra.mxu0 %v19144_v58  ;;  %v19176_v58 = vld [vmem:[%s21611_s26 + $0x28c4] ss:$16 sps:$4 sm:$0xff]  }
 0x2d8   : > { %13621 = vmatpush2.bf16.msra.mxu1 %v19147_v59  ;;  %13581 = vmatprep.subr.bf16.mxu0 %v19152_v60  ;;  %v19179_v59 = vld [vmem:[%s21611_s26 + $0x2ac4] ss:$16 sps:$4 sm:$0xff]   ;;  %v19174_v60 = vld [vmem:[%s21611_s26 + $0x28c0] ss:$16 sps:$4 sm:$0xff]  }
 0x2d9   : > { %13622 = vmatprep.subr.bf16.mxu1 %v19155_v6  ;;  %v19177_v6 = vld [vmem:[%s21611_s26 + $0x2ac0] ss:$16 sps:$4 sm:$0xff]  }
 0x2db   : > { %13582 = vmatpush2.bf16.msra.mxu0 %v19150_v8  ;;  %v22474_v8 = vpack.c.bf16 %v438_v25, %v438_v25 }
 0x2dc   : > { %13623 = vmatpush2.bf16.msra.mxu1 %v19153_v9  ;;  %13583 = vmatprep.subr.bf16.mxu0 %v19158_v7  ;;  %v22476_v9 = vpack.c.bf16 %v440_v43, %v440_v43 }
 0x2dd   : > { %13624 = vmatprep.subr.bf16.mxu1 %v19161_v14 }
 0x2df   : > { %13584 = vmatpush2.bf16.msra.mxu0 %v19156_v16 }
 0x2e0   : > { %13625 = vmatpush2.bf16.msra.mxu1 %v19159_v18  ;;  %13585 = vmatprep.subr.bf16.mxu0 %v19164_v17 }
 0x2e1   : > { %13626 = vmatprep.subr.bf16.mxu1 %v19167_v15  ;;  %v19182_v15 = vld [vmem:[%s21611_s26 + $0x28a4] ss:$16 sps:$4 sm:$0xff]  }
 0x2e3   : > { %13586 = vmatpush2.bf16.msra.mxu0 %v19162_v27  ;;  %v19185_v27 = vld [vmem:[%s21611_s26 + $0x2aa4] ss:$16 sps:$4 sm:$0xff]  }
 0x2e4   : > { %13627 = vmatpush2.bf16.msra.mxu1 %v19165_v28  ;;  %13637 = vmatprep.subr.bf16.mxu0 %v19170_v35  ;;  %v19183_v35 = vld [vmem:[%s21611_s26 + $0x2aa0] ss:$16 sps:$4 sm:$0xff]  }
 0x2e5   : > { %13678 = vmatprep.subr.bf16.mxu1 %v19173_v36 }
 0x2e6   : > { %v13343_v7 = vpop.f32.mrf.mxu0  ;;  %13588 = vmatmul.mubr.bf16.vlgmr.msra.gmra.mxu0 %v22462_v19 }
 0x2e7   : > { %v13384_v14 = vpop.f32.mrf.mxu1  ;;  %13629 = vmatmul.mubr.bf16.vlgmr.msra.gmra.mxu1 %v22464_v37  ;;  %v13344_v16 = vadd.f32 %v13343_v7, %v22397_v61  ;;  %13638 = vmatpush1.bf16.msra.mxu0 %v19168_v56  ;;  %v19192_v7 = vld [vmem:[%s21611_s26 + $0x2860] ss:$16 sps:$4 sm:$0xff]  }
 0x2e8   : > { %13679 = vmatpush1.bf16.msra.mxu1 %v19171_v57  ;;  %v13345_v18 = vpop.f32.mrf.mxu0  ;;  %13639 = vmatprep.subr.bf16.mxu0 %v19176_v58  ;;  %v19191_v57 = vld [vmem:[%s21611_s26 + $0x2a84] ss:$16 sps:$4 sm:$0xff]   ;;  %v19186_v58 = vld [vmem:[%s21611_s26 + $0x2880] ss:$16 sps:$4 sm:$0xff]  }
 0x2e9   : > { %v13386_v17 = vpop.f32.mrf.mxu1  ;;  %13680 = vmatprep.subr.bf16.mxu1 %v19179_v59  ;;  %v22483_v28 = vadd.f32 %v13384_v14, %v13344_v16  ;;  %v13346_v21 = vadd.f32 %v13345_v18, %v22404_v32  ;;  %13669 = vmatprep.mubr.bf16.mxu0 %v22474_v8  ;;  %v19188_v32 = vld [vmem:[%s21611_s26 + $0x2884] ss:$16 sps:$4 sm:$0xff]   ;;  %v19189_v59 = vld [vmem:[%s21611_s26 + $0x2a80] ss:$16 sps:$4 sm:$0xff]  }
 0x2ea   : > { %13710 = vmatprep.mubr.bf16.mxu1 %v22476_v9  ;;  %v13347_v61 = vpop.f32.mrf.mxu0  ;;  %v19195_v14 = vld [vmem:[%s21611_s26 + $0x2a60] ss:$16 sps:$4 sm:$0xff]   ;;  %v19200_v16 = vld [vmem:[%s21611_s26 + $0x2844] ss:$16 sps:$4 sm:$0xff]  }
 0x2eb   : > { %v13388_v36 = vpop.f32.mrf.mxu1  ;;  %v22490_v25 = vadd.f32 %v13386_v17, %v13346_v21  ;;  %13640 = vmatpush1.bf16.msra.mxu0 %v19174_v60  ;;  %v19194_v60 = vld [vmem:[%s21611_s26 + $0x2864] ss:$16 sps:$4 sm:$0xff]   ;;  %v19198_v17 = vld [vmem:[%s21611_s26 + $0x2840] ss:$16 sps:$4 sm:$0xff]  }
 0x2ec   : > { %13681 = vmatpush1.bf16.msra.mxu1 %v19177_v6  ;;  %v13348_v43 = vpop.f32.mrf.mxu0  ;;  %13641 = vmatprep.subr.bf16.mxu0 %v19182_v15  ;;  %v19197_v6 = vld [vmem:[%s21611_s26 + $0x2a64] ss:$16 sps:$4 sm:$0xff]   ;;  %v19201_v15 = vld [vmem:[%s21611_s26 + $0x2a40] ss:$16 sps:$4 sm:$0xff]  }
 0x2ed   : > { %v13389_v56 = vpop.f32.mrf.mxu1  ;;  %13682 = vmatprep.subr.bf16.mxu1 %v19185_v27  ;;  %v19203_v18 = vld [vmem:[%s21611_s26 + $0x2a44] ss:$16 sps:$4 sm:$0xff]   ;;  %v19210_v43 = vld [vmem:[%s21611_s26 + $0x2800] ss:$16 sps:$4 sm:$0xff]  }
 0x2ee   : > { %v19206_v27 = vld [vmem:[%s21611_s26 + $0x2824] ss:$16 sps:$4 sm:$0xff]   ;;  %v19213_v56 = vld [vmem:[%s21611_s26 + $0x2a00] ss:$16 sps:$4 sm:$0xff]  }
 0x2ef   : > { %13642 = vmatpush1.bf16.msra.mxu0 %v19180_v29  ;;  %v19209_v21 = vld [vmem:[%s21611_s26 + $0x2a24] ss:$16 sps:$4 sm:$0xff]   ;;  %v19204_v29 = vld [vmem:[%s21611_s26 + $0x2820] ss:$16 sps:$4 sm:$0xff]  }
 0x2f0   : > { %13683 = vmatpush1.bf16.msra.mxu1 %v19183_v35  ;;  %13643 = vmatprep.subr.bf16.mxu0 %v19188_v32  ;;  %v19207_v35 = vld [vmem:[%s21611_s26 + $0x2a20] ss:$16 sps:$4 sm:$0xff]   ;;  %v19212_v61 = vld [vmem:[%s21611_s26 + $0x2804] ss:$16 sps:$4 sm:$0xff]  }
 0x2f1   : > { %13684 = vmatprep.subr.bf16.mxu1 %v19191_v57  ;;  %v19215_v36 = vld [vmem:[%s21611_s26 + $0x2a04] ss:$16 sps:$4 sm:$0xff]  }
 0x2f2   : > { %v19218_v32 = vld [vmem:[%s21611_s26 + $0x29e4] ss:$16 sps:$4 sm:$0xff]  }
 0x2f3   : > { %13644 = vmatpush1.bf16.msra.mxu0 %v19186_v58  ;;  %v19221_v57 = vld [vmem:[%s21611_s26 + $0x2be4] ss:$16 sps:$4 sm:$0xff]   ;;  %v19216_v58 = vld [vmem:[%s21611_s26 + $0x29e0] ss:$16 sps:$4 sm:$0xff]  }
 0x2f4   : > { %13685 = vmatpush1.bf16.msra.mxu1 %v19189_v59  ;;  %13645 = vmatprep.subr.bf16.mxu0 %v19194_v60  ;;  %v19219_v59 = vld [vmem:[%s21611_s26 + $0x2be0] ss:$16 sps:$4 sm:$0xff]   ;;  %v19224_v60 = vld [vmem:[%s21611_s26 + $0x29c4] ss:$16 sps:$4 sm:$0xff]  }
 0x2f5   : > { %13686 = vmatprep.subr.bf16.mxu1 %v19197_v6  ;;  %v19227_v6 = vld [vmem:[%s21611_s26 + $0x2bc4] ss:$16 sps:$4 sm:$0xff]  }
 0x2f7   : > { %13646 = vmatpush1.bf16.msra.mxu0 %v19192_v7  ;;  %v19222_v7 = vld [vmem:[%s21611_s26 + $0x29c0] ss:$16 sps:$4 sm:$0xff]  }
 0x2f8   : > { %13687 = vmatpush1.bf16.msra.mxu1 %v19195_v14  ;;  %13647 = vmatprep.subr.bf16.mxu0 %v19200_v16  ;;  %v19225_v14 = vld [vmem:[%s21611_s26 + $0x2bc0] ss:$16 sps:$4 sm:$0xff]   ;;  %v19230_v16 = vld [vmem:[%s21611_s26 + $0x29a4] ss:$16 sps:$4 sm:$0xff]  }
 0x2f9   : > { %13688 = vmatprep.subr.bf16.mxu1 %v19203_v18  ;;  %v19233_v18 = vld [vmem:[%s21611_s26 + $0x2ba4] ss:$16 sps:$4 sm:$0xff]  }
 0x2fb   : > { %13648 = vmatpush1.bf16.msra.mxu0 %v19198_v17  ;;  %v19228_v17 = vld [vmem:[%s21611_s26 + $0x29a0] ss:$16 sps:$4 sm:$0xff]  }
 0x2fc   : > { %13689 = vmatpush1.bf16.msra.mxu1 %v19201_v15  ;;  %13649 = vmatprep.subr.bf16.mxu0 %v19206_v27  ;;  %v19231_v15 = vld [vmem:[%s21611_s26 + $0x2ba0] ss:$16 sps:$4 sm:$0xff]   ;;  %v19236_v27 = vld [vmem:[%s21611_s26 + $0x2984] ss:$16 sps:$4 sm:$0xff]  }
 0x2fd   : > { %13690 = vmatprep.subr.bf16.mxu1 %v19209_v21  ;;  %v19239_v21 = vld [vmem:[%s21611_s26 + $0x2b84] ss:$16 sps:$4 sm:$0xff]  }
 0x2ff   : > { %13650 = vmatpush1.bf16.msra.mxu0 %v19204_v29  ;;  %v19234_v29 = vld [vmem:[%s21611_s26 + $0x2980] ss:$16 sps:$4 sm:$0xff]  }
 0x300   : > { %13691 = vmatpush1.bf16.msra.mxu1 %v19207_v35  ;;  %13651 = vmatprep.subr.bf16.mxu0 %v19212_v61  ;;  %v19237_v35 = vld [vmem:[%s21611_s26 + $0x2b80] ss:$16 sps:$4 sm:$0xff]   ;;  %v19242_v61 = vld [vmem:[%s21611_s26 + $0x2964] ss:$16 sps:$4 sm:$0xff]  }
 0x301   : > { %13692 = vmatprep.subr.bf16.mxu1 %v19215_v36  ;;  %v19245_v36 = vld [vmem:[%s21611_s26 + $0x2b64] ss:$16 sps:$4 sm:$0xff]  }
 0x303   : > { %13652 = vmatpush1.bf16.msra.mxu0 %v19210_v43  ;;  %v19240_v43 = vld [vmem:[%s21611_s26 + $0x2960] ss:$16 sps:$4 sm:$0xff]  }
 0x304   : > { %13693 = vmatpush1.bf16.msra.mxu1 %v19213_v56  ;;  %13653 = vmatprep.subr.bf16.mxu0 %v19218_v32  ;;  %v19243_v56 = vld [vmem:[%s21611_s26 + $0x2b60] ss:$16 sps:$4 sm:$0xff]   ;;  %v19248_v32 = vld [vmem:[%s21611_s26 + $0x2944] ss:$16 sps:$4 sm:$0xff]  }
 0x305   : > { %13694 = vmatprep.subr.bf16.mxu1 %v19221_v57  ;;  %v19251_v57 = vld [vmem:[%s21611_s26 + $0x2b44] ss:$16 sps:$4 sm:$0xff]  }
 0x307   : > { %13654 = vmatpush2.bf16.msra.mxu0 %v19216_v58  ;;  %v19246_v58 = vld [vmem:[%s21611_s26 + $0x2940] ss:$16 sps:$4 sm:$0xff]  }
 0x308   : > { %13695 = vmatpush2.bf16.msra.mxu1 %v19219_v59  ;;  %13655 = vmatprep.subr.bf16.mxu0 %v19224_v60  ;;  %v19249_v59 = vld [vmem:[%s21611_s26 + $0x2b40] ss:$16 sps:$4 sm:$0xff]   ;;  %v19254_v60 = vld [vmem:[%s21611_s26 + $0x2924] ss:$16 sps:$4 sm:$0xff]  }
 0x309   : > { %13696 = vmatprep.subr.bf16.mxu1 %v19227_v6  ;;  %v19257_v6 = vld [vmem:[%s21611_s26 + $0x2b24] ss:$16 sps:$4 sm:$0xff]  }
 0x30b   : > { %13656 = vmatpush2.bf16.msra.mxu0 %v19222_v7  ;;  %v19252_v7 = vld [vmem:[%s21611_s26 + $0x2920] ss:$16 sps:$4 sm:$0xff]  }
 0x30c   : > { %13697 = vmatpush2.bf16.msra.mxu1 %v19225_v14  ;;  %13657 = vmatprep.subr.bf16.mxu0 %v19230_v16  ;;  %v19255_v14 = vld [vmem:[%s21611_s26 + $0x2b20] ss:$16 sps:$4 sm:$0xff]   ;;  %v19260_v16 = vld [vmem:[%s21611_s26 + $0x2904] ss:$16 sps:$4 sm:$0xff]  }
 0x30d   : > { %13698 = vmatprep.subr.bf16.mxu1 %v19233_v18  ;;  %v19263_v18 = vld [vmem:[%s21611_s26 + $0x2b04] ss:$16 sps:$4 sm:$0xff]  }
 0x30f   : > { %13658 = vmatpush2.bf16.msra.mxu0 %v19228_v17  ;;  %v19258_v17 = vld [vmem:[%s21611_s26 + $0x2900] ss:$16 sps:$4 sm:$0xff]  }
 0x310   : > { %13699 = vmatpush2.bf16.msra.mxu1 %v19231_v15  ;;  %13659 = vmatprep.subr.bf16.mxu0 %v19236_v27  ;;  %v19261_v15 = vld [vmem:[%s21611_s26 + $0x2b00] ss:$16 sps:$4 sm:$0xff]  }
 0x311   : > { %13700 = vmatprep.subr.bf16.mxu1 %v19239_v21  ;;  %v437_v27 = vld [vmem:[%s21629_s22 + $0x140] sm:$0xff]  ;;  %v439_v21 = vld [vmem:[%s21629_s22 + $0x150] sm:$0xff] }
 0x313   : > { %13660 = vmatpush2.bf16.msra.mxu0 %v19234_v29  ;;  %v19266_v29 = vld [vmem:[%s21611_s26 + $0x2ce4] ss:$16 sps:$4 sm:$0xff]  }
 0x314   : > { %13701 = vmatpush2.bf16.msra.mxu1 %v19237_v35  ;;  %13661 = vmatprep.subr.bf16.mxu0 %v19242_v61  ;;  %v19269_v35 = vld [vmem:[%s21611_s26 + $0x2ee4] ss:$16 sps:$4 sm:$0xff]   ;;  %v22548_v61 = vpack.c.bf16 %v437_v27, %v437_v27 }
 0x315   : > { %13702 = vmatprep.subr.bf16.mxu1 %v19245_v36  ;;  %v22550_v36 = vpack.c.bf16 %v439_v21, %v439_v21  ;;  %v19278_v21 = vld [vmem:[%s21611_s26 + $0x2ca4] ss:$16 sps:$4 sm:$0xff]  }
 0x316   : > { %24343 = vst [vmem:[#allocation14_spill] sm:$0xff] %v22548_v61 }
 0x317   : > { %13662 = vmatpush2.bf16.msra.mxu0 %v19240_v43  ;;  %24344 = vst [vmem:[#allocation15_spill] sm:$0xff] %v22550_v36  ;;  %v442_v43 = vld [vmem:[%s21629_s22 + $0x168] sm:$0xff] }
 0x318   : > { %13703 = vmatpush2.bf16.msra.mxu1 %v19243_v56  ;;  %13663 = vmatprep.subr.bf16.mxu0 %v19248_v32  ;;  %v444_v56 = vld [vmem:[%s21629_s22 + $0x178] sm:$0xff]  ;;  %v19264_v32 = vld [vmem:[%s21611_s26 + $0x2ce0] ss:$16 sps:$4 sm:$0xff]  }
 0x319   : > { %13704 = vmatprep.subr.bf16.mxu1 %v19251_v57  ;;  %v19267_v57 = vld [vmem:[%s21611_s26 + $0x2ee0] ss:$16 sps:$4 sm:$0xff]  }
 0x31b   : > { %13664 = vmatpush2.bf16.msra.mxu0 %v19246_v58  ;;  %v19272_v58 = vld [vmem:[%s21611_s26 + $0x2cc4] ss:$16 sps:$4 sm:$0xff]  }
 0x31c   : > { %13705 = vmatpush2.bf16.msra.mxu1 %v19249_v59  ;;  %13665 = vmatprep.subr.bf16.mxu0 %v19254_v60  ;;  %v19275_v59 = vld [vmem:[%s21611_s26 + $0x2ec4] ss:$16 sps:$4 sm:$0xff]   ;;  %v19270_v60 = vld [vmem:[%s21611_s26 + $0x2cc0] ss:$16 sps:$4 sm:$0xff]  }
 0x31d   : > { %13706 = vmatprep.subr.bf16.mxu1 %v19257_v6  ;;  %v19273_v6 = vld [vmem:[%s21611_s26 + $0x2ec0] ss:$16 sps:$4 sm:$0xff]  }
 0x31f   : > { %13666 = vmatpush2.bf16.msra.mxu0 %v19252_v7  ;;  %v22560_v7 = vpack.c.bf16 %v442_v43, %v442_v43 }
 0x320   : > { %13707 = vmatpush2.bf16.msra.mxu1 %v19255_v14  ;;  %13667 = vmatprep.subr.bf16.mxu0 %v19260_v16  ;;  %v22562_v14 = vpack.c.bf16 %v444_v56, %v444_v56  ;;  %v19276_v56 = vld [vmem:[%s21611_s26 + $0x2ca0] ss:$16 sps:$4 sm:$0xff]  }
 0x321   : > { %13708 = vmatprep.subr.bf16.mxu1 %v19263_v18  ;;  %24345 = vst [vmem:[#allocation16_spill] sm:$0xff] %v22560_v7 }
 0x322   : > { %24346 = vst [vmem:[#allocation17_spill] sm:$0xff] %v22562_v14 }
 0x323   : > { %13668 = vmatpush2.bf16.msra.mxu0 %v19258_v17 }
 0x324   : > { %13709 = vmatpush2.bf16.msra.mxu1 %v19261_v15  ;;  %13719 = vmatprep.subr.bf16.mxu0 %v19266_v29  ;;  %v19281_v29 = vld [vmem:[%s21611_s26 + $0x2ea4] ss:$16 sps:$4 sm:$0xff]  }
 0x325   : > { %13760 = vmatprep.subr.bf16.mxu1 %v19269_v35 }
 0x326   : > { %v13425_v16 = vpop.f32.mrf.mxu0  ;;  %13670 = vmatmul.mubr.bf16.vlgmr.msra.gmra.mxu0 %v22548_v61  ;;  %v19279_v61 = vld [vmem:[%s21611_s26 + $0x2ea0] ss:$16 sps:$4 sm:$0xff]  }
 0x327   : > { %v13466_v18 = vpop.f32.mrf.mxu1  ;;  %13711 = vmatmul.mubr.bf16.vlgmr.msra.gmra.mxu1 %v22550_v36  ;;  %v13426_v17 = vadd.f32 %v13425_v16, %v22483_v28  ;;  %13720 = vmatpush1.bf16.msra.mxu0 %v19264_v32  ;;  %v19287_v16 = vld [vmem:[%s21611_s26 + $0x2e84] ss:$16 sps:$4 sm:$0xff]   ;;  %v19372_v36 = vld [vmem:[%s21611_s26 + $0x30a0] ss:$16 sps:$4 sm:$0xff]  }
 0x328   : > { %13761 = vmatpush1.bf16.msra.mxu1 %v19267_v57  ;;  %v13427_v15 = vpop.f32.mrf.mxu0  ;;  %13721 = vmatprep.subr.bf16.mxu0 %v19272_v58 }
 0x329   : > { %v13468_v27 = vpop.f32.mrf.mxu1  ;;  %13762 = vmatprep.subr.bf16.mxu1 %v19275_v59  ;;  %v22569_v35 = vadd.f32 %v13466_v18, %v13426_v17  ;;  %v13428_v43 = vadd.f32 %v13427_v15, %v22490_v25  ;;  %13751 = vmatprep.mubr.bf16.mxu0 %v22560_v7  ;;  %v19284_v25 = vld [vmem:[%s21611_s26 + $0x2c84] ss:$16 sps:$4 sm:$0xff]   ;;  %v19282_v18 = vld [vmem:[%s21611_s26 + $0x2c80] ss:$16 sps:$4 sm:$0xff]  }
 0x32a   : > { %13792 = vmatprep.mubr.bf16.mxu1 %v22562_v14  ;;  %v13429_v28 = vpop.f32.mrf.mxu0  ;;  %v19285_v17 = vld [vmem:[%s21611_s26 + $0x2e80] ss:$16 sps:$4 sm:$0xff]  }
 0x32b   : > { %v13470_v32 = vpop.f32.mrf.mxu1  ;;  %v22576_v57 = vadd.f32 %v13468_v27, %v13428_v43  ;;  %13722 = vmatpush1.bf16.msra.mxu0 %v19270_v60  ;;  %v19290_v60 = vld [vmem:[%s21611_s26 + $0x2c64] ss:$16 sps:$4 sm:$0xff]   ;;  %v19288_v15 = vld [vmem:[%s21611_s26 + $0x2c60] ss:$16 sps:$4 sm:$0xff]  }
 0x32c   : > { %13763 = vmatpush1.bf16.msra.mxu1 %v19273_v6  ;;  %v13430_v58 = vpop.f32.mrf.mxu0  ;;  %13723 = vmatprep.subr.bf16.mxu0 %v19278_v21  ;;  %v19293_v6 = vld [vmem:[%s21611_s26 + $0x2e64] ss:$16 sps:$4 sm:$0xff]   ;;  %v19291_v27 = vld [vmem:[%s21611_s26 + $0x2e60] ss:$16 sps:$4 sm:$0xff]  }
 0x32d   : > { %v13471_v59 = vpop.f32.mrf.mxu1  ;;  %13764 = vmatprep.subr.bf16.mxu1 %v19281_v29  ;;  %v19296_v21 = vld [vmem:[%s21611_s26 + $0x2c44] ss:$16 sps:$4 sm:$0xff]   ;;  %v19294_v29 = vld [vmem:[%s21611_s26 + $0x2c40] ss:$16 sps:$4 sm:$0xff]  }
 0x32e   : > { %v19297_v43 = vld [vmem:[%s21611_s26 + $0x2e40] ss:$16 sps:$4 sm:$0xff]   ;;  %v19305_v28 = vld [vmem:[%s21611_s26 + $0x2e24] ss:$16 sps:$4 sm:$0xff]  }
 0x32f   : > { %13724 = vmatpush1.bf16.msra.mxu0 %v19276_v56  ;;  %v19302_v56 = vld [vmem:[%s21611_s26 + $0x2c24] ss:$16 sps:$4 sm:$0xff]   ;;  %v19300_v32 = vld [vmem:[%s21611_s26 + $0x2c20] ss:$16 sps:$4 sm:$0xff]  }
 0x330   : > { %13765 = vmatpush1.bf16.msra.mxu1 %v19279_v61  ;;  %13725 = vmatprep.subr.bf16.mxu0 %v19284_v25  ;;  %v19299_v61 = vld [vmem:[%s21611_s26 + $0x2e44] ss:$16 sps:$4 sm:$0xff]   ;;  %v19303_v58 = vld [vmem:[%s21611_s26 + $0x2e20] ss:$16 sps:$4 sm:$0xff]  }
 0x331   : > { %13766 = vmatprep.subr.bf16.mxu1 %v19287_v16  ;;  %v19308_v59 = vld [vmem:[%s21611_s26 + $0x2c04] ss:$16 sps:$4 sm:$0xff]   ;;  %v19306_v16 = vld [vmem:[%s21611_s26 + $0x2c00] ss:$16 sps:$4 sm:$0xff]  }
 0x332   : > { %v19311_v25 = vld [vmem:[%s21611_s26 + $0x2e04] ss:$16 sps:$4 sm:$0xff]  }
 0x333   : > { %13726 = vmatpush1.bf16.msra.mxu0 %v19282_v18  ;;  %v19309_v18 = vld [vmem:[%s21611_s26 + $0x2e00] ss:$16 sps:$4 sm:$0xff]  }
 0x334   : > { %13767 = vmatpush1.bf16.msra.mxu1 %v19285_v17  ;;  %13727 = vmatprep.subr.bf16.mxu0 %v19290_v60  ;;  %v19314_v17 = vld [vmem:[%s21611_s26 + $0x2de4] ss:$16 sps:$4 sm:$0xff]  }
 0x335   : > { %13768 = vmatprep.subr.bf16.mxu1 %v19293_v6  ;;  %v19317_v60 = vld [vmem:[%s21611_s26 + $0x2fe4] ss:$16 sps:$4 sm:$0xff]   ;;  %v19312_v6 = vld [vmem:[%s21611_s26 + $0x2de0] ss:$16 sps:$4 sm:$0xff]  }
 0x337   : > { %13728 = vmatpush1.bf16.msra.mxu0 %v19288_v15  ;;  %v19315_v15 = vld [vmem:[%s21611_s26 + $0x2fe0] ss:$16 sps:$4 sm:$0xff]  }
 0x338   : > { %13769 = vmatpush1.bf16.msra.mxu1 %v19291_v27  ;;  %13729 = vmatprep.subr.bf16.mxu0 %v19296_v21  ;;  %v19320_v27 = vld [vmem:[%s21611_s26 + $0x2dc4] ss:$16 sps:$4 sm:$0xff]  }
 0x339   : > { %13770 = vmatprep.subr.bf16.mxu1 %v19299_v61  ;;  %v19323_v21 = vld [vmem:[%s21611_s26 + $0x2fc4] ss:$16 sps:$4 sm:$0xff]   ;;  %v19318_v61 = vld [vmem:[%s21611_s26 + $0x2dc0] ss:$16 sps:$4 sm:$0xff]  }
 0x33b   : > { %13730 = vmatpush1.bf16.msra.mxu0 %v19294_v29  ;;  %v19321_v29 = vld [vmem:[%s21611_s26 + $0x2fc0] ss:$16 sps:$4 sm:$0xff]  }
 0x33c   : > { %13771 = vmatpush1.bf16.msra.mxu1 %v19297_v43  ;;  %13731 = vmatprep.subr.bf16.mxu0 %v19302_v56  ;;  %v19326_v43 = vld [vmem:[%s21611_s26 + $0x2da4] ss:$16 sps:$4 sm:$0xff]  }
 0x33d   : > { %13772 = vmatprep.subr.bf16.mxu1 %v19305_v28  ;;  %v19329_v56 = vld [vmem:[%s21611_s26 + $0x2fa4] ss:$16 sps:$4 sm:$0xff]   ;;  %v19324_v28 = vld [vmem:[%s21611_s26 + $0x2da0] ss:$16 sps:$4 sm:$0xff]  }
 0x33f   : > { %13732 = vmatpush1.bf16.msra.mxu0 %v19300_v32  ;;  %v19327_v32 = vld [vmem:[%s21611_s26 + $0x2fa0] ss:$16 sps:$4 sm:$0xff]  }
 0x340   : > { %13773 = vmatpush1.bf16.msra.mxu1 %v19303_v58  ;;  %13733 = vmatprep.subr.bf16.mxu0 %v19308_v59  ;;  %v19332_v58 = vld [vmem:[%s21611_s26 + $0x2d84] ss:$16 sps:$4 sm:$0xff]  }
 0x341   : > { %13774 = vmatprep.subr.bf16.mxu1 %v19311_v25  ;;  %v19335_v59 = vld [vmem:[%s21611_s26 + $0x2f84] ss:$16 sps:$4 sm:$0xff]   ;;  %v19330_v25 = vld [vmem:[%s21611_s26 + $0x2d80] ss:$16 sps:$4 sm:$0xff]  }
 0x343   : > { %13734 = vmatpush1.bf16.msra.mxu0 %v19306_v16  ;;  %v19333_v16 = vld [vmem:[%s21611_s26 + $0x2f80] ss:$16 sps:$4 sm:$0xff]  }
 0x344   : > { %13775 = vmatpush1.bf16.msra.mxu1 %v19309_v18  ;;  %13735 = vmatprep.subr.bf16.mxu0 %v19314_v17  ;;  %v19338_v18 = vld [vmem:[%s21611_s26 + $0x2d64] ss:$16 sps:$4 sm:$0xff]  }
 0x345   : > { %13776 = vmatprep.subr.bf16.mxu1 %v19317_v60  ;;  %v19341_v17 = vld [vmem:[%s21611_s26 + $0x2f64] ss:$16 sps:$4 sm:$0xff]   ;;  %v19336_v60 = vld [vmem:[%s21611_s26 + $0x2d60] ss:$16 sps:$4 sm:$0xff]  }
 0x347   : > { %13736 = vmatpush2.bf16.msra.mxu0 %v19312_v6  ;;  %v19339_v6 = vld [vmem:[%s21611_s26 + $0x2f60] ss:$16 sps:$4 sm:$0xff]  }
 0x348   : > { %13777 = vmatpush2.bf16.msra.mxu1 %v19315_v15  ;;  %13737 = vmatprep.subr.bf16.mxu0 %v19320_v27  ;;  %v19344_v15 = vld [vmem:[%s21611_s26 + $0x2d44] ss:$16 sps:$4 sm:$0xff]  }
 0x349   : > { %13778 = vmatprep.subr.bf16.mxu1 %v19323_v21  ;;  %v19347_v27 = vld [vmem:[%s21611_s26 + $0x2f44] ss:$16 sps:$4 sm:$0xff]   ;;  %v19342_v21 = vld [vmem:[%s21611_s26 + $0x2d40] ss:$16 sps:$4 sm:$0xff]  }
 0x34b   : > { %13738 = vmatpush2.bf16.msra.mxu0 %v19318_v61  ;;  %v19345_v61 = vld [vmem:[%s21611_s26 + $0x2f40] ss:$16 sps:$4 sm:$0xff]  }
 0x34c   : > { %13779 = vmatpush2.bf16.msra.mxu1 %v19321_v29  ;;  %13739 = vmatprep.subr.bf16.mxu0 %v19326_v43  ;;  %v19350_v29 = vld [vmem:[%s21611_s26 + $0x2d24] ss:$16 sps:$4 sm:$0xff]  }
 0x34d   : > { %13780 = vmatprep.subr.bf16.mxu1 %v19329_v56  ;;  %v19353_v43 = vld [vmem:[%s21611_s26 + $0x2f24] ss:$16 sps:$4 sm:$0xff]   ;;  %v19348_v56 = vld [vmem:[%s21611_s26 + $0x2d20] ss:$16 sps:$4 sm:$0xff]  }
 0x34f   : > { %13740 = vmatpush2.bf16.msra.mxu0 %v19324_v28  ;;  %v19351_v28 = vld [vmem:[%s21611_s26 + $0x2f20] ss:$16 sps:$4 sm:$0xff]  }
 0x350   : > { %13781 = vmatpush2.bf16.msra.mxu1 %v19327_v32  ;;  %13741 = vmatprep.subr.bf16.mxu0 %v19332_v58  ;;  %v19356_v32 = vld [vmem:[%s21611_s26 + $0x2d04] ss:$16 sps:$4 sm:$0xff]  }
 0x351   : > { %13782 = vmatprep.subr.bf16.mxu1 %v19335_v59  ;;  %v19359_v58 = vld [vmem:[%s21611_s26 + $0x2f04] ss:$16 sps:$4 sm:$0xff]   ;;  %v19354_v59 = vld [vmem:[%s21611_s26 + $0x2d00] ss:$16 sps:$4 sm:$0xff]  }
 0x353   : > { %13742 = vmatpush2.bf16.msra.mxu0 %v19330_v25  ;;  %v19357_v25 = vld [vmem:[%s21611_s26 + $0x2f00] ss:$16 sps:$4 sm:$0xff]  }
 0x354   : > { %13783 = vmatpush2.bf16.msra.mxu1 %v19333_v16  ;;  %13743 = vmatprep.subr.bf16.mxu0 %v19338_v18  ;;  %v441_v16 = vld [vmem:[%s21629_s22 + $0x160] sm:$0xff]  ;;  %v443_v18 = vld [vmem:[%s21629_s22 + $0x170] sm:$0xff] }
 0x355   : > { %13784 = vmatprep.subr.bf16.mxu1 %v19341_v17  ;;  %v19362_v17 = vld [vmem:[%s21611_s26 + $0x30e4] ss:$16 sps:$4 sm:$0xff]  }
 0x357   : > { %13744 = vmatpush2.bf16.msra.mxu0 %v19336_v60  ;;  %v19365_v60 = vld [vmem:[%s21611_s26 + $0x32e4] ss:$16 sps:$4 sm:$0xff]  }
 0x358   : > { %13785 = vmatpush2.bf16.msra.mxu1 %v19339_v6  ;;  %13745 = vmatprep.subr.bf16.mxu0 %v19344_v15  ;;  %v22634_v6 = vpack.c.bf16 %v441_v16, %v441_v16  ;;  %v22636_v15 = vpack.c.bf16 %v443_v18, %v443_v18 }
 0x359   : > { %13786 = vmatprep.subr.bf16.mxu1 %v19347_v27  ;;  %v446_v27 = vld [vmem:[%s21629_s22 + $0x188] sm:$0xff] }
 0x35a   : > { %24347 = vst [vmem:[#allocation18_spill] sm:$0xff] %v22634_v6  ;;  %24348 = vst [vmem:[#allocation19_spill] sm:$0xff] %v22636_v15 }
 0x35b   : > { %13746 = vmatpush2.bf16.msra.mxu0 %v19342_v21  ;;  %v448_v21 = vld [vmem:[%s21629_s22 + $0x198] sm:$0xff] }
 0x35c   : > { %13787 = vmatpush2.bf16.msra.mxu1 %v19345_v61  ;;  %13747 = vmatprep.subr.bf16.mxu0 %v19350_v29  ;;  %v19360_v61 = vld [vmem:[%s21611_s26 + $0x30e0] ss:$16 sps:$4 sm:$0xff]   ;;  %v22648_v16 = vpack.c.bf16 %v448_v21, %v448_v21 }
 0x35d   : > { %13788 = vmatprep.subr.bf16.mxu1 %v19353_v43  ;;  %v19363_v29 = vld [vmem:[%s21611_s26 + $0x32e0] ss:$16 sps:$4 sm:$0xff]   ;;  %v19368_v43 = vld [vmem:[%s21611_s26 + $0x30c4] ss:$16 sps:$4 sm:$0xff]  }
 0x35e   : > { %24350 = vst [vmem:[#allocation21_spill] sm:$0xff] %v22648_v16 }
 0x35f   : > { %13748 = vmatpush2.bf16.msra.mxu0 %v19348_v56  ;;  %v19371_v56 = vld [vmem:[%s21611_s26 + $0x32c4] ss:$16 sps:$4 sm:$0xff]  }
 0x360   : > { %13789 = vmatpush2.bf16.msra.mxu1 %v19351_v28  ;;  %13749 = vmatprep.subr.bf16.mxu0 %v19356_v32  ;;  %v19366_v28 = vld [vmem:[%s21611_s26 + $0x30c0] ss:$16 sps:$4 sm:$0xff]  }
 0x361   : > { %13790 = vmatprep.subr.bf16.mxu1 %v19359_v58  ;;  %v19369_v32 = vld [vmem:[%s21611_s26 + $0x32c0] ss:$16 sps:$4 sm:$0xff]   ;;  %v22646_v58 = vpack.c.bf16 %v446_v27, %v446_v27  ;;  %v19377_v27 = vld [vmem:[%s21611_s26 + $0x32a4] ss:$16 sps:$4 sm:$0xff]  }
 0x363   : > { %13750 = vmatpush2.bf16.msra.mxu0 %v19354_v59  ;;  %24349 = vst [vmem:[#allocation20_spill] sm:$0xff] %v22646_v58 }
 0x364   : > { %13791 = vmatpush2.bf16.msra.mxu1 %v19357_v25  ;;  %13801 = vmatprep.subr.bf16.mxu0 %v19362_v17 }
 0x365   : > { %13842 = vmatprep.subr.bf16.mxu1 %v19365_v60  ;;  %v19374_v60 = vld [vmem:[%s21611_s26 + $0x30a4] ss:$16 sps:$4 sm:$0xff]  }
 0x366   : > { %v13507_v18 = vpop.f32.mrf.mxu0  ;;  %13752 = vmatmul.mubr.bf16.vlgmr.msra.gmra.mxu0 %v22634_v6  ;;  %v19375_v6 = vld [vmem:[%s21611_s26 + $0x32a0] ss:$16 sps:$4 sm:$0xff]  }
 0x367   : > { %v13548_v14 = vpop.f32.mrf.mxu1  ;;  %13793 = vmatmul.mubr.bf16.vlgmr.msra.gmra.mxu1 %v22636_v15  ;;  %v13508_v59 = vadd.f32 %v13507_v18, %v22569_v35  ;;  %13802 = vmatpush1.bf16.msra.mxu0 %v19360_v61  ;;  %v19378_v18 = vld [vmem:[%s21611_s26 + $0x3080] ss:$16 sps:$4 sm:$0xff]  }
 0x368   : > { %13843 = vmatpush1.bf16.msra.mxu1 %v19363_v29  ;;  %v13509_v25 = vpop.f32.mrf.mxu0  ;;  %13803 = vmatprep.subr.bf16.mxu0 %v19368_v43  ;;  %v19468_v15 = vld [vmem:[%s21611_s26 + $0x34a0] ss:$16 sps:$4 sm:$0xff]  }
 0x369   : > { %v13550_v17 = vpop.f32.mrf.mxu1  ;;  %13844 = vmatprep.subr.bf16.mxu1 %v19371_v56  ;;  %v22655_v21 = vadd.f32 %v13548_v14, %v13508_v59  ;;  %v13510_v7 = vadd.f32 %v13509_v25, %v22576_v57  ;;  %13833 = vmatprep.mubr.bf16.mxu0 %v22646_v58  ;;  %v19380_v57 = vld [vmem:[%s21611_s26 + $0x3084] ss:$16 sps:$4 sm:$0xff]   ;;  %v19381_v59 = vld [vmem:[%s21611_s26 + $0x3280] ss:$16 sps:$4 sm:$0xff]  }
 0x36a   : > { %13874 = vmatprep.mubr.bf16.mxu1 %v22648_v16  ;;  %v13511_v35 = vpop.f32.mrf.mxu0  ;;  %v19383_v56 = vld [vmem:[%s21611_s26 + $0x3284] ss:$16 sps:$4 sm:$0xff]   ;;  %v19387_v25 = vld [vmem:[%s21611_s26 + $0x3260] ss:$16 sps:$4 sm:$0xff]  }
 0x36b   : > { %v13552_v61 = vpop.f32.mrf.mxu1  ;;  %v22662_v29 = vadd.f32 %v13550_v17, %v13510_v7  ;;  %13804 = vmatpush1.bf16.msra.mxu0 %v19366_v28  ;;  %v19386_v7 = vld [vmem:[%s21611_s26 + $0x3064] ss:$16 sps:$4 sm:$0xff]   ;;  %v19390_v17 = vld [vmem:[%s21611_s26 + $0x3040] ss:$16 sps:$4 sm:$0xff]  }
 0x36c   : > { %13845 = vmatpush1.bf16.msra.mxu1 %v19369_v32  ;;  %v13512_v14 = vpop.f32.mrf.mxu0  ;;  %13805 = vmatprep.subr.bf16.mxu0 %v19374_v60  ;;  %v19389_v28 = vld [vmem:[%s21611_s26 + $0x3264] ss:$16 sps:$4 sm:$0xff]   ;;  %v19384_v32 = vld [vmem:[%s21611_s26 + $0x3060] ss:$16 sps:$4 sm:$0xff]  }
 0x36d   : > { %v13553_v43 = vpop.f32.mrf.mxu1  ;;  %13846 = vmatprep.subr.bf16.mxu1 %v19377_v27  ;;  %v19393_v60 = vld [vmem:[%s21611_s26 + $0x3240] ss:$16 sps:$4 sm:$0xff]   ;;  %v19398_v27 = vld [vmem:[%s21611_s26 + $0x3024] ss:$16 sps:$4 sm:$0xff]  }
 0x36e   : > { %v19401_v35 = vld [vmem:[%s21611_s26 + $0x3224] ss:$16 sps:$4 sm:$0xff]   ;;  %v19396_v61 = vld [vmem:[%s21611_s26 + $0x3020] ss:$16 sps:$4 sm:$0xff]  }
 0x36f   : > { %13806 = vmatpush1.bf16.msra.mxu0 %v19372_v36  ;;  %v19392_v36 = vld [vmem:[%s21611_s26 + $0x3044] ss:$16 sps:$4 sm:$0xff]   ;;  %v19399_v14 = vld [vmem:[%s21611_s26 + $0x3220] ss:$16 sps:$4 sm:$0xff]  }
 0x370   : > { %13847 = vmatpush1.bf16.msra.mxu1 %v19375_v6  ;;  %13807 = vmatprep.subr.bf16.mxu0 %v19380_v57  ;;  %v19395_v6 = vld [vmem:[%s21611_s26 + $0x3244] ss:$16 sps:$4 sm:$0xff]  }
 0x371   : > { %13848 = vmatprep.subr.bf16.mxu1 %v19383_v56  ;;  %v19404_v43 = vld [vmem:[%s21611_s26 + $0x3004] ss:$16 sps:$4 sm:$0xff]   ;;  %v19402_v56 = vld [vmem:[%s21611_s26 + $0x3000] ss:$16 sps:$4 sm:$0xff]  }
 0x372   : > { %v19407_v57 = vld [vmem:[%s21611_s26 + $0x3204] ss:$16 sps:$4 sm:$0xff]  }
 0x373   : > { %13808 = vmatpush1.bf16.msra.mxu0 %v19378_v18  ;;  %v19405_v18 = vld [vmem:[%s21611_s26 + $0x3200] ss:$16 sps:$4 sm:$0xff]  }
 0x374   : > { %13849 = vmatpush1.bf16.msra.mxu1 %v19381_v59  ;;  %13809 = vmatprep.subr.bf16.mxu0 %v19386_v7  ;;  %v19410_v59 = vld [vmem:[%s21611_s26 + $0x31e4] ss:$16 sps:$4 sm:$0xff]  }
 0x375   : > { %13850 = vmatprep.subr.bf16.mxu1 %v19389_v28  ;;  %v19413_v7 = vld [vmem:[%s21611_s26 + $0x33e4] ss:$16 sps:$4 sm:$0xff]   ;;  %v19408_v28 = vld [vmem:[%s21611_s26 + $0x31e0] ss:$16 sps:$4 sm:$0xff]  }
 0x377   : > { %13810 = vmatpush1.bf16.msra.mxu0 %v19384_v32  ;;  %v19411_v32 = vld [vmem:[%s21611_s26 + $0x33e0] ss:$16 sps:$4 sm:$0xff]  }
 0x378   : > { %13851 = vmatpush1.bf16.msra.mxu1 %v19387_v25  ;;  %13811 = vmatprep.subr.bf16.mxu0 %v19392_v36  ;;  %v19416_v25 = vld [vmem:[%s21611_s26 + $0x31c4] ss:$16 sps:$4 sm:$0xff]  }
 0x379   : > { %13852 = vmatprep.subr.bf16.mxu1 %v19395_v6  ;;  %v19419_v36 = vld [vmem:[%s21611_s26 + $0x33c4] ss:$16 sps:$4 sm:$0xff]   ;;  %v19414_v6 = vld [vmem:[%s21611_s26 + $0x31c0] ss:$16 sps:$4 sm:$0xff]  }
 0x37b   : > { %13812 = vmatpush1.bf16.msra.mxu0 %v19390_v17  ;;  %v19417_v17 = vld [vmem:[%s21611_s26 + $0x33c0] ss:$16 sps:$4 sm:$0xff]  }
 0x37c   : > { %13853 = vmatpush1.bf16.msra.mxu1 %v19393_v60  ;;  %13813 = vmatprep.subr.bf16.mxu0 %v19398_v27  ;;  %v19422_v60 = vld [vmem:[%s21611_s26 + $0x31a4] ss:$16 sps:$4 sm:$0xff]  }
 0x37d   : > { %13854 = vmatprep.subr.bf16.mxu1 %v19401_v35  ;;  %v19425_v27 = vld [vmem:[%s21611_s26 + $0x33a4] ss:$16 sps:$4 sm:$0xff]   ;;  %v19420_v35 = vld [vmem:[%s21611_s26 + $0x31a0] ss:$16 sps:$4 sm:$0xff]  }
 0x37f   : > { %13814 = vmatpush1.bf16.msra.mxu0 %v19396_v61  ;;  %v19423_v61 = vld [vmem:[%s21611_s26 + $0x33a0] ss:$16 sps:$4 sm:$0xff]  }
 0x380   : > { %13855 = vmatpush1.bf16.msra.mxu1 %v19399_v14  ;;  %13815 = vmatprep.subr.bf16.mxu0 %v19404_v43  ;;  %v19428_v14 = vld [vmem:[%s21611_s26 + $0x3184] ss:$16 sps:$4 sm:$0xff]  }
 0x381   : > { %13856 = vmatprep.subr.bf16.mxu1 %v19407_v57  ;;  %v19431_v43 = vld [vmem:[%s21611_s26 + $0x3384] ss:$16 sps:$4 sm:$0xff]   ;;  %v19426_v57 = vld [vmem:[%s21611_s26 + $0x3180] ss:$16 sps:$4 sm:$0xff]  }
 0x383   : > { %13816 = vmatpush1.bf16.msra.mxu0 %v19402_v56  ;;  %v19429_v56 = vld [vmem:[%s21611_s26 + $0x3380] ss:$16 sps:$4 sm:$0xff]  }
 0x384   : > { %13857 = vmatpush1.bf16.msra.mxu1 %v19405_v18  ;;  %13817 = vmatprep.subr.bf16.mxu0 %v19410_v59  ;;  %v19434_v18 = vld [vmem:[%s21611_s26 + $0x3164] ss:$16 sps:$4 sm:$0xff]  }
 0x385   : > { %13858 = vmatprep.subr.bf16.mxu1 %v19413_v7  ;;  %v19437_v59 = vld [vmem:[%s21611_s26 + $0x3364] ss:$16 sps:$4 sm:$0xff]   ;;  %v19432_v7 = vld [vmem:[%s21611_s26 + $0x3160] ss:$16 sps:$4 sm:$0xff]  }
 0x387   : > { %13818 = vmatpush2.bf16.msra.mxu0 %v19408_v28  ;;  %v19435_v28 = vld [vmem:[%s21611_s26 + $0x3360] ss:$16 sps:$4 sm:$0xff]  }
 0x388   : > { %13859 = vmatpush2.bf16.msra.mxu1 %v19411_v32  ;;  %13819 = vmatprep.subr.bf16.mxu0 %v19416_v25  ;;  %v19440_v32 = vld [vmem:[%s21611_s26 + $0x3144] ss:$16 sps:$4 sm:$0xff]  }
 0x389   : > { %13860 = vmatprep.subr.bf16.mxu1 %v19419_v36  ;;  %v19443_v25 = vld [vmem:[%s21611_s26 + $0x3344] ss:$16 sps:$4 sm:$0xff]   ;;  %v19438_v36 = vld [vmem:[%s21611_s26 + $0x3140] ss:$16 sps:$4 sm:$0xff]  }
 0x38b   : > { %13820 = vmatpush2.bf16.msra.mxu0 %v19414_v6  ;;  %v19441_v6 = vld [vmem:[%s21611_s26 + $0x3340] ss:$16 sps:$4 sm:$0xff]  }
 0x38c   : > { %13861 = vmatpush2.bf16.msra.mxu1 %v19417_v17  ;;  %13821 = vmatprep.subr.bf16.mxu0 %v19422_v60  ;;  %v19446_v17 = vld [vmem:[%s21611_s26 + $0x3124] ss:$16 sps:$4 sm:$0xff]  }
 0x38d   : > { %13862 = vmatprep.subr.bf16.mxu1 %v19425_v27  ;;  %v19449_v60 = vld [vmem:[%s21611_s26 + $0x3324] ss:$16 sps:$4 sm:$0xff]   ;;  %v19444_v27 = vld [vmem:[%s21611_s26 + $0x3120] ss:$16 sps:$4 sm:$0xff]  }
 0x38f   : > { %13822 = vmatpush2.bf16.msra.mxu0 %v19420_v35  ;;  %v19447_v35 = vld [vmem:[%s21611_s26 + $0x3320] ss:$16 sps:$4 sm:$0xff]  }
 0x390   : > { %13863 = vmatpush2.bf16.msra.mxu1 %v19423_v61  ;;  %13823 = vmatprep.subr.bf16.mxu0 %v19428_v14  ;;  %v19452_v61 = vld [vmem:[%s21611_s26 + $0x3104] ss:$16 sps:$4 sm:$0xff]  }
 0x391   : > { %13864 = vmatprep.subr.bf16.mxu1 %v19431_v43  ;;  %v19455_v14 = vld [vmem:[%s21611_s26 + $0x3304] ss:$16 sps:$4 sm:$0xff]   ;;  %v19450_v43 = vld [vmem:[%s21611_s26 + $0x3100] ss:$16 sps:$4 sm:$0xff]  }
 0x393   : > { %13824 = vmatpush2.bf16.msra.mxu0 %v19426_v57  ;;  %v19453_v57 = vld [vmem:[%s21611_s26 + $0x3300] ss:$16 sps:$4 sm:$0xff]  }
 0x394   : > { %13865 = vmatpush2.bf16.msra.mxu1 %v19429_v56  ;;  %13825 = vmatprep.subr.bf16.mxu0 %v19434_v18  ;;  %v445_v56 = vld [vmem:[%s21629_s22 + $0x180] sm:$0xff]  ;;  %v447_v18 = vld [vmem:[%s21629_s22 + $0x190] sm:$0xff] }
 0x395   : > { %13866 = vmatprep.subr.bf16.mxu1 %v19437_v59  ;;  %v19458_v59 = vld [vmem:[%s21611_s26 + $0x34e4] ss:$16 sps:$4 sm:$0xff]  }
 0x397   : > { %13826 = vmatpush2.bf16.msra.mxu0 %v19432_v7  ;;  %v19461_v7 = vld [vmem:[%s21611_s26 + $0x36e4] ss:$16 sps:$4 sm:$0xff]  }
 0x398   : > { %13867 = vmatpush2.bf16.msra.mxu1 %v19435_v28  ;;  %13827 = vmatprep.subr.bf16.mxu0 %v19440_v32  ;;  %v22720_v28 = vpack.c.bf16 %v445_v56, %v445_v56  ;;  %v22722_v32 = vpack.c.bf16 %v447_v18, %v447_v18 }
 0x399   : > { %13868 = vmatprep.subr.bf16.mxu1 %v19443_v25  ;;  %v450_v25 = vld [vmem:[%s21629_s22 + $0x1a8] sm:$0xff] }
 0x39a   : > { %24351 = vst [vmem:[#allocation22_spill] sm:$0xff] %v22720_v28  ;;  %24352 = vst [vmem:[#allocation23_spill] sm:$0xff] %v22722_v32 }
 0x39b   : > { %13828 = vmatpush2.bf16.msra.mxu0 %v19438_v36  ;;  %v452_v36 = vld [vmem:[%s21629_s22 + $0x1b8] sm:$0xff] }
 0x39c   : > { %13869 = vmatpush2.bf16.msra.mxu1 %v19441_v6  ;;  %13829 = vmatprep.subr.bf16.mxu0 %v19446_v17  ;;  %v19456_v6 = vld [vmem:[%s21611_s26 + $0x34e0] ss:$16 sps:$4 sm:$0xff]   ;;  %v22734_v56 = vpack.c.bf16 %v452_v36, %v452_v36 }
 0x39d   : > { %13870 = vmatprep.subr.bf16.mxu1 %v19449_v60  ;;  %v19459_v17 = vld [vmem:[%s21611_s26 + $0x36e0] ss:$16 sps:$4 sm:$0xff]   ;;  %v19464_v60 = vld [vmem:[%s21611_s26 + $0x34c4] ss:$16 sps:$4 sm:$0xff]  }
 0x39e   : > { %24354 = vst [vmem:[#allocation25_spill] sm:$0xff] %v22734_v56 }
 0x39f   : > { %13830 = vmatpush2.bf16.msra.mxu0 %v19444_v27  ;;  %v19467_v27 = vld [vmem:[%s21611_s26 + $0x36c4] ss:$16 sps:$4 sm:$0xff]  }
 0x3a0   : > { %13871 = vmatpush2.bf16.msra.mxu1 %v19447_v35  ;;  %13831 = vmatprep.subr.bf16.mxu0 %v19452_v61  ;;  %v19462_v35 = vld [vmem:[%s21611_s26 + $0x34c0] ss:$16 sps:$4 sm:$0xff]  }
 0x3a1   : > { %13872 = vmatprep.subr.bf16.mxu1 %v19455_v14  ;;  %v19465_v61 = vld [vmem:[%s21611_s26 + $0x36c0] ss:$16 sps:$4 sm:$0xff]   ;;  %v22732_v14 = vpack.c.bf16 %v450_v25, %v450_v25  ;;  %v19473_v25 = vld [vmem:[%s21611_s26 + $0x36a4] ss:$16 sps:$4 sm:$0xff]  }
 0x3a3   : > { %13832 = vmatpush2.bf16.msra.mxu0 %v19450_v43  ;;  %24353 = vst [vmem:[#allocation24_spill] sm:$0xff] %v22732_v14 }
 0x3a4   : > { %13873 = vmatpush2.bf16.msra.mxu1 %v19453_v57  ;;  %13883 = vmatprep.subr.bf16.mxu0 %v19458_v59 }
 0x3a5   : > { %13924 = vmatprep.subr.bf16.mxu1 %v19461_v7  ;;  %v19470_v7 = vld [vmem:[%s21611_s26 + $0x34a4] ss:$16 sps:$4 sm:$0xff]  }
 0x3a6   : > { %v13589_v18 = vpop.f32.mrf.mxu0  ;;  %13834 = vmatmul.mubr.bf16.vlgmr.msra.gmra.mxu0 %v22720_v28  ;;  %v19471_v28 = vld [vmem:[%s21611_s26 + $0x36a0] ss:$16 sps:$4 sm:$0xff]  }
 0x3a7   : > { %v13630_v16 = vpop.f32.mrf.mxu1  ;;  %13875 = vmatmul.mubr.bf16.vlgmr.msra.gmra.mxu1 %v22722_v32  ;;  %v13590_v43 = vadd.f32 %v13589_v18, %v22655_v21  ;;  %13884 = vmatpush1.bf16.msra.mxu0 %v19456_v6  ;;  %v19474_v18 = vld [vmem:[%s21611_s26 + $0x3480] ss:$16 sps:$4 sm:$0xff]  }
 0x3a8   : > { %13925 = vmatpush1.bf16.msra.mxu1 %v19459_v17  ;;  %v13591_v57 = vpop.f32.mrf.mxu0  ;;  %13885 = vmatprep.subr.bf16.mxu0 %v19464_v60  ;;  %v19564_v32 = vld [vmem:[%s21611_s26 + $0x38a0] ss:$16 sps:$4 sm:$0xff]  }
 0x3a9   : > { %v13632_v59 = vpop.f32.mrf.mxu1  ;;  %13926 = vmatprep.subr.bf16.mxu1 %v19467_v27  ;;  %v22741_v36 = vadd.f32 %v13630_v16, %v13590_v43  ;;  %v13592_v58 = vadd.f32 %v13591_v57, %v22662_v29  ;;  %13915 = vmatprep.mubr.bf16.mxu0 %v22732_v14  ;;  %v19476_v29 = vld [vmem:[%s21611_s26 + $0x3484] ss:$16 sps:$4 sm:$0xff]   ;;  %v19477_v43 = vld [vmem:[%s21611_s26 + $0x3680] ss:$16 sps:$4 sm:$0xff]  }
 0x3aa   : > { %13956 = vmatprep.mubr.bf16.mxu1 %v22734_v56  ;;  %v13593_v21 = vpop.f32.mrf.mxu0  ;;  %v19479_v27 = vld [vmem:[%s21611_s26 + $0x3684] ss:$16 sps:$4 sm:$0xff]   ;;  %v19483_v57 = vld [vmem:[%s21611_s26 + $0x3660] ss:$16 sps:$4 sm:$0xff]  }
 0x3ab   : > { %v13634_v6 = vpop.f32.mrf.mxu1  ;;  %v22748_v17 = vadd.f32 %v13632_v59, %v13592_v58  ;;  %13886 = vmatpush1.bf16.msra.mxu0 %v19462_v35  ;;  %v19482_v58 = vld [vmem:[%s21611_s26 + $0x3464] ss:$16 sps:$4 sm:$0xff]   ;;  %v19486_v59 = vld [vmem:[%s21611_s26 + $0x3440] ss:$16 sps:$4 sm:$0xff]  }
 0x3ac   : > { %13927 = vmatpush1.bf16.msra.mxu1 %v19465_v61  ;;  %v13594_v16 = vpop.f32.mrf.mxu0  ;;  %13887 = vmatprep.subr.bf16.mxu0 %v19470_v7  ;;  %v19485_v35 = vld [vmem:[%s21611_s26 + $0x3664] ss:$16 sps:$4 sm:$0xff]   ;;  %v19480_v61 = vld [vmem:[%s21611_s26 + $0x3460] ss:$16 sps:$4 sm:$0xff]  }
 0x3ad   : > { %v13635_v60 = vpop.f32.mrf.mxu1  ;;  %13928 = vmatprep.subr.bf16.mxu1 %v19473_v25  ;;  %v19489_v7 = vld [vmem:[%s21611_s26 + $0x3640] ss:$16 sps:$4 sm:$0xff]   ;;  %v19494_v25 = vld [vmem:[%s21611_s26 + $0x3424] ss:$16 sps:$4 sm:$0xff]  }
 0x3ae   : > { %v19497_v21 = vld [vmem:[%s21611_s26 + $0x3624] ss:$16 sps:$4 sm:$0xff]   ;;  %v19492_v6 = vld [vmem:[%s21611_s26 + $0x3420] ss:$16 sps:$4 sm:$0xff]  }
 0x3af   : > { %13888 = vmatpush1.bf16.msra.mxu0 %v19468_v15  ;;  %v19488_v15 = vld [vmem:[%s21611_s26 + $0x3444] ss:$16 sps:$4 sm:$0xff]   ;;  %v19495_v16 = vld [vmem:[%s21611_s26 + $0x3620] ss:$16 sps:$4 sm:$0xff]  }
 0x3b0   : > { %13929 = vmatpush1.bf16.msra.mxu1 %v19471_v28  ;;  %13889 = vmatprep.subr.bf16.mxu0 %v19476_v29  ;;  %v19491_v28 = vld [vmem:[%s21611_s26 + $0x3644] ss:$16 sps:$4 sm:$0xff]  }
 0x3b1   : > { %13930 = vmatprep.subr.bf16.mxu1 %v19479_v27  ;;  %v19500_v60 = vld [vmem:[%s21611_s26 + $0x3404] ss:$16 sps:$4 sm:$0xff]   ;;  %v19498_v27 = vld [vmem:[%s21611_s26 + $0x3400] ss:$16 sps:$4 sm:$0xff]  }
 0x3b2   : > { %v19503_v29 = vld [vmem:[%s21611_s26 + $0x3604] ss:$16 sps:$4 sm:$0xff]  }
 0x3b3   : > { %13890 = vmatpush1.bf16.msra.mxu0 %v19474_v18  ;;  %v19501_v18 = vld [vmem:[%s21611_s26 + $0x3600] ss:$16 sps:$4 sm:$0xff]  }
 0x3b4   : > { %13931 = vmatpush1.bf16.msra.mxu1 %v19477_v43  ;;  %13891 = vmatprep.subr.bf16.mxu0 %v19482_v58  ;;  %v19506_v43 = vld [vmem:[%s21611_s26 + $0x35e4] ss:$16 sps:$4 sm:$0xff]  }
 0x3b5   : > { %13932 = vmatprep.subr.bf16.mxu1 %v19485_v35  ;;  %v19509_v58 = vld [vmem:[%s21611_s26 + $0x37e4] ss:$16 sps:$4 sm:$0xff]   ;;  %v19504_v35 = vld [vmem:[%s21611_s26 + $0x35e0] ss:$16 sps:$4 sm:$0xff]  }
 0x3b7   : > { %13892 = vmatpush1.bf16.msra.mxu0 %v19480_v61  ;;  %v19507_v61 = vld [vmem:[%s21611_s26 + $0x37e0] ss:$16 sps:$4 sm:$0xff]  }
 0x3b8   : > { %13933 = vmatpush1.bf16.msra.mxu1 %v19483_v57  ;;  %13893 = vmatprep.subr.bf16.mxu0 %v19488_v15  ;;  %v19512_v57 = vld [vmem:[%s21611_s26 + $0x35c4] ss:$16 sps:$4 sm:$0xff]  }
 0x3b9   : > { %13934 = vmatprep.subr.bf16.mxu1 %v19491_v28  ;;  %v19515_v15 = vld [vmem:[%s21611_s26 + $0x37c4] ss:$16 sps:$4 sm:$0xff]   ;;  %v19510_v28 = vld [vmem:[%s21611_s26 + $0x35c0] ss:$16 sps:$4 sm:$0xff]  }
 0x3bb   : > { %13894 = vmatpush1.bf16.msra.mxu0 %v19486_v59  ;;  %v19513_v59 = vld [vmem:[%s21611_s26 + $0x37c0] ss:$16 sps:$4 sm:$0xff]  }
 0x3bc   : > { %13935 = vmatpush1.bf16.msra.mxu1 %v19489_v7  ;;  %13895 = vmatprep.subr.bf16.mxu0 %v19494_v25  ;;  %v19518_v7 = vld [vmem:[%s21611_s26 + $0x35a4] ss:$16 sps:$4 sm:$0xff]  }
 0x3bd   : > { %13936 = vmatprep.subr.bf16.mxu1 %v19497_v21  ;;  %v19521_v25 = vld [vmem:[%s21611_s26 + $0x37a4] ss:$16 sps:$4 sm:$0xff]   ;;  %v19516_v21 = vld [vmem:[%s21611_s26 + $0x35a0] ss:$16 sps:$4 sm:$0xff]  }
 0x3bf   : > { %13896 = vmatpush1.bf16.msra.mxu0 %v19492_v6  ;;  %v19519_v6 = vld [vmem:[%s21611_s26 + $0x37a0] ss:$16 sps:$4 sm:$0xff]  }
 0x3c0   : > { %13937 = vmatpush1.bf16.msra.mxu1 %v19495_v16  ;;  %13897 = vmatprep.subr.bf16.mxu0 %v19500_v60  ;;  %v19524_v16 = vld [vmem:[%s21611_s26 + $0x3584] ss:$16 sps:$4 sm:$0xff]  }
 0x3c1   : > { %13938 = vmatprep.subr.bf16.mxu1 %v19503_v29  ;;  %v19527_v60 = vld [vmem:[%s21611_s26 + $0x3784] ss:$16 sps:$4 sm:$0xff]   ;;  %v19522_v29 = vld [vmem:[%s21611_s26 + $0x3580] ss:$16 sps:$4 sm:$0xff]  }
 0x3c3   : > { %13898 = vmatpush1.bf16.msra.mxu0 %v19498_v27  ;;  %v19525_v27 = vld [vmem:[%s21611_s26 + $0x3780] ss:$16 sps:$4 sm:$0xff]  }
 0x3c4   : > { %13939 = vmatpush1.bf16.msra.mxu1 %v19501_v18  ;;  %13899 = vmatprep.subr.bf16.mxu0 %v19506_v43  ;;  %v19530_v18 = vld [vmem:[%s21611_s26 + $0x3564] ss:$16 sps:$4 sm:$0xff]  }
 0x3c5   : > { %13940 = vmatprep.subr.bf16.mxu1 %v19509_v58  ;;  %v19533_v43 = vld [vmem:[%s21611_s26 + $0x3764] ss:$16 sps:$4 sm:$0xff]   ;;  %v19528_v58 = vld [vmem:[%s21611_s26 + $0x3560] ss:$16 sps:$4 sm:$0xff]  }
 0x3c7   : > { %13900 = vmatpush2.bf16.msra.mxu0 %v19504_v35  ;;  %v19531_v35 = vld [vmem:[%s21611_s26 + $0x3760] ss:$16 sps:$4 sm:$0xff]  }
 0x3c8   : > { %13941 = vmatpush2.bf16.msra.mxu1 %v19507_v61  ;;  %13901 = vmatprep.subr.bf16.mxu0 %v19512_v57  ;;  %v19536_v61 = vld [vmem:[%s21611_s26 + $0x3544] ss:$16 sps:$4 sm:$0xff]  }
 0x3c9   : > { %13942 = vmatprep.subr.bf16.mxu1 %v19515_v15  ;;  %v19539_v57 = vld [vmem:[%s21611_s26 + $0x3744] ss:$16 sps:$4 sm:$0xff]   ;;  %v19534_v15 = vld [vmem:[%s21611_s26 + $0x3540] ss:$16 sps:$4 sm:$0xff]  }
 0x3cb   : > { %13902 = vmatpush2.bf16.msra.mxu0 %v19510_v28  ;;  %v19537_v28 = vld [vmem:[%s21611_s26 + $0x3740] ss:$16 sps:$4 sm:$0xff]  }
 0x3cc   : > { %13943 = vmatpush2.bf16.msra.mxu1 %v19513_v59  ;;  %13903 = vmatprep.subr.bf16.mxu0 %v19518_v7  ;;  %v19542_v59 = vld [vmem:[%s21611_s26 + $0x3524] ss:$16 sps:$4 sm:$0xff]  }
 0x3cd   : > { %13944 = vmatprep.subr.bf16.mxu1 %v19521_v25  ;;  %v19545_v7 = vld [vmem:[%s21611_s26 + $0x3724] ss:$16 sps:$4 sm:$0xff]   ;;  %v19540_v25 = vld [vmem:[%s21611_s26 + $0x3520] ss:$16 sps:$4 sm:$0xff]  }
 0x3cf   : > { %13904 = vmatpush2.bf16.msra.mxu0 %v19516_v21  ;;  %v19543_v21 = vld [vmem:[%s21611_s26 + $0x3720] ss:$16 sps:$4 sm:$0xff]  }
 0x3d0   : > { %13945 = vmatpush2.bf16.msra.mxu1 %v19519_v6  ;;  %13905 = vmatprep.subr.bf16.mxu0 %v19524_v16  ;;  %v19548_v6 = vld [vmem:[%s21611_s26 + $0x3504] ss:$16 sps:$4 sm:$0xff]  }
 0x3d1   : > { %13946 = vmatprep.subr.bf16.mxu1 %v19527_v60  ;;  %v19551_v16 = vld [vmem:[%s21611_s26 + $0x3704] ss:$16 sps:$4 sm:$0xff]   ;;  %v19546_v60 = vld [vmem:[%s21611_s26 + $0x3500] ss:$16 sps:$4 sm:$0xff]  }
 0x3d3   : > { %13906 = vmatpush2.bf16.msra.mxu0 %v19522_v29  ;;  %v19549_v29 = vld [vmem:[%s21611_s26 + $0x3700] ss:$16 sps:$4 sm:$0xff]  }
 0x3d4   : > { %13947 = vmatpush2.bf16.msra.mxu1 %v19525_v27  ;;  %13907 = vmatprep.subr.bf16.mxu0 %v19530_v18  ;;  %v449_v27 = vld [vmem:[%s21629_s22 + $0x1a0] sm:$0xff]  ;;  %v451_v18 = vld [vmem:[%s21629_s22 + $0x1b0] sm:$0xff] }
 0x3d5   : > { %13948 = vmatprep.subr.bf16.mxu1 %v19533_v43  ;;  %v19554_v43 = vld [vmem:[%s21611_s26 + $0x38e4] ss:$16 sps:$4 sm:$0xff]  }
 0x3d7   : > { %13908 = vmatpush2.bf16.msra.mxu0 %v19528_v58  ;;  %v19557_v58 = vld [vmem:[%s21611_s26 + $0x3ae4] ss:$16 sps:$4 sm:$0xff]  }
 0x3d8   : > { %13949 = vmatpush2.bf16.msra.mxu1 %v19531_v35  ;;  %13909 = vmatprep.subr.bf16.mxu0 %v19536_v61  ;;  %v22806_v35 = vpack.c.bf16 %v449_v27, %v449_v27  ;;  %v22808_v61 = vpack.c.bf16 %v451_v18, %v451_v18 }
 0x3d9   : > { %13950 = vmatprep.subr.bf16.mxu1 %v19539_v57  ;;  %v454_v57 = vld [vmem:[%s21629_s22 + $0x1c8] sm:$0xff] }
 0x3da   : > { %24355 = vst [vmem:[#allocation26_spill] sm:$0xff] %v22806_v35  ;;  %24356 = vst [vmem:[#allocation27_spill] sm:$0xff] %v22808_v61 }
 0x3db   : > { %13910 = vmatpush2.bf16.msra.mxu0 %v19534_v15  ;;  %v456_v15 = vld [vmem:[%s21629_s22 + $0x1d8] sm:$0xff] }
 0x3dc   : > { %13951 = vmatpush2.bf16.msra.mxu1 %v19537_v28  ;;  %13911 = vmatprep.subr.bf16.mxu0 %v19542_v59  ;;  %v19552_v28 = vld [vmem:[%s21611_s26 + $0x38e0] ss:$16 sps:$4 sm:$0xff]   ;;  %v22820_v27 = vpack.c.bf16 %v456_v15, %v456_v15 }
 0x3dd   : > { %13952 = vmatprep.subr.bf16.mxu1 %v19545_v7  ;;  %v19555_v59 = vld [vmem:[%s21611_s26 + $0x3ae0] ss:$16 sps:$4 sm:$0xff]   ;;  %v19560_v7 = vld [vmem:[%s21611_s26 + $0x38c4] ss:$16 sps:$4 sm:$0xff]  }
 0x3de   : > { %24358 = vst [vmem:[#allocation29_spill] sm:$0xff] %v22820_v27 }
 0x3df   : > { %13912 = vmatpush2.bf16.msra.mxu0 %v19540_v25  ;;  %v19563_v25 = vld [vmem:[%s21611_s26 + $0x3ac4] ss:$16 sps:$4 sm:$0xff]  }
 0x3e0   : > { %13953 = vmatpush2.bf16.msra.mxu1 %v19543_v21  ;;  %13913 = vmatprep.subr.bf16.mxu0 %v19548_v6  ;;  %v19558_v21 = vld [vmem:[%s21611_s26 + $0x38c0] ss:$16 sps:$4 sm:$0xff]  }
 0x3e1   : > { %13954 = vmatprep.subr.bf16.mxu1 %v19551_v16  ;;  %v19561_v6 = vld [vmem:[%s21611_s26 + $0x3ac0] ss:$16 sps:$4 sm:$0xff]   ;;  %v22818_v16 = vpack.c.bf16 %v454_v57, %v454_v57  ;;  %v19569_v57 = vld [vmem:[%s21611_s26 + $0x3aa4] ss:$16 sps:$4 sm:$0xff]  }
 0x3e3   : > { %13914 = vmatpush2.bf16.msra.mxu0 %v19546_v60  ;;  %24357 = vst [vmem:[#allocation28_spill] sm:$0xff] %v22818_v16 }
 0x3e4   : > { %13955 = vmatpush2.bf16.msra.mxu1 %v19549_v29  ;;  %13965 = vmatprep.subr.bf16.mxu0 %v19554_v43 }
 0x3e5   : > { %14006 = vmatprep.subr.bf16.mxu1 %v19557_v58  ;;  %v19566_v58 = vld [vmem:[%s21611_s26 + $0x38a4] ss:$16 sps:$4 sm:$0xff]  }
 0x3e6   : > { %v13671_v18 = vpop.f32.mrf.mxu0  ;;  %13916 = vmatmul.mubr.bf16.vlgmr.msra.gmra.mxu0 %v22806_v35  ;;  %v19567_v35 = vld [vmem:[%s21611_s26 + $0x3aa0] ss:$16 sps:$4 sm:$0xff]  }
 0x3e7   : > { %v13712_v56 = vpop.f32.mrf.mxu1  ;;  %13957 = vmatmul.mubr.bf16.vlgmr.msra.gmra.mxu1 %v22808_v61  ;;  %v13672_v60 = vadd.f32 %v13671_v18, %v22741_v36  ;;  %13966 = vmatpush1.bf16.msra.mxu0 %v19552_v28  ;;  %v19570_v18 = vld [vmem:[%s21611_s26 + $0x3880] ss:$16 sps:$4 sm:$0xff]  }
 0x3e8   : > { %14007 = vmatpush1.bf16.msra.mxu1 %v19555_v59  ;;  %v13673_v29 = vpop.f32.mrf.mxu0  ;;  %13967 = vmatprep.subr.bf16.mxu0 %v19560_v7  ;;  %v19660_v61 = vld [vmem:[%s21611_s26 + $0x3ca0] ss:$16 sps:$4 sm:$0xff]  }
 0x3e9   : > { %v13714_v43 = vpop.f32.mrf.mxu1  ;;  %14008 = vmatprep.subr.bf16.mxu1 %v19563_v25  ;;  %v22827_v15 = vadd.f32 %v13712_v56, %v13672_v60  ;;  %v13674_v14 = vadd.f32 %v13673_v29, %v22748_v17  ;;  %13997 = vmatprep.mubr.bf16.mxu0 %v22818_v16  ;;  %v19572_v17 = vld [vmem:[%s21611_s26 + $0x3884] ss:$16 sps:$4 sm:$0xff]   ;;  %v19573_v60 = vld [vmem:[%s21611_s26 + $0x3a80] ss:$16 sps:$4 sm:$0xff]  }
 0x3ea   : > { %14038 = vmatprep.mubr.bf16.mxu1 %v22820_v27  ;;  %v13675_v36 = vpop.f32.mrf.mxu0  ;;  %v19575_v25 = vld [vmem:[%s21611_s26 + $0x3a84] ss:$16 sps:$4 sm:$0xff]   ;;  %v19579_v29 = vld [vmem:[%s21611_s26 + $0x3a60] ss:$16 sps:$4 sm:$0xff]  }
 0x3eb   : > { %v13716_v28 = vpop.f32.mrf.mxu1  ;;  %v22834_v59 = vadd.f32 %v13714_v43, %v13674_v14  ;;  %13968 = vmatpush1.bf16.msra.mxu0 %v19558_v21  ;;  %v19578_v14 = vld [vmem:[%s21611_s26 + $0x3864] ss:$16 sps:$4 sm:$0xff]   ;;  %v19582_v43 = vld [vmem:[%s21611_s26 + $0x3840] ss:$16 sps:$4 sm:$0xff]  }
 0x3ec   : > { %14009 = vmatpush1.bf16.msra.mxu1 %v19561_v6  ;;  %v13676_v56 = vpop.f32.mrf.mxu0  ;;  %13969 = vmatprep.subr.bf16.mxu0 %v19566_v58  ;;  %v19581_v21 = vld [vmem:[%s21611_s26 + $0x3a64] ss:$16 sps:$4 sm:$0xff]   ;;  %v19576_v6 = vld [vmem:[%s21611_s26 + $0x3860] ss:$16 sps:$4 sm:$0xff]  }
 0x3ed   : > { %v13717_v7 = vpop.f32.mrf.mxu1  ;;  %14010 = vmatprep.subr.bf16.mxu1 %v19569_v57  ;;  %v19585_v58 = vld [vmem:[%s21611_s26 + $0x3a40] ss:$16 sps:$4 sm:$0xff]   ;;  %v19590_v57 = vld [vmem:[%s21611_s26 + $0x3824] ss:$16 sps:$4 sm:$0xff]  }
 0x3ee   : > { %v19593_v36 = vld [vmem:[%s21611_s26 + $0x3a24] ss:$16 sps:$4 sm:$0xff]   ;;  %v19588_v28 = vld [vmem:[%s21611_s26 + $0x3820] ss:$16 sps:$4 sm:$0xff]  }
 0x3ef   : > { %13970 = vmatpush1.bf16.msra.mxu0 %v19564_v32  ;;  %v19584_v32 = vld [vmem:[%s21611_s26 + $0x3844] ss:$16 sps:$4 sm:$0xff]   ;;  %v19591_v56 = vld [vmem:[%s21611_s26 + $0x3a20] ss:$16 sps:$4 sm:$0xff]  }
 0x3f0   : > { %14011 = vmatpush1.bf16.msra.mxu1 %v19567_v35  ;;  %13971 = vmatprep.subr.bf16.mxu0 %v19572_v17  ;;  %v19587_v35 = vld [vmem:[%s21611_s26 + $0x3a44] ss:$16 sps:$4 sm:$0xff]   ;;  %v19657_v27 = vld [vmem:[%s21611_s26 + $0x3ec0] ss:$16 sps:$4 sm:$0xff]  }
 0x3f1   : > { %14012 = vmatprep.subr.bf16.mxu1 %v19575_v25  ;;  %v19596_v7 = vld [vmem:[%s21611_s26 + $0x3804] ss:$16 sps:$4 sm:$0xff]   ;;  %v19594_v25 = vld [vmem:[%s21611_s26 + $0x3800] ss:$16 sps:$4 sm:$0xff]  }
 0x3f2   : > { %v19599_v17 = vld [vmem:[%s21611_s26 + $0x3a04] ss:$16 sps:$4 sm:$0xff]  }
 0x3f3   : > { %13972 = vmatpush1.bf16.msra.mxu0 %v19570_v18  ;;  %v19597_v18 = vld [vmem:[%s21611_s26 + $0x3a00] ss:$16 sps:$4 sm:$0xff]  }
 0x3f4   : > { %14013 = vmatpush1.bf16.msra.mxu1 %v19573_v60  ;;  %13973 = vmatprep.subr.bf16.mxu0 %v19578_v14  ;;  %v19602_v60 = vld [vmem:[%s21611_s26 + $0x39e4] ss:$16 sps:$4 sm:$0xff]  }
 0x3f5   : > { %14014 = vmatprep.subr.bf16.mxu1 %v19581_v21  ;;  %v19605_v14 = vld [vmem:[%s21611_s26 + $0x3be4] ss:$16 sps:$4 sm:$0xff]   ;;  %v19600_v21 = vld [vmem:[%s21611_s26 + $0x39e0] ss:$16 sps:$4 sm:$0xff]  }
 0x3f7   : > { %13974 = vmatpush1.bf16.msra.mxu0 %v19576_v6  ;;  %v19603_v6 = vld [vmem:[%s21611_s26 + $0x3be0] ss:$16 sps:$4 sm:$0xff]  }
 0x3f8   : > { %14015 = vmatpush1.bf16.msra.mxu1 %v19579_v29  ;;  %13975 = vmatprep.subr.bf16.mxu0 %v19584_v32  ;;  %v19608_v29 = vld [vmem:[%s21611_s26 + $0x39c4] ss:$16 sps:$4 sm:$0xff]  }
 0x3f9   : > { %14016 = vmatprep.subr.bf16.mxu1 %v19587_v35  ;;  %v19611_v32 = vld [vmem:[%s21611_s26 + $0x3bc4] ss:$16 sps:$4 sm:$0xff]   ;;  %v19606_v35 = vld [vmem:[%s21611_s26 + $0x39c0] ss:$16 sps:$4 sm:$0xff]  }
 0x3fb   : > { %13976 = vmatpush1.bf16.msra.mxu0 %v19582_v43  ;;  %v19609_v43 = vld [vmem:[%s21611_s26 + $0x3bc0] ss:$16 sps:$4 sm:$0xff]  }
 0x3fc   : > { %14017 = vmatpush1.bf16.msra.mxu1 %v19585_v58  ;;  %13977 = vmatprep.subr.bf16.mxu0 %v19590_v57  ;;  %v19614_v58 = vld [vmem:[%s21611_s26 + $0x39a4] ss:$16 sps:$4 sm:$0xff]  }
 0x3fd   : > { %14018 = vmatprep.subr.bf16.mxu1 %v19593_v36  ;;  %v19617_v57 = vld [vmem:[%s21611_s26 + $0x3ba4] ss:$16 sps:$4 sm:$0xff]   ;;  %v19612_v36 = vld [vmem:[%s21611_s26 + $0x39a0] ss:$16 sps:$4 sm:$0xff]  }
 0x3ff   : > { %13978 = vmatpush1.bf16.msra.mxu0 %v19588_v28  ;;  %v19615_v28 = vld [vmem:[%s21611_s26 + $0x3ba0] ss:$16 sps:$4 sm:$0xff]  }
 0x400   : > { %14019 = vmatpush1.bf16.msra.mxu1 %v19591_v56  ;;  %13979 = vmatprep.subr.bf16.mxu0 %v19596_v7  ;;  %v19620_v56 = vld [vmem:[%s21611_s26 + $0x3984] ss:$16 sps:$4 sm:$0xff]  }
 0x401   : > { %14020 = vmatprep.subr.bf16.mxu1 %v19599_v17  ;;  %v19623_v7 = vld [vmem:[%s21611_s26 + $0x3b84] ss:$16 sps:$4 sm:$0xff]   ;;  %v19618_v17 = vld [vmem:[%s21611_s26 + $0x3980] ss:$16 sps:$4 sm:$0xff]  }
 0x403   : > { %13980 = vmatpush1.bf16.msra.mxu0 %v19594_v25  ;;  %v19621_v25 = vld [vmem:[%s21611_s26 + $0x3b80] ss:$16 sps:$4 sm:$0xff]  }
 0x404   : > { %14021 = vmatpush1.bf16.msra.mxu1 %v19597_v18  ;;  %13981 = vmatprep.subr.bf16.mxu0 %v19602_v60  ;;  %v19626_v18 = vld [vmem:[%s21611_s26 + $0x3964] ss:$16 sps:$4 sm:$0xff]  }
 0x405   : > { %14022 = vmatprep.subr.bf16.mxu1 %v19605_v14  ;;  %v19629_v60 = vld [vmem:[%s21611_s26 + $0x3b64] ss:$16 sps:$4 sm:$0xff]   ;;  %v19624_v14 = vld [vmem:[%s21611_s26 + $0x3960] ss:$16 sps:$4 sm:$0xff]  }
 0x407   : > { %13982 = vmatpush2.bf16.msra.mxu0 %v19600_v21  ;;  %v19627_v21 = vld [vmem:[%s21611_s26 + $0x3b60] ss:$16 sps:$4 sm:$0xff]  }
 0x408   : > { %14023 = vmatpush2.bf16.msra.mxu1 %v19603_v6  ;;  %13983 = vmatprep.subr.bf16.mxu0 %v19608_v29  ;;  %v19632_v6 = vld [vmem:[%s21611_s26 + $0x3944] ss:$16 sps:$4 sm:$0xff]  }
 0x409   : > { %14024 = vmatprep.subr.bf16.mxu1 %v19611_v32  ;;  %v19635_v29 = vld [vmem:[%s21611_s26 + $0x3b44] ss:$16 sps:$4 sm:$0xff]   ;;  %v19630_v32 = vld [vmem:[%s21611_s26 + $0x3940] ss:$16 sps:$4 sm:$0xff]  }
 0x40b   : > { %13984 = vmatpush2.bf16.msra.mxu0 %v19606_v35  ;;  %v19633_v35 = vld [vmem:[%s21611_s26 + $0x3b40] ss:$16 sps:$4 sm:$0xff]  }
 0x40c   : > { %14025 = vmatpush2.bf16.msra.mxu1 %v19609_v43  ;;  %13985 = vmatprep.subr.bf16.mxu0 %v19614_v58  ;;  %v19638_v43 = vld [vmem:[%s21611_s26 + $0x3924] ss:$16 sps:$4 sm:$0xff]  }
 0x40d   : > { %14026 = vmatprep.subr.bf16.mxu1 %v19617_v57  ;;  %v19641_v58 = vld [vmem:[%s21611_s26 + $0x3b24] ss:$16 sps:$4 sm:$0xff]   ;;  %v19636_v57 = vld [vmem:[%s21611_s26 + $0x3920] ss:$16 sps:$4 sm:$0xff]  }
 0x40f   : > { %13986 = vmatpush2.bf16.msra.mxu0 %v19612_v36  ;;  %v19639_v36 = vld [vmem:[%s21611_s26 + $0x3b20] ss:$16 sps:$4 sm:$0xff]  }
 0x410   : > { %14027 = vmatpush2.bf16.msra.mxu1 %v19615_v28  ;;  %13987 = vmatprep.subr.bf16.mxu0 %v19620_v56  ;;  %v19644_v28 = vld [vmem:[%s21611_s26 + $0x3904] ss:$16 sps:$4 sm:$0xff]  }
 0x411   : > { %14028 = vmatprep.subr.bf16.mxu1 %v19623_v7  ;;  %v19647_v56 = vld [vmem:[%s21611_s26 + $0x3b04] ss:$16 sps:$4 sm:$0xff]   ;;  %v19642_v7 = vld [vmem:[%s21611_s26 + $0x3900] ss:$16 sps:$4 sm:$0xff]  }
 0x413   : > { %13988 = vmatpush2.bf16.msra.mxu0 %v19618_v17  ;;  %v19645_v17 = vld [vmem:[%s21611_s26 + $0x3b00] ss:$16 sps:$4 sm:$0xff]  }
 0x414   : > { %14029 = vmatpush2.bf16.msra.mxu1 %v19621_v25  ;;  %13989 = vmatprep.subr.bf16.mxu0 %v19626_v18  ;;  %v453_v25 = vld [vmem:[%s21629_s22 + $0x1c0] sm:$0xff]  ;;  %v455_v18 = vld [vmem:[%s21629_s22 + $0x1d0] sm:$0xff] }
 0x415   : > { %14030 = vmatprep.subr.bf16.mxu1 %v19629_v60  ;;  %v19650_v60 = vld [vmem:[%s21611_s26 + $0x3ce4] ss:$16 sps:$4 sm:$0xff]  }
 0x417   : > { %13990 = vmatpush2.bf16.msra.mxu0 %v19624_v14  ;;  %v19653_v14 = vld [vmem:[%s21611_s26 + $0x3ee4] ss:$16 sps:$4 sm:$0xff]  }
 0x418   : > { %14031 = vmatpush2.bf16.msra.mxu1 %v19627_v21  ;;  %13991 = vmatprep.subr.bf16.mxu0 %v19632_v6  ;;  %v458_v21 = vld [vmem:[%s21629_s22 + $0x1e8] sm:$0xff]  ;;  %v460_v6 = vld [vmem:[%s21629_s22 + $0x1f8] sm:$0xff] }
 0x419   : > { %14032 = vmatprep.subr.bf16.mxu1 %v19635_v29  ;;  %v19648_v29 = vld [vmem:[%s21611_s26 + $0x3ce0] ss:$16 sps:$4 sm:$0xff]  }
 0x41b   : > { %13992 = vmatpush2.bf16.msra.mxu0 %v19630_v32  ;;  %v19651_v32 = vld [vmem:[%s21611_s26 + $0x3ee0] ss:$16 sps:$4 sm:$0xff]  }
 0x41c   : > { %14033 = vmatpush2.bf16.msra.mxu1 %v19633_v35  ;;  %13993 = vmatprep.subr.bf16.mxu0 %v19638_v43  ;;  %v22896_v35 = vpack.c.bf16 %v453_v25, %v453_v25  ;;  %v22898_v43 = vpack.c.bf16 %v455_v18, %v455_v18 }
 0x41d   : > { %14034 = vmatprep.subr.bf16.mxu1 %v19641_v58  ;;  %v19656_v58 = vld [vmem:[%s21611_s26 + $0x3cc4] ss:$16 sps:$4 sm:$0xff]  }
 0x41e   : > { %24359 = vst [vmem:[#allocation30_spill] sm:$0xff] %v22896_v35 }
 0x41f   : > { %13994 = vmatpush2.bf16.msra.mxu0 %v19636_v57  ;;  %v19659_v57 = vld [vmem:[%s21611_s26 + $0x3ec4] ss:$16 sps:$4 sm:$0xff]  }
 0x420   : > { %14035 = vmatpush2.bf16.msra.mxu1 %v19639_v36  ;;  %13995 = vmatprep.subr.bf16.mxu0 %v19644_v28  ;;  %v19654_v36 = vld [vmem:[%s21611_s26 + $0x3cc0] ss:$16 sps:$4 sm:$0xff]   ;;  %v22904_v28 = vpack.c.bf16 %v458_v21, %v458_v21 }
 0x421   : > { %14036 = vmatprep.subr.bf16.mxu1 %v19647_v56  ;;  %v22906_v56 = vpack.c.bf16 %v460_v6, %v460_v6 }
 0x423   : > { %13996 = vmatpush2.bf16.msra.mxu0 %v19642_v7  ;;  %24360 = vst [vmem:[#allocation31_spill] sm:$0xff] %v22906_v56 }
 0x424   : > { %14037 = vmatpush2.bf16.msra.mxu1 %v19645_v17  ;;  %14047 = vmatprep.subr.bf16.mxu0 %v19650_v60  ;;  %v19662_v60 = vld [vmem:[%s21611_s26 + $0x3ca4] ss:$16 sps:$4 sm:$0xff]  }
 0x425   : > { %14088 = vmatprep.subr.bf16.mxu1 %v19653_v14  ;;  %v19665_v14 = vld [vmem:[%s21611_s26 + $0x3ea4] ss:$16 sps:$4 sm:$0xff]  }
 0x426   : > { %v13753_v16 = vpop.f32.mrf.mxu0  ;;  %13998 = vmatmul.mubr.bf16.vlgmr.msra.gmra.mxu0 %v22896_v35  ;;  %v19663_v35 = vld [vmem:[%s21611_s26 + $0x3ea0] ss:$16 sps:$4 sm:$0xff]  }
 0x427   : > { %v13794_v25 = vpop.f32.mrf.mxu1  ;;  %14039 = vmatmul.mubr.bf16.vlgmr.msra.gmra.mxu1 %v22898_v43  ;;  %v13754_v7 = vadd.f32 %v13753_v16, %v22827_v15  ;;  %14048 = vmatpush1.bf16.msra.mxu0 %v19648_v29 }
 0x428   : > { %14089 = vmatpush1.bf16.msra.mxu1 %v19651_v32  ;;  %v13755_v17 = vpop.f32.mrf.mxu0  ;;  %14049 = vmatprep.subr.bf16.mxu0 %v19656_v58 }
 0x429   : > { %v13796_v18 = vpop.f32.mrf.mxu1  ;;  %14090 = vmatprep.subr.bf16.mxu1 %v19659_v57  ;;  %v22913_v21 = vadd.f32 %v13794_v25, %v13754_v7  ;;  %v13756_v6 = vadd.f32 %v13755_v17, %v22834_v59  ;;  %14079 = vmatprep.mubr.bf16.mxu0 %v22904_v28  ;;  %v19668_v59 = vld [vmem:[%s21611_s26 + $0x3c84] ss:$16 sps:$4 sm:$0xff]   ;;  %v19666_v25 = vld [vmem:[%s21611_s26 + $0x3c80] ss:$16 sps:$4 sm:$0xff]  }
 0x42a   : > { %14120 = vmatprep.mubr.bf16.mxu1 %v22906_v56  ;;  %v13757_v16 = vpop.f32.mrf.mxu0  ;;  %v19671_v57 = vld [vmem:[%s21611_s26 + $0x3e84] ss:$16 sps:$4 sm:$0xff]   ;;  %v19669_v7 = vld [vmem:[%s21611_s26 + $0x3e80] ss:$16 sps:$4 sm:$0xff]   ;;  %v19756_v56 = vld [vmem:[%s21611_s26 + $0xa8] ss:$16 sps:$4 sm:$0xff]  }
 0x42b   : > { %v13798_v15 = vpop.f32.mrf.mxu1  ;;  %v22920_v29 = vadd.f32 %v13796_v18, %v13756_v6  ;;  %14050 = vmatpush1.bf16.msra.mxu0 %v19654_v36  ;;  %v19674_v36 = vld [vmem:[%s21611_s26 + $0x3c64] ss:$16 sps:$4 sm:$0xff]   ;;  %v19672_v17 = vld [vmem:[%s21611_s26 + $0x3c60] ss:$16 sps:$4 sm:$0xff]  }
 0x42c   : > { %14091 = vmatpush1.bf16.msra.mxu1 %v19657_v27  ;;  %v13758_v32 = vpop.f32.mrf.mxu0  ;;  %14051 = vmatprep.subr.bf16.mxu0 %v19662_v60  ;;  %v19677_v27 = vld [vmem:[%s21611_s26 + $0x3e64] ss:$16 sps:$4 sm:$0xff]   ;;  %v19675_v18 = vld [vmem:[%s21611_s26 + $0x3e60] ss:$16 sps:$4 sm:$0xff]  }
 0x42d   : > { %v13799_v58 = vpop.f32.mrf.mxu1  ;;  %14092 = vmatprep.subr.bf16.mxu1 %v19665_v14  ;;  %v19678_v60 = vld [vmem:[%s21611_s26 + $0x3c40] ss:$16 sps:$4 sm:$0xff]   ;;  %v19686_v6 = vld [vmem:[%s21611_s26 + $0x3c24] ss:$16 sps:$4 sm:$0xff]  }
 0x42e   : > { %v19681_v14 = vld [vmem:[%s21611_s26 + $0x3e40] ss:$16 sps:$4 sm:$0xff]   ;;  %v19689_v16 = vld [vmem:[%s21611_s26 + $0x3e24] ss:$16 sps:$4 sm:$0xff]  }
 0x42f   : > { %14052 = vmatpush1.bf16.msra.mxu0 %v19660_v61  ;;  %v19680_v61 = vld [vmem:[%s21611_s26 + $0x3c44] ss:$16 sps:$4 sm:$0xff]   ;;  %v19684_v15 = vld [vmem:[%s21611_s26 + $0x3c20] ss:$16 sps:$4 sm:$0xff]  }
 0x430   : > { %14093 = vmatpush1.bf16.msra.mxu1 %v19663_v35  ;;  %14053 = vmatprep.subr.bf16.mxu0 %v19668_v59  ;;  %v19683_v35 = vld [vmem:[%s21611_s26 + $0x3e44] ss:$16 sps:$4 sm:$0xff]   ;;  %v19687_v32 = vld [vmem:[%s21611_s26 + $0x3e20] ss:$16 sps:$4 sm:$0xff]  }
 0x431   : > { %14094 = vmatprep.subr.bf16.mxu1 %v19671_v57  ;;  %v19692_v58 = vld [vmem:[%s21611_s26 + $0x3c04] ss:$16 sps:$4 sm:$0xff]   ;;  %v19690_v57 = vld [vmem:[%s21611_s26 + $0x3c00] ss:$16 sps:$4 sm:$0xff]  }
 0x432   : > { %v19695_v59 = vld [vmem:[%s21611_s26 + $0x3e04] ss:$16 sps:$4 sm:$0xff]  }
 0x433   : > { %14054 = vmatpush1.bf16.msra.mxu0 %v19666_v25  ;;  %v19693_v25 = vld [vmem:[%s21611_s26 + $0x3e00] ss:$16 sps:$4 sm:$0xff]  }
 0x434   : > { %14095 = vmatpush1.bf16.msra.mxu1 %v19669_v7  ;;  %14055 = vmatprep.subr.bf16.mxu0 %v19674_v36  ;;  %v19698_v7 = vld [vmem:[%s21611_s26 + $0x3de4] ss:$16 sps:$4 sm:$0xff]  }
 0x435   : > { %14096 = vmatprep.subr.bf16.mxu1 %v19677_v27  ;;  %v19701_v36 = vld [vmem:[%s21611_s26 + $0x3fe4] ss:$16 sps:$4 sm:$0xff]   ;;  %v19696_v27 = vld [vmem:[%s21611_s26 + $0x3de0] ss:$16 sps:$4 sm:$0xff]  }
 0x437   : > { %14056 = vmatpush1.bf16.msra.mxu0 %v19672_v17  ;;  %v19699_v17 = vld [vmem:[%s21611_s26 + $0x3fe0] ss:$16 sps:$4 sm:$0xff]  }
 0x438   : > { %14097 = vmatpush1.bf16.msra.mxu1 %v19675_v18  ;;  %14057 = vmatprep.subr.bf16.mxu0 %v19680_v61  ;;  %v19704_v18 = vld [vmem:[%s21611_s26 + $0x3dc4] ss:$16 sps:$4 sm:$0xff]  }
 0x439   : > { %14098 = vmatprep.subr.bf16.mxu1 %v19683_v35  ;;  %v19707_v61 = vld [vmem:[%s21611_s26 + $0x3fc4] ss:$16 sps:$4 sm:$0xff]   ;;  %v19702_v35 = vld [vmem:[%s21611_s26 + $0x3dc0] ss:$16 sps:$4 sm:$0xff]  }
 0x43b   : > { %14058 = vmatpush1.bf16.msra.mxu0 %v19678_v60  ;;  %v19705_v60 = vld [vmem:[%s21611_s26 + $0x3fc0] ss:$16 sps:$4 sm:$0xff]  }
 0x43c   : > { %14099 = vmatpush1.bf16.msra.mxu1 %v19681_v14  ;;  %14059 = vmatprep.subr.bf16.mxu0 %v19686_v6  ;;  %v19710_v14 = vld [vmem:[%s21611_s26 + $0x3da4] ss:$16 sps:$4 sm:$0xff]  }
 0x43d   : > { %14100 = vmatprep.subr.bf16.mxu1 %v19689_v16  ;;  %v19713_v6 = vld [vmem:[%s21611_s26 + $0x3fa4] ss:$16 sps:$4 sm:$0xff]   ;;  %v19708_v16 = vld [vmem:[%s21611_s26 + $0x3da0] ss:$16 sps:$4 sm:$0xff]  }
 0x43f   : > { %14060 = vmatpush1.bf16.msra.mxu0 %v19684_v15  ;;  %v19711_v15 = vld [vmem:[%s21611_s26 + $0x3fa0] ss:$16 sps:$4 sm:$0xff]  }
 0x440   : > { %14101 = vmatpush1.bf16.msra.mxu1 %v19687_v32  ;;  %14061 = vmatprep.subr.bf16.mxu0 %v19692_v58  ;;  %v19716_v32 = vld [vmem:[%s21611_s26 + $0x3d84] ss:$16 sps:$4 sm:$0xff]  }
 0x441   : > { %14102 = vmatprep.subr.bf16.mxu1 %v19695_v59  ;;  %v19719_v58 = vld [vmem:[%s21611_s26 + $0x3f84] ss:$16 sps:$4 sm:$0xff]   ;;  %v19714_v59 = vld [vmem:[%s21611_s26 + $0x3d80] ss:$16 sps:$4 sm:$0xff]  }
 0x443   : > { %14062 = vmatpush1.bf16.msra.mxu0 %v19690_v57  ;;  %v19717_v57 = vld [vmem:[%s21611_s26 + $0x3f80] ss:$16 sps:$4 sm:$0xff]  }
 0x444   : > { %14103 = vmatpush1.bf16.msra.mxu1 %v19693_v25  ;;  %14063 = vmatprep.subr.bf16.mxu0 %v19698_v7  ;;  %v19722_v25 = vld [vmem:[%s21611_s26 + $0x3d64] ss:$16 sps:$4 sm:$0xff]  }
 0x445   : > { %14104 = vmatprep.subr.bf16.mxu1 %v19701_v36  ;;  %v19725_v7 = vld [vmem:[%s21611_s26 + $0x3f64] ss:$16 sps:$4 sm:$0xff]   ;;  %v19720_v36 = vld [vmem:[%s21611_s26 + $0x3d60] ss:$16 sps:$4 sm:$0xff]  }
 0x447   : > { %14064 = vmatpush2.bf16.msra.mxu0 %v19696_v27  ;;  %v19723_v27 = vld [vmem:[%s21611_s26 + $0x3f60] ss:$16 sps:$4 sm:$0xff]  }
 0x448   : > { %14105 = vmatpush2.bf16.msra.mxu1 %v19699_v17  ;;  %14065 = vmatprep.subr.bf16.mxu0 %v19704_v18  ;;  %v19728_v17 = vld [vmem:[%s21611_s26 + $0x3d44] ss:$16 sps:$4 sm:$0xff]  }
 0x449   : > { %14106 = vmatprep.subr.bf16.mxu1 %v19707_v61  ;;  %v19731_v18 = vld [vmem:[%s21611_s26 + $0x3f44] ss:$16 sps:$4 sm:$0xff]   ;;  %v19726_v61 = vld [vmem:[%s21611_s26 + $0x3d40] ss:$16 sps:$4 sm:$0xff]  }
 0x44b   : > { %14066 = vmatpush2.bf16.msra.mxu0 %v19702_v35  ;;  %v19729_v35 = vld [vmem:[%s21611_s26 + $0x3f40] ss:$16 sps:$4 sm:$0xff]  }
 0x44c   : > { %14107 = vmatpush2.bf16.msra.mxu1 %v19705_v60  ;;  %14067 = vmatprep.subr.bf16.mxu0 %v19710_v14  ;;  %v19734_v60 = vld [vmem:[%s21611_s26 + $0x3d24] ss:$16 sps:$4 sm:$0xff]  }
 0x44d   : > { %14108 = vmatprep.subr.bf16.mxu1 %v19713_v6  ;;  %v19737_v14 = vld [vmem:[%s21611_s26 + $0x3f24] ss:$16 sps:$4 sm:$0xff]   ;;  %v19732_v6 = vld [vmem:[%s21611_s26 + $0x3d20] ss:$16 sps:$4 sm:$0xff]  }
 0x44f   : > { %14068 = vmatpush2.bf16.msra.mxu0 %v19708_v16  ;;  %v19735_v16 = vld [vmem:[%s21611_s26 + $0x3f20] ss:$16 sps:$4 sm:$0xff]  }
 0x450   : > { %14109 = vmatpush2.bf16.msra.mxu1 %v19711_v15  ;;  %14069 = vmatprep.subr.bf16.mxu0 %v19716_v32  ;;  %v19740_v15 = vld [vmem:[%s21611_s26 + $0x3d04] ss:$16 sps:$4 sm:$0xff]  }
 0x451   : > { %14110 = vmatprep.subr.bf16.mxu1 %v19719_v58  ;;  %v19743_v32 = vld [vmem:[%s21611_s26 + $0x3f04] ss:$16 sps:$4 sm:$0xff]   ;;  %v19738_v58 = vld [vmem:[%s21611_s26 + $0x3d00] ss:$16 sps:$4 sm:$0xff]  }
 0x453   : > { %14070 = vmatpush2.bf16.msra.mxu0 %v19714_v59  ;;  %v19741_v59 = vld [vmem:[%s21611_s26 + $0x3f00] ss:$16 sps:$4 sm:$0xff]  }
 0x454   : > { %14111 = vmatpush2.bf16.msra.mxu1 %v19717_v57  ;;  %14071 = vmatprep.subr.bf16.mxu0 %v19722_v25  ;;  %v457_v57 = vld [vmem:[%s21629_s22 + $0x1e0] sm:$0xff]  ;;  %v459_v25 = vld [vmem:[%s21629_s22 + $0x1f0] sm:$0xff] }
 0x455   : > { %14112 = vmatprep.subr.bf16.mxu1 %v19725_v7  ;;  %v19746_v7 = vld [vmem:[%s21611_s26 + $0xec] ss:$16 sps:$4 sm:$0xff]  }
 0x457   : > { %14072 = vmatpush2.bf16.msra.mxu0 %v19720_v36  ;;  %v19749_v36 = vld [vmem:[%s21611_s26 + $0x2ec] ss:$16 sps:$4 sm:$0xff]  }
 0x458   : > { %14113 = vmatpush2.bf16.msra.mxu1 %v19723_v27  ;;  %14073 = vmatprep.subr.bf16.mxu0 %v19728_v17  ;;  %v19744_v27 = vld [vmem:[%s21611_s26 + $0xe8] ss:$16 sps:$4 sm:$0xff]  }
 0x459   : > { %14114 = vmatprep.subr.bf16.mxu1 %v19731_v18  ;;  %v19747_v17 = vld [vmem:[%s21611_s26 + $0x2e8] ss:$16 sps:$4 sm:$0xff]   ;;  %v22980_v18 = vpack.c.bf16 %v457_v57, %v457_v57  ;;  %v19758_v57 = vld [vmem:[%s21611_s26 + $0xac] ss:$16 sps:$4 sm:$0xff]  }
 0x45b   : > { %14074 = vmatpush2.bf16.msra.mxu0 %v19726_v61  ;;  %24361 = vst [vmem:[#allocation32_spill] sm:$0xff] %v22980_v18  ;;  %v22982_v61 = vpack.c.bf16 %v459_v25, %v459_v25  ;;  %v19761_v25 = vld [vmem:[%s21611_s26 + $0x2ac] ss:$16 sps:$4 sm:$0xff]  }
 0x45c   : > { %14115 = vmatpush2.bf16.msra.mxu1 %v19729_v35  ;;  %14075 = vmatprep.subr.bf16.mxu0 %v19734_v60  ;;  %v19752_v35 = vld [vmem:[%s21611_s26 + $0xcc] ss:$16 sps:$4 sm:$0xff]  }
 0x45d   : > { %14116 = vmatprep.subr.bf16.mxu1 %v19737_v14  ;;  %v19755_v60 = vld [vmem:[%s21611_s26 + $0x2cc] ss:$16 sps:$4 sm:$0xff]   ;;  %v19750_v14 = vld [vmem:[%s21611_s26 + $0xc8] ss:$16 sps:$4 sm:$0xff]  }
 0x45f   : > { %14076 = vmatpush2.bf16.msra.mxu0 %v19732_v6  ;;  %v19753_v6 = vld [vmem:[%s21611_s26 + $0x2c8] ss:$16 sps:$4 sm:$0xff]  }
 0x460   : > { %14117 = vmatpush2.bf16.msra.mxu1 %v19735_v16  ;;  %14077 = vmatprep.subr.bf16.mxu0 %v19740_v15 }
 0x461   : > { %14118 = vmatprep.subr.bf16.mxu1 %v19743_v32 }
 0x463   : > { %14078 = vmatpush2.bf16.msra.mxu0 %v19738_v58 }
 0x464   : > { %14119 = vmatpush2.bf16.msra.mxu1 %v19741_v59  ;;  %14129 = vmatprep.subr.bf16.mxu0 %v19746_v7 }
 0x465   : > { %14170 = vmatprep.subr.bf16.mxu1 %v19749_v36 }
 0x466   : > { %v13835_v16 = vpop.f32.mrf.mxu0  ;;  %14080 = vmatmul.mubr.bf16.vlgmr.msra.gmra.mxu0 %v22980_v18  ;;  %v19759_v18 = vld [vmem:[%s21611_s26 + $0x2a8] ss:$16 sps:$4 sm:$0xff]  }
 0x467   : > { %v13876_v15 = vpop.f32.mrf.mxu1  ;;  %14121 = vmatmul.mubr.bf16.vlgmr.msra.gmra.mxu1 %v22982_v61  ;;  %v13836_v32 = vadd.f32 %v13835_v16, %v22913_v21  ;;  %14130 = vmatpush1.bf16.msra.mxu0 %v19744_v27  ;;  %v19765_v16 = vld [vmem:[%s21611_s26 + $0x288] ss:$16 sps:$4 sm:$0xff]  }
 0x468   : > { %14171 = vmatpush1.bf16.msra.mxu1 %v19747_v17  ;;  %v13837_v58 = vpop.f32.mrf.mxu0  ;;  %14131 = vmatprep.subr.bf16.mxu0 %v19752_v35 }
 0x469   : > { %v13878_v59 = vpop.f32.mrf.mxu1  ;;  %14172 = vmatprep.subr.bf16.mxu1 %v19755_v60  ;;  %v22993_v7 = vadd.f32 %v13876_v15, %v13836_v32  ;;  %v13838_v36 = vadd.f32 %v13837_v58, %v22920_v29  ;;  %14161 = vmatprep.mubr.bf16.mxu0 %v21681_v51  ;;  %v19764_v29 = vld [vmem:[%s21611_s26 + $0x8c] ss:$16 sps:$4 sm:$0xff]   ;;  %v19768_v15 = vld [vmem:[%s21611_s26 + $0x68] ss:$16 sps:$4 sm:$0xff]  }
 0x46a   : > { %14202 = vmatprep.mubr.bf16.mxu1 %v21685_v54  ;;  %v13839_v21 = vpop.f32.mrf.mxu0  ;;  %v19767_v51 = vld [vmem:[%s21611_s26 + $0x28c] ss:$16 sps:$4 sm:$0xff]   ;;  %v19762_v54 = vld [vmem:[%s21611_s26 + $0x88] ss:$16 sps:$4 sm:$0xff]  }
 0x46b   : > { %v13880_v27 = vpop.f32.mrf.mxu1  ;;  %v23000_v17 = vadd.f32 %v13878_v59, %v13838_v36  ;;  %14132 = vmatpush1.bf16.msra.mxu0 %v19750_v14  ;;  %v19770_v14 = vld [vmem:[%s21611_s26 + $0x6c] ss:$16 sps:$4 sm:$0xff]   ;;  %v19771_v32 = vld [vmem:[%s21611_s26 + $0x268] ss:$16 sps:$4 sm:$0xff]  }
 0x46c   : > { %14173 = vmatpush1.bf16.msra.mxu1 %v19753_v6  ;;  %v13840_v35 = vpop.f32.mrf.mxu0  ;;  %14133 = vmatprep.subr.bf16.mxu0 %v19758_v57  ;;  %v19773_v6 = vld [vmem:[%s21611_s26 + $0x26c] ss:$16 sps:$4 sm:$0xff]   ;;  %v19774_v58 = vld [vmem:[%s21611_s26 + $0x48] ss:$16 sps:$4 sm:$0xff]  }
 0x46d   : > { %v13881_v60 = vpop.f32.mrf.mxu1  ;;  %14174 = vmatprep.subr.bf16.mxu1 %v19761_v25  ;;  %v19777_v59 = vld [vmem:[%s21611_s26 + $0x248] ss:$16 sps:$4 sm:$0xff]   ;;  %v19782_v57 = vld [vmem:[%s21611_s26 + $0x2c] ss:$16 sps:$4 sm:$0xff]  }
 0x46e   : > { %v19785_v25 = vld [vmem:[%s21611_s26 + $0x22c] ss:$16 sps:$4 sm:$0xff]   ;;  %v19780_v36 = vld [vmem:[%s21611_s26 + $0x28] ss:$16 sps:$4 sm:$0xff]  }
 0x46f   : > { %14134 = vmatpush1.bf16.msra.mxu0 %v19756_v56  ;;  %v19776_v56 = vld [vmem:[%s21611_s26 + $0x4c] ss:$16 sps:$4 sm:$0xff]   ;;  %v19783_v21 = vld [vmem:[%s21611_s26 + $0x228] ss:$16 sps:$4 sm:$0xff]  }
 0x470   : > { %14175 = vmatpush1.bf16.msra.mxu1 %v19759_v18  ;;  %14135 = vmatprep.subr.bf16.mxu0 %v19764_v29  ;;  %v19779_v18 = vld [vmem:[%s21611_s26 + $0x24c] ss:$16 sps:$4 sm:$0xff]   ;;  %v19786_v60 = vld [vmem:[%s21611_s26 + $0x8] ss:$16 sps:$4 sm:$0xff]  }
 0x471   : > { %14176 = vmatprep.subr.bf16.mxu1 %v19767_v51  ;;  %v19788_v27 = vld [vmem:[%s21611_s26 + $0xc] ss:$16 sps:$4 sm:$0xff]   ;;  %v19789_v29 = vld [vmem:[%s21611_s26 + $0x208] ss:$16 sps:$4 sm:$0xff]  }
 0x472   : > { %v19791_v35 = vld [vmem:[%s21611_s26 + $0x20c] ss:$16 sps:$4 sm:$0xff]  }
 0x473   : > { %14136 = vmatpush1.bf16.msra.mxu0 %v19762_v54  ;;  %v19794_v51 = vld [vmem:[%s21611_s26 + $0x1ec] ss:$16 sps:$4 sm:$0xff]  }
 0x474   : > { %14177 = vmatpush1.bf16.msra.mxu1 %v19765_v16  ;;  %14137 = vmatprep.subr.bf16.mxu0 %v19770_v14  ;;  %v19797_v54 = vld [vmem:[%s21611_s26 + $0x3ec] ss:$16 sps:$4 sm:$0xff]   ;;  %v19792_v16 = vld [vmem:[%s21611_s26 + $0x1e8] ss:$16 sps:$4 sm:$0xff]  }
 0x475   : > { %14178 = vmatprep.subr.bf16.mxu1 %v19773_v6  ;;  %v19795_v14 = vld [vmem:[%s21611_s26 + $0x3e8] ss:$16 sps:$4 sm:$0xff]   ;;  %v19800_v6 = vld [vmem:[%s21611_s26 + $0x1cc] ss:$16 sps:$4 sm:$0xff]  }
 0x477   : > { %14138 = vmatpush1.bf16.msra.mxu0 %v19768_v15  ;;  %v19803_v15 = vld [vmem:[%s21611_s26 + $0x3cc] ss:$16 sps:$4 sm:$0xff]  }
 0x478   : > { %14179 = vmatpush1.bf16.msra.mxu1 %v19771_v32  ;;  %14139 = vmatprep.subr.bf16.mxu0 %v19776_v56  ;;  %v19798_v32 = vld [vmem:[%s21611_s26 + $0x1c8] ss:$16 sps:$4 sm:$0xff]  }
 0x479   : > { %14180 = vmatprep.subr.bf16.mxu1 %v19779_v18  ;;  %v19801_v56 = vld [vmem:[%s21611_s26 + $0x3c8] ss:$16 sps:$4 sm:$0xff]   ;;  %v19806_v18 = vld [vmem:[%s21611_s26 + $0x1ac] ss:$16 sps:$4 sm:$0xff]  }
 0x47b   : > { %14140 = vmatpush1.bf16.msra.mxu0 %v19774_v58  ;;  %v19809_v58 = vld [vmem:[%s21611_s26 + $0x3ac] ss:$16 sps:$4 sm:$0xff]  }
 0x47c   : > { %14181 = vmatpush1.bf16.msra.mxu1 %v19777_v59  ;;  %14141 = vmatprep.subr.bf16.mxu0 %v19782_v57  ;;  %v19804_v59 = vld [vmem:[%s21611_s26 + $0x1a8] ss:$16 sps:$4 sm:$0xff]  }
 0x47d   : > { %14182 = vmatprep.subr.bf16.mxu1 %v19785_v25  ;;  %v19807_v57 = vld [vmem:[%s21611_s26 + $0x3a8] ss:$16 sps:$4 sm:$0xff]   ;;  %v19812_v25 = vld [vmem:[%s21611_s26 + $0x18c] ss:$16 sps:$4 sm:$0xff]  }
 0x47f   : > { %14142 = vmatpush1.bf16.msra.mxu0 %v19780_v36  ;;  %v19815_v36 = vld [vmem:[%s21611_s26 + $0x38c] ss:$16 sps:$4 sm:$0xff]  }
 0x480   : > { %14183 = vmatpush1.bf16.msra.mxu1 %v19783_v21  ;;  %14143 = vmatprep.subr.bf16.mxu0 %v19788_v27  ;;  %v19810_v21 = vld [vmem:[%s21611_s26 + $0x188] ss:$16 sps:$4 sm:$0xff]  }
 0x481   : > { %14184 = vmatprep.subr.bf16.mxu1 %v19791_v35  ;;  %v19813_v27 = vld [vmem:[%s21611_s26 + $0x388] ss:$16 sps:$4 sm:$0xff]   ;;  %v19818_v35 = vld [vmem:[%s21611_s26 + $0x16c] ss:$16 sps:$4 sm:$0xff]  }
 0x483   : > { %14144 = vmatpush1.bf16.msra.mxu0 %v19786_v60  ;;  %v19821_v60 = vld [vmem:[%s21611_s26 + $0x36c] ss:$16 sps:$4 sm:$0xff]  }
 0x484   : > { %14185 = vmatpush1.bf16.msra.mxu1 %v19789_v29  ;;  %14145 = vmatprep.subr.bf16.mxu0 %v19794_v51  ;;  %v19816_v29 = vld [vmem:[%s21611_s26 + $0x168] ss:$16 sps:$4 sm:$0xff]  }
 0x485   : > { %14186 = vmatprep.subr.bf16.mxu1 %v19797_v54  ;;  %v19819_v51 = vld [vmem:[%s21611_s26 + $0x368] ss:$16 sps:$4 sm:$0xff]   ;;  %v19824_v54 = vld [vmem:[%s21611_s26 + $0x14c] ss:$16 sps:$4 sm:$0xff]  }
 0x487   : > { %14146 = vmatpush2.bf16.msra.mxu0 %v19792_v16  ;;  %v19827_v16 = vld [vmem:[%s21611_s26 + $0x34c] ss:$16 sps:$4 sm:$0xff]  }
 0x488   : > { %14187 = vmatpush2.bf16.msra.mxu1 %v19795_v14  ;;  %14147 = vmatprep.subr.bf16.mxu0 %v19800_v6  ;;  %v19822_v14 = vld [vmem:[%s21611_s26 + $0x148] ss:$16 sps:$4 sm:$0xff]  }
 0x489   : > { %14188 = vmatprep.subr.bf16.mxu1 %v19803_v15  ;;  %v19825_v6 = vld [vmem:[%s21611_s26 + $0x348] ss:$16 sps:$4 sm:$0xff]   ;;  %v19830_v15 = vld [vmem:[%s21611_s26 + $0x12c] ss:$16 sps:$4 sm:$0xff]  }
 0x48b   : > { %14148 = vmatpush2.bf16.msra.mxu0 %v19798_v32  ;;  %v19833_v32 = vld [vmem:[%s21611_s26 + $0x32c] ss:$16 sps:$4 sm:$0xff]  }
 0x48c   : > { %14189 = vmatpush2.bf16.msra.mxu1 %v19801_v56  ;;  %14149 = vmatprep.subr.bf16.mxu0 %v19806_v18  ;;  %v19828_v56 = vld [vmem:[%s21611_s26 + $0x128] ss:$16 sps:$4 sm:$0xff]  }
 0x48d   : > { %14190 = vmatprep.subr.bf16.mxu1 %v19809_v58  ;;  %v19831_v18 = vld [vmem:[%s21611_s26 + $0x328] ss:$16 sps:$4 sm:$0xff]   ;;  %v19836_v58 = vld [vmem:[%s21611_s26 + $0x10c] ss:$16 sps:$4 sm:$0xff]  }
 0x48f   : > { %14150 = vmatpush2.bf16.msra.mxu0 %v19804_v59  ;;  %v19839_v59 = vld [vmem:[%s21611_s26 + $0x30c] ss:$16 sps:$4 sm:$0xff]  }
 0x490   : > { %14191 = vmatpush2.bf16.msra.mxu1 %v19807_v57  ;;  %14151 = vmatprep.subr.bf16.mxu0 %v19812_v25  ;;  %v19834_v57 = vld [vmem:[%s21611_s26 + $0x108] ss:$16 sps:$4 sm:$0xff]  }
 0x491   : > { %14192 = vmatprep.subr.bf16.mxu1 %v19815_v36  ;;  %v19837_v25 = vld [vmem:[%s21611_s26 + $0x308] ss:$16 sps:$4 sm:$0xff]   ;;  %v19842_v36 = vld [vmem:[%s21611_s26 + $0x4ec] ss:$16 sps:$4 sm:$0xff]  }
 0x493   : > { %14152 = vmatpush2.bf16.msra.mxu0 %v19810_v21  ;;  %v19845_v21 = vld [vmem:[%s21611_s26 + $0x6ec] ss:$16 sps:$4 sm:$0xff]  }
 0x494   : > { %14193 = vmatpush2.bf16.msra.mxu1 %v19813_v27  ;;  %14153 = vmatprep.subr.bf16.mxu0 %v19818_v35  ;;  %v19840_v27 = vld [vmem:[%s21611_s26 + $0x4e8] ss:$16 sps:$4 sm:$0xff]  }
 0x495   : > { %14194 = vmatprep.subr.bf16.mxu1 %v19821_v60  ;;  %v19843_v35 = vld [vmem:[%s21611_s26 + $0x6e8] ss:$16 sps:$4 sm:$0xff]   ;;  %v19848_v60 = vld [vmem:[%s21611_s26 + $0x4cc] ss:$16 sps:$4 sm:$0xff]  }
 0x497   : > { %14154 = vmatpush2.bf16.msra.mxu0 %v19816_v29  ;;  %v19851_v29 = vld [vmem:[%s21611_s26 + $0x6cc] ss:$16 sps:$4 sm:$0xff]  }
 0x498   : > { %14195 = vmatpush2.bf16.msra.mxu1 %v19819_v51  ;;  %14155 = vmatprep.subr.bf16.mxu0 %v19824_v54  ;;  %v19846_v51 = vld [vmem:[%s21611_s26 + $0x4c8] ss:$16 sps:$4 sm:$0xff]  }
 0x499   : > { %14196 = vmatprep.subr.bf16.mxu1 %v19827_v16 }
 0x49b   : > { %14156 = vmatpush2.bf16.msra.mxu0 %v19822_v14 }
 0x49c   : > { %14197 = vmatpush2.bf16.msra.mxu1 %v19825_v6  ;;  %14157 = vmatprep.subr.bf16.mxu0 %v19830_v15  ;;  %v19849_v6 = vld [vmem:[%s21611_s26 + $0x6c8] ss:$16 sps:$4 sm:$0xff]  }
 0x49d   : > { %14198 = vmatprep.subr.bf16.mxu1 %v19833_v32 }
 0x49f   : > { %14158 = vmatpush2.bf16.msra.mxu0 %v19828_v56  ;;  %v19854_v56 = vld [vmem:[%s21611_s26 + $0x4ac] ss:$16 sps:$4 sm:$0xff]  }
 0x4a0   : > { %14199 = vmatpush2.bf16.msra.mxu1 %v19831_v18  ;;  %14159 = vmatprep.subr.bf16.mxu0 %v19836_v58  ;;  %v19857_v18 = vld [vmem:[%s21611_s26 + $0x6ac] ss:$16 sps:$4 sm:$0xff]  }
 0x4a1   : > { %14200 = vmatprep.subr.bf16.mxu1 %v19839_v59 }
 0x4a3   : > { %14160 = vmatpush2.bf16.msra.mxu0 %v19834_v57  ;;  %v19855_v57 = vld [vmem:[%s21611_s26 + $0x6a8] ss:$16 sps:$4 sm:$0xff]  }
 0x4a4   : > { %14201 = vmatpush2.bf16.msra.mxu1 %v19837_v25  ;;  %14211 = vmatprep.subr.bf16.mxu0 %v19842_v36 }
 0x4a5   : > { %14252 = vmatprep.subr.bf16.mxu1 %v19845_v21 }
 0x4a6   : > { %v13917_v54 = vpop.f32.mrf.mxu0  ;;  %14162 = vmatmul.mubr.bf16.vlgmr.msra.gmra.mxu0 %v21708_v10  ;;  %v19852_v10 = vld [vmem:[%s21611_s26 + $0x4a8] ss:$16 sps:$4 sm:$0xff]  }
 0x4a7   : > { %v13958_v16 = vpop.f32.mrf.mxu1  ;;  %14203 = vmatmul.mubr.bf16.vlgmr.msra.gmra.mxu1 %v21710_v11  ;;  %v13918_v14 = vadd.f32 %v13917_v54, %v22993_v7  ;;  %14212 = vmatpush1.bf16.msra.mxu0 %v19840_v27  ;;  %v19861_v27 = vld [vmem:[%s21611_s26 + $0x688] ss:$16 sps:$4 sm:$0xff]   ;;  %v19872_v54 = vld [vmem:[%s21611_s26 + $0x44c] ss:$16 sps:$4 sm:$0xff]  }
 0x4a8   : > { %14253 = vmatpush1.bf16.msra.mxu1 %v19843_v35  ;;  %v13919_v15 = vpop.f32.mrf.mxu0  ;;  %14213 = vmatprep.subr.bf16.mxu0 %v19848_v60  ;;  %v19866_v35 = vld [vmem:[%s21611_s26 + $0x46c] ss:$16 sps:$4 sm:$0xff]  }
 0x4a9   : > { %v13960_v32 = vpop.f32.mrf.mxu1  ;;  %14254 = vmatprep.subr.bf16.mxu1 %v19851_v29  ;;  %v23067_v58 = vadd.f32 %v13958_v16, %v13918_v14  ;;  %v13920_v59 = vadd.f32 %v13919_v15, %v23000_v17  ;;  %14243 = vmatprep.mubr.bf16.mxu0 %v21741_v39  ;;  %v19860_v17 = vld [vmem:[%s21611_s26 + $0x48c] ss:$16 sps:$4 sm:$0xff]   ;;  %v19864_v29 = vld [vmem:[%s21611_s26 + $0x468] ss:$16 sps:$4 sm:$0xff]  }
 0x4aa   : > { %14284 = vmatprep.mubr.bf16.mxu1 %v21745_v42  ;;  %v13921_v11 = vpop.f32.mrf.mxu0  ;;  %v19863_v39 = vld [vmem:[%s21611_s26 + $0x68c] ss:$16 sps:$4 sm:$0xff]   ;;  %v19858_v42 = vld [vmem:[%s21611_s26 + $0x488] ss:$16 sps:$4 sm:$0xff]  }
 0x4ab   : > { %v13962_v7 = vpop.f32.mrf.mxu1  ;;  %v23074_v25 = vadd.f32 %v13960_v32, %v13920_v59  ;;  %14214 = vmatpush1.bf16.msra.mxu0 %v19846_v51  ;;  %v19869_v60 = vld [vmem:[%s21611_s26 + $0x66c] ss:$16 sps:$4 sm:$0xff]   ;;  %v19867_v51 = vld [vmem:[%s21611_s26 + $0x668] ss:$16 sps:$4 sm:$0xff]  }
 0x4ac   : > { %14255 = vmatpush1.bf16.msra.mxu1 %v19849_v6  ;;  %v13922_v36 = vpop.f32.mrf.mxu0  ;;  %14215 = vmatprep.subr.bf16.mxu0 %v19854_v56  ;;  %v19875_v16 = vld [vmem:[%s21611_s26 + $0x64c] ss:$16 sps:$4 sm:$0xff]   ;;  %v19870_v14 = vld [vmem:[%s21611_s26 + $0x448] ss:$16 sps:$4 sm:$0xff]  }
 0x4ad   : > { %v13963_v21 = vpop.f32.mrf.mxu1  ;;  %14256 = vmatprep.subr.bf16.mxu1 %v19857_v18  ;;  %v19873_v6 = vld [vmem:[%s21611_s26 + $0x648] ss:$16 sps:$4 sm:$0xff]   ;;  %v19878_v15 = vld [vmem:[%s21611_s26 + $0x42c] ss:$16 sps:$4 sm:$0xff]  }
 0x4ae   : > { %v19881_v32 = vld [vmem:[%s21611_s26 + $0x62c] ss:$16 sps:$4 sm:$0xff]   ;;  %v19876_v56 = vld [vmem:[%s21611_s26 + $0x428] ss:$16 sps:$4 sm:$0xff]  }
 0x4af   : > { %14216 = vmatpush1.bf16.msra.mxu0 %v19852_v10  ;;  %v19879_v18 = vld [vmem:[%s21611_s26 + $0x628] ss:$16 sps:$4 sm:$0xff]   ;;  %v19884_v59 = vld [vmem:[%s21611_s26 + $0x40c] ss:$16 sps:$4 sm:$0xff]  }
 0x4b0   : > { %14257 = vmatpush1.bf16.msra.mxu1 %v19855_v57  ;;  %14217 = vmatprep.subr.bf16.mxu0 %v19860_v17  ;;  %v19887_v10 = vld [vmem:[%s21611_s26 + $0x60c] ss:$16 sps:$4 sm:$0xff]   ;;  %v19882_v57 = vld [vmem:[%s21611_s26 + $0x408] ss:$16 sps:$4 sm:$0xff]  }
 0x4b1   : > { %14258 = vmatprep.subr.bf16.mxu1 %v19863_v39  ;;  %v19885_v11 = vld [vmem:[%s21611_s26 + $0x608] ss:$16 sps:$4 sm:$0xff]   ;;  %v19890_v7 = vld [vmem:[%s21611_s26 + $0x5ec] ss:$16 sps:$4 sm:$0xff]  }
 0x4b2   : > { %v19893_v36 = vld [vmem:[%s21611_s26 + $0x7ec] ss:$16 sps:$4 sm:$0xff]   ;;  %v19888_v21 = vld [vmem:[%s21611_s26 + $0x5e8] ss:$16 sps:$4 sm:$0xff]  }
 0x4b3   : > { %14218 = vmatpush1.bf16.msra.mxu0 %v19858_v42  ;;  %v19891_v17 = vld [vmem:[%s21611_s26 + $0x7e8] ss:$16 sps:$4 sm:$0xff]   ;;  %v19896_v39 = vld [vmem:[%s21611_s26 + $0x5cc] ss:$16 sps:$4 sm:$0xff]  }
 0x4b4   : > { %14259 = vmatpush1.bf16.msra.mxu1 %v19861_v27  ;;  %14219 = vmatprep.subr.bf16.mxu0 %v19866_v35  ;;  %v19899_v42 = vld [vmem:[%s21611_s26 + $0x7cc] ss:$16 sps:$4 sm:$0xff]   ;;  %v19894_v27 = vld [vmem:[%s21611_s26 + $0x5c8] ss:$16 sps:$4 sm:$0xff]  }
 0x4b5   : > { %14260 = vmatprep.subr.bf16.mxu1 %v19869_v60  ;;  %v19897_v35 = vld [vmem:[%s21611_s26 + $0x7c8] ss:$16 sps:$4 sm:$0xff]   ;;  %v19902_v60 = vld [vmem:[%s21611_s26 + $0x5ac] ss:$16 sps:$4 sm:$0xff]  }
 0x4b7   : > { %14220 = vmatpush1.bf16.msra.mxu0 %v19864_v29  ;;  %v19905_v29 = vld [vmem:[%s21611_s26 + $0x7ac] ss:$16 sps:$4 sm:$0xff]  }
 0x4b8   : > { %14261 = vmatpush1.bf16.msra.mxu1 %v19867_v51  ;;  %14221 = vmatprep.subr.bf16.mxu0 %v19872_v54  ;;  %v19900_v51 = vld [vmem:[%s21611_s26 + $0x5a8] ss:$16 sps:$4 sm:$0xff]  }
 0x4b9   : > { %14262 = vmatprep.subr.bf16.mxu1 %v19875_v16  ;;  %v19903_v54 = vld [vmem:[%s21611_s26 + $0x7a8] ss:$16 sps:$4 sm:$0xff]   ;;  %v19908_v16 = vld [vmem:[%s21611_s26 + $0x58c] ss:$16 sps:$4 sm:$0xff]  }
 0x4bb   : > { %14222 = vmatpush1.bf16.msra.mxu0 %v19870_v14  ;;  %v19911_v14 = vld [vmem:[%s21611_s26 + $0x78c] ss:$16 sps:$4 sm:$0xff]  }
 0x4bc   : > { %14263 = vmatpush1.bf16.msra.mxu1 %v19873_v6  ;;  %14223 = vmatprep.subr.bf16.mxu0 %v19878_v15  ;;  %v19906_v6 = vld [vmem:[%s21611_s26 + $0x588] ss:$16 sps:$4 sm:$0xff]  }
 0x4bd   : > { %14264 = vmatprep.subr.bf16.mxu1 %v19881_v32  ;;  %v19909_v15 = vld [vmem:[%s21611_s26 + $0x788] ss:$16 sps:$4 sm:$0xff]   ;;  %v19914_v32 = vld [vmem:[%s21611_s26 + $0x56c] ss:$16 sps:$4 sm:$0xff]  }
 0x4bf   : > { %14224 = vmatpush1.bf16.msra.mxu0 %v19876_v56  ;;  %v19917_v56 = vld [vmem:[%s21611_s26 + $0x76c] ss:$16 sps:$4 sm:$0xff]  }
 0x4c0   : > { %14265 = vmatpush1.bf16.msra.mxu1 %v19879_v18  ;;  %14225 = vmatprep.subr.bf16.mxu0 %v19884_v59  ;;  %v19912_v18 = vld [vmem:[%s21611_s26 + $0x568] ss:$16 sps:$4 sm:$0xff]  }
 0x4c1   : > { %14266 = vmatprep.subr.bf16.mxu1 %v19887_v10  ;;  %v19915_v59 = vld [vmem:[%s21611_s26 + $0x768] ss:$16 sps:$4 sm:$0xff]   ;;  %v19920_v10 = vld [vmem:[%s21611_s26 + $0x54c] ss:$16 sps:$4 sm:$0xff]  }
 0x4c3   : > { %14226 = vmatpush1.bf16.msra.mxu0 %v19882_v57  ;;  %v19923_v57 = vld [vmem:[%s21611_s26 + $0x74c] ss:$16 sps:$4 sm:$0xff]  }
 0x4c4   : > { %14267 = vmatpush1.bf16.msra.mxu1 %v19885_v11  ;;  %14227 = vmatprep.subr.bf16.mxu0 %v19890_v7  ;;  %v19918_v11 = vld [vmem:[%s21611_s26 + $0x548] ss:$16 sps:$4 sm:$0xff]  }
 0x4c5   : > { %14268 = vmatprep.subr.bf16.mxu1 %v19893_v36  ;;  %v19921_v7 = vld [vmem:[%s21611_s26 + $0x748] ss:$16 sps:$4 sm:$0xff]   ;;  %v19926_v36 = vld [vmem:[%s21611_s26 + $0x52c] ss:$16 sps:$4 sm:$0xff]  }
 0x4c7   : > { %14228 = vmatpush2.bf16.msra.mxu0 %v19888_v21  ;;  %v19929_v21 = vld [vmem:[%s21611_s26 + $0x72c] ss:$16 sps:$4 sm:$0xff]  }
 0x4c8   : > { %14269 = vmatpush2.bf16.msra.mxu1 %v19891_v17  ;;  %14229 = vmatprep.subr.bf16.mxu0 %v19896_v39  ;;  %v19924_v17 = vld [vmem:[%s21611_s26 + $0x528] ss:$16 sps:$4 sm:$0xff]  }
 0x4c9   : > { %14270 = vmatprep.subr.bf16.mxu1 %v19899_v42  ;;  %v19927_v39 = vld [vmem:[%s21611_s26 + $0x728] ss:$16 sps:$4 sm:$0xff]   ;;  %v19932_v42 = vld [vmem:[%s21611_s26 + $0x50c] ss:$16 sps:$4 sm:$0xff]  }
 0x4cb   : > { %14230 = vmatpush2.bf16.msra.mxu0 %v19894_v27  ;;  %v19935_v27 = vld [vmem:[%s21611_s26 + $0x70c] ss:$16 sps:$4 sm:$0xff]  }
 0x4cc   : > { %14271 = vmatpush2.bf16.msra.mxu1 %v19897_v35  ;;  %14231 = vmatprep.subr.bf16.mxu0 %v19902_v60  ;;  %v19930_v35 = vld [vmem:[%s21611_s26 + $0x508] ss:$16 sps:$4 sm:$0xff]  }
 0x4cd   : > { %14272 = vmatprep.subr.bf16.mxu1 %v19905_v29  ;;  %v19933_v60 = vld [vmem:[%s21611_s26 + $0x708] ss:$16 sps:$4 sm:$0xff]   ;;  %v19938_v29 = vld [vmem:[%s21611_s26 + $0x8ec] ss:$16 sps:$4 sm:$0xff]  }
 0x4cf   : > { %14232 = vmatpush2.bf16.msra.mxu0 %v19900_v51  ;;  %v19941_v51 = vld [vmem:[%s21611_s26 + $0xaec] ss:$16 sps:$4 sm:$0xff]  }
 0x4d0   : > { %14273 = vmatpush2.bf16.msra.mxu1 %v19903_v54  ;;  %14233 = vmatprep.subr.bf16.mxu0 %v19908_v16  ;;  %v19936_v54 = vld [vmem:[%s21611_s26 + $0x8e8] ss:$16 sps:$4 sm:$0xff]  }
 0x4d1   : > { %14274 = vmatprep.subr.bf16.mxu1 %v19911_v14  ;;  %v19939_v16 = vld [vmem:[%s21611_s26 + $0xae8] ss:$16 sps:$4 sm:$0xff]   ;;  %v19944_v14 = vld [vmem:[%s21611_s26 + $0x8cc] ss:$16 sps:$4 sm:$0xff]  }
 0x4d3   : > { %14234 = vmatpush2.bf16.msra.mxu0 %v19906_v6  ;;  %v19947_v6 = vld [vmem:[%s21611_s26 + $0xacc] ss:$16 sps:$4 sm:$0xff]  }
 0x4d4   : > { %14275 = vmatpush2.bf16.msra.mxu1 %v19909_v15  ;;  %14235 = vmatprep.subr.bf16.mxu0 %v19914_v32 }
 0x4d5   : > { %14276 = vmatprep.subr.bf16.mxu1 %v19917_v56  ;;  %v19942_v56 = vld [vmem:[%s21611_s26 + $0x8c8] ss:$16 sps:$4 sm:$0xff]  }
 0x4d7   : > { %14236 = vmatpush2.bf16.msra.mxu0 %v19912_v18  ;;  %v19945_v18 = vld [vmem:[%s21611_s26 + $0xac8] ss:$16 sps:$4 sm:$0xff]  }
 0x4d8   : > { %14277 = vmatpush2.bf16.msra.mxu1 %v19915_v59  ;;  %14237 = vmatprep.subr.bf16.mxu0 %v19920_v10 }
 0x4d9   : > { %14278 = vmatprep.subr.bf16.mxu1 %v19923_v57  ;;  %v19950_v57 = vld [vmem:[%s21611_s26 + $0x8ac] ss:$16 sps:$4 sm:$0xff]  }
 0x4db   : > { %14238 = vmatpush2.bf16.msra.mxu0 %v19918_v11  ;;  %v19953_v11 = vld [vmem:[%s21611_s26 + $0xaac] ss:$16 sps:$4 sm:$0xff]  }
 0x4dc   : > { %14279 = vmatpush2.bf16.msra.mxu1 %v19921_v7  ;;  %14239 = vmatprep.subr.bf16.mxu0 %v19926_v36  ;;  %v19948_v7 = vld [vmem:[%s21611_s26 + $0x8a8] ss:$16 sps:$4 sm:$0xff]  }
 0x4dd   : > { %14280 = vmatprep.subr.bf16.mxu1 %v19929_v21  ;;  %v19951_v36 = vld [vmem:[%s21611_s26 + $0xaa8] ss:$16 sps:$4 sm:$0xff]  }
 0x4df   : > { %14240 = vmatpush2.bf16.msra.mxu0 %v19924_v17 }
 0x4e0   : > { %14281 = vmatpush2.bf16.msra.mxu1 %v19927_v39  ;;  %14241 = vmatprep.subr.bf16.mxu0 %v19932_v42  ;;  %v19956_v39 = vld [vmem:[%s21611_s26 + $0x88c] ss:$16 sps:$4 sm:$0xff]   ;;  %v19957_v42 = vld [vmem:[%s21611_s26 + $0xa88] ss:$16 sps:$4 sm:$0xff]  }
 0x4e1   : > { %14282 = vmatprep.subr.bf16.mxu1 %v19935_v27  ;;  %v19962_v27 = vld [vmem:[%s21611_s26 + $0x86c] ss:$16 sps:$4 sm:$0xff]  }
 0x4e3   : > { %14242 = vmatpush2.bf16.msra.mxu0 %v19930_v35  ;;  %v19965_v35 = vld [vmem:[%s21611_s26 + $0xa6c] ss:$16 sps:$4 sm:$0xff]  }
 0x4e4   : > { %14283 = vmatpush2.bf16.msra.mxu1 %v19933_v60  ;;  %14293 = vmatprep.subr.bf16.mxu0 %v19938_v29  ;;  %v19960_v60 = vld [vmem:[%s21611_s26 + $0x868] ss:$16 sps:$4 sm:$0xff]  }
 0x4e5   : > { %14334 = vmatprep.subr.bf16.mxu1 %v19941_v51  ;;  %v19963_v29 = vld [vmem:[%s21611_s26 + $0xa68] ss:$16 sps:$4 sm:$0xff]   ;;  %v19968_v51 = vld [vmem:[%s21611_s26 + $0x84c] ss:$16 sps:$4 sm:$0xff]  }
 0x4e6   : > { %v23134_v15 = vpop.f32.mrf.mxu0  ;;  %14244 = vmatmul.mubr.bf16.vlgmr.msra.gmra.mxu0 %v21788_v22 }
 0x4e7   : > { %v23136_v32 = vpop.f32.mrf.mxu1  ;;  %14285 = vmatmul.mubr.bf16.vlgmr.msra.gmra.mxu1 %v21790_v23  ;;  %14294 = vmatpush1.bf16.msra.mxu0 %v19936_v54  ;;  %v19971_v54 = vld [vmem:[%s21611_s26 + $0xa4c] ss:$16 sps:$4 sm:$0xff]  }
 0x4e8   : > { %14335 = vmatpush1.bf16.msra.mxu1 %v19939_v16  ;;  %v23142_v59 = vpop.f32.mrf.mxu0  ;;  %14295 = vmatprep.subr.bf16.mxu0 %v19944_v14  ;;  %v19966_v16 = vld [vmem:[%s21611_s26 + $0x848] ss:$16 sps:$4 sm:$0xff]  }
 0x4e9   : > { %v23144_v10 = vpop.f32.mrf.mxu1  ;;  %14336 = vmatprep.subr.bf16.mxu1 %v19947_v6  ;;  %14325 = vmatprep.mubr.bf16.mxu0 %v21801_v31  ;;  %v19959_v31 = vld [vmem:[%s21611_s26 + $0xa8c] ss:$16 sps:$4 sm:$0xff]   ;;  %v19969_v14 = vld [vmem:[%s21611_s26 + $0xa48] ss:$16 sps:$4 sm:$0xff]  }
 0x4ea   : > { %14366 = vmatprep.mubr.bf16.mxu1 %v21805_v34  ;;  %v14003_v22 = vpop.f32.mrf.mxu0  ;;  %v19954_v34 = vld [vmem:[%s21611_s26 + $0x888] ss:$16 sps:$4 sm:$0xff]   ;;  %v19974_v6 = vld [vmem:[%s21611_s26 + $0x82c] ss:$16 sps:$4 sm:$0xff]  }
 0x4eb   : > { %v14044_v23 = vpop.f32.mrf.mxu1  ;;  %14296 = vmatpush1.bf16.msra.mxu0 %v19942_v56  ;;  %v19977_v56 = vld [vmem:[%s21611_s26 + $0xa2c] ss:$16 sps:$4 sm:$0xff]  }
 0x4ec   : > { %14337 = vmatpush1.bf16.msra.mxu1 %v19945_v18  ;;  %v14004_v21 = vpop.f32.mrf.mxu0  ;;  %14297 = vmatprep.subr.bf16.mxu0 %v19950_v57  ;;  %v19972_v18 = vld [vmem:[%s21611_s26 + $0x828] ss:$16 sps:$4 sm:$0xff]   ;;  %v19983_v22 = vld [vmem:[%s21611_s26 + $0xa0c] ss:$16 sps:$4 sm:$0xff]  }
 0x4ed   : > { %v14045_v17 = vpop.f32.mrf.mxu1  ;;  %14338 = vmatprep.subr.bf16.mxu1 %v19953_v11  ;;  %v19975_v57 = vld [vmem:[%s21611_s26 + $0xa28] ss:$16 sps:$4 sm:$0xff]   ;;  %v19980_v11 = vld [vmem:[%s21611_s26 + $0x80c] ss:$16 sps:$4 sm:$0xff]  }
 0x4ee   : > { %v19978_v23 = vld [vmem:[%s21611_s26 + $0x808] ss:$16 sps:$4 sm:$0xff]   ;;  %v19989_v21 = vld [vmem:[%s21611_s26 + $0xbec] ss:$16 sps:$4 sm:$0xff]  }
 0x4ef   : > { %14298 = vmatpush1.bf16.msra.mxu0 %v19948_v7  ;;  %v19981_v7 = vld [vmem:[%s21611_s26 + $0xa08] ss:$16 sps:$4 sm:$0xff]  }
 0x4f0   : > { %14339 = vmatpush1.bf16.msra.mxu1 %v19951_v36  ;;  %14299 = vmatprep.subr.bf16.mxu0 %v19956_v39  ;;  %v19986_v36 = vld [vmem:[%s21611_s26 + $0x9ec] ss:$16 sps:$4 sm:$0xff]   ;;  %v19984_v17 = vld [vmem:[%s21611_s26 + $0x9e8] ss:$16 sps:$4 sm:$0xff]  }
 0x4f1   : > { %14340 = vmatprep.subr.bf16.mxu1 %v19959_v31  ;;  %v19987_v39 = vld [vmem:[%s21611_s26 + $0xbe8] ss:$16 sps:$4 sm:$0xff]   ;;  %v19992_v31 = vld [vmem:[%s21611_s26 + $0x9cc] ss:$16 sps:$4 sm:$0xff]  }
 0x4f3   : > { %14300 = vmatpush1.bf16.msra.mxu0 %v19954_v34  ;;  %v19995_v34 = vld [vmem:[%s21611_s26 + $0xbcc] ss:$16 sps:$4 sm:$0xff]  }
 0x4f4   : > { %14341 = vmatpush1.bf16.msra.mxu1 %v19957_v42  ;;  %14301 = vmatprep.subr.bf16.mxu0 %v19962_v27  ;;  %v19990_v42 = vld [vmem:[%s21611_s26 + $0x9c8] ss:$16 sps:$4 sm:$0xff]  }
 0x4f5   : > { %14342 = vmatprep.subr.bf16.mxu1 %v19965_v35  ;;  %v19993_v27 = vld [vmem:[%s21611_s26 + $0xbc8] ss:$16 sps:$4 sm:$0xff]   ;;  %v19998_v35 = vld [vmem:[%s21611_s26 + $0x9ac] ss:$16 sps:$4 sm:$0xff]  }
 0x4f7   : > { %14302 = vmatpush1.bf16.msra.mxu0 %v19960_v60  ;;  %v20001_v60 = vld [vmem:[%s21611_s26 + $0xbac] ss:$16 sps:$4 sm:$0xff]  }
 0x4f8   : > { %14343 = vmatpush1.bf16.msra.mxu1 %v19963_v29  ;;  %14303 = vmatprep.subr.bf16.mxu0 %v19968_v51  ;;  %v19996_v29 = vld [vmem:[%s21611_s26 + $0x9a8] ss:$16 sps:$4 sm:$0xff]  }
 0x4f9   : > { %14344 = vmatprep.subr.bf16.mxu1 %v19971_v54  ;;  %v19999_v51 = vld [vmem:[%s21611_s26 + $0xba8] ss:$16 sps:$4 sm:$0xff]   ;;  %v20004_v54 = vld [vmem:[%s21611_s26 + $0x98c] ss:$16 sps:$4 sm:$0xff]  }
 0x4fb   : > { %14304 = vmatpush1.bf16.msra.mxu0 %v19966_v16  ;;  %v20007_v16 = vld [vmem:[%s21611_s26 + $0xb8c] ss:$16 sps:$4 sm:$0xff]  }
 0x4fc   : > { %14345 = vmatpush1.bf16.msra.mxu1 %v19969_v14  ;;  %14305 = vmatprep.subr.bf16.mxu0 %v19974_v6  ;;  %v20002_v14 = vld [vmem:[%s21611_s26 + $0x988] ss:$16 sps:$4 sm:$0xff]  }
 0x4fd   : > { %14346 = vmatprep.subr.bf16.mxu1 %v19977_v56  ;;  %v20005_v6 = vld [vmem:[%s21611_s26 + $0xb88] ss:$16 sps:$4 sm:$0xff]   ;;  %v20010_v56 = vld [vmem:[%s21611_s26 + $0x96c] ss:$16 sps:$4 sm:$0xff]  }
 0x4ff   : > { %14306 = vmatpush1.bf16.msra.mxu0 %v19972_v18  ;;  %v20013_v18 = vld [vmem:[%s21611_s26 + $0xb6c] ss:$16 sps:$4 sm:$0xff]  }
 0x500   : > { %14347 = vmatpush1.bf16.msra.mxu1 %v19975_v57  ;;  %14307 = vmatprep.subr.bf16.mxu0 %v19980_v11  ;;  %v20008_v57 = vld [vmem:[%s21611_s26 + $0x968] ss:$16 sps:$4 sm:$0xff]  }
 0x501   : > { %14348 = vmatprep.subr.bf16.mxu1 %v19983_v22  ;;  %v20011_v11 = vld [vmem:[%s21611_s26 + $0xb68] ss:$16 sps:$4 sm:$0xff]   ;;  %v20016_v22 = vld [vmem:[%s21611_s26 + $0x94c] ss:$16 sps:$4 sm:$0xff]  }
 0x503   : > { %14308 = vmatpush1.bf16.msra.mxu0 %v19978_v23  ;;  %v20019_v23 = vld [vmem:[%s21611_s26 + $0xb4c] ss:$16 sps:$4 sm:$0xff]  }
 0x504   : > { %14349 = vmatpush1.bf16.msra.mxu1 %v19981_v7  ;;  %14309 = vmatprep.subr.bf16.mxu0 %v19986_v36  ;;  %v20014_v7 = vld [vmem:[%s21611_s26 + $0x948] ss:$16 sps:$4 sm:$0xff]  }
 0x505   : > { %14350 = vmatprep.subr.bf16.mxu1 %v19989_v21  ;;  %v20017_v36 = vld [vmem:[%s21611_s26 + $0xb48] ss:$16 sps:$4 sm:$0xff]   ;;  %v20022_v21 = vld [vmem:[%s21611_s26 + $0x92c] ss:$16 sps:$4 sm:$0xff]  }
 0x507   : > { %14310 = vmatpush2.bf16.msra.mxu0 %v19984_v17  ;;  %v20025_v17 = vld [vmem:[%s21611_s26 + $0xb2c] ss:$16 sps:$4 sm:$0xff]  }
 0x508   : > { %14351 = vmatpush2.bf16.msra.mxu1 %v19987_v39  ;;  %14311 = vmatprep.subr.bf16.mxu0 %v19992_v31  ;;  %v20020_v39 = vld [vmem:[%s21611_s26 + $0x928] ss:$16 sps:$4 sm:$0xff]  }
 0x509   : > { %14352 = vmatprep.subr.bf16.mxu1 %v19995_v34  ;;  %v20023_v31 = vld [vmem:[%s21611_s26 + $0xb28] ss:$16 sps:$4 sm:$0xff]   ;;  %v20028_v34 = vld [vmem:[%s21611_s26 + $0x90c] ss:$16 sps:$4 sm:$0xff]  }
 0x50b   : > { %14312 = vmatpush2.bf16.msra.mxu0 %v19990_v42  ;;  %v20031_v42 = vld [vmem:[%s21611_s26 + $0xb0c] ss:$16 sps:$4 sm:$0xff]  }
 0x50c   : > { %14353 = vmatpush2.bf16.msra.mxu1 %v19993_v27  ;;  %14313 = vmatprep.subr.bf16.mxu0 %v19998_v35  ;;  %v20026_v27 = vld [vmem:[%s21611_s26 + $0x908] ss:$16 sps:$4 sm:$0xff]  }
 0x50d   : > { %14354 = vmatprep.subr.bf16.mxu1 %v20001_v60  ;;  %v20029_v35 = vld [vmem:[%s21611_s26 + $0xb08] ss:$16 sps:$4 sm:$0xff]   ;;  %v20034_v60 = vld [vmem:[%s21611_s26 + $0xcec] ss:$16 sps:$4 sm:$0xff]  }
 0x50f   : > { %14314 = vmatpush2.bf16.msra.mxu0 %v19996_v29  ;;  %v20037_v29 = vld [vmem:[%s21611_s26 + $0xeec] ss:$16 sps:$4 sm:$0xff]  }
 0x510   : > { %14355 = vmatpush2.bf16.msra.mxu1 %v19999_v51  ;;  %14315 = vmatprep.subr.bf16.mxu0 %v20004_v54  ;;  %v14000_v51 = vadd.f32 %v23134_v15, %v23067_v58  ;;  %v14002_v54 = vadd.f32 %v23142_v59, %v23074_v25  ;;  %v20038_v15 = vld [vmem:[%s21611_s26 + $0xcc8] ss:$16 sps:$4 sm:$0xff]  }
 0x511   : > { %14356 = vmatprep.subr.bf16.mxu1 %v20007_v16  ;;  %v20032_v16 = vld [vmem:[%s21611_s26 + $0xce8] ss:$16 sps:$4 sm:$0xff]  }
 0x512   : > { %v14043_v58 = vadd.f32 %v23144_v10, %v14002_v54  ;;  %v20041_v59 = vld [vmem:[%s21611_s26 + $0xec8] ss:$16 sps:$4 sm:$0xff]   ;;  %v20058_v54 = vld [vmem:[%s21611_s26 + $0xc6c] ss:$16 sps:$4 sm:$0xff]  }
 0x513   : > { %14316 = vmatpush2.bf16.msra.mxu0 %v20002_v14  ;;  %v20035_v14 = vld [vmem:[%s21611_s26 + $0xee8] ss:$16 sps:$4 sm:$0xff]  }
 0x514   : > { %14357 = vmatpush2.bf16.msra.mxu1 %v20005_v6  ;;  %14317 = vmatprep.subr.bf16.mxu0 %v20010_v56  ;;  %v20040_v6 = vld [vmem:[%s21611_s26 + $0xccc] ss:$16 sps:$4 sm:$0xff]  }
 0x515   : > { %14358 = vmatprep.subr.bf16.mxu1 %v20013_v18  ;;  %v20043_v56 = vld [vmem:[%s21611_s26 + $0xecc] ss:$16 sps:$4 sm:$0xff]   ;;  %v14041_v18 = vadd.f32 %v23136_v32, %v14000_v51  ;;  %v20053_v51 = vld [vmem:[%s21611_s26 + $0xe88] ss:$16 sps:$4 sm:$0xff]  }
 0x516   : > { %v20046_v32 = vld [vmem:[%s21611_s26 + $0xcac] ss:$16 sps:$4 sm:$0xff]  }
 0x517   : > { %14318 = vmatpush2.bf16.msra.mxu0 %v20008_v57 }
 0x518   : > { %14359 = vmatpush2.bf16.msra.mxu1 %v20011_v11  ;;  %14319 = vmatprep.subr.bf16.mxu0 %v20016_v22  ;;  %v525_v22 = vld [vmem:[#allocation2 + $0x10] sm:$0xff] }
 0x519   : > { %14360 = vmatprep.subr.bf16.mxu1 %v20019_v23 }
 0x51b   : > { %14320 = vmatpush2.bf16.msra.mxu0 %v20014_v7 }
 0x51c   : > { %14361 = vmatpush2.bf16.msra.mxu1 %v20017_v36  ;;  %14321 = vmatprep.subr.bf16.mxu0 %v20022_v21  ;;  %v20049_v36 = vld [vmem:[%s21611_s26 + $0xeac] ss:$16 sps:$4 sm:$0xff]  }
 0x51d   : > { %14362 = vmatprep.subr.bf16.mxu1 %v20025_v17 }
 0x51f   : > { %14322 = vmatpush2.bf16.msra.mxu0 %v20020_v39 }
 0x520   : > { %14363 = vmatpush2.bf16.msra.mxu1 %v20023_v31  ;;  %14323 = vmatprep.subr.bf16.mxu0 %v20028_v34  ;;  %v20044_v34 = vld [vmem:[%s21611_s26 + $0xca8] ss:$16 sps:$4 sm:$0xff]  }
 0x521   : > { %14364 = vmatprep.subr.bf16.mxu1 %v20031_v42  ;;  %v20047_v42 = vld [vmem:[%s21611_s26 + $0xea8] ss:$16 sps:$4 sm:$0xff]  }
 0x523   : > { %14324 = vmatpush2.bf16.msra.mxu0 %v20026_v27 }
 0x524   : > { %14365 = vmatpush2.bf16.msra.mxu1 %v20029_v35  ;;  %14375 = vmatprep.subr.bf16.mxu0 %v20034_v60 }
 0x525   : > { %14416 = vmatprep.subr.bf16.mxu1 %v20037_v29  ;;  %v20050_v29 = vld [vmem:[%s21611_s26 + $0xc88] ss:$16 sps:$4 sm:$0xff]  }
 0x526   : > { %v14081_v57 = vpop.f32.mrf.mxu0  ;;  %14326 = vmatmul.mubr.bf16.vlgmr.msra.gmra.mxu0 %v21870_v44 }
 0x527   : > { %v14122_v11 = vpop.f32.mrf.mxu1  ;;  %14367 = vmatmul.mubr.bf16.vlgmr.msra.gmra.mxu1 %v21872_v45  ;;  %v14082_v25 = vadd.f32 %v14081_v57, %v14041_v18  ;;  %14376 = vmatpush1.bf16.msra.mxu0 %v20032_v16  ;;  %v526_v45 = vld [vmem:[#allocation2] sm:$0xff]  ;;  %v20062_v57 = vld [vmem:[%s21611_s26 + $0xc48] ss:$16 sps:$4 sm:$0xff]  }
 0x528   : > { %14417 = vmatpush1.bf16.msra.mxu1 %v20035_v14  ;;  %v14083_v23 = vpop.f32.mrf.mxu0  ;;  %14377 = vmatprep.subr.bf16.mxu0 %v20040_v6  ;;  %v20061_v16 = vld [vmem:[%s21611_s26 + $0xe6c] ss:$16 sps:$4 sm:$0xff]   ;;  %v20056_v14 = vld [vmem:[%s21611_s26 + $0xc68] ss:$16 sps:$4 sm:$0xff]  }
 0x529   : > { %v14124_v7 = vpop.f32.mrf.mxu1  ;;  %14418 = vmatprep.subr.bf16.mxu1 %v20043_v56  ;;  %v14123_v21 = vadd.f32 %v14122_v11, %v14082_v25  ;;  %v14084_v44 = vadd.f32 %v14083_v23, %v14043_v58  ;;  %14407 = vmatprep.mubr.bf16.mxu0 %v21878_v50  ;;  %v20052_v50 = vld [vmem:[%s21611_s26 + $0xc8c] ss:$16 sps:$4 sm:$0xff]   ;;  %v20059_v6 = vld [vmem:[%s21611_s26 + $0xe68] ss:$16 sps:$4 sm:$0xff]  }
 0x52a   : > { %14448 = vmatprep.mubr.bf16.mxu1 %v21880_v52  ;;  %v14085_v10 = vpop.f32.mrf.mxu0  ;;  %v20055_v52 = vld [vmem:[%s21611_s26 + $0xe8c] ss:$16 sps:$4 sm:$0xff]   ;;  %v20065_v11 = vld [vmem:[%s21611_s26 + $0xe48] ss:$16 sps:$4 sm:$0xff]  }
 0x52b   : > { %v14126_v17 = vpop.f32.mrf.mxu1  ;;  %v15441_v39 = vadd.f32 %v14123_v21, %v525_v22  ;;  %v14125_v31 = vadd.f32 %v14124_v7, %v14084_v44  ;;  %14378 = vmatpush1.bf16.msra.mxu0 %v20038_v15  ;;  %v20064_v56 = vld [vmem:[%s21611_s26 + $0xc4c] ss:$16 sps:$4 sm:$0xff]   ;;  %v20068_v15 = vld [vmem:[%s21611_s26 + $0xc28] ss:$16 sps:$4 sm:$0xff]  }
 0x52c   : > { %14419 = vmatpush1.bf16.msra.mxu1 %v20041_v59  ;;  %v14086_v27 = vpop.f32.mrf.mxu0  ;;  %14379 = vmatprep.subr.bf16.mxu0 %v20046_v32  ;;  %v20067_v18 = vld [vmem:[%s21611_s26 + $0xe4c] ss:$16 sps:$4 sm:$0xff]   ;;  %v20071_v59 = vld [vmem:[%s21611_s26 + $0xe28] ss:$16 sps:$4 sm:$0xff]  }
 0x52d   : > { %v14127_v35 = vpop.f32.mrf.mxu1  ;;  %14420 = vmatprep.subr.bf16.mxu1 %v20049_v36  ;;  %15445 = vst [vmem:[#allocation2 + $0x10] sm:$0xff] %v15441_v39  ;;  %v15442_v60 = vadd.f32 %v14125_v31, %v526_v45  ;;  %v20070_v58 = vld [vmem:[%s21611_s26 + $0xc2c] ss:$16 sps:$4 sm:$0xff]   ;;  %v20074_v7 = vld [vmem:[%s21611_s26 + $0xc08] ss:$16 sps:$4 sm:$0xff]  }
 0x52e   : > { %v20073_v25 = vld [vmem:[%s21611_s26 + $0xe2c] ss:$16 sps:$4 sm:$0xff]   ;;  %v20077_v32 = vld [vmem:[%s21611_s26 + $0xe08] ss:$16 sps:$4 sm:$0xff]  }
 0x52f   : > { %15446 = vst [vmem:[#allocation2] sm:$0xff] %v15442_v60  ;;  %14380 = vmatpush1.bf16.msra.mxu0 %v20044_v34  ;;  %v20076_v22 = vld [vmem:[%s21611_s26 + $0xc0c] ss:$16 sps:$4 sm:$0xff]   ;;  %v20080_v44 = vld [vmem:[%s21611_s26 + $0xde8] ss:$16 sps:$4 sm:$0xff]  }
 0x530   : > { %14421 = vmatpush1.bf16.msra.mxu1 %v20047_v42  ;;  %14381 = vmatprep.subr.bf16.mxu0 %v20052_v50  ;;  %v20079_v23 = vld [vmem:[%s21611_s26 + $0xe0c] ss:$16 sps:$4 sm:$0xff]   ;;  %v20083_v45 = vld [vmem:[%s21611_s26 + $0xfe8] ss:$16 sps:$4 sm:$0xff]  }
 0x531   : > { %14422 = vmatprep.subr.bf16.mxu1 %v20055_v52  ;;  %v20082_v36 = vld [vmem:[%s21611_s26 + $0xdec] ss:$16 sps:$4 sm:$0xff]   ;;  %v20086_v39 = vld [vmem:[%s21611_s26 + $0xdc8] ss:$16 sps:$4 sm:$0xff]  }
 0x532   : > { %v20085_v21 = vld [vmem:[%s21611_s26 + $0xfec] ss:$16 sps:$4 sm:$0xff]   ;;  %v20089_v31 = vld [vmem:[%s21611_s26 + $0xfc8] ss:$16 sps:$4 sm:$0xff]  }
 0x533   : > { %14382 = vmatpush1.bf16.msra.mxu0 %v20050_v29  ;;  %v20088_v10 = vld [vmem:[%s21611_s26 + $0xdcc] ss:$16 sps:$4 sm:$0xff]   ;;  %v20092_v27 = vld [vmem:[%s21611_s26 + $0xda8] ss:$16 sps:$4 sm:$0xff]  }
 0x534   : > { %14423 = vmatpush1.bf16.msra.mxu1 %v20053_v51  ;;  %14383 = vmatprep.subr.bf16.mxu0 %v20058_v54  ;;  %v20091_v17 = vld [vmem:[%s21611_s26 + $0xfcc] ss:$16 sps:$4 sm:$0xff]   ;;  %v20095_v35 = vld [vmem:[%s21611_s26 + $0xfa8] ss:$16 sps:$4 sm:$0xff]  }
 0x535   : > { %14424 = vmatprep.subr.bf16.mxu1 %v20061_v16  ;;  %v20094_v34 = vld [vmem:[%s21611_s26 + $0xdac] ss:$16 sps:$4 sm:$0xff]   ;;  %v20098_v60 = vld [vmem:[%s21611_s26 + $0xd88] ss:$16 sps:$4 sm:$0xff]  }
 0x536   : > { %v20097_v42 = vld [vmem:[%s21611_s26 + $0xfac] ss:$16 sps:$4 sm:$0xff]   ;;  %v20101_v29 = vld [vmem:[%s21611_s26 + $0xf88] ss:$16 sps:$4 sm:$0xff]  }
 0x537   : > { %14384 = vmatpush1.bf16.msra.mxu0 %v20056_v14  ;;  %v20100_v50 = vld [vmem:[%s21611_s26 + $0xd8c] ss:$16 sps:$4 sm:$0xff]   ;;  %v20104_v16 = vld [vmem:[%s21611_s26 + $0xd68] ss:$16 sps:$4 sm:$0xff]  }
 0x538   : > { %14425 = vmatpush1.bf16.msra.mxu1 %v20059_v6  ;;  %14385 = vmatprep.subr.bf16.mxu0 %v20064_v56  ;;  %v20103_v52 = vld [vmem:[%s21611_s26 + $0xf8c] ss:$16 sps:$4 sm:$0xff]   ;;  %v20107_v14 = vld [vmem:[%s21611_s26 + $0xf68] ss:$16 sps:$4 sm:$0xff]  }
 0x539   : > { %14426 = vmatprep.subr.bf16.mxu1 %v20067_v18  ;;  %v20106_v51 = vld [vmem:[%s21611_s26 + $0xd6c] ss:$16 sps:$4 sm:$0xff]   ;;  %v20110_v18 = vld [vmem:[%s21611_s26 + $0xd48] ss:$16 sps:$4 sm:$0xff]  }
 0x53a   : > { %v20109_v54 = vld [vmem:[%s21611_s26 + $0xf6c] ss:$16 sps:$4 sm:$0xff]  }
 0x53b   : > { %14386 = vmatpush1.bf16.msra.mxu0 %v20062_v57  ;;  %v20112_v6 = vld [vmem:[%s21611_s26 + $0xd4c] ss:$16 sps:$4 sm:$0xff]   ;;  %v20113_v57 = vld [vmem:[%s21611_s26 + $0xf48] ss:$16 sps:$4 sm:$0xff]  }
 0x53c   : > { %14427 = vmatpush1.bf16.msra.mxu1 %v20065_v11  ;;  %14387 = vmatprep.subr.bf16.mxu0 %v20070_v58  ;;  %v20115_v56 = vld [vmem:[%s21611_s26 + $0xf4c] ss:$16 sps:$4 sm:$0xff]  }
 0x53d   : > { %14428 = vmatprep.subr.bf16.mxu1 %v20073_v25  ;;  %v20118_v11 = vld [vmem:[%s21611_s26 + $0xd2c] ss:$16 sps:$4 sm:$0xff]   ;;  %v20116_v25 = vld [vmem:[%s21611_s26 + $0xd28] ss:$16 sps:$4 sm:$0xff]  }
 0x53e   : > { %v20121_v58 = vld [vmem:[%s21611_s26 + $0xf2c] ss:$16 sps:$4 sm:$0xff]  }
 0x53f   : > { %14388 = vmatpush1.bf16.msra.mxu0 %v20068_v15  ;;  %v20119_v15 = vld [vmem:[%s21611_s26 + $0xf28] ss:$16 sps:$4 sm:$0xff]  }
 0x540   : > { %14429 = vmatpush1.bf16.msra.mxu1 %v20071_v59  ;;  %14389 = vmatprep.subr.bf16.mxu0 %v20076_v22  ;;  %v20124_v59 = vld [vmem:[%s21611_s26 + $0xd0c] ss:$16 sps:$4 sm:$0xff]  }
 0x541   : > { %14430 = vmatprep.subr.bf16.mxu1 %v20079_v23  ;;  %v20127_v22 = vld [vmem:[%s21611_s26 + $0xf0c] ss:$16 sps:$4 sm:$0xff]   ;;  %v20122_v23 = vld [vmem:[%s21611_s26 + $0xd08] ss:$16 sps:$4 sm:$0xff]  }
 0x543   : > { %14390 = vmatpush1.bf16.msra.mxu0 %v20074_v7  ;;  %v20125_v7 = vld [vmem:[%s21611_s26 + $0xf08] ss:$16 sps:$4 sm:$0xff]  }
 0x544   : > { %14431 = vmatpush1.bf16.msra.mxu1 %v20077_v32  ;;  %14391 = vmatprep.subr.bf16.mxu0 %v20082_v36  ;;  %v20130_v32 = vld [vmem:[%s21611_s26 + $0x10ec] ss:$16 sps:$4 sm:$0xff]  }
 0x545   : > { %14432 = vmatprep.subr.bf16.mxu1 %v20085_v21  ;;  %v20133_v36 = vld [vmem:[%s21611_s26 + $0x12ec] ss:$16 sps:$4 sm:$0xff]   ;;  %v20128_v21 = vld [vmem:[%s21611_s26 + $0x10e8] ss:$16 sps:$4 sm:$0xff]  }
 0x547   : > { %14392 = vmatpush2.bf16.msra.mxu0 %v20080_v44  ;;  %v20131_v44 = vld [vmem:[%s21611_s26 + $0x12e8] ss:$16 sps:$4 sm:$0xff]  }
 0x548   : > { %14433 = vmatpush2.bf16.msra.mxu1 %v20083_v45  ;;  %14393 = vmatprep.subr.bf16.mxu0 %v20088_v10  ;;  %v20136_v45 = vld [vmem:[%s21611_s26 + $0x10cc] ss:$16 sps:$4 sm:$0xff]  }
 0x549   : > { %14434 = vmatprep.subr.bf16.mxu1 %v20091_v17  ;;  %v20139_v10 = vld [vmem:[%s21611_s26 + $0x12cc] ss:$16 sps:$4 sm:$0xff]  }
 0x54b   : > { %14394 = vmatpush2.bf16.msra.mxu0 %v20086_v39 }
 0x54c   : > { %14435 = vmatpush2.bf16.msra.mxu1 %v20089_v31  ;;  %14395 = vmatprep.subr.bf16.mxu0 %v20094_v34  ;;  %v20134_v34 = vld [vmem:[%s21611_s26 + $0x10c8] ss:$16 sps:$4 sm:$0xff]  }
 0x54d   : > { %14436 = vmatprep.subr.bf16.mxu1 %v20097_v42  ;;  %v20137_v42 = vld [vmem:[%s21611_s26 + $0x12c8] ss:$16 sps:$4 sm:$0xff]  }
 0x54f   : > { %14396 = vmatpush2.bf16.msra.mxu0 %v20092_v27 }
 0x550   : > { %14437 = vmatpush2.bf16.msra.mxu1 %v20095_v35  ;;  %14397 = vmatprep.subr.bf16.mxu0 %v20100_v50  ;;  %v20142_v50 = vld [vmem:[%s21611_s26 + $0x10ac] ss:$16 sps:$4 sm:$0xff]  }
 0x551   : > { %14438 = vmatprep.subr.bf16.mxu1 %v20103_v52  ;;  %v20145_v52 = vld [vmem:[%s21611_s26 + $0x12ac] ss:$16 sps:$4 sm:$0xff]  }
 0x553   : > { %14398 = vmatpush2.bf16.msra.mxu0 %v20098_v60 }
 0x554   : > { %14439 = vmatpush2.bf16.msra.mxu1 %v20101_v29  ;;  %14399 = vmatprep.subr.bf16.mxu0 %v20106_v51  ;;  %v20140_v29 = vld [vmem:[%s21611_s26 + $0x10a8] ss:$16 sps:$4 sm:$0xff]  }
 0x555   : > { %14440 = vmatprep.subr.bf16.mxu1 %v20109_v54  ;;  %v20143_v51 = vld [vmem:[%s21611_s26 + $0x12a8] ss:$16 sps:$4 sm:$0xff]  }
 0x557   : > { %14400 = vmatpush2.bf16.msra.mxu0 %v20104_v16 }
 0x558   : > { %14441 = vmatpush2.bf16.msra.mxu1 %v20107_v14  ;;  %14401 = vmatprep.subr.bf16.mxu0 %v20112_v6  ;;  %v20148_v14 = vld [vmem:[%s21611_s26 + $0x108c] ss:$16 sps:$4 sm:$0xff]   ;;  %v20149_v6 = vld [vmem:[%s21611_s26 + $0x1288] ss:$16 sps:$4 sm:$0xff]  }
 0x559   : > { %14442 = vmatprep.subr.bf16.mxu1 %v20115_v56  ;;  %v20154_v56 = vld [vmem:[%s21611_s26 + $0x106c] ss:$16 sps:$4 sm:$0xff]  }
 0x55b   : > { %14402 = vmatpush2.bf16.msra.mxu0 %v20110_v18  ;;  %v20157_v18 = vld [vmem:[%s21611_s26 + $0x126c] ss:$16 sps:$4 sm:$0xff]  }
 0x55c   : > { %14443 = vmatpush2.bf16.msra.mxu1 %v20113_v57  ;;  %14403 = vmatprep.subr.bf16.mxu0 %v20118_v11  ;;  %v20152_v57 = vld [vmem:[%s21611_s26 + $0x1068] ss:$16 sps:$4 sm:$0xff]  }
 0x55d   : > { %14444 = vmatprep.subr.bf16.mxu1 %v20121_v58  ;;  %v20155_v11 = vld [vmem:[%s21611_s26 + $0x1268] ss:$16 sps:$4 sm:$0xff]   ;;  %v20160_v58 = vld [vmem:[%s21611_s26 + $0x104c] ss:$16 sps:$4 sm:$0xff]  }
 0x55f   : > { %14404 = vmatpush2.bf16.msra.mxu0 %v20116_v25  ;;  %v20163_v25 = vld [vmem:[%s21611_s26 + $0x124c] ss:$16 sps:$4 sm:$0xff]  }
 0x560   : > { %14445 = vmatpush2.bf16.msra.mxu1 %v20119_v15  ;;  %14405 = vmatprep.subr.bf16.mxu0 %v20124_v59  ;;  %v20158_v15 = vld [vmem:[%s21611_s26 + $0x1048] ss:$16 sps:$4 sm:$0xff]  }
 0x561   : > { %14446 = vmatprep.subr.bf16.mxu1 %v20127_v22  ;;  %v20161_v59 = vld [vmem:[%s21611_s26 + $0x1248] ss:$16 sps:$4 sm:$0xff]   ;;  %v20166_v22 = vld [vmem:[%s21611_s26 + $0x102c] ss:$16 sps:$4 sm:$0xff]  }
 0x563   : > { %14406 = vmatpush2.bf16.msra.mxu0 %v20122_v23  ;;  %v20169_v23 = vld [vmem:[%s21611_s26 + $0x122c] ss:$16 sps:$4 sm:$0xff]  }
 0x564   : > { %14447 = vmatpush2.bf16.msra.mxu1 %v20125_v7  ;;  %14457 = vmatprep.subr.bf16.mxu0 %v20130_v32  ;;  %v20164_v7 = vld [vmem:[%s21611_s26 + $0x1028] ss:$16 sps:$4 sm:$0xff]  }
 0x565   : > { %14498 = vmatprep.subr.bf16.mxu1 %v20133_v36  ;;  %v20167_v32 = vld [vmem:[%s21611_s26 + $0x1228] ss:$16 sps:$4 sm:$0xff]   ;;  %v20172_v36 = vld [vmem:[%s21611_s26 + $0x100c] ss:$16 sps:$4 sm:$0xff]  }
 0x566   : > { %v14163_v17 = vpop.f32.mrf.mxu0  ;;  %14408 = vmatmul.mubr.bf16.vlgmr.msra.gmra.mxu0 %v21950_v4 }
 0x567   : > { %v14204_v39 = vpop.f32.mrf.mxu1  ;;  %14449 = vmatmul.mubr.bf16.vlgmr.msra.gmra.mxu1 %v21952_v5  ;;  %14458 = vmatpush1.bf16.msra.mxu0 %v20128_v21  ;;  %v20175_v21 = vld [vmem:[%s21611_s26 + $0x120c] ss:$16 sps:$4 sm:$0xff]  }
 0x568   : > { %v23286_v31 = vadd.f32 %v14204_v39, %v14163_v17  ;;  %14499 = vmatpush1.bf16.msra.mxu1 %v20131_v44  ;;  %v14165_v27 = vpop.f32.mrf.mxu0  ;;  %14459 = vmatprep.subr.bf16.mxu0 %v20136_v45  ;;  %v20170_v44 = vld [vmem:[%s21611_s26 + $0x1008] ss:$16 sps:$4 sm:$0xff]   ;;  %v20181_v17 = vld [vmem:[%s21611_s26 + $0x13ec] ss:$16 sps:$4 sm:$0xff]  }
 0x569   : > { %v14206_v35 = vpop.f32.mrf.mxu1  ;;  %14500 = vmatprep.subr.bf16.mxu1 %v20139_v10  ;;  %14489 = vmatprep.mubr.bf16.mxu0 %v21958_v12  ;;  %v20151_v12 = vld [vmem:[%s21611_s26 + $0x128c] ss:$16 sps:$4 sm:$0xff]   ;;  %v20173_v45 = vld [vmem:[%s21611_s26 + $0x1208] ss:$16 sps:$4 sm:$0xff]  }
 0x56a   : > { %v23292_v60 = vadd.f32 %v14206_v35, %v14165_v27  ;;  %14530 = vmatprep.mubr.bf16.mxu1 %v21960_v13  ;;  %v14167_v4 = vpop.f32.mrf.mxu0  ;;  %v20146_v13 = vld [vmem:[%s21611_s26 + $0x1088] ss:$16 sps:$4 sm:$0xff]   ;;  %v20178_v10 = vld [vmem:[%s21611_s26 + $0x11ec] ss:$16 sps:$4 sm:$0xff]  }
 0x56b   : > { %v14208_v5 = vpop.f32.mrf.mxu1  ;;  %14460 = vmatpush1.bf16.msra.mxu0 %v20134_v34  ;;  %v20176_v39 = vld [vmem:[%s21611_s26 + $0x11e8] ss:$16 sps:$4 sm:$0xff]   ;;  %v20187_v27 = vld [vmem:[%s21611_s26 + $0x13cc] ss:$16 sps:$4 sm:$0xff]  }
 0x56c   : > { %14501 = vmatpush1.bf16.msra.mxu1 %v20137_v42  ;;  %v14168_v54 = vpop.f32.mrf.mxu0  ;;  %14461 = vmatprep.subr.bf16.mxu0 %v20142_v50  ;;  %v20179_v34 = vld [vmem:[%s21611_s26 + $0x13e8] ss:$16 sps:$4 sm:$0xff]   ;;  %v20184_v42 = vld [vmem:[%s21611_s26 + $0x11cc] ss:$16 sps:$4 sm:$0xff]  }
 0x56d   : > { %v14209_v16 = vpop.f32.mrf.mxu1  ;;  %14502 = vmatprep.subr.bf16.mxu1 %v20145_v52  ;;  %v20182_v35 = vld [vmem:[%s21611_s26 + $0x11c8] ss:$16 sps:$4 sm:$0xff]   ;;  %v20190_v52 = vld [vmem:[%s21611_s26 + $0x11ac] ss:$16 sps:$4 sm:$0xff]  }
 0x56e   : > { %v20185_v50 = vld [vmem:[%s21611_s26 + $0x13c8] ss:$16 sps:$4 sm:$0xff]   ;;  %v20193_v4 = vld [vmem:[%s21611_s26 + $0x13ac] ss:$16 sps:$4 sm:$0xff]  }
 0x56f   : > { %14462 = vmatpush1.bf16.msra.mxu0 %v20140_v29  ;;  %v20188_v5 = vld [vmem:[%s21611_s26 + $0x11a8] ss:$16 sps:$4 sm:$0xff]   ;;  %v20199_v54 = vld [vmem:[%s21611_s26 + $0x138c] ss:$16 sps:$4 sm:$0xff]  }
 0x570   : > { %14503 = vmatpush1.bf16.msra.mxu1 %v20143_v51  ;;  %14463 = vmatprep.subr.bf16.mxu0 %v20148_v14  ;;  %v20191_v29 = vld [vmem:[%s21611_s26 + $0x13a8] ss:$16 sps:$4 sm:$0xff]   ;;  %v20196_v51 = vld [vmem:[%s21611_s26 + $0x118c] ss:$16 sps:$4 sm:$0xff]  }
 0x571   : > { %14504 = vmatprep.subr.bf16.mxu1 %v20151_v12  ;;  %v20194_v16 = vld [vmem:[%s21611_s26 + $0x1188] ss:$16 sps:$4 sm:$0xff]   ;;  %v20202_v12 = vld [vmem:[%s21611_s26 + $0x116c] ss:$16 sps:$4 sm:$0xff]  }
 0x572   : > { %v20197_v14 = vld [vmem:[%s21611_s26 + $0x1388] ss:$16 sps:$4 sm:$0xff]  }
 0x573   : > { %14464 = vmatpush1.bf16.msra.mxu0 %v20146_v13  ;;  %v20205_v13 = vld [vmem:[%s21611_s26 + $0x136c] ss:$16 sps:$4 sm:$0xff]  }
 0x574   : > { %14505 = vmatpush1.bf16.msra.mxu1 %v20149_v6  ;;  %14465 = vmatprep.subr.bf16.mxu0 %v20154_v56  ;;  %v20200_v6 = vld [vmem:[%s21611_s26 + $0x1168] ss:$16 sps:$4 sm:$0xff]  }
 0x575   : > { %14506 = vmatprep.subr.bf16.mxu1 %v20157_v18  ;;  %v20203_v56 = vld [vmem:[%s21611_s26 + $0x1368] ss:$16 sps:$4 sm:$0xff]   ;;  %v20208_v18 = vld [vmem:[%s21611_s26 + $0x114c] ss:$16 sps:$4 sm:$0xff]  }
 0x577   : > { %14466 = vmatpush1.bf16.msra.mxu0 %v20152_v57  ;;  %v20211_v57 = vld [vmem:[%s21611_s26 + $0x134c] ss:$16 sps:$4 sm:$0xff]  }
 0x578   : > { %14507 = vmatpush1.bf16.msra.mxu1 %v20155_v11  ;;  %14467 = vmatprep.subr.bf16.mxu0 %v20160_v58  ;;  %v20206_v11 = vld [vmem:[%s21611_s26 + $0x1148] ss:$16 sps:$4 sm:$0xff]  }
 0x579   : > { %14508 = vmatprep.subr.bf16.mxu1 %v20163_v25  ;;  %v20209_v58 = vld [vmem:[%s21611_s26 + $0x1348] ss:$16 sps:$4 sm:$0xff]   ;;  %v20214_v25 = vld [vmem:[%s21611_s26 + $0x112c] ss:$16 sps:$4 sm:$0xff]  }
 0x57b   : > { %14468 = vmatpush1.bf16.msra.mxu0 %v20158_v15  ;;  %v20217_v15 = vld [vmem:[%s21611_s26 + $0x132c] ss:$16 sps:$4 sm:$0xff]  }
 0x57c   : > { %14509 = vmatpush1.bf16.msra.mxu1 %v20161_v59  ;;  %14469 = vmatprep.subr.bf16.mxu0 %v20166_v22  ;;  %v20212_v59 = vld [vmem:[%s21611_s26 + $0x1128] ss:$16 sps:$4 sm:$0xff]  }
 0x57d   : > { %14510 = vmatprep.subr.bf16.mxu1 %v20169_v23  ;;  %v20215_v22 = vld [vmem:[%s21611_s26 + $0x1328] ss:$16 sps:$4 sm:$0xff]   ;;  %v20220_v23 = vld [vmem:[%s21611_s26 + $0x110c] ss:$16 sps:$4 sm:$0xff]  }
 0x57f   : > { %14470 = vmatpush1.bf16.msra.mxu0 %v20164_v7  ;;  %v20223_v7 = vld [vmem:[%s21611_s26 + $0x130c] ss:$16 sps:$4 sm:$0xff]  }
 0x580   : > { %14511 = vmatpush1.bf16.msra.mxu1 %v20167_v32  ;;  %14471 = vmatprep.subr.bf16.mxu0 %v20172_v36  ;;  %v20218_v32 = vld [vmem:[%s21611_s26 + $0x1108] ss:$16 sps:$4 sm:$0xff]  }
 0x581   : > { %14512 = vmatprep.subr.bf16.mxu1 %v20175_v21  ;;  %v20221_v36 = vld [vmem:[%s21611_s26 + $0x1308] ss:$16 sps:$4 sm:$0xff]   ;;  %v20226_v21 = vld [vmem:[%s21611_s26 + $0x14ec] ss:$16 sps:$4 sm:$0xff]  }
 0x583   : > { %14472 = vmatpush1.bf16.msra.mxu0 %v20170_v44  ;;  %v20229_v44 = vld [vmem:[%s21611_s26 + $0x16ec] ss:$16 sps:$4 sm:$0xff]  }
 0x584   : > { %14513 = vmatpush1.bf16.msra.mxu1 %v20173_v45  ;;  %14473 = vmatprep.subr.bf16.mxu0 %v20178_v10  ;;  %v20224_v45 = vld [vmem:[%s21611_s26 + $0x14e8] ss:$16 sps:$4 sm:$0xff]  }
 0x585   : > { %14514 = vmatprep.subr.bf16.mxu1 %v20181_v17  ;;  %v20227_v10 = vld [vmem:[%s21611_s26 + $0x16e8] ss:$16 sps:$4 sm:$0xff]   ;;  %v20232_v17 = vld [vmem:[%s21611_s26 + $0x14cc] ss:$16 sps:$4 sm:$0xff]  }
 0x587   : > { %14474 = vmatpush2.bf16.msra.mxu0 %v20176_v39  ;;  %v20235_v39 = vld [vmem:[%s21611_s26 + $0x16cc] ss:$16 sps:$4 sm:$0xff]  }
 0x588   : > { %14515 = vmatpush2.bf16.msra.mxu1 %v20179_v34  ;;  %14475 = vmatprep.subr.bf16.mxu0 %v20184_v42 }
 0x589   : > { %14516 = vmatprep.subr.bf16.mxu1 %v20187_v27 }
 0x58b   : > { %14476 = vmatpush2.bf16.msra.mxu0 %v20182_v35  ;;  %v20230_v35 = vld [vmem:[%s21611_s26 + $0x14c8] ss:$16 sps:$4 sm:$0xff]  }
 0x58c   : > { %14517 = vmatpush2.bf16.msra.mxu1 %v20185_v50  ;;  %14477 = vmatprep.subr.bf16.mxu0 %v20190_v52  ;;  %v20233_v50 = vld [vmem:[%s21611_s26 + $0x16c8] ss:$16 sps:$4 sm:$0xff]  }
 0x58d   : > { %14518 = vmatprep.subr.bf16.mxu1 %v20193_v4 }
 0x58f   : > { %14478 = vmatpush2.bf16.msra.mxu0 %v20188_v5  ;;  %v20238_v5 = vld [vmem:[%s21611_s26 + $0x14ac] ss:$16 sps:$4 sm:$0xff]  }
 0x590   : > { %14519 = vmatpush2.bf16.msra.mxu1 %v20191_v29  ;;  %14479 = vmatprep.subr.bf16.mxu0 %v20196_v51  ;;  %v20241_v29 = vld [vmem:[%s21611_s26 + $0x16ac] ss:$16 sps:$4 sm:$0xff]  }
 0x591   : > { %14520 = vmatprep.subr.bf16.mxu1 %v20199_v54 }
 0x593   : > { %14480 = vmatpush2.bf16.msra.mxu0 %v20194_v16  ;;  %v20236_v16 = vld [vmem:[%s21611_s26 + $0x14a8] ss:$16 sps:$4 sm:$0xff]  }
 0x594   : > { %14521 = vmatpush2.bf16.msra.mxu1 %v20197_v14  ;;  %14481 = vmatprep.subr.bf16.mxu0 %v20202_v12  ;;  %v20239_v14 = vld [vmem:[%s21611_s26 + $0x16a8] ss:$16 sps:$4 sm:$0xff]  }
 0x595   : > { %14522 = vmatprep.subr.bf16.mxu1 %v20205_v13 }
 0x597   : > { %14482 = vmatpush2.bf16.msra.mxu0 %v20200_v6  ;;  %v20245_v6 = vld [vmem:[%s21611_s26 + $0x1688] ss:$16 sps:$4 sm:$0xff]  }
 0x598   : > { %14523 = vmatpush2.bf16.msra.mxu1 %v20203_v56  ;;  %14483 = vmatprep.subr.bf16.mxu0 %v20208_v18  ;;  %v20250_v56 = vld [vmem:[%s21611_s26 + $0x146c] ss:$16 sps:$4 sm:$0xff]  }
 0x599   : > { %14524 = vmatprep.subr.bf16.mxu1 %v20211_v57  ;;  %v20253_v18 = vld [vmem:[%s21611_s26 + $0x166c] ss:$16 sps:$4 sm:$0xff]   ;;  %v20248_v57 = vld [vmem:[%s21611_s26 + $0x1468] ss:$16 sps:$4 sm:$0xff]  }
 0x59b   : > { %14484 = vmatpush2.bf16.msra.mxu0 %v20206_v11  ;;  %v20251_v11 = vld [vmem:[%s21611_s26 + $0x1668] ss:$16 sps:$4 sm:$0xff]  }
 0x59c   : > { %14525 = vmatpush2.bf16.msra.mxu1 %v20209_v58  ;;  %14485 = vmatprep.subr.bf16.mxu0 %v20214_v25  ;;  %v20256_v58 = vld [vmem:[%s21611_s26 + $0x144c] ss:$16 sps:$4 sm:$0xff]  }
 0x59d   : > { %14526 = vmatprep.subr.bf16.mxu1 %v20217_v15  ;;  %v20259_v25 = vld [vmem:[%s21611_s26 + $0x164c] ss:$16 sps:$4 sm:$0xff]   ;;  %v20254_v15 = vld [vmem:[%s21611_s26 + $0x1448] ss:$16 sps:$4 sm:$0xff]  }
 0x59f   : > { %14486 = vmatpush2.bf16.msra.mxu0 %v20212_v59  ;;  %v20257_v59 = vld [vmem:[%s21611_s26 + $0x1648] ss:$16 sps:$4 sm:$0xff]  }
 0x5a0   : > { %14527 = vmatpush2.bf16.msra.mxu1 %v20215_v22  ;;  %14487 = vmatprep.subr.bf16.mxu0 %v20220_v23  ;;  %v20262_v22 = vld [vmem:[%s21611_s26 + $0x142c] ss:$16 sps:$4 sm:$0xff]  }
 0x5a1   : > { %14528 = vmatprep.subr.bf16.mxu1 %v20223_v7  ;;  %v20265_v23 = vld [vmem:[%s21611_s26 + $0x162c] ss:$16 sps:$4 sm:$0xff]   ;;  %v20260_v7 = vld [vmem:[%s21611_s26 + $0x1428] ss:$16 sps:$4 sm:$0xff]  }
 0x5a3   : > { %14488 = vmatpush2.bf16.msra.mxu0 %v20218_v32  ;;  %v20263_v32 = vld [vmem:[%s21611_s26 + $0x1628] ss:$16 sps:$4 sm:$0xff]  }
 0x5a4   : > { %14529 = vmatpush2.bf16.msra.mxu1 %v20221_v36  ;;  %14539 = vmatprep.subr.bf16.mxu0 %v20226_v21  ;;  %v20268_v36 = vld [vmem:[%s21611_s26 + $0x140c] ss:$16 sps:$4 sm:$0xff]  }
 0x5a5   : > { %14580 = vmatprep.subr.bf16.mxu1 %v20229_v44  ;;  %v20271_v21 = vld [vmem:[%s21611_s26 + $0x160c] ss:$16 sps:$4 sm:$0xff]   ;;  %v20266_v44 = vld [vmem:[%s21611_s26 + $0x1408] ss:$16 sps:$4 sm:$0xff]  }
 0x5a6   : > { %v14245_v34 = vpop.f32.mrf.mxu0  ;;  %14490 = vmatmul.mubr.bf16.vlgmr.msra.gmra.mxu0 %v22032_v53 }
 0x5a7   : > { %v14286_v42 = vpop.f32.mrf.mxu1  ;;  %14531 = vmatmul.mubr.bf16.vlgmr.msra.gmra.mxu1 %v22034_v55  ;;  %v14246_v27 = vadd.f32 %v14245_v34, %v23286_v31  ;;  %14540 = vmatpush1.bf16.msra.mxu0 %v20224_v45  ;;  %v20269_v45 = vld [vmem:[%s21611_s26 + $0x1608] ss:$16 sps:$4 sm:$0xff]  }
 0x5a8   : > { %14581 = vmatpush1.bf16.msra.mxu1 %v20227_v10  ;;  %v14247_v52 = vpop.f32.mrf.mxu0  ;;  %14541 = vmatprep.subr.bf16.mxu0 %v20232_v17  ;;  %v20274_v10 = vld [vmem:[%s21611_s26 + $0x15ec] ss:$16 sps:$4 sm:$0xff]   ;;  %v20275_v34 = vld [vmem:[%s21611_s26 + $0x17e8] ss:$16 sps:$4 sm:$0xff]  }
 0x5a9   : > { %v14288_v4 = vpop.f32.mrf.mxu1  ;;  %14582 = vmatprep.subr.bf16.mxu1 %v20235_v39  ;;  %v23363_v51 = vadd.f32 %v14286_v42, %v14246_v27  ;;  %v14248_v53 = vadd.f32 %v14247_v52, %v23292_v60  ;;  %14571 = vmatprep.mubr.bf16.mxu0 %v22044_v0  ;;  %v20244_v0 = vld [vmem:[%s21611_s26 + $0x148c] ss:$16 sps:$4 sm:$0xff]   ;;  %v20242_v60 = vld [vmem:[%s21611_s26 + $0x1488] ss:$16 sps:$4 sm:$0xff]  }
 0x5aa   : > { %14612 = vmatprep.mubr.bf16.mxu1 %v22046_v1  ;;  %v14249_v55 = vpop.f32.mrf.mxu0  ;;  %v20247_v1 = vld [vmem:[%s21611_s26 + $0x168c] ss:$16 sps:$4 sm:$0xff]   ;;  %v20272_v39 = vld [vmem:[%s21611_s26 + $0x15e8] ss:$16 sps:$4 sm:$0xff]  }
 0x5ab   : > { %v14290_v31 = vpop.f32.mrf.mxu1  ;;  %v23368_v54 = vadd.f32 %v14288_v4, %v14248_v53  ;;  %14542 = vmatpush1.bf16.msra.mxu0 %v20230_v35  ;;  %v20277_v17 = vld [vmem:[%s21611_s26 + $0x17ec] ss:$16 sps:$4 sm:$0xff]   ;;  %v20278_v35 = vld [vmem:[%s21611_s26 + $0x15c8] ss:$16 sps:$4 sm:$0xff]  }
 0x5ac   : > { %14583 = vmatpush1.bf16.msra.mxu1 %v20233_v50  ;;  %v14250_v12 = vpop.f32.mrf.mxu0  ;;  %14543 = vmatprep.subr.bf16.mxu0 %v20238_v5  ;;  %v20280_v42 = vld [vmem:[%s21611_s26 + $0x15cc] ss:$16 sps:$4 sm:$0xff]   ;;  %v20281_v50 = vld [vmem:[%s21611_s26 + $0x17c8] ss:$16 sps:$4 sm:$0xff]  }
 0x5ad   : > { %v14291_v13 = vpop.f32.mrf.mxu1  ;;  %14584 = vmatprep.subr.bf16.mxu1 %v20241_v29  ;;  %v20283_v27 = vld [vmem:[%s21611_s26 + $0x17cc] ss:$16 sps:$4 sm:$0xff]   ;;  %v20284_v5 = vld [vmem:[%s21611_s26 + $0x15a8] ss:$16 sps:$4 sm:$0xff]  }
 0x5ae   : > { %v20286_v52 = vld [vmem:[%s21611_s26 + $0x15ac] ss:$16 sps:$4 sm:$0xff]   ;;  %v20287_v29 = vld [vmem:[%s21611_s26 + $0x17a8] ss:$16 sps:$4 sm:$0xff]  }
 0x5af   : > { %14544 = vmatpush1.bf16.msra.mxu0 %v20236_v16  ;;  %v20289_v4 = vld [vmem:[%s21611_s26 + $0x17ac] ss:$16 sps:$4 sm:$0xff]   ;;  %v20290_v31 = vld [vmem:[%s21611_s26 + $0x1588] ss:$16 sps:$4 sm:$0xff]  }
 0x5b0   : > { %14585 = vmatpush1.bf16.msra.mxu1 %v20239_v14  ;;  %14545 = vmatprep.subr.bf16.mxu0 %v20244_v0  ;;  %v20292_v53 = vld [vmem:[%s21611_s26 + $0x158c] ss:$16 sps:$4 sm:$0xff]   ;;  %v20293_v16 = vld [vmem:[%s21611_s26 + $0x1788] ss:$16 sps:$4 sm:$0xff]  }
 0x5b1   : > { %14586 = vmatprep.subr.bf16.mxu1 %v20247_v1  ;;  %v20295_v55 = vld [vmem:[%s21611_s26 + $0x178c] ss:$16 sps:$4 sm:$0xff]   ;;  %v20296_v13 = vld [vmem:[%s21611_s26 + $0x1568] ss:$16 sps:$4 sm:$0xff]  }
 0x5b2   : > { %v20298_v14 = vld [vmem:[%s21611_s26 + $0x156c] ss:$16 sps:$4 sm:$0xff]   ;;  %v20299_v0 = vld [vmem:[%s21611_s26 + $0x1768] ss:$16 sps:$4 sm:$0xff]  }
 0x5b3   : > { %14546 = vmatpush1.bf16.msra.mxu0 %v20242_v60  ;;  %v20301_v12 = vld [vmem:[%s21611_s26 + $0x176c] ss:$16 sps:$4 sm:$0xff]  }
 0x5b4   : > { %14587 = vmatpush1.bf16.msra.mxu1 %v20245_v6  ;;  %14547 = vmatprep.subr.bf16.mxu0 %v20250_v56  ;;  %v20304_v1 = vld [vmem:[%s21611_s26 + $0x154c] ss:$16 sps:$4 sm:$0xff]   ;;  %v20302_v6 = vld [vmem:[%s21611_s26 + $0x1548] ss:$16 sps:$4 sm:$0xff]  }
 0x5b5   : > { %14588 = vmatprep.subr.bf16.mxu1 %v20253_v18  ;;  %v20307_v60 = vld [vmem:[%s21611_s26 + $0x174c] ss:$16 sps:$4 sm:$0xff]   ;;  %v20305_v56 = vld [vmem:[%s21611_s26 + $0x1748] ss:$16 sps:$4 sm:$0xff]  }
 0x5b6   : > { %v20310_v18 = vld [vmem:[%s21611_s26 + $0x152c] ss:$16 sps:$4 sm:$0xff]  }
 0x5b7   : > { %14548 = vmatpush1.bf16.msra.mxu0 %v20248_v57  ;;  %v20313_v57 = vld [vmem:[%s21611_s26 + $0x172c] ss:$16 sps:$4 sm:$0xff]  }
 0x5b8   : > { %14589 = vmatpush1.bf16.msra.mxu1 %v20251_v11  ;;  %14549 = vmatprep.subr.bf16.mxu0 %v20256_v58  ;;  %v20308_v11 = vld [vmem:[%s21611_s26 + $0x1528] ss:$16 sps:$4 sm:$0xff]  }
 0x5b9   : > { %14590 = vmatprep.subr.bf16.mxu1 %v20259_v25  ;;  %v20311_v58 = vld [vmem:[%s21611_s26 + $0x1728] ss:$16 sps:$4 sm:$0xff]   ;;  %v20316_v25 = vld [vmem:[%s21611_s26 + $0x150c] ss:$16 sps:$4 sm:$0xff]  }
 0x5bb   : > { %14550 = vmatpush1.bf16.msra.mxu0 %v20254_v15  ;;  %v20319_v15 = vld [vmem:[%s21611_s26 + $0x170c] ss:$16 sps:$4 sm:$0xff]  }
 0x5bc   : > { %14591 = vmatpush1.bf16.msra.mxu1 %v20257_v59  ;;  %14551 = vmatprep.subr.bf16.mxu0 %v20262_v22  ;;  %v20314_v59 = vld [vmem:[%s21611_s26 + $0x1508] ss:$16 sps:$4 sm:$0xff]  }
 0x5bd   : > { %14592 = vmatprep.subr.bf16.mxu1 %v20265_v23  ;;  %v20317_v22 = vld [vmem:[%s21611_s26 + $0x1708] ss:$16 sps:$4 sm:$0xff]   ;;  %v20322_v23 = vld [vmem:[%s21611_s26 + $0x18ec] ss:$16 sps:$4 sm:$0xff]  }
 0x5bf   : > { %14552 = vmatpush1.bf16.msra.mxu0 %v20260_v7  ;;  %v20325_v7 = vld [vmem:[%s21611_s26 + $0x1aec] ss:$16 sps:$4 sm:$0xff]  }
 0x5c0   : > { %14593 = vmatpush1.bf16.msra.mxu1 %v20263_v32  ;;  %14553 = vmatprep.subr.bf16.mxu0 %v20268_v36  ;;  %v20320_v32 = vld [vmem:[%s21611_s26 + $0x18e8] ss:$16 sps:$4 sm:$0xff]  }
 0x5c1   : > { %14594 = vmatprep.subr.bf16.mxu1 %v20271_v21  ;;  %v20323_v36 = vld [vmem:[%s21611_s26 + $0x1ae8] ss:$16 sps:$4 sm:$0xff]   ;;  %v20328_v21 = vld [vmem:[%s21611_s26 + $0x18cc] ss:$16 sps:$4 sm:$0xff]  }
 0x5c3   : > { %14554 = vmatpush1.bf16.msra.mxu0 %v20266_v44  ;;  %v20331_v44 = vld [vmem:[%s21611_s26 + $0x1acc] ss:$16 sps:$4 sm:$0xff]  }
 0x5c4   : > { %14595 = vmatpush1.bf16.msra.mxu1 %v20269_v45  ;;  %14555 = vmatprep.subr.bf16.mxu0 %v20274_v10 }
 0x5c5   : > { %14596 = vmatprep.subr.bf16.mxu1 %v20277_v17 }
 0x5c7   : > { %14556 = vmatpush2.bf16.msra.mxu0 %v20272_v39  ;;  %v20326_v39 = vld [vmem:[%s21611_s26 + $0x18c8] ss:$16 sps:$4 sm:$0xff]  }
 0x5c8   : > { %14597 = vmatpush2.bf16.msra.mxu1 %v20275_v34  ;;  %14557 = vmatprep.subr.bf16.mxu0 %v20280_v42  ;;  %v20329_v34 = vld [vmem:[%s21611_s26 + $0x1ac8] ss:$16 sps:$4 sm:$0xff]  }
 0x5c9   : > { %14598 = vmatprep.subr.bf16.mxu1 %v20283_v27 }
 0x5cb   : > { %14558 = vmatpush2.bf16.msra.mxu0 %v20278_v35  ;;  %v20334_v35 = vld [vmem:[%s21611_s26 + $0x18ac] ss:$16 sps:$4 sm:$0xff]  }
 0x5cc   : > { %14599 = vmatpush2.bf16.msra.mxu1 %v20281_v50  ;;  %14559 = vmatprep.subr.bf16.mxu0 %v20286_v52  ;;  %v20337_v50 = vld [vmem:[%s21611_s26 + $0x1aac] ss:$16 sps:$4 sm:$0xff]  }
 0x5cd   : > { %14600 = vmatprep.subr.bf16.mxu1 %v20289_v4 }
 0x5cf   : > { %14560 = vmatpush2.bf16.msra.mxu0 %v20284_v5  ;;  %v20332_v5 = vld [vmem:[%s21611_s26 + $0x18a8] ss:$16 sps:$4 sm:$0xff]  }
 0x5d0   : > { %14601 = vmatpush2.bf16.msra.mxu1 %v20287_v29  ;;  %14561 = vmatprep.subr.bf16.mxu0 %v20292_v53  ;;  %v20335_v29 = vld [vmem:[%s21611_s26 + $0x1aa8] ss:$16 sps:$4 sm:$0xff]  }
 0x5d1   : > { %14602 = vmatprep.subr.bf16.mxu1 %v20295_v55 }
 0x5d3   : > { %14562 = vmatpush2.bf16.msra.mxu0 %v20290_v31  ;;  %v20341_v31 = vld [vmem:[%s21611_s26 + $0x1a88] ss:$16 sps:$4 sm:$0xff]  }
 0x5d4   : > { %14603 = vmatpush2.bf16.msra.mxu1 %v20293_v16  ;;  %14563 = vmatprep.subr.bf16.mxu0 %v20298_v14  ;;  %v20346_v16 = vld [vmem:[%s21611_s26 + $0x186c] ss:$16 sps:$4 sm:$0xff]  }
 0x5d5   : > { %14604 = vmatprep.subr.bf16.mxu1 %v20301_v12  ;;  %v20349_v14 = vld [vmem:[%s21611_s26 + $0x1a6c] ss:$16 sps:$4 sm:$0xff]   ;;  %v20344_v12 = vld [vmem:[%s21611_s26 + $0x1868] ss:$16 sps:$4 sm:$0xff]  }
 0x5d7   : > { %14564 = vmatpush2.bf16.msra.mxu0 %v20296_v13  ;;  %v20347_v13 = vld [vmem:[%s21611_s26 + $0x1a68] ss:$16 sps:$4 sm:$0xff]  }
 0x5d8   : > { %14605 = vmatpush2.bf16.msra.mxu1 %v20299_v0  ;;  %14565 = vmatprep.subr.bf16.mxu0 %v20304_v1  ;;  %v20352_v0 = vld [vmem:[%s21611_s26 + $0x184c] ss:$16 sps:$4 sm:$0xff]  }
 0x5d9   : > { %14606 = vmatprep.subr.bf16.mxu1 %v20307_v60  ;;  %v20355_v1 = vld [vmem:[%s21611_s26 + $0x1a4c] ss:$16 sps:$4 sm:$0xff]   ;;  %v20350_v60 = vld [vmem:[%s21611_s26 + $0x1848] ss:$16 sps:$4 sm:$0xff]  }
 0x5db   : > { %14566 = vmatpush2.bf16.msra.mxu0 %v20302_v6  ;;  %v20353_v6 = vld [vmem:[%s21611_s26 + $0x1a48] ss:$16 sps:$4 sm:$0xff]  }
 0x5dc   : > { %14607 = vmatpush2.bf16.msra.mxu1 %v20305_v56  ;;  %14567 = vmatprep.subr.bf16.mxu0 %v20310_v18  ;;  %v20358_v56 = vld [vmem:[%s21611_s26 + $0x182c] ss:$16 sps:$4 sm:$0xff]  }
 0x5dd   : > { %14608 = vmatprep.subr.bf16.mxu1 %v20313_v57  ;;  %v20361_v18 = vld [vmem:[%s21611_s26 + $0x1a2c] ss:$16 sps:$4 sm:$0xff]   ;;  %v20356_v57 = vld [vmem:[%s21611_s26 + $0x1828] ss:$16 sps:$4 sm:$0xff]  }
 0x5df   : > { %14568 = vmatpush2.bf16.msra.mxu0 %v20308_v11  ;;  %v20359_v11 = vld [vmem:[%s21611_s26 + $0x1a28] ss:$16 sps:$4 sm:$0xff]  }
 0x5e0   : > { %14609 = vmatpush2.bf16.msra.mxu1 %v20311_v58  ;;  %14569 = vmatprep.subr.bf16.mxu0 %v20316_v25  ;;  %v20364_v58 = vld [vmem:[%s21611_s26 + $0x180c] ss:$16 sps:$4 sm:$0xff]  }
 0x5e1   : > { %14610 = vmatprep.subr.bf16.mxu1 %v20319_v15  ;;  %v20367_v25 = vld [vmem:[%s21611_s26 + $0x1a0c] ss:$16 sps:$4 sm:$0xff]   ;;  %v20362_v15 = vld [vmem:[%s21611_s26 + $0x1808] ss:$16 sps:$4 sm:$0xff]  }
 0x5e3   : > { %14570 = vmatpush2.bf16.msra.mxu0 %v20314_v59  ;;  %v20365_v59 = vld [vmem:[%s21611_s26 + $0x1a08] ss:$16 sps:$4 sm:$0xff]  }
 0x5e4   : > { %14611 = vmatpush2.bf16.msra.mxu1 %v20317_v22  ;;  %14621 = vmatprep.subr.bf16.mxu0 %v20322_v23  ;;  %v20370_v22 = vld [vmem:[%s21611_s26 + $0x19ec] ss:$16 sps:$4 sm:$0xff]  }
 0x5e5   : > { %14662 = vmatprep.subr.bf16.mxu1 %v20325_v7  ;;  %v20373_v23 = vld [vmem:[%s21611_s26 + $0x1bec] ss:$16 sps:$4 sm:$0xff]   ;;  %v20368_v7 = vld [vmem:[%s21611_s26 + $0x19e8] ss:$16 sps:$4 sm:$0xff]  }
 0x5e6   : > { %v14327_v45 = vpop.f32.mrf.mxu0  ;;  %14572 = vmatmul.mubr.bf16.vlgmr.msra.gmra.mxu0 %v22118_v48 }
 0x5e7   : > { %v14368_v10 = vpop.f32.mrf.mxu1  ;;  %14613 = vmatmul.mubr.bf16.vlgmr.msra.gmra.mxu1 %v22120_v49  ;;  %v14328_v17 = vadd.f32 %v14327_v45, %v23363_v51  ;;  %14622 = vmatpush1.bf16.msra.mxu0 %v20320_v32  ;;  %v20371_v32 = vld [vmem:[%s21611_s26 + $0x1be8] ss:$16 sps:$4 sm:$0xff]  }
 0x5e8   : > { %14663 = vmatpush1.bf16.msra.mxu1 %v20323_v36  ;;  %v14329_v42 = vpop.f32.mrf.mxu0  ;;  %14623 = vmatprep.subr.bf16.mxu0 %v20328_v21  ;;  %v20376_v36 = vld [vmem:[%s21611_s26 + $0x19cc] ss:$16 sps:$4 sm:$0xff]   ;;  %v20377_v45 = vld [vmem:[%s21611_s26 + $0x1bc8] ss:$16 sps:$4 sm:$0xff]  }
 0x5e9   : > { %v14370_v27 = vpop.f32.mrf.mxu1  ;;  %14664 = vmatprep.subr.bf16.mxu1 %v20331_v44  ;;  %v23437_v52 = vadd.f32 %v14368_v10, %v14328_v17  ;;  %v14330_v48 = vadd.f32 %v14329_v42, %v23368_v54  ;;  %14653 = vmatprep.mubr.bf16.mxu0 %v22130_v2  ;;  %v20340_v2 = vld [vmem:[%s21611_s26 + $0x188c] ss:$16 sps:$4 sm:$0xff]   ;;  %v20338_v54 = vld [vmem:[%s21611_s26 + $0x1888] ss:$16 sps:$4 sm:$0xff]  }
 0x5ea   : > { %14694 = vmatprep.mubr.bf16.mxu1 %v22132_v3  ;;  %v14331_v49 = vpop.f32.mrf.mxu0  ;;  %v20343_v3 = vld [vmem:[%s21611_s26 + $0x1a8c] ss:$16 sps:$4 sm:$0xff]   ;;  %v20374_v44 = vld [vmem:[%s21611_s26 + $0x19c8] ss:$16 sps:$4 sm:$0xff]  }
 0x5eb   : > { %v14372_v51 = vpop.f32.mrf.mxu1  ;;  %v23442_v4 = vadd.f32 %v14370_v27, %v14330_v48  ;;  %14624 = vmatpush1.bf16.msra.mxu0 %v20326_v39  ;;  %v20379_v21 = vld [vmem:[%s21611_s26 + $0x1bcc] ss:$16 sps:$4 sm:$0xff]   ;;  %v20380_v39 = vld [vmem:[%s21611_s26 + $0x19a8] ss:$16 sps:$4 sm:$0xff]  }
 0x5ec   : > { %14665 = vmatpush1.bf16.msra.mxu1 %v20329_v34  ;;  %v14332_v53 = vpop.f32.mrf.mxu0  ;;  %14625 = vmatprep.subr.bf16.mxu0 %v20334_v35  ;;  %v20382_v10 = vld [vmem:[%s21611_s26 + $0x19ac] ss:$16 sps:$4 sm:$0xff]   ;;  %v20383_v34 = vld [vmem:[%s21611_s26 + $0x1ba8] ss:$16 sps:$4 sm:$0xff]  }
 0x5ed   : > { %v14373_v55 = vpop.f32.mrf.mxu1  ;;  %14666 = vmatprep.subr.bf16.mxu1 %v20337_v50  ;;  %v20385_v17 = vld [vmem:[%s21611_s26 + $0x1bac] ss:$16 sps:$4 sm:$0xff]   ;;  %v20386_v35 = vld [vmem:[%s21611_s26 + $0x1988] ss:$16 sps:$4 sm:$0xff]  }
 0x5ee   : > { %v20388_v42 = vld [vmem:[%s21611_s26 + $0x198c] ss:$16 sps:$4 sm:$0xff]   ;;  %v20389_v50 = vld [vmem:[%s21611_s26 + $0x1b88] ss:$16 sps:$4 sm:$0xff]  }
 0x5ef   : > { %14626 = vmatpush1.bf16.msra.mxu0 %v20332_v5  ;;  %v20391_v27 = vld [vmem:[%s21611_s26 + $0x1b8c] ss:$16 sps:$4 sm:$0xff]   ;;  %v20392_v51 = vld [vmem:[%s21611_s26 + $0x1968] ss:$16 sps:$4 sm:$0xff]  }
 0x5f0   : > { %14667 = vmatpush1.bf16.msra.mxu1 %v20335_v29  ;;  %14627 = vmatprep.subr.bf16.mxu0 %v20340_v2  ;;  %v20394_v48 = vld [vmem:[%s21611_s26 + $0x196c] ss:$16 sps:$4 sm:$0xff]   ;;  %v20395_v5 = vld [vmem:[%s21611_s26 + $0x1b68] ss:$16 sps:$4 sm:$0xff]  }
 0x5f1   : > { %14668 = vmatprep.subr.bf16.mxu1 %v20343_v3  ;;  %v20397_v49 = vld [vmem:[%s21611_s26 + $0x1b6c] ss:$16 sps:$4 sm:$0xff]   ;;  %v20398_v55 = vld [vmem:[%s21611_s26 + $0x1948] ss:$16 sps:$4 sm:$0xff]  }
 0x5f2   : > { %v20400_v29 = vld [vmem:[%s21611_s26 + $0x194c] ss:$16 sps:$4 sm:$0xff]   ;;  %v20401_v2 = vld [vmem:[%s21611_s26 + $0x1b48] ss:$16 sps:$4 sm:$0xff]  }
 0x5f3   : > { %14628 = vmatpush1.bf16.msra.mxu0 %v20338_v54  ;;  %v20403_v53 = vld [vmem:[%s21611_s26 + $0x1b4c] ss:$16 sps:$4 sm:$0xff]  }
 0x5f4   : > { %14669 = vmatpush1.bf16.msra.mxu1 %v20341_v31  ;;  %14629 = vmatprep.subr.bf16.mxu0 %v20346_v16  ;;  %v20406_v3 = vld [vmem:[%s21611_s26 + $0x192c] ss:$16 sps:$4 sm:$0xff]   ;;  %v20404_v31 = vld [vmem:[%s21611_s26 + $0x1928] ss:$16 sps:$4 sm:$0xff]  }
 0x5f5   : > { %14670 = vmatprep.subr.bf16.mxu1 %v20349_v14  ;;  %v20409_v54 = vld [vmem:[%s21611_s26 + $0x1b2c] ss:$16 sps:$4 sm:$0xff]   ;;  %v20407_v16 = vld [vmem:[%s21611_s26 + $0x1b28] ss:$16 sps:$4 sm:$0xff]  }
 0x5f6   : > { %v20412_v14 = vld [vmem:[%s21611_s26 + $0x190c] ss:$16 sps:$4 sm:$0xff]  }
 0x5f7   : > { %14630 = vmatpush1.bf16.msra.mxu0 %v20344_v12  ;;  %v20415_v12 = vld [vmem:[%s21611_s26 + $0x1b0c] ss:$16 sps:$4 sm:$0xff]  }
 0x5f8   : > { %14671 = vmatpush1.bf16.msra.mxu1 %v20347_v13  ;;  %14631 = vmatprep.subr.bf16.mxu0 %v20352_v0  ;;  %v20410_v13 = vld [vmem:[%s21611_s26 + $0x1908] ss:$16 sps:$4 sm:$0xff]  }
 0x5f9   : > { %14672 = vmatprep.subr.bf16.mxu1 %v20355_v1  ;;  %v20413_v0 = vld [vmem:[%s21611_s26 + $0x1b08] ss:$16 sps:$4 sm:$0xff]   ;;  %v20418_v1 = vld [vmem:[%s21611_s26 + $0x1cec] ss:$16 sps:$4 sm:$0xff]  }
 0x5fb   : > { %14632 = vmatpush1.bf16.msra.mxu0 %v20350_v60  ;;  %v20421_v60 = vld [vmem:[%s21611_s26 + $0x1eec] ss:$16 sps:$4 sm:$0xff]  }
 0x5fc   : > { %14673 = vmatpush1.bf16.msra.mxu1 %v20353_v6  ;;  %14633 = vmatprep.subr.bf16.mxu0 %v20358_v56  ;;  %v20416_v6 = vld [vmem:[%s21611_s26 + $0x1ce8] ss:$16 sps:$4 sm:$0xff]  }
 0x5fd   : > { %14674 = vmatprep.subr.bf16.mxu1 %v20361_v18  ;;  %v20419_v56 = vld [vmem:[%s21611_s26 + $0x1ee8] ss:$16 sps:$4 sm:$0xff]   ;;  %v20424_v18 = vld [vmem:[%s21611_s26 + $0x1ccc] ss:$16 sps:$4 sm:$0xff]  }
 0x5ff   : > { %14634 = vmatpush1.bf16.msra.mxu0 %v20356_v57  ;;  %v20427_v57 = vld [vmem:[%s21611_s26 + $0x1ecc] ss:$16 sps:$4 sm:$0xff]  }
 0x600   : > { %14675 = vmatpush1.bf16.msra.mxu1 %v20359_v11  ;;  %14635 = vmatprep.subr.bf16.mxu0 %v20364_v58 }
 0x601   : > { %14676 = vmatprep.subr.bf16.mxu1 %v20367_v25 }
 0x603   : > { %14636 = vmatpush1.bf16.msra.mxu0 %v20362_v15  ;;  %v20422_v15 = vld [vmem:[%s21611_s26 + $0x1cc8] ss:$16 sps:$4 sm:$0xff]  }
 0x604   : > { %14677 = vmatpush1.bf16.msra.mxu1 %v20365_v59  ;;  %14637 = vmatprep.subr.bf16.mxu0 %v20370_v22  ;;  %v20425_v59 = vld [vmem:[%s21611_s26 + $0x1ec8] ss:$16 sps:$4 sm:$0xff]  }
 0x605   : > { %14678 = vmatprep.subr.bf16.mxu1 %v20373_v23 }
 0x607   : > { %14638 = vmatpush2.bf16.msra.mxu0 %v20368_v7  ;;  %v20430_v7 = vld [vmem:[%s21611_s26 + $0x1cac] ss:$16 sps:$4 sm:$0xff]  }
 0x608   : > { %14679 = vmatpush2.bf16.msra.mxu1 %v20371_v32  ;;  %14639 = vmatprep.subr.bf16.mxu0 %v20376_v36  ;;  %v20433_v32 = vld [vmem:[%s21611_s26 + $0x1eac] ss:$16 sps:$4 sm:$0xff]  }
 0x609   : > { %14680 = vmatprep.subr.bf16.mxu1 %v20379_v21 }
 0x60b   : > { %14640 = vmatpush2.bf16.msra.mxu0 %v20374_v44  ;;  %v20428_v44 = vld [vmem:[%s21611_s26 + $0x1ca8] ss:$16 sps:$4 sm:$0xff]  }
 0x60c   : > { %14681 = vmatpush2.bf16.msra.mxu1 %v20377_v45  ;;  %14641 = vmatprep.subr.bf16.mxu0 %v20382_v10  ;;  %v20431_v45 = vld [vmem:[%s21611_s26 + $0x1ea8] ss:$16 sps:$4 sm:$0xff]  }
 0x60d   : > { %14682 = vmatprep.subr.bf16.mxu1 %v20385_v17 }
 0x60f   : > { %14642 = vmatpush2.bf16.msra.mxu0 %v20380_v39  ;;  %v20437_v39 = vld [vmem:[%s21611_s26 + $0x1e88] ss:$16 sps:$4 sm:$0xff]  }
 0x610   : > { %14683 = vmatpush2.bf16.msra.mxu1 %v20383_v34  ;;  %14643 = vmatprep.subr.bf16.mxu0 %v20388_v42  ;;  %v20442_v34 = vld [vmem:[%s21611_s26 + $0x1c6c] ss:$16 sps:$4 sm:$0xff]  }
 0x611   : > { %14684 = vmatprep.subr.bf16.mxu1 %v20391_v27  ;;  %v20445_v42 = vld [vmem:[%s21611_s26 + $0x1e6c] ss:$16 sps:$4 sm:$0xff]   ;;  %v20440_v27 = vld [vmem:[%s21611_s26 + $0x1c68] ss:$16 sps:$4 sm:$0xff]  }
 0x613   : > { %14644 = vmatpush2.bf16.msra.mxu0 %v20386_v35  ;;  %v20443_v35 = vld [vmem:[%s21611_s26 + $0x1e68] ss:$16 sps:$4 sm:$0xff]  }
 0x614   : > { %14685 = vmatpush2.bf16.msra.mxu1 %v20389_v50  ;;  %14645 = vmatprep.subr.bf16.mxu0 %v20394_v48  ;;  %v20448_v50 = vld [vmem:[%s21611_s26 + $0x1c4c] ss:$16 sps:$4 sm:$0xff]  }
 0x615   : > { %14686 = vmatprep.subr.bf16.mxu1 %v20397_v49  ;;  %v20451_v48 = vld [vmem:[%s21611_s26 + $0x1e4c] ss:$16 sps:$4 sm:$0xff]   ;;  %v20446_v49 = vld [vmem:[%s21611_s26 + $0x1c48] ss:$16 sps:$4 sm:$0xff]  }
 0x617   : > { %14646 = vmatpush2.bf16.msra.mxu0 %v20392_v51  ;;  %v20449_v51 = vld [vmem:[%s21611_s26 + $0x1e48] ss:$16 sps:$4 sm:$0xff]  }
 0x618   : > { %14687 = vmatpush2.bf16.msra.mxu1 %v20395_v5  ;;  %14647 = vmatprep.subr.bf16.mxu0 %v20400_v29  ;;  %v20454_v5 = vld [vmem:[%s21611_s26 + $0x1c2c] ss:$16 sps:$4 sm:$0xff]  }
 0x619   : > { %14688 = vmatprep.subr.bf16.mxu1 %v20403_v53  ;;  %v20457_v29 = vld [vmem:[%s21611_s26 + $0x1e2c] ss:$16 sps:$4 sm:$0xff]   ;;  %v20452_v53 = vld [vmem:[%s21611_s26 + $0x1c28] ss:$16 sps:$4 sm:$0xff]  }
 0x61b   : > { %14648 = vmatpush2.bf16.msra.mxu0 %v20398_v55  ;;  %v20455_v55 = vld [vmem:[%s21611_s26 + $0x1e28] ss:$16 sps:$4 sm:$0xff]  }
 0x61c   : > { %14689 = vmatpush2.bf16.msra.mxu1 %v20401_v2  ;;  %14649 = vmatprep.subr.bf16.mxu0 %v20406_v3  ;;  %v20460_v2 = vld [vmem:[%s21611_s26 + $0x1c0c] ss:$16 sps:$4 sm:$0xff]  }
 0x61d   : > { %14690 = vmatprep.subr.bf16.mxu1 %v20409_v54  ;;  %v20463_v3 = vld [vmem:[%s21611_s26 + $0x1e0c] ss:$16 sps:$4 sm:$0xff]   ;;  %v20458_v54 = vld [vmem:[%s21611_s26 + $0x1c08] ss:$16 sps:$4 sm:$0xff]  }
 0x61f   : > { %14650 = vmatpush2.bf16.msra.mxu0 %v20404_v31  ;;  %v20461_v31 = vld [vmem:[%s21611_s26 + $0x1e08] ss:$16 sps:$4 sm:$0xff]  }
 0x620   : > { %14691 = vmatpush2.bf16.msra.mxu1 %v20407_v16  ;;  %14651 = vmatprep.subr.bf16.mxu0 %v20412_v14  ;;  %v20466_v16 = vld [vmem:[%s21611_s26 + $0x1dec] ss:$16 sps:$4 sm:$0xff]  }
 0x621   : > { %14692 = vmatprep.subr.bf16.mxu1 %v20415_v12  ;;  %v20469_v14 = vld [vmem:[%s21611_s26 + $0x1fec] ss:$16 sps:$4 sm:$0xff]   ;;  %v20464_v12 = vld [vmem:[%s21611_s26 + $0x1de8] ss:$16 sps:$4 sm:$0xff]  }
 0x623   : > { %14652 = vmatpush2.bf16.msra.mxu0 %v20410_v13  ;;  %v20467_v13 = vld [vmem:[%s21611_s26 + $0x1fe8] ss:$16 sps:$4 sm:$0xff]  }
 0x624   : > { %14693 = vmatpush2.bf16.msra.mxu1 %v20413_v0  ;;  %14703 = vmatprep.subr.bf16.mxu0 %v20418_v1  ;;  %v20472_v0 = vld [vmem:[%s21611_s26 + $0x1dcc] ss:$16 sps:$4 sm:$0xff]  }
 0x625   : > { %14744 = vmatprep.subr.bf16.mxu1 %v20421_v60  ;;  %v20475_v1 = vld [vmem:[%s21611_s26 + $0x1fcc] ss:$16 sps:$4 sm:$0xff]   ;;  %v20470_v60 = vld [vmem:[%s21611_s26 + $0x1dc8] ss:$16 sps:$4 sm:$0xff]  }
 0x626   : > { %v14409_v11 = vpop.f32.mrf.mxu0  ;;  %14654 = vmatmul.mubr.bf16.vlgmr.msra.gmra.mxu0 %v22204_v62 }
 0x627   : > { %v14450_v58 = vpop.f32.mrf.mxu1  ;;  %14695 = vmatmul.mubr.bf16.vlgmr.msra.gmra.mxu1 %v22206_v63  ;;  %v14410_v25 = vadd.f32 %v14409_v11, %v23437_v52  ;;  %14704 = vmatpush1.bf16.msra.mxu0 %v20416_v6  ;;  %v20473_v6 = vld [vmem:[%s21611_s26 + $0x1fc8] ss:$16 sps:$4 sm:$0xff]  }
 0x628   : > { %14745 = vmatpush1.bf16.msra.mxu1 %v20419_v56  ;;  %v14411_v22 = vpop.f32.mrf.mxu0  ;;  %14705 = vmatprep.subr.bf16.mxu0 %v20424_v18  ;;  %v20478_v56 = vld [vmem:[%s21611_s26 + $0x1dac] ss:$16 sps:$4 sm:$0xff]   ;;  %v20479_v11 = vld [vmem:[%s21611_s26 + $0x1fa8] ss:$16 sps:$4 sm:$0xff]  }
 0x629   : > { %v14452_v23 = vpop.f32.mrf.mxu1  ;;  %14746 = vmatprep.subr.bf16.mxu1 %v20427_v57  ;;  %v23511_v36 = vadd.f32 %v14450_v58, %v14410_v25  ;;  %v14412_v62 = vadd.f32 %v14411_v22, %v23442_v4  ;;  %14735 = vmatprep.mubr.bf16.mxu0 %v22216_v20  ;;  %v20436_v20 = vld [vmem:[%s21611_s26 + $0x1c8c] ss:$16 sps:$4 sm:$0xff]   ;;  %v20434_v4 = vld [vmem:[%s21611_s26 + $0x1c88] ss:$16 sps:$4 sm:$0xff]  }
 0x62a   : > { %14776 = vmatprep.mubr.bf16.mxu1 %v22218_v24  ;;  %v14413_v63 = vpop.f32.mrf.mxu0  ;;  %v20439_v24 = vld [vmem:[%s21611_s26 + $0x1e8c] ss:$16 sps:$4 sm:$0xff]   ;;  %v20476_v57 = vld [vmem:[%s21611_s26 + $0x1da8] ss:$16 sps:$4 sm:$0xff]  }
 0x62b   : > { %v14454_v52 = vpop.f32.mrf.mxu1  ;;  %v23516_v21 = vadd.f32 %v14452_v23, %v14412_v62  ;;  %14706 = vmatpush1.bf16.msra.mxu0 %v20422_v15  ;;  %v20481_v18 = vld [vmem:[%s21611_s26 + $0x1fac] ss:$16 sps:$4 sm:$0xff]   ;;  %v20482_v15 = vld [vmem:[%s21611_s26 + $0x1d88] ss:$16 sps:$4 sm:$0xff]  }
 0x62c   : > { %14747 = vmatpush1.bf16.msra.mxu1 %v20425_v59  ;;  %v14414_v10 = vpop.f32.mrf.mxu0  ;;  %14707 = vmatprep.subr.bf16.mxu0 %v20430_v7  ;;  %v20484_v58 = vld [vmem:[%s21611_s26 + $0x1d8c] ss:$16 sps:$4 sm:$0xff]   ;;  %v20485_v59 = vld [vmem:[%s21611_s26 + $0x1f88] ss:$16 sps:$4 sm:$0xff]  }
 0x62d   : > { %v14455_v17 = vpop.f32.mrf.mxu1  ;;  %14748 = vmatprep.subr.bf16.mxu1 %v20433_v32  ;;  %v20487_v25 = vld [vmem:[%s21611_s26 + $0x1f8c] ss:$16 sps:$4 sm:$0xff]   ;;  %v20488_v7 = vld [vmem:[%s21611_s26 + $0x1d68] ss:$16 sps:$4 sm:$0xff]  }
 0x62e   : > { %v20490_v22 = vld [vmem:[%s21611_s26 + $0x1d6c] ss:$16 sps:$4 sm:$0xff]   ;;  %v20491_v32 = vld [vmem:[%s21611_s26 + $0x1f68] ss:$16 sps:$4 sm:$0xff]  }
 0x62f   : > { %14708 = vmatpush1.bf16.msra.mxu0 %v20428_v44  ;;  %v20493_v23 = vld [vmem:[%s21611_s26 + $0x1f6c] ss:$16 sps:$4 sm:$0xff]   ;;  %v20494_v52 = vld [vmem:[%s21611_s26 + $0x1d48] ss:$16 sps:$4 sm:$0xff]  }
 0x630   : > { %14749 = vmatpush1.bf16.msra.mxu1 %v20431_v45  ;;  %14709 = vmatprep.subr.bf16.mxu0 %v20436_v20  ;;  %v20496_v62 = vld [vmem:[%s21611_s26 + $0x1d4c] ss:$16 sps:$4 sm:$0xff]   ;;  %v20497_v44 = vld [vmem:[%s21611_s26 + $0x1f48] ss:$16 sps:$4 sm:$0xff]  }
 0x631   : > { %14750 = vmatprep.subr.bf16.mxu1 %v20439_v24  ;;  %v20499_v63 = vld [vmem:[%s21611_s26 + $0x1f4c] ss:$16 sps:$4 sm:$0xff]   ;;  %v20500_v17 = vld [vmem:[%s21611_s26 + $0x1d28] ss:$16 sps:$4 sm:$0xff]  }
 0x632   : > { %v20502_v45 = vld [vmem:[%s21611_s26 + $0x1d2c] ss:$16 sps:$4 sm:$0xff]   ;;  %v20503_v20 = vld [vmem:[%s21611_s26 + $0x1f28] ss:$16 sps:$4 sm:$0xff]  }
 0x633   : > { %14710 = vmatpush1.bf16.msra.mxu0 %v20434_v4  ;;  %v20505_v10 = vld [vmem:[%s21611_s26 + $0x1f2c] ss:$16 sps:$4 sm:$0xff]  }
 0x634   : > { %14751 = vmatpush1.bf16.msra.mxu1 %v20437_v39  ;;  %14711 = vmatprep.subr.bf16.mxu0 %v20442_v34  ;;  %v20508_v24 = vld [vmem:[%s21611_s26 + $0x1d0c] ss:$16 sps:$4 sm:$0xff]   ;;  %v20506_v39 = vld [vmem:[%s21611_s26 + $0x1d08] ss:$16 sps:$4 sm:$0xff]  }
 0x635   : > { %14752 = vmatprep.subr.bf16.mxu1 %v20445_v42  ;;  %v20511_v4 = vld [vmem:[%s21611_s26 + $0x1f0c] ss:$16 sps:$4 sm:$0xff]   ;;  %v20509_v34 = vld [vmem:[%s21611_s26 + $0x1f08] ss:$16 sps:$4 sm:$0xff]  }
 0x636   : > { %v20514_v42 = vld [vmem:[%s21611_s26 + $0x20ec] ss:$16 sps:$4 sm:$0xff]  }
 0x637   : > { %14712 = vmatpush1.bf16.msra.mxu0 %v20440_v27  ;;  %v20517_v27 = vld [vmem:[%s21611_s26 + $0x22ec] ss:$16 sps:$4 sm:$0xff]  }
 0x638   : > { %14753 = vmatpush1.bf16.msra.mxu1 %v20443_v35  ;;  %14713 = vmatprep.subr.bf16.mxu0 %v20448_v50  ;;  %v20512_v35 = vld [vmem:[%s21611_s26 + $0x20e8] ss:$16 sps:$4 sm:$0xff]  }
 0x639   : > { %14754 = vmatprep.subr.bf16.mxu1 %v20451_v48  ;;  %v20515_v50 = vld [vmem:[%s21611_s26 + $0x22e8] ss:$16 sps:$4 sm:$0xff]   ;;  %v20520_v48 = vld [vmem:[%s21611_s26 + $0x20cc] ss:$16 sps:$4 sm:$0xff]  }
 0x63b   : > { %14714 = vmatpush1.bf16.msra.mxu0 %v20446_v49  ;;  %v20523_v49 = vld [vmem:[%s21611_s26 + $0x22cc] ss:$16 sps:$4 sm:$0xff]  }
 0x63c   : > { %14755 = vmatpush1.bf16.msra.mxu1 %v20449_v51  ;;  %14715 = vmatprep.subr.bf16.mxu0 %v20454_v5 }
 0x63d   : > { %14756 = vmatprep.subr.bf16.mxu1 %v20457_v29 }
 0x63f   : > { %14716 = vmatpush1.bf16.msra.mxu0 %v20452_v53  ;;  %v20518_v53 = vld [vmem:[%s21611_s26 + $0x20c8] ss:$16 sps:$4 sm:$0xff]  }
 0x640   : > { %14757 = vmatpush1.bf16.msra.mxu1 %v20455_v55  ;;  %14717 = vmatprep.subr.bf16.mxu0 %v20460_v2  ;;  %v20521_v55 = vld [vmem:[%s21611_s26 + $0x22c8] ss:$16 sps:$4 sm:$0xff]  }
 0x641   : > { %14758 = vmatprep.subr.bf16.mxu1 %v20463_v3 }
 0x643   : > { %14718 = vmatpush1.bf16.msra.mxu0 %v20458_v54  ;;  %v20526_v54 = vld [vmem:[%s21611_s26 + $0x20ac] ss:$16 sps:$4 sm:$0xff]  }
 0x644   : > { %14759 = vmatpush1.bf16.msra.mxu1 %v20461_v31  ;;  %14719 = vmatprep.subr.bf16.mxu0 %v20466_v16  ;;  %v20529_v31 = vld [vmem:[%s21611_s26 + $0x22ac] ss:$16 sps:$4 sm:$0xff]  }
 0x645   : > { %14760 = vmatprep.subr.bf16.mxu1 %v20469_v14 }
 0x647   : > { %14720 = vmatpush2.bf16.msra.mxu0 %v20464_v12  ;;  %v20524_v12 = vld [vmem:[%s21611_s26 + $0x20a8] ss:$16 sps:$4 sm:$0xff]  }
 0x648   : > { %14761 = vmatpush2.bf16.msra.mxu1 %v20467_v13  ;;  %14721 = vmatprep.subr.bf16.mxu0 %v20472_v0  ;;  %v20527_v13 = vld [vmem:[%s21611_s26 + $0x22a8] ss:$16 sps:$4 sm:$0xff]  }
 0x649   : > { %14762 = vmatprep.subr.bf16.mxu1 %v20475_v1 }
 0x64b   : > { %14722 = vmatpush2.bf16.msra.mxu0 %v20470_v60  ;;  %v20533_v60 = vld [vmem:[%s21611_s26 + $0x2288] ss:$16 sps:$4 sm:$0xff]  }
 0x64c   : > { %14763 = vmatpush2.bf16.msra.mxu1 %v20473_v6  ;;  %14723 = vmatprep.subr.bf16.mxu0 %v20478_v56  ;;  %v20538_v6 = vld [vmem:[%s21611_s26 + $0x206c] ss:$16 sps:$4 sm:$0xff]  }
 0x64d   : > { %14764 = vmatprep.subr.bf16.mxu1 %v20481_v18  ;;  %v20541_v56 = vld [vmem:[%s21611_s26 + $0x226c] ss:$16 sps:$4 sm:$0xff]   ;;  %v20536_v18 = vld [vmem:[%s21611_s26 + $0x2068] ss:$16 sps:$4 sm:$0xff]  }
 0x64f   : > { %14724 = vmatpush2.bf16.msra.mxu0 %v20476_v57  ;;  %v20539_v57 = vld [vmem:[%s21611_s26 + $0x2268] ss:$16 sps:$4 sm:$0xff]  }
 0x650   : > { %14765 = vmatpush2.bf16.msra.mxu1 %v20479_v11  ;;  %14725 = vmatprep.subr.bf16.mxu0 %v20484_v58  ;;  %v20544_v11 = vld [vmem:[%s21611_s26 + $0x204c] ss:$16 sps:$4 sm:$0xff]  }
 0x651   : > { %14766 = vmatprep.subr.bf16.mxu1 %v20487_v25  ;;  %v20547_v58 = vld [vmem:[%s21611_s26 + $0x224c] ss:$16 sps:$4 sm:$0xff]   ;;  %v20542_v25 = vld [vmem:[%s21611_s26 + $0x2048] ss:$16 sps:$4 sm:$0xff]  }
 0x653   : > { %14726 = vmatpush2.bf16.msra.mxu0 %v20482_v15  ;;  %v20545_v15 = vld [vmem:[%s21611_s26 + $0x2248] ss:$16 sps:$4 sm:$0xff]  }
 0x654   : > { %14767 = vmatpush2.bf16.msra.mxu1 %v20485_v59  ;;  %14727 = vmatprep.subr.bf16.mxu0 %v20490_v22  ;;  %v20550_v59 = vld [vmem:[%s21611_s26 + $0x202c] ss:$16 sps:$4 sm:$0xff]  }
 0x655   : > { %14768 = vmatprep.subr.bf16.mxu1 %v20493_v23  ;;  %v20553_v22 = vld [vmem:[%s21611_s26 + $0x222c] ss:$16 sps:$4 sm:$0xff]   ;;  %v20548_v23 = vld [vmem:[%s21611_s26 + $0x2028] ss:$16 sps:$4 sm:$0xff]  }
 0x657   : > { %14728 = vmatpush2.bf16.msra.mxu0 %v20488_v7  ;;  %v20551_v7 = vld [vmem:[%s21611_s26 + $0x2228] ss:$16 sps:$4 sm:$0xff]  }
 0x658   : > { %14769 = vmatpush2.bf16.msra.mxu1 %v20491_v32  ;;  %14729 = vmatprep.subr.bf16.mxu0 %v20496_v62  ;;  %v20556_v32 = vld [vmem:[%s21611_s26 + $0x200c] ss:$16 sps:$4 sm:$0xff]  }
 0x659   : > { %14770 = vmatprep.subr.bf16.mxu1 %v20499_v63  ;;  %v20559_v62 = vld [vmem:[%s21611_s26 + $0x220c] ss:$16 sps:$4 sm:$0xff]   ;;  %v20554_v63 = vld [vmem:[%s21611_s26 + $0x2008] ss:$16 sps:$4 sm:$0xff]  }
 0x65b   : > { %14730 = vmatpush2.bf16.msra.mxu0 %v20494_v52  ;;  %v20557_v52 = vld [vmem:[%s21611_s26 + $0x2208] ss:$16 sps:$4 sm:$0xff]  }
 0x65c   : > { %14771 = vmatpush2.bf16.msra.mxu1 %v20497_v44  ;;  %14731 = vmatprep.subr.bf16.mxu0 %v20502_v45  ;;  %v20562_v44 = vld [vmem:[%s21611_s26 + $0x21ec] ss:$16 sps:$4 sm:$0xff]  }
 0x65d   : > { %14772 = vmatprep.subr.bf16.mxu1 %v20505_v10  ;;  %v20565_v45 = vld [vmem:[%s21611_s26 + $0x23ec] ss:$16 sps:$4 sm:$0xff]   ;;  %v20560_v10 = vld [vmem:[%s21611_s26 + $0x21e8] ss:$16 sps:$4 sm:$0xff]  }
 0x65f   : > { %14732 = vmatpush2.bf16.msra.mxu0 %v20500_v17  ;;  %v20563_v17 = vld [vmem:[%s21611_s26 + $0x23e8] ss:$16 sps:$4 sm:$0xff]  }
 0x660   : > { %14773 = vmatpush2.bf16.msra.mxu1 %v20503_v20  ;;  %14733 = vmatprep.subr.bf16.mxu0 %v20508_v24  ;;  %v20568_v20 = vld [vmem:[%s21611_s26 + $0x21cc] ss:$16 sps:$4 sm:$0xff]  }
 0x661   : > { %14774 = vmatprep.subr.bf16.mxu1 %v20511_v4  ;;  %v20571_v24 = vld [vmem:[%s21611_s26 + $0x23cc] ss:$16 sps:$4 sm:$0xff]   ;;  %v20566_v4 = vld [vmem:[%s21611_s26 + $0x21c8] ss:$16 sps:$4 sm:$0xff]  }
 0x663   : > { %14734 = vmatpush2.bf16.msra.mxu0 %v20506_v39  ;;  %v20569_v39 = vld [vmem:[%s21611_s26 + $0x23c8] ss:$16 sps:$4 sm:$0xff]  }
 0x664   : > { %14775 = vmatpush2.bf16.msra.mxu1 %v20509_v34  ;;  %14785 = vmatprep.subr.bf16.mxu0 %v20514_v42  ;;  %v20574_v34 = vld [vmem:[%s21611_s26 + $0x21ac] ss:$16 sps:$4 sm:$0xff]  }
 0x665   : > { %14826 = vmatprep.subr.bf16.mxu1 %v20517_v27  ;;  %v20577_v42 = vld [vmem:[%s21611_s26 + $0x23ac] ss:$16 sps:$4 sm:$0xff]   ;;  %v20572_v27 = vld [vmem:[%s21611_s26 + $0x21a8] ss:$16 sps:$4 sm:$0xff]  }
 0x666   : > { %v14491_v51 = vpop.f32.mrf.mxu0  ;;  %14736 = vmatmul.mubr.bf16.vlgmr.msra.gmra.mxu0 %v22290_v30 }
 0x667   : > { %v14532_v5 = vpop.f32.mrf.mxu1  ;;  %14777 = vmatmul.mubr.bf16.vlgmr.msra.gmra.mxu1 %v22292_v33  ;;  %v14492_v29 = vadd.f32 %v14491_v51, %v23511_v36  ;;  %14786 = vmatpush1.bf16.msra.mxu0 %v20512_v35  ;;  %v20575_v35 = vld [vmem:[%s21611_s26 + $0x23a8] ss:$16 sps:$4 sm:$0xff]  }
 0x668   : > { %14827 = vmatpush1.bf16.msra.mxu1 %v20515_v50  ;;  %v14493_v2 = vpop.f32.mrf.mxu0  ;;  %14787 = vmatprep.subr.bf16.mxu0 %v20520_v48  ;;  %v20580_v50 = vld [vmem:[%s21611_s26 + $0x218c] ss:$16 sps:$4 sm:$0xff]   ;;  %v20581_v51 = vld [vmem:[%s21611_s26 + $0x2388] ss:$16 sps:$4 sm:$0xff]  }
 0x669   : > { %v14534_v3 = vpop.f32.mrf.mxu1  ;;  %14828 = vmatprep.subr.bf16.mxu1 %v20523_v49  ;;  %v23585_v16 = vadd.f32 %v14532_v5, %v14492_v29  ;;  %v14494_v30 = vadd.f32 %v14493_v2, %v23516_v21  ;;  %14817 = vmatprep.mubr.bf16.mxu0 %v22302_v46  ;;  %v20532_v46 = vld [vmem:[%s21611_s26 + $0x208c] ss:$16 sps:$4 sm:$0xff]   ;;  %v20530_v21 = vld [vmem:[%s21611_s26 + $0x2088] ss:$16 sps:$4 sm:$0xff]  }
 0x66a   : > { %14858 = vmatprep.mubr.bf16.mxu1 %v22304_v47  ;;  %v14495_v33 = vpop.f32.mrf.mxu0  ;;  %v20535_v47 = vld [vmem:[%s21611_s26 + $0x228c] ss:$16 sps:$4 sm:$0xff]   ;;  %v20578_v49 = vld [vmem:[%s21611_s26 + $0x2188] ss:$16 sps:$4 sm:$0xff]  }
 0x66b   : > { %v14536_v36 = vpop.f32.mrf.mxu1  ;;  %v23590_v14 = vadd.f32 %v14534_v3, %v14494_v30  ;;  %14788 = vmatpush1.bf16.msra.mxu0 %v20518_v53  ;;  %v20583_v48 = vld [vmem:[%s21611_s26 + $0x238c] ss:$16 sps:$4 sm:$0xff]   ;;  %v20584_v53 = vld [vmem:[%s21611_s26 + $0x2168] ss:$16 sps:$4 sm:$0xff]  }
 0x66c   : > { %14829 = vmatpush1.bf16.msra.mxu1 %v20521_v55  ;;  %v14496_v0 = vpop.f32.mrf.mxu0  ;;  %14789 = vmatprep.subr.bf16.mxu0 %v20526_v54  ;;  %v20586_v5 = vld [vmem:[%s21611_s26 + $0x216c] ss:$16 sps:$4 sm:$0xff]   ;;  %v20587_v55 = vld [vmem:[%s21611_s26 + $0x2368] ss:$16 sps:$4 sm:$0xff]  }
 0x66d   : > { %v14537_v1 = vpop.f32.mrf.mxu1  ;;  %14830 = vmatprep.subr.bf16.mxu1 %v20529_v31  ;;  %v20589_v29 = vld [vmem:[%s21611_s26 + $0x236c] ss:$16 sps:$4 sm:$0xff]   ;;  %v20590_v54 = vld [vmem:[%s21611_s26 + $0x2148] ss:$16 sps:$4 sm:$0xff]  }
 0x66e   : > { %v20592_v2 = vld [vmem:[%s21611_s26 + $0x214c] ss:$16 sps:$4 sm:$0xff]   ;;  %v20593_v31 = vld [vmem:[%s21611_s26 + $0x2348] ss:$16 sps:$4 sm:$0xff]  }
 0x66f   : > { %14790 = vmatpush1.bf16.msra.mxu0 %v20524_v12  ;;  %v20595_v3 = vld [vmem:[%s21611_s26 + $0x234c] ss:$16 sps:$4 sm:$0xff]   ;;  %v20596_v36 = vld [vmem:[%s21611_s26 + $0x2128] ss:$16 sps:$4 sm:$0xff]  }
 0x670   : > { %14831 = vmatpush1.bf16.msra.mxu1 %v20527_v13  ;;  %14791 = vmatprep.subr.bf16.mxu0 %v20532_v46  ;;  %v20598_v30 = vld [vmem:[%s21611_s26 + $0x212c] ss:$16 sps:$4 sm:$0xff]   ;;  %v20599_v12 = vld [vmem:[%s21611_s26 + $0x2328] ss:$16 sps:$4 sm:$0xff]  }
 0x671   : > { %14832 = vmatprep.subr.bf16.mxu1 %v20535_v47  ;;  %v20601_v33 = vld [vmem:[%s21611_s26 + $0x232c] ss:$16 sps:$4 sm:$0xff]   ;;  %v20602_v1 = vld [vmem:[%s21611_s26 + $0x2108] ss:$16 sps:$4 sm:$0xff]  }
 0x672   : > { %v20604_v13 = vld [vmem:[%s21611_s26 + $0x210c] ss:$16 sps:$4 sm:$0xff]   ;;  %v20605_v46 = vld [vmem:[%s21611_s26 + $0x2308] ss:$16 sps:$4 sm:$0xff]  }
 0x673   : > { %14792 = vmatpush1.bf16.msra.mxu0 %v20530_v21  ;;  %v20607_v0 = vld [vmem:[%s21611_s26 + $0x230c] ss:$16 sps:$4 sm:$0xff]  }
 0x674   : > { %14833 = vmatpush1.bf16.msra.mxu1 %v20533_v60  ;;  %14793 = vmatprep.subr.bf16.mxu0 %v20538_v6  ;;  %v20610_v47 = vld [vmem:[%s21611_s26 + $0x24ec] ss:$16 sps:$4 sm:$0xff]   ;;  %v20608_v60 = vld [vmem:[%s21611_s26 + $0x24e8] ss:$16 sps:$4 sm:$0xff]  }
 0x675   : > { %14834 = vmatprep.subr.bf16.mxu1 %v20541_v56  ;;  %v20613_v21 = vld [vmem:[%s21611_s26 + $0x26ec] ss:$16 sps:$4 sm:$0xff]   ;;  %v20611_v6 = vld [vmem:[%s21611_s26 + $0x26e8] ss:$16 sps:$4 sm:$0xff]  }
 0x676   : > { %v20616_v56 = vld [vmem:[%s21611_s26 + $0x24cc] ss:$16 sps:$4 sm:$0xff]  }
 0x677   : > { %14794 = vmatpush1.bf16.msra.mxu0 %v20536_v18  ;;  %v20619_v18 = vld [vmem:[%s21611_s26 + $0x26cc] ss:$16 sps:$4 sm:$0xff]  }
 0x678   : > { %14835 = vmatpush1.bf16.msra.mxu1 %v20539_v57  ;;  %14795 = vmatprep.subr.bf16.mxu0 %v20544_v11 }
 0x679   : > { %14836 = vmatprep.subr.bf16.mxu1 %v20547_v58 }
 0x67b   : > { %14796 = vmatpush1.bf16.msra.mxu0 %v20542_v25  ;;  %v20614_v25 = vld [vmem:[%s21611_s26 + $0x24c8] ss:$16 sps:$4 sm:$0xff]  }
 0x67c   : > { %14837 = vmatpush1.bf16.msra.mxu1 %v20545_v15  ;;  %14797 = vmatprep.subr.bf16.mxu0 %v20550_v59  ;;  %v20617_v15 = vld [vmem:[%s21611_s26 + $0x26c8] ss:$16 sps:$4 sm:$0xff]  }
 0x67d   : > { %14838 = vmatprep.subr.bf16.mxu1 %v20553_v22 }
 0x67f   : > { %14798 = vmatpush1.bf16.msra.mxu0 %v20548_v23  ;;  %v20622_v23 = vld [vmem:[%s21611_s26 + $0x24ac] ss:$16 sps:$4 sm:$0xff]  }
 0x680   : > { %14839 = vmatpush1.bf16.msra.mxu1 %v20551_v7  ;;  %14799 = vmatprep.subr.bf16.mxu0 %v20556_v32  ;;  %v20625_v7 = vld [vmem:[%s21611_s26 + $0x26ac] ss:$16 sps:$4 sm:$0xff]  }
 0x681   : > { %14840 = vmatprep.subr.bf16.mxu1 %v20559_v62 }
 0x683   : > { %14800 = vmatpush1.bf16.msra.mxu0 %v20554_v63  ;;  %v20620_v63 = vld [vmem:[%s21611_s26 + $0x24a8] ss:$16 sps:$4 sm:$0xff]  }
 0x684   : > { %14841 = vmatpush1.bf16.msra.mxu1 %v20557_v52  ;;  %14801 = vmatprep.subr.bf16.mxu0 %v20562_v44  ;;  %v20623_v52 = vld [vmem:[%s21611_s26 + $0x26a8] ss:$16 sps:$4 sm:$0xff]  }
 0x685   : > { %14842 = vmatprep.subr.bf16.mxu1 %v20565_v45 }
 0x687   : > { %14802 = vmatpush2.bf16.msra.mxu0 %v20560_v10  ;;  %v20629_v10 = vld [vmem:[%s21611_s26 + $0x2688] ss:$16 sps:$4 sm:$0xff]  }
 0x688   : > { %14843 = vmatpush2.bf16.msra.mxu1 %v20563_v17  ;;  %14803 = vmatprep.subr.bf16.mxu0 %v20568_v20  ;;  %v20634_v17 = vld [vmem:[%s21611_s26 + $0x246c] ss:$16 sps:$4 sm:$0xff]  }
 0x689   : > { %14844 = vmatprep.subr.bf16.mxu1 %v20571_v24  ;;  %v20637_v20 = vld [vmem:[%s21611_s26 + $0x266c] ss:$16 sps:$4 sm:$0xff]   ;;  %v20632_v24 = vld [vmem:[%s21611_s26 + $0x2468] ss:$16 sps:$4 sm:$0xff]  }
 0x68b   : > { %14804 = vmatpush2.bf16.msra.mxu0 %v20566_v4  ;;  %v20635_v4 = vld [vmem:[%s21611_s26 + $0x2668] ss:$16 sps:$4 sm:$0xff]  }
 0x68c   : > { %14845 = vmatpush2.bf16.msra.mxu1 %v20569_v39  ;;  %14805 = vmatprep.subr.bf16.mxu0 %v20574_v34  ;;  %v20640_v39 = vld [vmem:[%s21611_s26 + $0x244c] ss:$16 sps:$4 sm:$0xff]  }
 0x68d   : > { %14846 = vmatprep.subr.bf16.mxu1 %v20577_v42  ;;  %v20643_v34 = vld [vmem:[%s21611_s26 + $0x264c] ss:$16 sps:$4 sm:$0xff]   ;;  %v20638_v42 = vld [vmem:[%s21611_s26 + $0x2448] ss:$16 sps:$4 sm:$0xff]  }
 0x68f   : > { %14806 = vmatpush2.bf16.msra.mxu0 %v20572_v27  ;;  %v20641_v27 = vld [vmem:[%s21611_s26 + $0x2648] ss:$16 sps:$4 sm:$0xff]  }
 0x690   : > { %14847 = vmatpush2.bf16.msra.mxu1 %v20575_v35  ;;  %14807 = vmatprep.subr.bf16.mxu0 %v20580_v50  ;;  %v20646_v35 = vld [vmem:[%s21611_s26 + $0x242c] ss:$16 sps:$4 sm:$0xff]  }
 0x691   : > { %14848 = vmatprep.subr.bf16.mxu1 %v20583_v48  ;;  %v20649_v50 = vld [vmem:[%s21611_s26 + $0x262c] ss:$16 sps:$4 sm:$0xff]   ;;  %v20644_v48 = vld [vmem:[%s21611_s26 + $0x2428] ss:$16 sps:$4 sm:$0xff]  }
 0x693   : > { %14808 = vmatpush2.bf16.msra.mxu0 %v20578_v49  ;;  %v20647_v49 = vld [vmem:[%s21611_s26 + $0x2628] ss:$16 sps:$4 sm:$0xff]  }
 0x694   : > { %14849 = vmatpush2.bf16.msra.mxu1 %v20581_v51  ;;  %14809 = vmatprep.subr.bf16.mxu0 %v20586_v5  ;;  %v20652_v51 = vld [vmem:[%s21611_s26 + $0x240c] ss:$16 sps:$4 sm:$0xff]  }
 0x695   : > { %14850 = vmatprep.subr.bf16.mxu1 %v20589_v29  ;;  %v20655_v5 = vld [vmem:[%s21611_s26 + $0x260c] ss:$16 sps:$4 sm:$0xff]   ;;  %v20650_v29 = vld [vmem:[%s21611_s26 + $0x2408] ss:$16 sps:$4 sm:$0xff]  }
 0x697   : > { %14810 = vmatpush2.bf16.msra.mxu0 %v20584_v53  ;;  %v20653_v53 = vld [vmem:[%s21611_s26 + $0x2608] ss:$16 sps:$4 sm:$0xff]  }
 0x698   : > { %14851 = vmatpush2.bf16.msra.mxu1 %v20587_v55  ;;  %14811 = vmatprep.subr.bf16.mxu0 %v20592_v2  ;;  %v20658_v55 = vld [vmem:[%s21611_s26 + $0x25ec] ss:$16 sps:$4 sm:$0xff]  }
 0x699   : > { %14852 = vmatprep.subr.bf16.mxu1 %v20595_v3  ;;  %v20661_v2 = vld [vmem:[%s21611_s26 + $0x27ec] ss:$16 sps:$4 sm:$0xff]   ;;  %v20656_v3 = vld [vmem:[%s21611_s26 + $0x25e8] ss:$16 sps:$4 sm:$0xff]  }
 0x69b   : > { %14812 = vmatpush2.bf16.msra.mxu0 %v20590_v54  ;;  %v20659_v54 = vld [vmem:[%s21611_s26 + $0x27e8] ss:$16 sps:$4 sm:$0xff]  }
 0x69c   : > { %14853 = vmatpush2.bf16.msra.mxu1 %v20593_v31  ;;  %14813 = vmatprep.subr.bf16.mxu0 %v20598_v30  ;;  %v20664_v31 = vld [vmem:[%s21611_s26 + $0x25cc] ss:$16 sps:$4 sm:$0xff]  }
 0x69d   : > { %14854 = vmatprep.subr.bf16.mxu1 %v20601_v33  ;;  %v20667_v30 = vld [vmem:[%s21611_s26 + $0x27cc] ss:$16 sps:$4 sm:$0xff]   ;;  %v20662_v33 = vld [vmem:[%s21611_s26 + $0x25c8] ss:$16 sps:$4 sm:$0xff]  }
 0x69f   : > { %14814 = vmatpush2.bf16.msra.mxu0 %v20596_v36  ;;  %v20665_v36 = vld [vmem:[%s21611_s26 + $0x27c8] ss:$16 sps:$4 sm:$0xff]  }
 0x6a0   : > { %14855 = vmatpush2.bf16.msra.mxu1 %v20599_v12  ;;  %14815 = vmatprep.subr.bf16.mxu0 %v20604_v13  ;;  %v20670_v12 = vld [vmem:[%s21611_s26 + $0x25ac] ss:$16 sps:$4 sm:$0xff]  }
 0x6a1   : > { %14856 = vmatprep.subr.bf16.mxu1 %v20607_v0  ;;  %v20673_v13 = vld [vmem:[%s21611_s26 + $0x27ac] ss:$16 sps:$4 sm:$0xff]   ;;  %v20668_v0 = vld [vmem:[%s21611_s26 + $0x25a8] ss:$16 sps:$4 sm:$0xff]  }
 0x6a3   : > { %14816 = vmatpush2.bf16.msra.mxu0 %v20602_v1  ;;  %v20671_v1 = vld [vmem:[%s21611_s26 + $0x27a8] ss:$16 sps:$4 sm:$0xff]  }
 0x6a4   : > { %14857 = vmatpush2.bf16.msra.mxu1 %v20605_v46  ;;  %14867 = vmatprep.subr.bf16.mxu0 %v20610_v47  ;;  %v20676_v46 = vld [vmem:[%s21611_s26 + $0x258c] ss:$16 sps:$4 sm:$0xff]  }
 0x6a5   : > { %14908 = vmatprep.subr.bf16.mxu1 %v20613_v21  ;;  %v20679_v47 = vld [vmem:[%s21611_s26 + $0x278c] ss:$16 sps:$4 sm:$0xff]   ;;  %v20674_v21 = vld [vmem:[%s21611_s26 + $0x2588] ss:$16 sps:$4 sm:$0xff]  }
 0x6a6   : > { %v14573_v57 = vpop.f32.mrf.mxu0  ;;  %14818 = vmatmul.mubr.bf16.vlgmr.msra.gmra.mxu0 %v22376_v38 }
 0x6a7   : > { %v14614_v11 = vpop.f32.mrf.mxu1  ;;  %14859 = vmatmul.mubr.bf16.vlgmr.msra.gmra.mxu1 %v22378_v26  ;;  %v14574_v58 = vadd.f32 %v14573_v57, %v23585_v16  ;;  %14868 = vmatpush1.bf16.msra.mxu0 %v20608_v60  ;;  %v20677_v60 = vld [vmem:[%s21611_s26 + $0x2788] ss:$16 sps:$4 sm:$0xff]  }
 0x6a8   : > { %14909 = vmatpush1.bf16.msra.mxu1 %v20611_v6  ;;  %v14575_v59 = vpop.f32.mrf.mxu0  ;;  %14869 = vmatprep.subr.bf16.mxu0 %v20616_v56  ;;  %v20682_v6 = vld [vmem:[%s21611_s26 + $0x256c] ss:$16 sps:$4 sm:$0xff]   ;;  %v20683_v57 = vld [vmem:[%s21611_s26 + $0x2768] ss:$16 sps:$4 sm:$0xff]  }
 0x6a9   : > { %v14616_v22 = vpop.f32.mrf.mxu1  ;;  %14910 = vmatprep.subr.bf16.mxu1 %v20619_v18  ;;  %v23659_v32 = vadd.f32 %v14614_v11, %v14574_v58  ;;  %v14576_v38 = vadd.f32 %v14575_v59, %v23590_v14  ;;  %14899 = vmatprep.mubr.bf16.mxu0 %v22388_v40  ;;  %v20628_v40 = vld [vmem:[%s21611_s26 + $0x248c] ss:$16 sps:$4 sm:$0xff]   ;;  %v20626_v14 = vld [vmem:[%s21611_s26 + $0x2488] ss:$16 sps:$4 sm:$0xff]  }
 0x6aa   : > { %14940 = vmatprep.mubr.bf16.mxu1 %v22390_v41  ;;  %v14577_v26 = vpop.f32.mrf.mxu0  ;;  %v20631_v41 = vld [vmem:[%s21611_s26 + $0x268c] ss:$16 sps:$4 sm:$0xff]   ;;  %v20680_v18 = vld [vmem:[%s21611_s26 + $0x2568] ss:$16 sps:$4 sm:$0xff]  }
 0x6ab   : > { %v14618_v16 = vpop.f32.mrf.mxu1  ;;  %v23664_v62 = vadd.f32 %v14616_v22, %v14576_v38  ;;  %14870 = vmatpush1.bf16.msra.mxu0 %v20614_v25  ;;  %v20685_v56 = vld [vmem:[%s21611_s26 + $0x276c] ss:$16 sps:$4 sm:$0xff]   ;;  %v20686_v25 = vld [vmem:[%s21611_s26 + $0x2548] ss:$16 sps:$4 sm:$0xff]  }
 0x6ac   : > { %14911 = vmatpush1.bf16.msra.mxu1 %v20617_v15  ;;  %v14578_v44 = vpop.f32.mrf.mxu0  ;;  %14871 = vmatprep.subr.bf16.mxu0 %v20622_v23  ;;  %v20688_v11 = vld [vmem:[%s21611_s26 + $0x254c] ss:$16 sps:$4 sm:$0xff]   ;;  %v20689_v15 = vld [vmem:[%s21611_s26 + $0x2748] ss:$16 sps:$4 sm:$0xff]  }
 0x6ad   : > { %v14619_v45 = vpop.f32.mrf.mxu1  ;;  %14912 = vmatprep.subr.bf16.mxu1 %v20625_v7  ;;  %v20691_v58 = vld [vmem:[%s21611_s26 + $0x274c] ss:$16 sps:$4 sm:$0xff]   ;;  %v20692_v23 = vld [vmem:[%s21611_s26 + $0x2528] ss:$16 sps:$4 sm:$0xff]  }
 0x6ae   : > { %v20694_v59 = vld [vmem:[%s21611_s26 + $0x252c] ss:$16 sps:$4 sm:$0xff]   ;;  %v20695_v7 = vld [vmem:[%s21611_s26 + $0x2728] ss:$16 sps:$4 sm:$0xff]  }
 0x6af   : > { %14872 = vmatpush1.bf16.msra.mxu0 %v20620_v63  ;;  %v20697_v22 = vld [vmem:[%s21611_s26 + $0x272c] ss:$16 sps:$4 sm:$0xff]   ;;  %v20698_v16 = vld [vmem:[%s21611_s26 + $0x2508] ss:$16 sps:$4 sm:$0xff]  }
 0x6b0   : > { %14913 = vmatpush1.bf16.msra.mxu1 %v20623_v52  ;;  %14873 = vmatprep.subr.bf16.mxu0 %v20628_v40  ;;  %v20700_v38 = vld [vmem:[%s21611_s26 + $0x250c] ss:$16 sps:$4 sm:$0xff]   ;;  %v20701_v63 = vld [vmem:[%s21611_s26 + $0x2708] ss:$16 sps:$4 sm:$0xff]  }
 0x6b1   : > { %14914 = vmatprep.subr.bf16.mxu1 %v20631_v41  ;;  %v20703_v26 = vld [vmem:[%s21611_s26 + $0x270c] ss:$16 sps:$4 sm:$0xff]   ;;  %v20704_v45 = vld [vmem:[%s21611_s26 + $0x28e8] ss:$16 sps:$4 sm:$0xff]  }
 0x6b2   : > { %v20706_v52 = vld [vmem:[%s21611_s26 + $0x28ec] ss:$16 sps:$4 sm:$0xff]   ;;  %v20707_v40 = vld [vmem:[%s21611_s26 + $0x2ae8] ss:$16 sps:$4 sm:$0xff]  }
 0x6b3   : > { %14874 = vmatpush1.bf16.msra.mxu0 %v20626_v14  ;;  %v20709_v44 = vld [vmem:[%s21611_s26 + $0x2aec] ss:$16 sps:$4 sm:$0xff]  }
 0x6b4   : > { %14915 = vmatpush1.bf16.msra.mxu1 %v20629_v10  ;;  %14875 = vmatprep.subr.bf16.mxu0 %v20634_v17  ;;  %v20712_v41 = vld [vmem:[%s21611_s26 + $0x28cc] ss:$16 sps:$4 sm:$0xff]  }
 0x6b5   : > { %14916 = vmatprep.subr.bf16.mxu1 %v20637_v20  ;;  %v20715_v14 = vld [vmem:[%s21611_s26 + $0x2acc] ss:$16 sps:$4 sm:$0xff]  }
 0x6b7   : > { %14876 = vmatpush1.bf16.msra.mxu0 %v20632_v24  ;;  %v20710_v24 = vld [vmem:[%s21611_s26 + $0x28c8] ss:$16 sps:$4 sm:$0xff]  }
 0x6b8   : > { %14917 = vmatpush1.bf16.msra.mxu1 %v20635_v4  ;;  %14877 = vmatprep.subr.bf16.mxu0 %v20640_v39  ;;  %v20713_v4 = vld [vmem:[%s21611_s26 + $0x2ac8] ss:$16 sps:$4 sm:$0xff]  }
 0x6b9   : > { %14918 = vmatprep.subr.bf16.mxu1 %v20643_v34 }
 0x6bb   : > { %14878 = vmatpush1.bf16.msra.mxu0 %v20638_v42  ;;  %v20718_v42 = vld [vmem:[%s21611_s26 + $0x28ac] ss:$16 sps:$4 sm:$0xff]  }
 0x6bc   : > { %14919 = vmatpush1.bf16.msra.mxu1 %v20641_v27  ;;  %14879 = vmatprep.subr.bf16.mxu0 %v20646_v35  ;;  %v20721_v27 = vld [vmem:[%s21611_s26 + $0x2aac] ss:$16 sps:$4 sm:$0xff]  }
 0x6bd   : > { %14920 = vmatprep.subr.bf16.mxu1 %v20649_v50 }
 0x6bf   : > { %14880 = vmatpush1.bf16.msra.mxu0 %v20644_v48  ;;  %v20716_v48 = vld [vmem:[%s21611_s26 + $0x28a8] ss:$16 sps:$4 sm:$0xff]  }
 0x6c0   : > { %14921 = vmatpush1.bf16.msra.mxu1 %v20647_v49  ;;  %14881 = vmatprep.subr.bf16.mxu0 %v20652_v51  ;;  %v20719_v49 = vld [vmem:[%s21611_s26 + $0x2aa8] ss:$16 sps:$4 sm:$0xff]  }
 0x6c1   : > { %14922 = vmatprep.subr.bf16.mxu1 %v20655_v5 }
 0x6c3   : > { %14882 = vmatpush1.bf16.msra.mxu0 %v20650_v29  ;;  %v20725_v29 = vld [vmem:[%s21611_s26 + $0x2a88] ss:$16 sps:$4 sm:$0xff]  }
 0x6c4   : > { %14923 = vmatpush1.bf16.msra.mxu1 %v20653_v53  ;;  %14883 = vmatprep.subr.bf16.mxu0 %v20658_v55  ;;  %v20730_v53 = vld [vmem:[%s21611_s26 + $0x286c] ss:$16 sps:$4 sm:$0xff]  }
 0x6c5   : > { %14924 = vmatprep.subr.bf16.mxu1 %v20661_v2  ;;  %v20733_v55 = vld [vmem:[%s21611_s26 + $0x2a6c] ss:$16 sps:$4 sm:$0xff]   ;;  %v20728_v2 = vld [vmem:[%s21611_s26 + $0x2868] ss:$16 sps:$4 sm:$0xff]  }
 0x6c7   : > { %14884 = vmatpush2.bf16.msra.mxu0 %v20656_v3  ;;  %v20731_v3 = vld [vmem:[%s21611_s26 + $0x2a68] ss:$16 sps:$4 sm:$0xff]  }
 0x6c8   : > { %14925 = vmatpush2.bf16.msra.mxu1 %v20659_v54  ;;  %14885 = vmatprep.subr.bf16.mxu0 %v20664_v31  ;;  %v20736_v54 = vld [vmem:[%s21611_s26 + $0x284c] ss:$16 sps:$4 sm:$0xff]  }
 0x6c9   : > { %14926 = vmatprep.subr.bf16.mxu1 %v20667_v30  ;;  %v20739_v31 = vld [vmem:[%s21611_s26 + $0x2a4c] ss:$16 sps:$4 sm:$0xff]   ;;  %v20734_v30 = vld [vmem:[%s21611_s26 + $0x2848] ss:$16 sps:$4 sm:$0xff]  }
 0x6cb   : > { %14886 = vmatpush2.bf16.msra.mxu0 %v20662_v33  ;;  %v20737_v33 = vld [vmem:[%s21611_s26 + $0x2a48] ss:$16 sps:$4 sm:$0xff]  }
 0x6cc   : > { %14927 = vmatpush2.bf16.msra.mxu1 %v20665_v36  ;;  %14887 = vmatprep.subr.bf16.mxu0 %v20670_v12  ;;  %v20742_v36 = vld [vmem:[%s21611_s26 + $0x282c] ss:$16 sps:$4 sm:$0xff]  }
 0x6cd   : > { %14928 = vmatprep.subr.bf16.mxu1 %v20673_v13  ;;  %v20745_v12 = vld [vmem:[%s21611_s26 + $0x2a2c] ss:$16 sps:$4 sm:$0xff]   ;;  %v20740_v13 = vld [vmem:[%s21611_s26 + $0x2828] ss:$16 sps:$4 sm:$0xff]  }
 0x6cf   : > { %14888 = vmatpush2.bf16.msra.mxu0 %v20668_v0  ;;  %v20743_v0 = vld [vmem:[%s21611_s26 + $0x2a28] ss:$16 sps:$4 sm:$0xff]  }
 0x6d0   : > { %14929 = vmatpush2.bf16.msra.mxu1 %v20671_v1  ;;  %14889 = vmatprep.subr.bf16.mxu0 %v20676_v46  ;;  %v20748_v1 = vld [vmem:[%s21611_s26 + $0x280c] ss:$16 sps:$4 sm:$0xff]  }
 0x6d1   : > { %14930 = vmatprep.subr.bf16.mxu1 %v20679_v47  ;;  %v20751_v46 = vld [vmem:[%s21611_s26 + $0x2a0c] ss:$16 sps:$4 sm:$0xff]   ;;  %v20746_v47 = vld [vmem:[%s21611_s26 + $0x2808] ss:$16 sps:$4 sm:$0xff]  }
 0x6d3   : > { %14890 = vmatpush2.bf16.msra.mxu0 %v20674_v21  ;;  %v20749_v21 = vld [vmem:[%s21611_s26 + $0x2a08] ss:$16 sps:$4 sm:$0xff]  }
 0x6d4   : > { %14931 = vmatpush2.bf16.msra.mxu1 %v20677_v60  ;;  %14891 = vmatprep.subr.bf16.mxu0 %v20682_v6  ;;  %v20754_v60 = vld [vmem:[%s21611_s26 + $0x29ec] ss:$16 sps:$4 sm:$0xff]  }
 0x6d5   : > { %14932 = vmatprep.subr.bf16.mxu1 %v20685_v56  ;;  %v20757_v6 = vld [vmem:[%s21611_s26 + $0x2bec] ss:$16 sps:$4 sm:$0xff]   ;;  %v20752_v56 = vld [vmem:[%s21611_s26 + $0x29e8] ss:$16 sps:$4 sm:$0xff]  }
 0x6d7   : > { %14892 = vmatpush2.bf16.msra.mxu0 %v20680_v18  ;;  %v20755_v18 = vld [vmem:[%s21611_s26 + $0x2be8] ss:$16 sps:$4 sm:$0xff]  }
 0x6d8   : > { %14933 = vmatpush2.bf16.msra.mxu1 %v20683_v57  ;;  %14893 = vmatprep.subr.bf16.mxu0 %v20688_v11  ;;  %v20760_v57 = vld [vmem:[%s21611_s26 + $0x29cc] ss:$16 sps:$4 sm:$0xff]  }
 0x6d9   : > { %14934 = vmatprep.subr.bf16.mxu1 %v20691_v58  ;;  %v20763_v11 = vld [vmem:[%s21611_s26 + $0x2bcc] ss:$16 sps:$4 sm:$0xff]   ;;  %v20758_v58 = vld [vmem:[%s21611_s26 + $0x29c8] ss:$16 sps:$4 sm:$0xff]  }
 0x6db   : > { %14894 = vmatpush2.bf16.msra.mxu0 %v20686_v25  ;;  %v20761_v25 = vld [vmem:[%s21611_s26 + $0x2bc8] ss:$16 sps:$4 sm:$0xff]  }
 0x6dc   : > { %14935 = vmatpush2.bf16.msra.mxu1 %v20689_v15  ;;  %14895 = vmatprep.subr.bf16.mxu0 %v20694_v59  ;;  %v20766_v15 = vld [vmem:[%s21611_s26 + $0x29ac] ss:$16 sps:$4 sm:$0xff]  }
 0x6dd   : > { %14936 = vmatprep.subr.bf16.mxu1 %v20697_v22  ;;  %v20769_v59 = vld [vmem:[%s21611_s26 + $0x2bac] ss:$16 sps:$4 sm:$0xff]   ;;  %v20764_v22 = vld [vmem:[%s21611_s26 + $0x29a8] ss:$16 sps:$4 sm:$0xff]  }
 0x6df   : > { %14896 = vmatpush2.bf16.msra.mxu0 %v20692_v23  ;;  %v20767_v23 = vld [vmem:[%s21611_s26 + $0x2ba8] ss:$16 sps:$4 sm:$0xff]  }
 0x6e0   : > { %14937 = vmatpush2.bf16.msra.mxu1 %v20695_v7  ;;  %14897 = vmatprep.subr.bf16.mxu0 %v20700_v38  ;;  %v20772_v7 = vld [vmem:[%s21611_s26 + $0x298c] ss:$16 sps:$4 sm:$0xff]  }
 0x6e1   : > { %14938 = vmatprep.subr.bf16.mxu1 %v20703_v26  ;;  %v20775_v38 = vld [vmem:[%s21611_s26 + $0x2b8c] ss:$16 sps:$4 sm:$0xff]   ;;  %v20770_v26 = vld [vmem:[%s21611_s26 + $0x2988] ss:$16 sps:$4 sm:$0xff]  }
 0x6e3   : > { %14898 = vmatpush2.bf16.msra.mxu0 %v20698_v16  ;;  %v20773_v16 = vld [vmem:[%s21611_s26 + $0x2b88] ss:$16 sps:$4 sm:$0xff]  }
 0x6e4   : > { %14939 = vmatpush2.bf16.msra.mxu1 %v20701_v63  ;;  %14949 = vmatprep.subr.bf16.mxu0 %v20706_v52  ;;  %v20778_v63 = vld [vmem:[%s21611_s26 + $0x296c] ss:$16 sps:$4 sm:$0xff]  }
 0x6e5   : > { %14990 = vmatprep.subr.bf16.mxu1 %v20709_v44  ;;  %v20781_v52 = vld [vmem:[%s21611_s26 + $0x2b6c] ss:$16 sps:$4 sm:$0xff]   ;;  %v20776_v44 = vld [vmem:[%s21611_s26 + $0x2968] ss:$16 sps:$4 sm:$0xff]  }
 0x6e6   : > { %v14655_v10 = vpop.f32.mrf.mxu0  ;;  %14900 = vmatmul.mubr.bf16.vlgmr.msra.gmra.mxu0 %v22462_v19 }
 0x6e7   : > { %v14696_v17 = vpop.f32.mrf.mxu1  ;;  %14941 = vmatmul.mubr.bf16.vlgmr.msra.gmra.mxu1 %v22464_v37  ;;  %v14656_v20 = vadd.f32 %v14655_v10, %v23659_v32  ;;  %14950 = vmatpush1.bf16.msra.mxu0 %v20704_v45  ;;  %v20779_v45 = vld [vmem:[%s21611_s26 + $0x2b68] ss:$16 sps:$4 sm:$0xff]  }
 0x6e8   : > { %14991 = vmatpush1.bf16.msra.mxu1 %v20707_v40  ;;  %v14657_v39 = vpop.f32.mrf.mxu0  ;;  %14951 = vmatprep.subr.bf16.mxu0 %v20712_v41  ;;  %v20784_v40 = vld [vmem:[%s21611_s26 + $0x294c] ss:$16 sps:$4 sm:$0xff]   ;;  %v20785_v10 = vld [vmem:[%s21611_s26 + $0x2b48] ss:$16 sps:$4 sm:$0xff]  }
 0x6e9   : > { %v14698_v34 = vpop.f32.mrf.mxu1  ;;  %14992 = vmatprep.subr.bf16.mxu1 %v20715_v14  ;;  %v23733_v35 = vadd.f32 %v14696_v17, %v14656_v20  ;;  %v14658_v19 = vadd.f32 %v14657_v39, %v23664_v62  ;;  %14981 = vmatprep.mubr.bf16.mxu0 %v22474_v8  ;;  %v20724_v8 = vld [vmem:[%s21611_s26 + $0x288c] ss:$16 sps:$4 sm:$0xff]   ;;  %v20722_v62 = vld [vmem:[%s21611_s26 + $0x2888] ss:$16 sps:$4 sm:$0xff]  }
 0x6ea   : > { %15022 = vmatprep.mubr.bf16.mxu1 %v22476_v9  ;;  %v14659_v37 = vpop.f32.mrf.mxu0  ;;  %v20727_v9 = vld [vmem:[%s21611_s26 + $0x2a8c] ss:$16 sps:$4 sm:$0xff]   ;;  %v20782_v14 = vld [vmem:[%s21611_s26 + $0x2948] ss:$16 sps:$4 sm:$0xff]  }
 0x6eb   : > { %v14700_v32 = vpop.f32.mrf.mxu1  ;;  %v23738_v50 = vadd.f32 %v14698_v34, %v14658_v19  ;;  %14952 = vmatpush1.bf16.msra.mxu0 %v20710_v24  ;;  %v20787_v41 = vld [vmem:[%s21611_s26 + $0x2b4c] ss:$16 sps:$4 sm:$0xff]   ;;  %v20788_v24 = vld [vmem:[%s21611_s26 + $0x2928] ss:$16 sps:$4 sm:$0xff]  }
 0x6ec   : > { %14993 = vmatpush1.bf16.msra.mxu1 %v20713_v4  ;;  %v14660_v51 = vpop.f32.mrf.mxu0  ;;  %14953 = vmatprep.subr.bf16.mxu0 %v20718_v42  ;;  %v20790_v17 = vld [vmem:[%s21611_s26 + $0x292c] ss:$16 sps:$4 sm:$0xff]   ;;  %v20791_v4 = vld [vmem:[%s21611_s26 + $0x2b28] ss:$16 sps:$4 sm:$0xff]  }
 0x6ed   : > { %v14701_v5 = vpop.f32.mrf.mxu1  ;;  %14994 = vmatprep.subr.bf16.mxu1 %v20721_v27  ;;  %v20793_v20 = vld [vmem:[%s21611_s26 + $0x2b2c] ss:$16 sps:$4 sm:$0xff]   ;;  %v20794_v42 = vld [vmem:[%s21611_s26 + $0x2908] ss:$16 sps:$4 sm:$0xff]  }
 0x6ee   : > { %v20796_v39 = vld [vmem:[%s21611_s26 + $0x290c] ss:$16 sps:$4 sm:$0xff]   ;;  %v20797_v27 = vld [vmem:[%s21611_s26 + $0x2b08] ss:$16 sps:$4 sm:$0xff]  }
 0x6ef   : > { %14954 = vmatpush1.bf16.msra.mxu0 %v20716_v48  ;;  %v20799_v34 = vld [vmem:[%s21611_s26 + $0x2b0c] ss:$16 sps:$4 sm:$0xff]   ;;  %v20800_v32 = vld [vmem:[%s21611_s26 + $0x2ce8] ss:$16 sps:$4 sm:$0xff]  }
 0x6f0   : > { %14995 = vmatpush1.bf16.msra.mxu1 %v20719_v49  ;;  %14955 = vmatprep.subr.bf16.mxu0 %v20724_v8  ;;  %v20802_v19 = vld [vmem:[%s21611_s26 + $0x2cec] ss:$16 sps:$4 sm:$0xff]   ;;  %v20803_v48 = vld [vmem:[%s21611_s26 + $0x2ee8] ss:$16 sps:$4 sm:$0xff]  }
 0x6f1   : > { %14996 = vmatprep.subr.bf16.mxu1 %v20727_v9  ;;  %v20805_v37 = vld [vmem:[%s21611_s26 + $0x2eec] ss:$16 sps:$4 sm:$0xff]  }
 0x6f2   : > { %v20808_v49 = vld [vmem:[%s21611_s26 + $0x2ccc] ss:$16 sps:$4 sm:$0xff]  }
 0x6f3   : > { %14956 = vmatpush1.bf16.msra.mxu0 %v20722_v62  ;;  %v20811_v51 = vld [vmem:[%s21611_s26 + $0x2ecc] ss:$16 sps:$4 sm:$0xff]  }
 0x6f4   : > { %14997 = vmatpush1.bf16.msra.mxu1 %v20725_v29  ;;  %14957 = vmatprep.subr.bf16.mxu0 %v20730_v53  ;;  %v24362_v9 = vld [vmem:[#allocation14_spill] sm:$0xff]  ;;  %v24363_v62 = vld [vmem:[#allocation15_spill] sm:$0xff] }
 0x6f5   : > { %14998 = vmatprep.subr.bf16.mxu1 %v20733_v55  ;;  %v20806_v53 = vld [vmem:[%s21611_s26 + $0x2cc8] ss:$16 sps:$4 sm:$0xff]  }
 0x6f6   : > { %v20809_v55 = vld [vmem:[%s21611_s26 + $0x2ec8] ss:$16 sps:$4 sm:$0xff]  }
 0x6f7   : > { %14958 = vmatpush1.bf16.msra.mxu0 %v20728_v2 }
 0x6f8   : > { %14999 = vmatpush1.bf16.msra.mxu1 %v20731_v3  ;;  %14959 = vmatprep.subr.bf16.mxu0 %v20736_v54  ;;  %v20814_v54 = vld [vmem:[%s21611_s26 + $0x2cac] ss:$16 sps:$4 sm:$0xff]  }
 0x6f9   : > { %15000 = vmatprep.subr.bf16.mxu1 %v20739_v31  ;;  %v20817_v31 = vld [vmem:[%s21611_s26 + $0x2eac] ss:$16 sps:$4 sm:$0xff]  }
 0x6fb   : > { %14960 = vmatpush1.bf16.msra.mxu0 %v20734_v30 }
 0x6fc   : > { %15001 = vmatpush1.bf16.msra.mxu1 %v20737_v33  ;;  %14961 = vmatprep.subr.bf16.mxu0 %v20742_v36  ;;  %v24364_v36 = vld [vmem:[#allocation16_spill] sm:$0xff] }
 0x6fd   : > { %15002 = vmatprep.subr.bf16.mxu1 %v20745_v12 }
 0x6ff   : > { %14962 = vmatpush1.bf16.msra.mxu0 %v20740_v13 }
 0x700   : > { %15003 = vmatpush1.bf16.msra.mxu1 %v20743_v0  ;;  %14963 = vmatprep.subr.bf16.mxu0 %v20748_v1  ;;  %v20812_v1 = vld [vmem:[%s21611_s26 + $0x2ca8] ss:$16 sps:$4 sm:$0xff]  }
 0x701   : > { %15004 = vmatprep.subr.bf16.mxu1 %v20751_v46  ;;  %v20815_v46 = vld [vmem:[%s21611_s26 + $0x2ea8] ss:$16 sps:$4 sm:$0xff]  }
 0x703   : > { %14964 = vmatpush1.bf16.msra.mxu0 %v20746_v47 }
 0x704   : > { %15005 = vmatpush1.bf16.msra.mxu1 %v20749_v21  ;;  %14965 = vmatprep.subr.bf16.mxu0 %v20754_v60  ;;  %v20823_v60 = vld [vmem:[%s21611_s26 + $0x2e8c] ss:$16 sps:$4 sm:$0xff]  }
 0x705   : > { %15006 = vmatprep.subr.bf16.mxu1 %v20757_v6  ;;  %v20818_v6 = vld [vmem:[%s21611_s26 + $0x2c88] ss:$16 sps:$4 sm:$0xff]  }
 0x707   : > { %14966 = vmatpush2.bf16.msra.mxu0 %v20752_v56  ;;  %v20821_v56 = vld [vmem:[%s21611_s26 + $0x2e88] ss:$16 sps:$4 sm:$0xff]  }
 0x708   : > { %15007 = vmatpush2.bf16.msra.mxu1 %v20755_v18  ;;  %14967 = vmatprep.subr.bf16.mxu0 %v20760_v57  ;;  %v20826_v18 = vld [vmem:[%s21611_s26 + $0x2c6c] ss:$16 sps:$4 sm:$0xff]  }
 0x709   : > { %15008 = vmatprep.subr.bf16.mxu1 %v20763_v11  ;;  %v20829_v57 = vld [vmem:[%s21611_s26 + $0x2e6c] ss:$16 sps:$4 sm:$0xff]   ;;  %v20824_v11 = vld [vmem:[%s21611_s26 + $0x2c68] ss:$16 sps:$4 sm:$0xff]  }
 0x70b   : > { %14968 = vmatpush2.bf16.msra.mxu0 %v20758_v58  ;;  %v20827_v58 = vld [vmem:[%s21611_s26 + $0x2e68] ss:$16 sps:$4 sm:$0xff]  }
 0x70c   : > { %15009 = vmatpush2.bf16.msra.mxu1 %v20761_v25  ;;  %14969 = vmatprep.subr.bf16.mxu0 %v20766_v15  ;;  %v20832_v25 = vld [vmem:[%s21611_s26 + $0x2c4c] ss:$16 sps:$4 sm:$0xff]  }
 0x70d   : > { %15010 = vmatprep.subr.bf16.mxu1 %v20769_v59  ;;  %v20835_v15 = vld [vmem:[%s21611_s26 + $0x2e4c] ss:$16 sps:$4 sm:$0xff]   ;;  %v20830_v59 = vld [vmem:[%s21611_s26 + $0x2c48] ss:$16 sps:$4 sm:$0xff]  }
 0x70f   : > { %14970 = vmatpush2.bf16.msra.mxu0 %v20764_v22  ;;  %v20833_v22 = vld [vmem:[%s21611_s26 + $0x2e48] ss:$16 sps:$4 sm:$0xff]  }
 0x710   : > { %15011 = vmatpush2.bf16.msra.mxu1 %v20767_v23  ;;  %14971 = vmatprep.subr.bf16.mxu0 %v20772_v7  ;;  %v20838_v23 = vld [vmem:[%s21611_s26 + $0x2c2c] ss:$16 sps:$4 sm:$0xff]  }
 0x711   : > { %15012 = vmatprep.subr.bf16.mxu1 %v20775_v38  ;;  %v20841_v7 = vld [vmem:[%s21611_s26 + $0x2e2c] ss:$16 sps:$4 sm:$0xff]   ;;  %v20836_v38 = vld [vmem:[%s21611_s26 + $0x2c28] ss:$16 sps:$4 sm:$0xff]  }
 0x713   : > { %14972 = vmatpush2.bf16.msra.mxu0 %v20770_v26  ;;  %v20839_v26 = vld [vmem:[%s21611_s26 + $0x2e28] ss:$16 sps:$4 sm:$0xff]  }
 0x714   : > { %15013 = vmatpush2.bf16.msra.mxu1 %v20773_v16  ;;  %14973 = vmatprep.subr.bf16.mxu0 %v20778_v63  ;;  %v20844_v16 = vld [vmem:[%s21611_s26 + $0x2c0c] ss:$16 sps:$4 sm:$0xff]  }
 0x715   : > { %15014 = vmatprep.subr.bf16.mxu1 %v20781_v52  ;;  %v20847_v63 = vld [vmem:[%s21611_s26 + $0x2e0c] ss:$16 sps:$4 sm:$0xff]   ;;  %v20842_v52 = vld [vmem:[%s21611_s26 + $0x2c08] ss:$16 sps:$4 sm:$0xff]  }
 0x717   : > { %14974 = vmatpush2.bf16.msra.mxu0 %v20776_v44  ;;  %v20845_v44 = vld [vmem:[%s21611_s26 + $0x2e08] ss:$16 sps:$4 sm:$0xff]  }
 0x718   : > { %15015 = vmatpush2.bf16.msra.mxu1 %v20779_v45  ;;  %14975 = vmatprep.subr.bf16.mxu0 %v20784_v40  ;;  %v20850_v45 = vld [vmem:[%s21611_s26 + $0x2dec] ss:$16 sps:$4 sm:$0xff]  }
 0x719   : > { %15016 = vmatprep.subr.bf16.mxu1 %v20787_v41  ;;  %v20853_v40 = vld [vmem:[%s21611_s26 + $0x2fec] ss:$16 sps:$4 sm:$0xff]   ;;  %v20848_v41 = vld [vmem:[%s21611_s26 + $0x2de8] ss:$16 sps:$4 sm:$0xff]  }
 0x71b   : > { %14976 = vmatpush2.bf16.msra.mxu0 %v20782_v14  ;;  %v20851_v14 = vld [vmem:[%s21611_s26 + $0x2fe8] ss:$16 sps:$4 sm:$0xff]  }
 0x71c   : > { %15017 = vmatpush2.bf16.msra.mxu1 %v20785_v10  ;;  %14977 = vmatprep.subr.bf16.mxu0 %v20790_v17  ;;  %v20856_v10 = vld [vmem:[%s21611_s26 + $0x2dcc] ss:$16 sps:$4 sm:$0xff]  }
 0x71d   : > { %15018 = vmatprep.subr.bf16.mxu1 %v20793_v20  ;;  %v20859_v17 = vld [vmem:[%s21611_s26 + $0x2fcc] ss:$16 sps:$4 sm:$0xff]   ;;  %v20854_v20 = vld [vmem:[%s21611_s26 + $0x2dc8] ss:$16 sps:$4 sm:$0xff]  }
 0x71f   : > { %14978 = vmatpush2.bf16.msra.mxu0 %v20788_v24  ;;  %v20857_v24 = vld [vmem:[%s21611_s26 + $0x2fc8] ss:$16 sps:$4 sm:$0xff]  }
 0x720   : > { %15019 = vmatpush2.bf16.msra.mxu1 %v20791_v4  ;;  %14979 = vmatprep.subr.bf16.mxu0 %v20796_v39  ;;  %v20862_v4 = vld [vmem:[%s21611_s26 + $0x2dac] ss:$16 sps:$4 sm:$0xff]  }
 0x721   : > { %15020 = vmatprep.subr.bf16.mxu1 %v20799_v34  ;;  %v20865_v39 = vld [vmem:[%s21611_s26 + $0x2fac] ss:$16 sps:$4 sm:$0xff]   ;;  %v20860_v34 = vld [vmem:[%s21611_s26 + $0x2da8] ss:$16 sps:$4 sm:$0xff]  }
 0x723   : > { %14980 = vmatpush2.bf16.msra.mxu0 %v20794_v42  ;;  %v20863_v42 = vld [vmem:[%s21611_s26 + $0x2fa8] ss:$16 sps:$4 sm:$0xff]  }
 0x724   : > { %15021 = vmatpush2.bf16.msra.mxu1 %v20797_v27  ;;  %15031 = vmatprep.subr.bf16.mxu0 %v20802_v19  ;;  %v20868_v27 = vld [vmem:[%s21611_s26 + $0x2d8c] ss:$16 sps:$4 sm:$0xff]  }
 0x725   : > { %15072 = vmatprep.subr.bf16.mxu1 %v20805_v37  ;;  %v20871_v19 = vld [vmem:[%s21611_s26 + $0x2f8c] ss:$16 sps:$4 sm:$0xff]   ;;  %v20866_v37 = vld [vmem:[%s21611_s26 + $0x2d88] ss:$16 sps:$4 sm:$0xff]  }
 0x726   : > { %v14737_v5 = vpop.f32.mrf.mxu0  ;;  %14982 = vmatmul.mubr.bf16.vlgmr.msra.gmra.mxu0 %v24362_v9  ;;  %v20883_v9 = vld [vmem:[%s21611_s26 + $0x2f4c] ss:$16 sps:$4 sm:$0xff]  }
 0x727   : > { %v14778_v8 = vpop.f32.mrf.mxu1  ;;  %15023 = vmatmul.mubr.bf16.vlgmr.msra.gmra.mxu1 %v24363_v62  ;;  %v14738_v29 = vadd.f32 %v14737_v5, %v23733_v35  ;;  %15032 = vmatpush1.bf16.msra.mxu0 %v20800_v32  ;;  %v24365_v35 = vld [vmem:[#allocation17_spill] sm:$0xff]  ;;  %v20869_v32 = vld [vmem:[%s21611_s26 + $0x2f88] ss:$16 sps:$4 sm:$0xff]  }
 0x728   : > { %15073 = vmatpush1.bf16.msra.mxu1 %v20803_v48  ;;  %v14739_v2 = vpop.f32.mrf.mxu0  ;;  %15033 = vmatprep.subr.bf16.mxu0 %v20808_v49  ;;  %v20874_v48 = vld [vmem:[%s21611_s26 + $0x2d6c] ss:$16 sps:$4 sm:$0xff]   ;;  %v20875_v5 = vld [vmem:[%s21611_s26 + $0x2f68] ss:$16 sps:$4 sm:$0xff]  }
 0x729   : > { %v14780_v3 = vpop.f32.mrf.mxu1  ;;  %15074 = vmatprep.subr.bf16.mxu1 %v20811_v51  ;;  %v23807_v30 = vadd.f32 %v14778_v8, %v14738_v29  ;;  %v14740_v33 = vadd.f32 %v14739_v2, %v23738_v50  ;;  %15063 = vmatprep.mubr.bf16.mxu0 %v24364_v36  ;;  %v20820_v50 = vld [vmem:[%s21611_s26 + $0x2c8c] ss:$16 sps:$4 sm:$0xff]   ;;  %v20872_v51 = vld [vmem:[%s21611_s26 + $0x2d68] ss:$16 sps:$4 sm:$0xff]  }
 0x72a   : > { %15104 = vmatprep.mubr.bf16.mxu1 %v24365_v35  ;;  %v14741_v12 = vpop.f32.mrf.mxu0  ;;  %v20877_v49 = vld [vmem:[%s21611_s26 + $0x2f6c] ss:$16 sps:$4 sm:$0xff]   ;;  %v20878_v62 = vld [vmem:[%s21611_s26 + $0x2d48] ss:$16 sps:$4 sm:$0xff]  }
 0x72b   : > { %v14782_v13 = vpop.f32.mrf.mxu1  ;;  %v23812_v0 = vadd.f32 %v14780_v3, %v14740_v33  ;;  %15034 = vmatpush1.bf16.msra.mxu0 %v20806_v53  ;;  %v20880_v8 = vld [vmem:[%s21611_s26 + $0x2d4c] ss:$16 sps:$4 sm:$0xff]   ;;  %v20881_v29 = vld [vmem:[%s21611_s26 + $0x2f48] ss:$16 sps:$4 sm:$0xff]  }
 0x72c   : > { %15075 = vmatpush1.bf16.msra.mxu1 %v20809_v55  ;;  %v14742_v47 = vpop.f32.mrf.mxu0  ;;  %15035 = vmatprep.subr.bf16.mxu0 %v20814_v54  ;;  %v20886_v53 = vld [vmem:[%s21611_s26 + $0x2d2c] ss:$16 sps:$4 sm:$0xff]   ;;  %v20884_v2 = vld [vmem:[%s21611_s26 + $0x2d28] ss:$16 sps:$4 sm:$0xff]  }
 0x72d   : > { %v14783_v21 = vpop.f32.mrf.mxu1  ;;  %15076 = vmatprep.subr.bf16.mxu1 %v20817_v31  ;;  %v20889_v55 = vld [vmem:[%s21611_s26 + $0x2f2c] ss:$16 sps:$4 sm:$0xff]   ;;  %v20887_v3 = vld [vmem:[%s21611_s26 + $0x2f28] ss:$16 sps:$4 sm:$0xff]  }
 0x72e   : > { %v20892_v54 = vld [vmem:[%s21611_s26 + $0x2d0c] ss:$16 sps:$4 sm:$0xff]   ;;  %v20890_v33 = vld [vmem:[%s21611_s26 + $0x2d08] ss:$16 sps:$4 sm:$0xff]  }
 0x72f   : > { %15036 = vmatpush1.bf16.msra.mxu0 %v20812_v1  ;;  %v20895_v31 = vld [vmem:[%s21611_s26 + $0x2f0c] ss:$16 sps:$4 sm:$0xff]   ;;  %v20893_v36 = vld [vmem:[%s21611_s26 + $0x2f08] ss:$16 sps:$4 sm:$0xff]  }
 0x730   : > { %15077 = vmatpush1.bf16.msra.mxu1 %v20815_v46  ;;  %15037 = vmatprep.subr.bf16.mxu0 %v20820_v50  ;;  %v20898_v35 = vld [vmem:[%s21611_s26 + $0x30ec] ss:$16 sps:$4 sm:$0xff]   ;;  %v20896_v13 = vld [vmem:[%s21611_s26 + $0x30e8] ss:$16 sps:$4 sm:$0xff]  }
 0x731   : > { %15078 = vmatprep.subr.bf16.mxu1 %v20823_v60  ;;  %v20901_v12 = vld [vmem:[%s21611_s26 + $0x32ec] ss:$16 sps:$4 sm:$0xff]   ;;  %v20899_v1 = vld [vmem:[%s21611_s26 + $0x32e8] ss:$16 sps:$4 sm:$0xff]  }
 0x732   : > { %v20904_v46 = vld [vmem:[%s21611_s26 + $0x30cc] ss:$16 sps:$4 sm:$0xff]  }
 0x733   : > { %15038 = vmatpush1.bf16.msra.mxu0 %v20818_v6  ;;  %v20907_v47 = vld [vmem:[%s21611_s26 + $0x32cc] ss:$16 sps:$4 sm:$0xff]  }
 0x734   : > { %15079 = vmatpush1.bf16.msra.mxu1 %v20821_v56  ;;  %15039 = vmatprep.subr.bf16.mxu0 %v20826_v18  ;;  %v24366_v60 = vld [vmem:[#allocation18_spill] sm:$0xff]  ;;  %v24367_v6 = vld [vmem:[#allocation19_spill] sm:$0xff] }
 0x735   : > { %15080 = vmatprep.subr.bf16.mxu1 %v20829_v57  ;;  %v20902_v18 = vld [vmem:[%s21611_s26 + $0x30c8] ss:$16 sps:$4 sm:$0xff]  }
 0x736   : > { %v20905_v57 = vld [vmem:[%s21611_s26 + $0x32c8] ss:$16 sps:$4 sm:$0xff]  }
 0x737   : > { %15040 = vmatpush1.bf16.msra.mxu0 %v20824_v11 }
 0x738   : > { %15081 = vmatpush1.bf16.msra.mxu1 %v20827_v58  ;;  %15041 = vmatprep.subr.bf16.mxu0 %v20832_v25  ;;  %v20910_v25 = vld [vmem:[%s21611_s26 + $0x30ac] ss:$16 sps:$4 sm:$0xff]  }
 0x739   : > { %15082 = vmatprep.subr.bf16.mxu1 %v20835_v15  ;;  %v20913_v15 = vld [vmem:[%s21611_s26 + $0x32ac] ss:$16 sps:$4 sm:$0xff]  }
 0x73b   : > { %15042 = vmatpush1.bf16.msra.mxu0 %v20830_v59 }
 0x73c   : > { %15083 = vmatpush1.bf16.msra.mxu1 %v20833_v22  ;;  %15043 = vmatprep.subr.bf16.mxu0 %v20838_v23  ;;  %v24368_v23 = vld [vmem:[#allocation20_spill] sm:$0xff] }
 0x73d   : > { %15084 = vmatprep.subr.bf16.mxu1 %v20841_v7 }
 0x73f   : > { %15044 = vmatpush1.bf16.msra.mxu0 %v20836_v38 }
 0x740   : > { %15085 = vmatpush1.bf16.msra.mxu1 %v20839_v26  ;;  %15045 = vmatprep.subr.bf16.mxu0 %v20844_v16  ;;  %v20908_v16 = vld [vmem:[%s21611_s26 + $0x30a8] ss:$16 sps:$4 sm:$0xff]  }
 0x741   : > { %15086 = vmatprep.subr.bf16.mxu1 %v20847_v63  ;;  %v20911_v63 = vld [vmem:[%s21611_s26 + $0x32a8] ss:$16 sps:$4 sm:$0xff]  }
 0x743   : > { %15046 = vmatpush1.bf16.msra.mxu0 %v20842_v52 }
 0x744   : > { %15087 = vmatpush1.bf16.msra.mxu1 %v20845_v44  ;;  %15047 = vmatprep.subr.bf16.mxu0 %v20850_v45  ;;  %v20919_v45 = vld [vmem:[%s21611_s26 + $0x328c] ss:$16 sps:$4 sm:$0xff]  }
 0x745   : > { %15088 = vmatprep.subr.bf16.mxu1 %v20853_v40  ;;  %v20914_v40 = vld [vmem:[%s21611_s26 + $0x3088] ss:$16 sps:$4 sm:$0xff]  }
 0x747   : > { %15048 = vmatpush2.bf16.msra.mxu0 %v20848_v41  ;;  %v20917_v41 = vld [vmem:[%s21611_s26 + $0x3288] ss:$16 sps:$4 sm:$0xff]  }
 0x748   : > { %15089 = vmatpush2.bf16.msra.mxu1 %v20851_v14  ;;  %15049 = vmatprep.subr.bf16.mxu0 %v20856_v10  ;;  %v20922_v14 = vld [vmem:[%s21611_s26 + $0x306c] ss:$16 sps:$4 sm:$0xff]  }
 0x749   : > { %15090 = vmatprep.subr.bf16.mxu1 %v20859_v17  ;;  %v20925_v10 = vld [vmem:[%s21611_s26 + $0x326c] ss:$16 sps:$4 sm:$0xff]   ;;  %v20920_v17 = vld [vmem:[%s21611_s26 + $0x3068] ss:$16 sps:$4 sm:$0xff]  }
 0x74b   : > { %15050 = vmatpush2.bf16.msra.mxu0 %v20854_v20  ;;  %v20923_v20 = vld [vmem:[%s21611_s26 + $0x3268] ss:$16 sps:$4 sm:$0xff]  }
 0x74c   : > { %15091 = vmatpush2.bf16.msra.mxu1 %v20857_v24  ;;  %15051 = vmatprep.subr.bf16.mxu0 %v20862_v4  ;;  %v20928_v24 = vld [vmem:[%s21611_s26 + $0x304c] ss:$16 sps:$4 sm:$0xff]  }
 0x74d   : > { %15092 = vmatprep.subr.bf16.mxu1 %v20865_v39  ;;  %v20931_v4 = vld [vmem:[%s21611_s26 + $0x324c] ss:$16 sps:$4 sm:$0xff]   ;;  %v20926_v39 = vld [vmem:[%s21611_s26 + $0x3048] ss:$16 sps:$4 sm:$0xff]  }
 0x74f   : > { %15052 = vmatpush2.bf16.msra.mxu0 %v20860_v34  ;;  %v20929_v34 = vld [vmem:[%s21611_s26 + $0x3248] ss:$16 sps:$4 sm:$0xff]  }
 0x750   : > { %15093 = vmatpush2.bf16.msra.mxu1 %v20863_v42  ;;  %15053 = vmatprep.subr.bf16.mxu0 %v20868_v27  ;;  %v20934_v42 = vld [vmem:[%s21611_s26 + $0x302c] ss:$16 sps:$4 sm:$0xff]  }
 0x751   : > { %15094 = vmatprep.subr.bf16.mxu1 %v20871_v19  ;;  %v20937_v27 = vld [vmem:[%s21611_s26 + $0x322c] ss:$16 sps:$4 sm:$0xff]   ;;  %v20932_v19 = vld [vmem:[%s21611_s26 + $0x3028] ss:$16 sps:$4 sm:$0xff]  }
 0x753   : > { %15054 = vmatpush2.bf16.msra.mxu0 %v20866_v37  ;;  %v20935_v37 = vld [vmem:[%s21611_s26 + $0x3228] ss:$16 sps:$4 sm:$0xff]  }
 0x754   : > { %15095 = vmatpush2.bf16.msra.mxu1 %v20869_v32  ;;  %15055 = vmatprep.subr.bf16.mxu0 %v20874_v48  ;;  %v20940_v32 = vld [vmem:[%s21611_s26 + $0x300c] ss:$16 sps:$4 sm:$0xff]  }
 0x755   : > { %15096 = vmatprep.subr.bf16.mxu1 %v20877_v49  ;;  %v20943_v48 = vld [vmem:[%s21611_s26 + $0x320c] ss:$16 sps:$4 sm:$0xff]   ;;  %v20938_v49 = vld [vmem:[%s21611_s26 + $0x3008] ss:$16 sps:$4 sm:$0xff]  }
 0x757   : > { %15056 = vmatpush2.bf16.msra.mxu0 %v20872_v51  ;;  %v20941_v51 = vld [vmem:[%s21611_s26 + $0x3208] ss:$16 sps:$4 sm:$0xff]  }
 0x758   : > { %15097 = vmatpush2.bf16.msra.mxu1 %v20875_v5  ;;  %15057 = vmatprep.subr.bf16.mxu0 %v20880_v8  ;;  %v20946_v5 = vld [vmem:[%s21611_s26 + $0x31ec] ss:$16 sps:$4 sm:$0xff]  }
 0x759   : > { %15098 = vmatprep.subr.bf16.mxu1 %v20883_v9  ;;  %v20949_v8 = vld [vmem:[%s21611_s26 + $0x33ec] ss:$16 sps:$4 sm:$0xff]   ;;  %v20944_v9 = vld [vmem:[%s21611_s26 + $0x31e8] ss:$16 sps:$4 sm:$0xff]  }
 0x75b   : > { %15058 = vmatpush2.bf16.msra.mxu0 %v20878_v62  ;;  %v20947_v62 = vld [vmem:[%s21611_s26 + $0x33e8] ss:$16 sps:$4 sm:$0xff]  }
 0x75c   : > { %15099 = vmatpush2.bf16.msra.mxu1 %v20881_v29  ;;  %15059 = vmatprep.subr.bf16.mxu0 %v20886_v53  ;;  %v20952_v29 = vld [vmem:[%s21611_s26 + $0x31cc] ss:$16 sps:$4 sm:$0xff]  }
 0x75d   : > { %15100 = vmatprep.subr.bf16.mxu1 %v20889_v55  ;;  %v20955_v53 = vld [vmem:[%s21611_s26 + $0x33cc] ss:$16 sps:$4 sm:$0xff]   ;;  %v20950_v55 = vld [vmem:[%s21611_s26 + $0x31c8] ss:$16 sps:$4 sm:$0xff]  }
 0x75f   : > { %15060 = vmatpush2.bf16.msra.mxu0 %v20884_v2  ;;  %v20953_v2 = vld [vmem:[%s21611_s26 + $0x33c8] ss:$16 sps:$4 sm:$0xff]  }
 0x760   : > { %15101 = vmatpush2.bf16.msra.mxu1 %v20887_v3  ;;  %15061 = vmatprep.subr.bf16.mxu0 %v20892_v54  ;;  %v20958_v3 = vld [vmem:[%s21611_s26 + $0x31ac] ss:$16 sps:$4 sm:$0xff]  }
 0x761   : > { %15102 = vmatprep.subr.bf16.mxu1 %v20895_v31  ;;  %v20961_v54 = vld [vmem:[%s21611_s26 + $0x33ac] ss:$16 sps:$4 sm:$0xff]   ;;  %v20956_v31 = vld [vmem:[%s21611_s26 + $0x31a8] ss:$16 sps:$4 sm:$0xff]  }
 0x763   : > { %15062 = vmatpush2.bf16.msra.mxu0 %v20890_v33  ;;  %v20959_v33 = vld [vmem:[%s21611_s26 + $0x33a8] ss:$16 sps:$4 sm:$0xff]  }
 0x764   : > { %15103 = vmatpush2.bf16.msra.mxu1 %v20893_v36  ;;  %15113 = vmatprep.subr.bf16.mxu0 %v20898_v35  ;;  %v20964_v36 = vld [vmem:[%s21611_s26 + $0x318c] ss:$16 sps:$4 sm:$0xff]  }
 0x765   : > { %15154 = vmatprep.subr.bf16.mxu1 %v20901_v12  ;;  %v20967_v35 = vld [vmem:[%s21611_s26 + $0x338c] ss:$16 sps:$4 sm:$0xff]   ;;  %v20962_v12 = vld [vmem:[%s21611_s26 + $0x3188] ss:$16 sps:$4 sm:$0xff]  }
 0x766   : > { %v14819_v21 = vpop.f32.mrf.mxu0  ;;  %15064 = vmatmul.mubr.bf16.vlgmr.msra.gmra.mxu0 %v24366_v60  ;;  %v20979_v60 = vld [vmem:[%s21611_s26 + $0x334c] ss:$16 sps:$4 sm:$0xff]  }
 0x767   : > { %v14860_v50 = vpop.f32.mrf.mxu1  ;;  %15105 = vmatmul.mubr.bf16.vlgmr.msra.gmra.mxu1 %v24367_v6  ;;  %v14820_v56 = vadd.f32 %v14819_v21, %v23807_v30  ;;  %15114 = vmatpush1.bf16.msra.mxu0 %v20896_v13  ;;  %v24369_v30 = vld [vmem:[#allocation21_spill] sm:$0xff]  ;;  %v20965_v13 = vld [vmem:[%s21611_s26 + $0x3388] ss:$16 sps:$4 sm:$0xff]  }
 0x768   : > { %15155 = vmatpush1.bf16.msra.mxu1 %v20899_v1  ;;  %v14821_v11 = vpop.f32.mrf.mxu0  ;;  %15115 = vmatprep.subr.bf16.mxu0 %v20904_v46  ;;  %v20970_v1 = vld [vmem:[%s21611_s26 + $0x316c] ss:$16 sps:$4 sm:$0xff]   ;;  %v20971_v21 = vld [vmem:[%s21611_s26 + $0x3368] ss:$16 sps:$4 sm:$0xff]  }
 0x769   : > { %v14862_v58 = vpop.f32.mrf.mxu1  ;;  %15156 = vmatprep.subr.bf16.mxu1 %v20907_v47  ;;  %v23881_v59 = vadd.f32 %v14860_v50, %v14820_v56  ;;  %v14822_v22 = vadd.f32 %v14821_v11, %v23812_v0  ;;  %15145 = vmatprep.mubr.bf16.mxu0 %v24368_v23  ;;  %v20916_v0 = vld [vmem:[%s21611_s26 + $0x308c] ss:$16 sps:$4 sm:$0xff]   ;;  %v20968_v47 = vld [vmem:[%s21611_s26 + $0x3168] ss:$16 sps:$4 sm:$0xff]  }
 0x76a   : > { %15186 = vmatprep.mubr.bf16.mxu1 %v24369_v30  ;;  %v14823_v7 = vpop.f32.mrf.mxu0  ;;  %v20973_v46 = vld [vmem:[%s21611_s26 + $0x336c] ss:$16 sps:$4 sm:$0xff]   ;;  %v20974_v6 = vld [vmem:[%s21611_s26 + $0x3148] ss:$16 sps:$4 sm:$0xff]  }
 0x76b   : > { %v14864_v38 = vpop.f32.mrf.mxu1  ;;  %v23886_v26 = vadd.f32 %v14862_v58, %v14822_v22  ;;  %15116 = vmatpush1.bf16.msra.mxu0 %v20902_v18  ;;  %v20976_v50 = vld [vmem:[%s21611_s26 + $0x314c] ss:$16 sps:$4 sm:$0xff]   ;;  %v20977_v56 = vld [vmem:[%s21611_s26 + $0x3348] ss:$16 sps:$4 sm:$0xff]  }
 0x76c   : > { %15157 = vmatpush1.bf16.msra.mxu1 %v20905_v57  ;;  %v14824_v52 = vpop.f32.mrf.mxu0  ;;  %15117 = vmatprep.subr.bf16.mxu0 %v20910_v25  ;;  %v20982_v18 = vld [vmem:[%s21611_s26 + $0x312c] ss:$16 sps:$4 sm:$0xff]   ;;  %v20980_v11 = vld [vmem:[%s21611_s26 + $0x3128] ss:$16 sps:$4 sm:$0xff]  }
 0x76d   : > { %v14865_v44 = vpop.f32.mrf.mxu1  ;;  %15158 = vmatprep.subr.bf16.mxu1 %v20913_v15  ;;  %v20985_v57 = vld [vmem:[%s21611_s26 + $0x332c] ss:$16 sps:$4 sm:$0xff]   ;;  %v20983_v58 = vld [vmem:[%s21611_s26 + $0x3328] ss:$16 sps:$4 sm:$0xff]  }
 0x76e   : > { %v20988_v25 = vld [vmem:[%s21611_s26 + $0x310c] ss:$16 sps:$4 sm:$0xff]   ;;  %v20986_v22 = vld [vmem:[%s21611_s26 + $0x3108] ss:$16 sps:$4 sm:$0xff]  }
 0x76f   : > { %15118 = vmatpush1.bf16.msra.mxu0 %v20908_v16  ;;  %v20991_v15 = vld [vmem:[%s21611_s26 + $0x330c] ss:$16 sps:$4 sm:$0xff]   ;;  %v20989_v23 = vld [vmem:[%s21611_s26 + $0x3308] ss:$16 sps:$4 sm:$0xff]  }
 0x770   : > { %15159 = vmatpush1.bf16.msra.mxu1 %v20911_v63  ;;  %15119 = vmatprep.subr.bf16.mxu0 %v20916_v0  ;;  %v20994_v30 = vld [vmem:[%s21611_s26 + $0x34ec] ss:$16 sps:$4 sm:$0xff]   ;;  %v20992_v38 = vld [vmem:[%s21611_s26 + $0x34e8] ss:$16 sps:$4 sm:$0xff]  }
 0x771   : > { %15160 = vmatprep.subr.bf16.mxu1 %v20919_v45  ;;  %v20997_v7 = vld [vmem:[%s21611_s26 + $0x36ec] ss:$16 sps:$4 sm:$0xff]   ;;  %v20995_v16 = vld [vmem:[%s21611_s26 + $0x36e8] ss:$16 sps:$4 sm:$0xff]  }
 0x772   : > { %v21000_v63 = vld [vmem:[%s21611_s26 + $0x34cc] ss:$16 sps:$4 sm:$0xff]  }
 0x773   : > { %15120 = vmatpush1.bf16.msra.mxu0 %v20914_v40  ;;  %v21003_v52 = vld [vmem:[%s21611_s26 + $0x36cc] ss:$16 sps:$4 sm:$0xff]  }
 0x774   : > { %15161 = vmatpush1.bf16.msra.mxu1 %v20917_v41  ;;  %15121 = vmatprep.subr.bf16.mxu0 %v20922_v14  ;;  %v24370_v45 = vld [vmem:[#allocation22_spill] sm:$0xff]  ;;  %v24371_v40 = vld [vmem:[#allocation23_spill] sm:$0xff] }
 0x775   : > { %15162 = vmatprep.subr.bf16.mxu1 %v20925_v10  ;;  %v20998_v14 = vld [vmem:[%s21611_s26 + $0x34c8] ss:$16 sps:$4 sm:$0xff]  }
 0x776   : > { %v21001_v10 = vld [vmem:[%s21611_s26 + $0x36c8] ss:$16 sps:$4 sm:$0xff]  }
 0x777   : > { %15122 = vmatpush1.bf16.msra.mxu0 %v20920_v17 }
 0x778   : > { %15163 = vmatpush1.bf16.msra.mxu1 %v20923_v20  ;;  %15123 = vmatprep.subr.bf16.mxu0 %v20928_v24  ;;  %v21006_v24 = vld [vmem:[%s21611_s26 + $0x34ac] ss:$16 sps:$4 sm:$0xff]  }
 0x779   : > { %15164 = vmatprep.subr.bf16.mxu1 %v20931_v4  ;;  %v21009_v4 = vld [vmem:[%s21611_s26 + $0x36ac] ss:$16 sps:$4 sm:$0xff]  }
 0x77b   : > { %15124 = vmatpush1.bf16.msra.mxu0 %v20926_v39 }
 0x77c   : > { %15165 = vmatpush1.bf16.msra.mxu1 %v20929_v34  ;;  %15125 = vmatprep.subr.bf16.mxu0 %v20934_v42  ;;  %v24372_v42 = vld [vmem:[#allocation24_spill] sm:$0xff] }
 0x77d   : > { %15166 = vmatprep.subr.bf16.mxu1 %v20937_v27 }
 0x77f   : > { %15126 = vmatpush1.bf16.msra.mxu0 %v20932_v19 }
 0x780   : > { %15167 = vmatpush1.bf16.msra.mxu1 %v20935_v37  ;;  %15127 = vmatprep.subr.bf16.mxu0 %v20940_v32  ;;  %v21004_v32 = vld [vmem:[%s21611_s26 + $0x34a8] ss:$16 sps:$4 sm:$0xff]  }
 0x781   : > { %15168 = vmatprep.subr.bf16.mxu1 %v20943_v48  ;;  %v21007_v48 = vld [vmem:[%s21611_s26 + $0x36a8] ss:$16 sps:$4 sm:$0xff]  }
 0x783   : > { %15128 = vmatpush1.bf16.msra.mxu0 %v20938_v49 }
 0x784   : > { %15169 = vmatpush1.bf16.msra.mxu1 %v20941_v51  ;;  %15129 = vmatprep.subr.bf16.mxu0 %v20946_v5  ;;  %v21015_v5 = vld [vmem:[%s21611_s26 + $0x368c] ss:$16 sps:$4 sm:$0xff]  }
 0x785   : > { %15170 = vmatprep.subr.bf16.mxu1 %v20949_v8  ;;  %v21010_v8 = vld [vmem:[%s21611_s26 + $0x3488] ss:$16 sps:$4 sm:$0xff]  }
 0x787   : > { %15130 = vmatpush2.bf16.msra.mxu0 %v20944_v9  ;;  %v21013_v9 = vld [vmem:[%s21611_s26 + $0x3688] ss:$16 sps:$4 sm:$0xff]  }
 0x788   : > { %15171 = vmatpush2.bf16.msra.mxu1 %v20947_v62  ;;  %15131 = vmatprep.subr.bf16.mxu0 %v20952_v29  ;;  %v21018_v62 = vld [vmem:[%s21611_s26 + $0x346c] ss:$16 sps:$4 sm:$0xff]  }
 0x789   : > { %15172 = vmatprep.subr.bf16.mxu1 %v20955_v53  ;;  %v21021_v29 = vld [vmem:[%s21611_s26 + $0x366c] ss:$16 sps:$4 sm:$0xff]   ;;  %v21016_v53 = vld [vmem:[%s21611_s26 + $0x3468] ss:$16 sps:$4 sm:$0xff]  }
 0x78b   : > { %15132 = vmatpush2.bf16.msra.mxu0 %v20950_v55  ;;  %v21019_v55 = vld [vmem:[%s21611_s26 + $0x3668] ss:$16 sps:$4 sm:$0xff]  }
 0x78c   : > { %15173 = vmatpush2.bf16.msra.mxu1 %v20953_v2  ;;  %15133 = vmatprep.subr.bf16.mxu0 %v20958_v3  ;;  %v21024_v2 = vld [vmem:[%s21611_s26 + $0x344c] ss:$16 sps:$4 sm:$0xff]  }
 0x78d   : > { %15174 = vmatprep.subr.bf16.mxu1 %v20961_v54  ;;  %v21027_v3 = vld [vmem:[%s21611_s26 + $0x364c] ss:$16 sps:$4 sm:$0xff]   ;;  %v21022_v54 = vld [vmem:[%s21611_s26 + $0x3448] ss:$16 sps:$4 sm:$0xff]  }
 0x78f   : > { %15134 = vmatpush2.bf16.msra.mxu0 %v20956_v31  ;;  %v21025_v31 = vld [vmem:[%s21611_s26 + $0x3648] ss:$16 sps:$4 sm:$0xff]  }
 0x790   : > { %15175 = vmatpush2.bf16.msra.mxu1 %v20959_v33  ;;  %15135 = vmatprep.subr.bf16.mxu0 %v20964_v36  ;;  %v21030_v33 = vld [vmem:[%s21611_s26 + $0x342c] ss:$16 sps:$4 sm:$0xff]  }
 0x791   : > { %15176 = vmatprep.subr.bf16.mxu1 %v20967_v35  ;;  %v21033_v36 = vld [vmem:[%s21611_s26 + $0x362c] ss:$16 sps:$4 sm:$0xff]   ;;  %v21028_v35 = vld [vmem:[%s21611_s26 + $0x3428] ss:$16 sps:$4 sm:$0xff]  }
 0x793   : > { %15136 = vmatpush2.bf16.msra.mxu0 %v20962_v12  ;;  %v21031_v12 = vld [vmem:[%s21611_s26 + $0x3628] ss:$16 sps:$4 sm:$0xff]  }
 0x794   : > { %15177 = vmatpush2.bf16.msra.mxu1 %v20965_v13  ;;  %15137 = vmatprep.subr.bf16.mxu0 %v20970_v1  ;;  %v21036_v13 = vld [vmem:[%s21611_s26 + $0x340c] ss:$16 sps:$4 sm:$0xff]  }
 0x795   : > { %15178 = vmatprep.subr.bf16.mxu1 %v20973_v46  ;;  %v21039_v1 = vld [vmem:[%s21611_s26 + $0x360c] ss:$16 sps:$4 sm:$0xff]   ;;  %v21034_v46 = vld [vmem:[%s21611_s26 + $0x3408] ss:$16 sps:$4 sm:$0xff]  }
 0x797   : > { %15138 = vmatpush2.bf16.msra.mxu0 %v20968_v47  ;;  %v21037_v47 = vld [vmem:[%s21611_s26 + $0x3608] ss:$16 sps:$4 sm:$0xff]  }
 0x798   : > { %15179 = vmatpush2.bf16.msra.mxu1 %v20971_v21  ;;  %15139 = vmatprep.subr.bf16.mxu0 %v20976_v50  ;;  %v21042_v21 = vld [vmem:[%s21611_s26 + $0x35ec] ss:$16 sps:$4 sm:$0xff]  }
 0x799   : > { %15180 = vmatprep.subr.bf16.mxu1 %v20979_v60  ;;  %v21045_v50 = vld [vmem:[%s21611_s26 + $0x37ec] ss:$16 sps:$4 sm:$0xff]   ;;  %v21040_v60 = vld [vmem:[%s21611_s26 + $0x35e8] ss:$16 sps:$4 sm:$0xff]  }
 0x79b   : > { %15140 = vmatpush2.bf16.msra.mxu0 %v20974_v6  ;;  %v21043_v6 = vld [vmem:[%s21611_s26 + $0x37e8] ss:$16 sps:$4 sm:$0xff]  }
 0x79c   : > { %15181 = vmatpush2.bf16.msra.mxu1 %v20977_v56  ;;  %15141 = vmatprep.subr.bf16.mxu0 %v20982_v18  ;;  %v21048_v56 = vld [vmem:[%s21611_s26 + $0x35cc] ss:$16 sps:$4 sm:$0xff]  }
 0x79d   : > { %15182 = vmatprep.subr.bf16.mxu1 %v20985_v57  ;;  %v21051_v18 = vld [vmem:[%s21611_s26 + $0x37cc] ss:$16 sps:$4 sm:$0xff]   ;;  %v21046_v57 = vld [vmem:[%s21611_s26 + $0x35c8] ss:$16 sps:$4 sm:$0xff]  }
 0x79f   : > { %15142 = vmatpush2.bf16.msra.mxu0 %v20980_v11  ;;  %v21049_v11 = vld [vmem:[%s21611_s26 + $0x37c8] ss:$16 sps:$4 sm:$0xff]  }
 0x7a0   : > { %15183 = vmatpush2.bf16.msra.mxu1 %v20983_v58  ;;  %15143 = vmatprep.subr.bf16.mxu0 %v20988_v25  ;;  %v21054_v58 = vld [vmem:[%s21611_s26 + $0x35ac] ss:$16 sps:$4 sm:$0xff]  }
 0x7a1   : > { %15184 = vmatprep.subr.bf16.mxu1 %v20991_v15  ;;  %v21057_v25 = vld [vmem:[%s21611_s26 + $0x37ac] ss:$16 sps:$4 sm:$0xff]   ;;  %v21052_v15 = vld [vmem:[%s21611_s26 + $0x35a8] ss:$16 sps:$4 sm:$0xff]  }
 0x7a3   : > { %15144 = vmatpush2.bf16.msra.mxu0 %v20986_v22  ;;  %v21055_v22 = vld [vmem:[%s21611_s26 + $0x37a8] ss:$16 sps:$4 sm:$0xff]  }
 0x7a4   : > { %15185 = vmatpush2.bf16.msra.mxu1 %v20989_v23  ;;  %15195 = vmatprep.subr.bf16.mxu0 %v20994_v30  ;;  %v21060_v23 = vld [vmem:[%s21611_s26 + $0x358c] ss:$16 sps:$4 sm:$0xff]  }
 0x7a5   : > { %15236 = vmatprep.subr.bf16.mxu1 %v20997_v7  ;;  %v21063_v30 = vld [vmem:[%s21611_s26 + $0x378c] ss:$16 sps:$4 sm:$0xff]   ;;  %v21058_v7 = vld [vmem:[%s21611_s26 + $0x3588] ss:$16 sps:$4 sm:$0xff]  }
 0x7a6   : > { %v14901_v44 = vpop.f32.mrf.mxu0  ;;  %15146 = vmatmul.mubr.bf16.vlgmr.msra.gmra.mxu0 %v24370_v45  ;;  %v21075_v45 = vld [vmem:[%s21611_s26 + $0x374c] ss:$16 sps:$4 sm:$0xff]  }
 0x7a7   : > { %v14942_v0 = vpop.f32.mrf.mxu1  ;;  %15187 = vmatmul.mubr.bf16.vlgmr.msra.gmra.mxu1 %v24371_v40  ;;  %v14902_v41 = vadd.f32 %v14901_v44, %v23881_v59  ;;  %15196 = vmatpush1.bf16.msra.mxu0 %v20992_v38  ;;  %v24373_v59 = vld [vmem:[#allocation25_spill] sm:$0xff]  ;;  %v21061_v38 = vld [vmem:[%s21611_s26 + $0x3788] ss:$16 sps:$4 sm:$0xff]  }
 0x7a8   : > { %15237 = vmatpush1.bf16.msra.mxu1 %v20995_v16  ;;  %v14903_v17 = vpop.f32.mrf.mxu0  ;;  %15197 = vmatprep.subr.bf16.mxu0 %v21000_v63  ;;  %v21066_v16 = vld [vmem:[%s21611_s26 + $0x356c] ss:$16 sps:$4 sm:$0xff]   ;;  %v21067_v44 = vld [vmem:[%s21611_s26 + $0x3768] ss:$16 sps:$4 sm:$0xff]  }
 0x7a9   : > { %v14944_v20 = vpop.f32.mrf.mxu1  ;;  %15238 = vmatprep.subr.bf16.mxu1 %v21003_v52  ;;  %v23955_v39 = vadd.f32 %v14942_v0, %v14902_v41  ;;  %v14904_v34 = vadd.f32 %v14903_v17, %v23886_v26  ;;  %15227 = vmatprep.mubr.bf16.mxu0 %v24372_v42  ;;  %v21012_v26 = vld [vmem:[%s21611_s26 + $0x348c] ss:$16 sps:$4 sm:$0xff]   ;;  %v21064_v52 = vld [vmem:[%s21611_s26 + $0x3568] ss:$16 sps:$4 sm:$0xff]  }
 0x7aa   : > { %15268 = vmatprep.mubr.bf16.mxu1 %v24373_v59  ;;  %v14905_v27 = vpop.f32.mrf.mxu0  ;;  %v21069_v63 = vld [vmem:[%s21611_s26 + $0x376c] ss:$16 sps:$4 sm:$0xff]   ;;  %v21070_v40 = vld [vmem:[%s21611_s26 + $0x3548] ss:$16 sps:$4 sm:$0xff]  }
 0x7ab   : > { %v14946_v19 = vpop.f32.mrf.mxu1  ;;  %v23960_v37 = vadd.f32 %v14944_v20, %v14904_v34  ;;  %15198 = vmatpush1.bf16.msra.mxu0 %v20998_v14  ;;  %v21072_v0 = vld [vmem:[%s21611_s26 + $0x354c] ss:$16 sps:$4 sm:$0xff]   ;;  %v21073_v41 = vld [vmem:[%s21611_s26 + $0x3748] ss:$16 sps:$4 sm:$0xff]  }
 0x7ac   : > { %15239 = vmatpush1.bf16.msra.mxu1 %v21001_v10  ;;  %v14906_v49 = vpop.f32.mrf.mxu0  ;;  %15199 = vmatprep.subr.bf16.mxu0 %v21006_v24  ;;  %v21078_v14 = vld [vmem:[%s21611_s26 + $0x352c] ss:$16 sps:$4 sm:$0xff]   ;;  %v21076_v17 = vld [vmem:[%s21611_s26 + $0x3528] ss:$16 sps:$4 sm:$0xff]  }
 0x7ad   : > { %v14947_v51 = vpop.f32.mrf.mxu1  ;;  %15240 = vmatprep.subr.bf16.mxu1 %v21009_v4  ;;  %v21081_v10 = vld [vmem:[%s21611_s26 + $0x372c] ss:$16 sps:$4 sm:$0xff]   ;;  %v21079_v20 = vld [vmem:[%s21611_s26 + $0x3728] ss:$16 sps:$4 sm:$0xff]  }
 0x7ae   : > { %v21084_v24 = vld [vmem:[%s21611_s26 + $0x350c] ss:$16 sps:$4 sm:$0xff]   ;;  %v21082_v34 = vld [vmem:[%s21611_s26 + $0x3508] ss:$16 sps:$4 sm:$0xff]  }
 0x7af   : > { %15200 = vmatpush1.bf16.msra.mxu0 %v21004_v32  ;;  %v21087_v4 = vld [vmem:[%s21611_s26 + $0x370c] ss:$16 sps:$4 sm:$0xff]   ;;  %v21085_v42 = vld [vmem:[%s21611_s26 + $0x3708] ss:$16 sps:$4 sm:$0xff]  }
 0x7b0   : > { %15241 = vmatpush1.bf16.msra.mxu1 %v21007_v48  ;;  %15201 = vmatprep.subr.bf16.mxu0 %v21012_v26  ;;  %v21090_v59 = vld [vmem:[%s21611_s26 + $0x38ec] ss:$16 sps:$4 sm:$0xff]   ;;  %v21088_v19 = vld [vmem:[%s21611_s26 + $0x38e8] ss:$16 sps:$4 sm:$0xff]  }
 0x7b1   : > { %15242 = vmatprep.subr.bf16.mxu1 %v21015_v5  ;;  %v21093_v27 = vld [vmem:[%s21611_s26 + $0x3aec] ss:$16 sps:$4 sm:$0xff]   ;;  %v21091_v32 = vld [vmem:[%s21611_s26 + $0x3ae8] ss:$16 sps:$4 sm:$0xff]  }
 0x7b2   : > { %v21096_v48 = vld [vmem:[%s21611_s26 + $0x38cc] ss:$16 sps:$4 sm:$0xff]  }
 0x7b3   : > { %15202 = vmatpush1.bf16.msra.mxu0 %v21010_v8  ;;  %v21099_v49 = vld [vmem:[%s21611_s26 + $0x3acc] ss:$16 sps:$4 sm:$0xff]  }
 0x7b4   : > { %15243 = vmatpush1.bf16.msra.mxu1 %v21013_v9  ;;  %15203 = vmatprep.subr.bf16.mxu0 %v21018_v62  ;;  %v24374_v5 = vld [vmem:[#allocation26_spill] sm:$0xff]  ;;  %v24375_v8 = vld [vmem:[#allocation27_spill] sm:$0xff] }
 0x7b5   : > { %15244 = vmatprep.subr.bf16.mxu1 %v21021_v29  ;;  %v21094_v62 = vld [vmem:[%s21611_s26 + $0x38c8] ss:$16 sps:$4 sm:$0xff]  }
 0x7b6   : > { %v21097_v29 = vld [vmem:[%s21611_s26 + $0x3ac8] ss:$16 sps:$4 sm:$0xff]  }
 0x7b7   : > { %15204 = vmatpush1.bf16.msra.mxu0 %v21016_v53 }
 0x7b8   : > { %15245 = vmatpush1.bf16.msra.mxu1 %v21019_v55  ;;  %15205 = vmatprep.subr.bf16.mxu0 %v21024_v2  ;;  %v21102_v2 = vld [vmem:[%s21611_s26 + $0x38ac] ss:$16 sps:$4 sm:$0xff]  }
 0x7b9   : > { %15246 = vmatprep.subr.bf16.mxu1 %v21027_v3  ;;  %v21105_v3 = vld [vmem:[%s21611_s26 + $0x3aac] ss:$16 sps:$4 sm:$0xff]  }
 0x7bb   : > { %15206 = vmatpush1.bf16.msra.mxu0 %v21022_v54 }
 0x7bc   : > { %15247 = vmatpush1.bf16.msra.mxu1 %v21025_v31  ;;  %15207 = vmatprep.subr.bf16.mxu0 %v21030_v33  ;;  %v24376_v33 = vld [vmem:[#allocation28_spill] sm:$0xff] }
 0x7bd   : > { %15248 = vmatprep.subr.bf16.mxu1 %v21033_v36 }
 0x7bf   : > { %15208 = vmatpush1.bf16.msra.mxu0 %v21028_v35 }
 0x7c0   : > { %15249 = vmatpush1.bf16.msra.mxu1 %v21031_v12  ;;  %15209 = vmatprep.subr.bf16.mxu0 %v21036_v13  ;;  %v21100_v13 = vld [vmem:[%s21611_s26 + $0x38a8] ss:$16 sps:$4 sm:$0xff]  }
 0x7c1   : > { %15250 = vmatprep.subr.bf16.mxu1 %v21039_v1  ;;  %v21103_v1 = vld [vmem:[%s21611_s26 + $0x3aa8] ss:$16 sps:$4 sm:$0xff]  }
 0x7c3   : > { %15210 = vmatpush1.bf16.msra.mxu0 %v21034_v46 }
 0x7c4   : > { %15251 = vmatpush1.bf16.msra.mxu1 %v21037_v47  ;;  %15211 = vmatprep.subr.bf16.mxu0 %v21042_v21  ;;  %v21111_v21 = vld [vmem:[%s21611_s26 + $0x3a8c] ss:$16 sps:$4 sm:$0xff]  }
 0x7c5   : > { %15252 = vmatprep.subr.bf16.mxu1 %v21045_v50  ;;  %v21106_v50 = vld [vmem:[%s21611_s26 + $0x3888] ss:$16 sps:$4 sm:$0xff]  }
 0x7c7   : > { %15212 = vmatpush2.bf16.msra.mxu0 %v21040_v60  ;;  %v21109_v60 = vld [vmem:[%s21611_s26 + $0x3a88] ss:$16 sps:$4 sm:$0xff]  }
 0x7c8   : > { %15253 = vmatpush2.bf16.msra.mxu1 %v21043_v6  ;;  %15213 = vmatprep.subr.bf16.mxu0 %v21048_v56  ;;  %v21114_v6 = vld [vmem:[%s21611_s26 + $0x386c] ss:$16 sps:$4 sm:$0xff]  }
 0x7c9   : > { %15254 = vmatprep.subr.bf16.mxu1 %v21051_v18  ;;  %v21117_v56 = vld [vmem:[%s21611_s26 + $0x3a6c] ss:$16 sps:$4 sm:$0xff]   ;;  %v21112_v18 = vld [vmem:[%s21611_s26 + $0x3868] ss:$16 sps:$4 sm:$0xff]  }
 0x7cb   : > { %15214 = vmatpush2.bf16.msra.mxu0 %v21046_v57  ;;  %v21115_v57 = vld [vmem:[%s21611_s26 + $0x3a68] ss:$16 sps:$4 sm:$0xff]  }
 0x7cc   : > { %15255 = vmatpush2.bf16.msra.mxu1 %v21049_v11  ;;  %15215 = vmatprep.subr.bf16.mxu0 %v21054_v58  ;;  %v21120_v11 = vld [vmem:[%s21611_s26 + $0x384c] ss:$16 sps:$4 sm:$0xff]  }
 0x7cd   : > { %15256 = vmatprep.subr.bf16.mxu1 %v21057_v25  ;;  %v21123_v58 = vld [vmem:[%s21611_s26 + $0x3a4c] ss:$16 sps:$4 sm:$0xff]   ;;  %v21118_v25 = vld [vmem:[%s21611_s26 + $0x3848] ss:$16 sps:$4 sm:$0xff]  }
 0x7cf   : > { %15216 = vmatpush2.bf16.msra.mxu0 %v21052_v15  ;;  %v21121_v15 = vld [vmem:[%s21611_s26 + $0x3a48] ss:$16 sps:$4 sm:$0xff]  }
 0x7d0   : > { %15257 = vmatpush2.bf16.msra.mxu1 %v21055_v22  ;;  %15217 = vmatprep.subr.bf16.mxu0 %v21060_v23  ;;  %v21126_v22 = vld [vmem:[%s21611_s26 + $0x382c] ss:$16 sps:$4 sm:$0xff]  }
 0x7d1   : > { %15258 = vmatprep.subr.bf16.mxu1 %v21063_v30  ;;  %v21129_v23 = vld [vmem:[%s21611_s26 + $0x3a2c] ss:$16 sps:$4 sm:$0xff]   ;;  %v21124_v30 = vld [vmem:[%s21611_s26 + $0x3828] ss:$16 sps:$4 sm:$0xff]  }
 0x7d3   : > { %15218 = vmatpush2.bf16.msra.mxu0 %v21058_v7  ;;  %v21127_v7 = vld [vmem:[%s21611_s26 + $0x3a28] ss:$16 sps:$4 sm:$0xff]  }
 0x7d4   : > { %15259 = vmatpush2.bf16.msra.mxu1 %v21061_v38  ;;  %15219 = vmatprep.subr.bf16.mxu0 %v21066_v16  ;;  %v21132_v38 = vld [vmem:[%s21611_s26 + $0x380c] ss:$16 sps:$4 sm:$0xff]  }
 0x7d5   : > { %15260 = vmatprep.subr.bf16.mxu1 %v21069_v63  ;;  %v21135_v16 = vld [vmem:[%s21611_s26 + $0x3a0c] ss:$16 sps:$4 sm:$0xff]   ;;  %v21130_v63 = vld [vmem:[%s21611_s26 + $0x3808] ss:$16 sps:$4 sm:$0xff]  }
 0x7d7   : > { %15220 = vmatpush2.bf16.msra.mxu0 %v21064_v52  ;;  %v21133_v52 = vld [vmem:[%s21611_s26 + $0x3a08] ss:$16 sps:$4 sm:$0xff]  }
 0x7d8   : > { %15261 = vmatpush2.bf16.msra.mxu1 %v21067_v44  ;;  %15221 = vmatprep.subr.bf16.mxu0 %v21072_v0  ;;  %v21138_v44 = vld [vmem:[%s21611_s26 + $0x39ec] ss:$16 sps:$4 sm:$0xff]  }
 0x7d9   : > { %15262 = vmatprep.subr.bf16.mxu1 %v21075_v45  ;;  %v21141_v0 = vld [vmem:[%s21611_s26 + $0x3bec] ss:$16 sps:$4 sm:$0xff]   ;;  %v21136_v45 = vld [vmem:[%s21611_s26 + $0x39e8] ss:$16 sps:$4 sm:$0xff]  }
 0x7db   : > { %15222 = vmatpush2.bf16.msra.mxu0 %v21070_v40  ;;  %v21139_v40 = vld [vmem:[%s21611_s26 + $0x3be8] ss:$16 sps:$4 sm:$0xff]  }
 0x7dc   : > { %15263 = vmatpush2.bf16.msra.mxu1 %v21073_v41  ;;  %15223 = vmatprep.subr.bf16.mxu0 %v21078_v14  ;;  %v21144_v41 = vld [vmem:[%s21611_s26 + $0x39cc] ss:$16 sps:$4 sm:$0xff]  }
 0x7dd   : > { %15264 = vmatprep.subr.bf16.mxu1 %v21081_v10  ;;  %v21147_v14 = vld [vmem:[%s21611_s26 + $0x3bcc] ss:$16 sps:$4 sm:$0xff]   ;;  %v21142_v10 = vld [vmem:[%s21611_s26 + $0x39c8] ss:$16 sps:$4 sm:$0xff]  }
 0x7df   : > { %15224 = vmatpush2.bf16.msra.mxu0 %v21076_v17  ;;  %v21145_v17 = vld [vmem:[%s21611_s26 + $0x3bc8] ss:$16 sps:$4 sm:$0xff]  }
 0x7e0   : > { %15265 = vmatpush2.bf16.msra.mxu1 %v21079_v20  ;;  %15225 = vmatprep.subr.bf16.mxu0 %v21084_v24  ;;  %v21150_v20 = vld [vmem:[%s21611_s26 + $0x39ac] ss:$16 sps:$4 sm:$0xff]  }
 0x7e1   : > { %15266 = vmatprep.subr.bf16.mxu1 %v21087_v4  ;;  %v21153_v24 = vld [vmem:[%s21611_s26 + $0x3bac] ss:$16 sps:$4 sm:$0xff]   ;;  %v21148_v4 = vld [vmem:[%s21611_s26 + $0x39a8] ss:$16 sps:$4 sm:$0xff]  }
 0x7e3   : > { %15226 = vmatpush2.bf16.msra.mxu0 %v21082_v34  ;;  %v21151_v34 = vld [vmem:[%s21611_s26 + $0x3ba8] ss:$16 sps:$4 sm:$0xff]  }
 0x7e4   : > { %15267 = vmatpush2.bf16.msra.mxu1 %v21085_v42  ;;  %15277 = vmatprep.subr.bf16.mxu0 %v21090_v59  ;;  %v21156_v42 = vld [vmem:[%s21611_s26 + $0x398c] ss:$16 sps:$4 sm:$0xff]  }
 0x7e5   : > { %15318 = vmatprep.subr.bf16.mxu1 %v21093_v27  ;;  %v21159_v59 = vld [vmem:[%s21611_s26 + $0x3b8c] ss:$16 sps:$4 sm:$0xff]   ;;  %v21154_v27 = vld [vmem:[%s21611_s26 + $0x3988] ss:$16 sps:$4 sm:$0xff]  }
 0x7e6   : > { %v14983_v51 = vpop.f32.mrf.mxu0  ;;  %15228 = vmatmul.mubr.bf16.vlgmr.msra.gmra.mxu0 %v24374_v5  ;;  %v21171_v5 = vld [vmem:[%s21611_s26 + $0x3b4c] ss:$16 sps:$4 sm:$0xff]  }
 0x7e7   : > { %v15024_v26 = vpop.f32.mrf.mxu1  ;;  %15269 = vmatmul.mubr.bf16.vlgmr.msra.gmra.mxu1 %v24375_v8  ;;  %v14984_v9 = vadd.f32 %v14983_v51, %v23955_v39  ;;  %15278 = vmatpush1.bf16.msra.mxu0 %v21088_v19  ;;  %v24377_v39 = vld [vmem:[#allocation29_spill] sm:$0xff]  ;;  %v21157_v19 = vld [vmem:[%s21611_s26 + $0x3b88] ss:$16 sps:$4 sm:$0xff]  }
 0x7e8   : > { %15319 = vmatpush1.bf16.msra.mxu1 %v21091_v32  ;;  %v14985_v53 = vpop.f32.mrf.mxu0  ;;  %15279 = vmatprep.subr.bf16.mxu0 %v21096_v48  ;;  %v21162_v32 = vld [vmem:[%s21611_s26 + $0x396c] ss:$16 sps:$4 sm:$0xff]   ;;  %v21163_v51 = vld [vmem:[%s21611_s26 + $0x3b68] ss:$16 sps:$4 sm:$0xff]  }
 0x7e9   : > { %v15026_v55 = vpop.f32.mrf.mxu1  ;;  %15320 = vmatprep.subr.bf16.mxu1 %v21099_v49  ;;  %v24029_v54 = vadd.f32 %v15024_v26, %v14984_v9  ;;  %v14986_v31 = vadd.f32 %v14985_v53, %v23960_v37  ;;  %15309 = vmatprep.mubr.bf16.mxu0 %v24376_v33  ;;  %v21108_v37 = vld [vmem:[%s21611_s26 + $0x388c] ss:$16 sps:$4 sm:$0xff]   ;;  %v21160_v49 = vld [vmem:[%s21611_s26 + $0x3968] ss:$16 sps:$4 sm:$0xff]  }
 0x7ea   : > { %15350 = vmatprep.mubr.bf16.mxu1 %v24377_v39  ;;  %v14987_v36 = vpop.f32.mrf.mxu0  ;;  %v21165_v48 = vld [vmem:[%s21611_s26 + $0x3b6c] ss:$16 sps:$4 sm:$0xff]   ;;  %v21166_v8 = vld [vmem:[%s21611_s26 + $0x3948] ss:$16 sps:$4 sm:$0xff]  }
 0x7eb   : > { %v15028_v35 = vpop.f32.mrf.mxu1  ;;  %v24034_v12 = vadd.f32 %v15026_v55, %v14986_v31  ;;  %15280 = vmatpush1.bf16.msra.mxu0 %v21094_v62  ;;  %v21168_v26 = vld [vmem:[%s21611_s26 + $0x394c] ss:$16 sps:$4 sm:$0xff]   ;;  %v21169_v9 = vld [vmem:[%s21611_s26 + $0x3b48] ss:$16 sps:$4 sm:$0xff]  }
 0x7ec   : > { %15321 = vmatpush1.bf16.msra.mxu1 %v21097_v29  ;;  %v14988_v46 = vpop.f32.mrf.mxu0  ;;  %15281 = vmatprep.subr.bf16.mxu0 %v21102_v2  ;;  %v21174_v62 = vld [vmem:[%s21611_s26 + $0x392c] ss:$16 sps:$4 sm:$0xff]   ;;  %v21172_v53 = vld [vmem:[%s21611_s26 + $0x3928] ss:$16 sps:$4 sm:$0xff]  }
 0x7ed   : > { %v15029_v47 = vpop.f32.mrf.mxu1  ;;  %15322 = vmatprep.subr.bf16.mxu1 %v21105_v3  ;;  %v21177_v29 = vld [vmem:[%s21611_s26 + $0x3b2c] ss:$16 sps:$4 sm:$0xff]   ;;  %v21175_v55 = vld [vmem:[%s21611_s26 + $0x3b28] ss:$16 sps:$4 sm:$0xff]  }
 0x7ee   : > { %v21180_v2 = vld [vmem:[%s21611_s26 + $0x390c] ss:$16 sps:$4 sm:$0xff]   ;;  %v21178_v31 = vld [vmem:[%s21611_s26 + $0x3908] ss:$16 sps:$4 sm:$0xff]  }
 0x7ef   : > { %15282 = vmatpush1.bf16.msra.mxu0 %v21100_v13  ;;  %v21183_v3 = vld [vmem:[%s21611_s26 + $0x3b0c] ss:$16 sps:$4 sm:$0xff]   ;;  %v21181_v33 = vld [vmem:[%s21611_s26 + $0x3b08] ss:$16 sps:$4 sm:$0xff]  }
 0x7f0   : > { %15323 = vmatpush1.bf16.msra.mxu1 %v21103_v1  ;;  %15283 = vmatprep.subr.bf16.mxu0 %v21108_v37  ;;  %v21186_v39 = vld [vmem:[%s21611_s26 + $0x3cec] ss:$16 sps:$4 sm:$0xff]   ;;  %v21184_v35 = vld [vmem:[%s21611_s26 + $0x3ce8] ss:$16 sps:$4 sm:$0xff]  }
 0x7f1   : > { %15324 = vmatprep.subr.bf16.mxu1 %v21111_v21  ;;  %v21189_v36 = vld [vmem:[%s21611_s26 + $0x3eec] ss:$16 sps:$4 sm:$0xff]   ;;  %v21187_v13 = vld [vmem:[%s21611_s26 + $0x3ee8] ss:$16 sps:$4 sm:$0xff]  }
 0x7f2   : > { %v21192_v1 = vld [vmem:[%s21611_s26 + $0x3ccc] ss:$16 sps:$4 sm:$0xff]  }
 0x7f3   : > { %15284 = vmatpush1.bf16.msra.mxu0 %v21106_v50  ;;  %v21195_v46 = vld [vmem:[%s21611_s26 + $0x3ecc] ss:$16 sps:$4 sm:$0xff]  }
 0x7f4   : > { %15325 = vmatpush1.bf16.msra.mxu1 %v21109_v60  ;;  %15285 = vmatprep.subr.bf16.mxu0 %v21114_v6  ;;  %v24378_v21 = vld [vmem:[#allocation30_spill] sm:$0xff] }
 0x7f5   : > { %15326 = vmatprep.subr.bf16.mxu1 %v21117_v56  ;;  %v21190_v60 = vld [vmem:[%s21611_s26 + $0x3cc8] ss:$16 sps:$4 sm:$0xff]  }
 0x7f6   : > { %v21193_v6 = vld [vmem:[%s21611_s26 + $0x3ec8] ss:$16 sps:$4 sm:$0xff]  }
 0x7f7   : > { %15286 = vmatpush1.bf16.msra.mxu0 %v21112_v18 }
 0x7f8   : > { %15327 = vmatpush1.bf16.msra.mxu1 %v21115_v57  ;;  %15287 = vmatprep.subr.bf16.mxu0 %v21120_v11  ;;  %v21198_v57 = vld [vmem:[%s21611_s26 + $0x3cac] ss:$16 sps:$4 sm:$0xff]  }
 0x7f9   : > { %15328 = vmatprep.subr.bf16.mxu1 %v21123_v58  ;;  %v21201_v11 = vld [vmem:[%s21611_s26 + $0x3eac] ss:$16 sps:$4 sm:$0xff]  }
 0x7fb   : > { %15288 = vmatpush1.bf16.msra.mxu0 %v21118_v25 }
 0x7fc   : > { %15329 = vmatpush1.bf16.msra.mxu1 %v21121_v15  ;;  %15289 = vmatprep.subr.bf16.mxu0 %v21126_v22 }
 0x7fd   : > { %15330 = vmatprep.subr.bf16.mxu1 %v21129_v23  ;;  %v21196_v23 = vld [vmem:[%s21611_s26 + $0x3ca8] ss:$16 sps:$4 sm:$0xff]  }
 0x7ff   : > { %15290 = vmatpush1.bf16.msra.mxu0 %v21124_v30  ;;  %v21199_v30 = vld [vmem:[%s21611_s26 + $0x3ea8] ss:$16 sps:$4 sm:$0xff]  }
 0x800   : > { %15331 = vmatpush1.bf16.msra.mxu1 %v21127_v7  ;;  %15291 = vmatprep.subr.bf16.mxu0 %v21132_v38 }
 0x801   : > { %15332 = vmatprep.subr.bf16.mxu1 %v21135_v16  ;;  %v21202_v16 = vld [vmem:[%s21611_s26 + $0x3c88] ss:$16 sps:$4 sm:$0xff]  }
 0x803   : > { %15292 = vmatpush1.bf16.msra.mxu0 %v21130_v63  ;;  %v21205_v63 = vld [vmem:[%s21611_s26 + $0x3e88] ss:$16 sps:$4 sm:$0xff]  }
 0x804   : > { %15333 = vmatpush1.bf16.msra.mxu1 %v21133_v52  ;;  %15293 = vmatprep.subr.bf16.mxu0 %v21138_v44  ;;  %v21210_v52 = vld [vmem:[%s21611_s26 + $0x3c6c] ss:$16 sps:$4 sm:$0xff]  }
 0x805   : > { %15334 = vmatprep.subr.bf16.mxu1 %v21141_v0  ;;  %v21213_v44 = vld [vmem:[%s21611_s26 + $0x3e6c] ss:$16 sps:$4 sm:$0xff]   ;;  %v21208_v0 = vld [vmem:[%s21611_s26 + $0x3c68] ss:$16 sps:$4 sm:$0xff]  }
 0x807   : > { %15294 = vmatpush2.bf16.msra.mxu0 %v21136_v45  ;;  %v21211_v45 = vld [vmem:[%s21611_s26 + $0x3e68] ss:$16 sps:$4 sm:$0xff]  }
 0x808   : > { %15335 = vmatpush2.bf16.msra.mxu1 %v21139_v40  ;;  %15295 = vmatprep.subr.bf16.mxu0 %v21144_v41  ;;  %v21216_v40 = vld [vmem:[%s21611_s26 + $0x3c4c] ss:$16 sps:$4 sm:$0xff]  }
 0x809   : > { %15336 = vmatprep.subr.bf16.mxu1 %v21147_v14  ;;  %v21219_v41 = vld [vmem:[%s21611_s26 + $0x3e4c] ss:$16 sps:$4 sm:$0xff]   ;;  %v21214_v14 = vld [vmem:[%s21611_s26 + $0x3c48] ss:$16 sps:$4 sm:$0xff]  }
 0x80b   : > { %15296 = vmatpush2.bf16.msra.mxu0 %v21142_v10  ;;  %v21217_v10 = vld [vmem:[%s21611_s26 + $0x3e48] ss:$16 sps:$4 sm:$0xff]  }
 0x80c   : > { %15337 = vmatpush2.bf16.msra.mxu1 %v21145_v17  ;;  %15297 = vmatprep.subr.bf16.mxu0 %v21150_v20  ;;  %v21222_v17 = vld [vmem:[%s21611_s26 + $0x3c2c] ss:$16 sps:$4 sm:$0xff]  }
 0x80d   : > { %15338 = vmatprep.subr.bf16.mxu1 %v21153_v24  ;;  %v21225_v20 = vld [vmem:[%s21611_s26 + $0x3e2c] ss:$16 sps:$4 sm:$0xff]   ;;  %v21220_v24 = vld [vmem:[%s21611_s26 + $0x3c28] ss:$16 sps:$4 sm:$0xff]  }
 0x80f   : > { %15298 = vmatpush2.bf16.msra.mxu0 %v21148_v4  ;;  %v21223_v4 = vld [vmem:[%s21611_s26 + $0x3e28] ss:$16 sps:$4 sm:$0xff]  }
 0x810   : > { %15339 = vmatpush2.bf16.msra.mxu1 %v21151_v34  ;;  %15299 = vmatprep.subr.bf16.mxu0 %v21156_v42  ;;  %v21228_v34 = vld [vmem:[%s21611_s26 + $0x3c0c] ss:$16 sps:$4 sm:$0xff]  }
 0x811   : > { %15340 = vmatprep.subr.bf16.mxu1 %v21159_v59  ;;  %v21231_v42 = vld [vmem:[%s21611_s26 + $0x3e0c] ss:$16 sps:$4 sm:$0xff]   ;;  %v21226_v59 = vld [vmem:[%s21611_s26 + $0x3c08] ss:$16 sps:$4 sm:$0xff]  }
 0x813   : > { %15300 = vmatpush2.bf16.msra.mxu0 %v21154_v27  ;;  %v21229_v27 = vld [vmem:[%s21611_s26 + $0x3e08] ss:$16 sps:$4 sm:$0xff]  }
 0x814   : > { %15341 = vmatpush2.bf16.msra.mxu1 %v21157_v19  ;;  %15301 = vmatprep.subr.bf16.mxu0 %v21162_v32  ;;  %v21234_v19 = vld [vmem:[%s21611_s26 + $0x3dec] ss:$16 sps:$4 sm:$0xff]  }
 0x815   : > { %15342 = vmatprep.subr.bf16.mxu1 %v21165_v48  ;;  %v21237_v32 = vld [vmem:[%s21611_s26 + $0x3fec] ss:$16 sps:$4 sm:$0xff]   ;;  %v21232_v48 = vld [vmem:[%s21611_s26 + $0x3de8] ss:$16 sps:$4 sm:$0xff]  }
 0x817   : > { %15302 = vmatpush2.bf16.msra.mxu0 %v21160_v49  ;;  %v21235_v49 = vld [vmem:[%s21611_s26 + $0x3fe8] ss:$16 sps:$4 sm:$0xff]  }
 0x818   : > { %15343 = vmatpush2.bf16.msra.mxu1 %v21163_v51  ;;  %15303 = vmatprep.subr.bf16.mxu0 %v21168_v26  ;;  %v21240_v51 = vld [vmem:[%s21611_s26 + $0x3dcc] ss:$16 sps:$4 sm:$0xff]  }
 0x819   : > { %15344 = vmatprep.subr.bf16.mxu1 %v21171_v5  ;;  %v21243_v26 = vld [vmem:[%s21611_s26 + $0x3fcc] ss:$16 sps:$4 sm:$0xff]   ;;  %v21238_v5 = vld [vmem:[%s21611_s26 + $0x3dc8] ss:$16 sps:$4 sm:$0xff]  }
 0x81b   : > { %15304 = vmatpush2.bf16.msra.mxu0 %v21166_v8  ;;  %v21241_v8 = vld [vmem:[%s21611_s26 + $0x3fc8] ss:$16 sps:$4 sm:$0xff]  }
 0x81c   : > { %15345 = vmatpush2.bf16.msra.mxu1 %v21169_v9  ;;  %15305 = vmatprep.subr.bf16.mxu0 %v21174_v62  ;;  %v21246_v9 = vld [vmem:[%s21611_s26 + $0x3dac] ss:$16 sps:$4 sm:$0xff]  }
 0x81d   : > { %15346 = vmatprep.subr.bf16.mxu1 %v21177_v29  ;;  %v21249_v62 = vld [vmem:[%s21611_s26 + $0x3fac] ss:$16 sps:$4 sm:$0xff]   ;;  %v21244_v29 = vld [vmem:[%s21611_s26 + $0x3da8] ss:$16 sps:$4 sm:$0xff]  }
 0x81f   : > { %15306 = vmatpush2.bf16.msra.mxu0 %v21172_v53  ;;  %v21247_v53 = vld [vmem:[%s21611_s26 + $0x3fa8] ss:$16 sps:$4 sm:$0xff]  }
 0x820   : > { %15347 = vmatpush2.bf16.msra.mxu1 %v21175_v55  ;;  %15307 = vmatprep.subr.bf16.mxu0 %v21180_v2  ;;  %v21252_v55 = vld [vmem:[%s21611_s26 + $0x3d8c] ss:$16 sps:$4 sm:$0xff]  }
 0x821   : > { %15348 = vmatprep.subr.bf16.mxu1 %v21183_v3  ;;  %v21255_v2 = vld [vmem:[%s21611_s26 + $0x3f8c] ss:$16 sps:$4 sm:$0xff]   ;;  %v21250_v3 = vld [vmem:[%s21611_s26 + $0x3d88] ss:$16 sps:$4 sm:$0xff]  }
 0x823   : > { %15308 = vmatpush2.bf16.msra.mxu0 %v21178_v31  ;;  %v21253_v31 = vld [vmem:[%s21611_s26 + $0x3f88] ss:$16 sps:$4 sm:$0xff]  }
 0x824   : > { %15349 = vmatpush2.bf16.msra.mxu1 %v21181_v33  ;;  %15359 = vmatprep.subr.bf16.mxu0 %v21186_v39  ;;  %v21258_v33 = vld [vmem:[%s21611_s26 + $0x3d6c] ss:$16 sps:$4 sm:$0xff]  }
 0x825   : > { %15400 = vmatprep.subr.bf16.mxu1 %v21189_v36  ;;  %v21261_v39 = vld [vmem:[%s21611_s26 + $0x3f6c] ss:$16 sps:$4 sm:$0xff]   ;;  %v21256_v36 = vld [vmem:[%s21611_s26 + $0x3d68] ss:$16 sps:$4 sm:$0xff]  }
 0x826   : > { %v15065_v47 = vpop.f32.mrf.mxu0  ;;  %15310 = vmatmul.mubr.bf16.vlgmr.msra.gmra.mxu0 %v24378_v21  ;;  %v21273_v21 = vld [vmem:[%s21611_s26 + $0x3f2c] ss:$16 sps:$4 sm:$0xff]  }
 0x827   : > { %v15106_v37 = vpop.f32.mrf.mxu1  ;;  %15351 = vmatmul.mubr.bf16.vlgmr.msra.gmra.mxu1 %v22898_v43  ;;  %v15066_v50 = vadd.f32 %v15065_v47, %v24029_v54  ;;  %15360 = vmatpush1.bf16.msra.mxu0 %v21184_v35  ;;  %v24379_v54 = vld [vmem:[#allocation31_spill] sm:$0xff]  ;;  %v21259_v35 = vld [vmem:[%s21611_s26 + $0x3f68] ss:$16 sps:$4 sm:$0xff]  }
 0x828   : > { %15401 = vmatpush1.bf16.msra.mxu1 %v21187_v13  ;;  %v15067_v56 = vpop.f32.mrf.mxu0  ;;  %15361 = vmatprep.subr.bf16.mxu0 %v21192_v1  ;;  %v21264_v13 = vld [vmem:[%s21611_s26 + $0x3d4c] ss:$16 sps:$4 sm:$0xff]   ;;  %v21265_v47 = vld [vmem:[%s21611_s26 + $0x3f48] ss:$16 sps:$4 sm:$0xff]  }
 0x829   : > { %v15108_v18 = vpop.f32.mrf.mxu1  ;;  %15402 = vmatprep.subr.bf16.mxu1 %v21195_v46  ;;  %v24103_v58 = vadd.f32 %v15106_v37, %v15066_v50  ;;  %v15068_v43 = vadd.f32 %v15067_v56, %v24034_v12  ;;  %15391 = vmatprep.mubr.bf16.mxu0 %v22904_v28  ;;  %v21204_v28 = vld [vmem:[%s21611_s26 + $0x3c8c] ss:$16 sps:$4 sm:$0xff]   ;;  %v21262_v46 = vld [vmem:[%s21611_s26 + $0x3d48] ss:$16 sps:$4 sm:$0xff]  }
 0x82a   : > { %15432 = vmatprep.mubr.bf16.mxu1 %v24379_v54  ;;  %v15069_v25 = vpop.f32.mrf.mxu0  ;;  %v21207_v12 = vld [vmem:[%s21611_s26 + $0x3e8c] ss:$16 sps:$4 sm:$0xff]   ;;  %v21268_v50 = vld [vmem:[%s21611_s26 + $0x3d28] ss:$16 sps:$4 sm:$0xff]  }
 0x82b   : > { %v15110_v15 = vpop.f32.mrf.mxu1  ;;  %v24108_v22 = vadd.f32 %v15108_v18, %v15068_v43  ;;  %15362 = vmatpush1.bf16.msra.mxu0 %v21190_v60  ;;  %v21267_v1 = vld [vmem:[%s21611_s26 + $0x3f4c] ss:$16 sps:$4 sm:$0xff]   ;;  %v21271_v60 = vld [vmem:[%s21611_s26 + $0x3f28] ss:$16 sps:$4 sm:$0xff]  }
 0x82c   : > { %15403 = vmatpush1.bf16.msra.mxu1 %v21193_v6  ;;  %v15070_v7 = vpop.f32.mrf.mxu0  ;;  %15363 = vmatprep.subr.bf16.mxu0 %v21198_v57  ;;  %v21270_v37 = vld [vmem:[%s21611_s26 + $0x3d2c] ss:$16 sps:$4 sm:$0xff]   ;;  %v21274_v18 = vld [vmem:[%s21611_s26 + $0x3d08] ss:$16 sps:$4 sm:$0xff]  }
 0x82d   : > { %v15111_v38 = vpop.f32.mrf.mxu1  ;;  %15404 = vmatprep.subr.bf16.mxu1 %v21201_v11  ;;  %v21276_v6 = vld [vmem:[%s21611_s26 + $0x3d0c] ss:$16 sps:$4 sm:$0xff]   ;;  %v21277_v57 = vld [vmem:[%s21611_s26 + $0x3f08] ss:$16 sps:$4 sm:$0xff]  }
 0x82e   : > { %v21279_v56 = vld [vmem:[%s21611_s26 + $0x3f0c] ss:$16 sps:$4 sm:$0xff]  }
 0x82f   : > { %15364 = vmatpush1.bf16.msra.mxu0 %v21196_v23  ;;  %v24380_v54 = vld [vmem:[#allocation32_spill] sm:$0xff] }
 0x830   : > { %15405 = vmatpush1.bf16.msra.mxu1 %v21199_v30  ;;  %15365 = vmatprep.subr.bf16.mxu0 %v21204_v28 }
 0x831   : > { %15406 = vmatprep.subr.bf16.mxu1 %v21207_v12 }
 0x833   : > { %15366 = vmatpush1.bf16.msra.mxu0 %v21202_v16 }
 0x834   : > { %15407 = vmatpush1.bf16.msra.mxu1 %v21205_v63  ;;  %15367 = vmatprep.subr.bf16.mxu0 %v21210_v52 }
 0x835   : > { %15408 = vmatprep.subr.bf16.mxu1 %v21213_v44 }
 0x837   : > { %15368 = vmatpush1.bf16.msra.mxu0 %v21208_v0 }
 0x838   : > { %15409 = vmatpush1.bf16.msra.mxu1 %v21211_v45  ;;  %15369 = vmatprep.subr.bf16.mxu0 %v21216_v40 }
 0x839   : > { %15410 = vmatprep.subr.bf16.mxu1 %v21219_v41 }
 0x83b   : > { %15370 = vmatpush1.bf16.msra.mxu0 %v21214_v14 }
 0x83c   : > { %15411 = vmatpush1.bf16.msra.mxu1 %v21217_v10  ;;  %15371 = vmatprep.subr.bf16.mxu0 %v21222_v17 }
 0x83d   : > { %15412 = vmatprep.subr.bf16.mxu1 %v21225_v20 }
 0x83f   : > { %15372 = vmatpush1.bf16.msra.mxu0 %v21220_v24 }
 0x840   : > { %15413 = vmatpush1.bf16.msra.mxu1 %v21223_v4  ;;  %15373 = vmatprep.subr.bf16.mxu0 %v21228_v34 }
 0x841   : > { %15414 = vmatprep.subr.bf16.mxu1 %v21231_v42 }
 0x843   : > { %15374 = vmatpush1.bf16.msra.mxu0 %v21226_v59 }
 0x844   : > { %15415 = vmatpush1.bf16.msra.mxu1 %v21229_v27  ;;  %15375 = vmatprep.subr.bf16.mxu0 %v21234_v19 }
 0x845   : > { %15416 = vmatprep.subr.bf16.mxu1 %v21237_v32 }
 0x847   : > { %15376 = vmatpush2.bf16.msra.mxu0 %v21232_v48 }
 0x848   : > { %15417 = vmatpush2.bf16.msra.mxu1 %v21235_v49  ;;  %15377 = vmatprep.subr.bf16.mxu0 %v21240_v51 }
 0x849   : > { %15418 = vmatprep.subr.bf16.mxu1 %v21243_v26 }
 0x84b   : > { %15378 = vmatpush2.bf16.msra.mxu0 %v21238_v5 }
 0x84c   : > { %15419 = vmatpush2.bf16.msra.mxu1 %v21241_v8  ;;  %15379 = vmatprep.subr.bf16.mxu0 %v21246_v9  ;;  %v527_v9 = vld [vmem:[#allocation2 + $0x18] sm:$0xff] }
 0x84d   : > { %15420 = vmatprep.subr.bf16.mxu1 %v21249_v62 }
 0x84f   : > { %15380 = vmatpush2.bf16.msra.mxu0 %v21244_v29 }
 0x850   : > { %15421 = vmatpush2.bf16.msra.mxu1 %v21247_v53  ;;  %15381 = vmatprep.subr.bf16.mxu0 %v21252_v55 }
 0x851   : > { %15422 = vmatprep.subr.bf16.mxu1 %v21255_v2  ;;  %v528_v2 = vld [vmem:[#allocation2 + $0x8] sm:$0xff] }
 0x853   : > { %15382 = vmatpush2.bf16.msra.mxu0 %v21250_v3 }
 0x854   : > { %15423 = vmatpush2.bf16.msra.mxu1 %v21253_v31  ;;  %15383 = vmatprep.subr.bf16.mxu0 %v21258_v33 }
 0x855   : > { %15424 = vmatprep.subr.bf16.mxu1 %v21261_v39 }
 0x857   : > { %15384 = vmatpush2.bf16.msra.mxu0 %v21256_v36 }
 0x858   : > { %15425 = vmatpush2.bf16.msra.mxu1 %v21259_v35  ;;  %15385 = vmatprep.subr.bf16.mxu0 %v21264_v13 }
 0x859   : > { %15426 = vmatprep.subr.bf16.mxu1 %v21267_v1 }
 0x85b   : > { %15386 = vmatpush2.bf16.msra.mxu0 %v21262_v46 }
 0x85c   : > { %15427 = vmatpush2.bf16.msra.mxu1 %v21265_v47  ;;  %15387 = vmatprep.subr.bf16.mxu0 %v21270_v37 }
 0x85d   : > { %15428 = vmatprep.subr.bf16.mxu1 %v21273_v21 }
 0x85f   : > { %15388 = vmatpush2.bf16.msra.mxu0 %v21268_v50 }
 0x860   : > { %15429 = vmatpush2.bf16.msra.mxu1 %v21271_v60  ;;  %15389 = vmatprep.subr.bf16.mxu0 %v21276_v6 }
 0x861   : > { %15430 = vmatprep.subr.bf16.mxu1 %v21279_v56 }
 0x863   : > { %15390 = vmatpush2.bf16.msra.mxu0 %v21274_v18 }
 0x864   : > { %15431 = vmatpush2.bf16.msra.mxu1 %v21277_v57 }
 0x866   : > { %v15147_v11 = vpop.f32.mrf.mxu0  ;;  %15392 = vmatmul.mubr.bf16.vlgmr.msra.gmra.mxu0 %v24380_v54 }
 0x867   : > { %v15188_v43 = vpop.f32.mrf.mxu1  ;;  %15433 = vmatmul.mubr.bf16.vlgmr.msra.gmra.mxu1 %v22982_v61  ;;  %v15148_v25 = vadd.f32 %v15147_v11, %v24103_v58 }
 0x868   : > { %v15149_v15 = vpop.f32.mrf.mxu0 }
 0x869   : > { %v15190_v23 = vpop.f32.mrf.mxu1  ;;  %v15189_v30 = vadd.f32 %v15188_v43, %v15148_v25  ;;  %v15150_v7 = vadd.f32 %v15149_v15, %v24108_v22 }
 0x86a   : > { %v15151_v38 = vpop.f32.mrf.mxu0 }
 0x86b   : > { %v15192_v28 = vpop.f32.mrf.mxu1  ;;  %v15191_v12 = vadd.f32 %v15190_v23, %v15150_v7 }
 0x86c   : > { %v15152_v16 = vpop.f32.mrf.mxu0 }
 0x86d   : > { %v15193_v63 = vpop.f32.mrf.mxu1 }
 0x8a6   : > { %v15229_v52 = vpop.f32.mrf.mxu0 }
 0x8a7   : > { %v15270_v44 = vpop.f32.mrf.mxu1  ;;  %v15230_v0 = vadd.f32 %v15229_v52, %v15189_v30 }
 0x8a8   : > { %v15231_v45 = vpop.f32.mrf.mxu0 }
 0x8a9   : > { %v15272_v40 = vpop.f32.mrf.mxu1  ;;  %v15271_v41 = vadd.f32 %v15270_v44, %v15230_v0  ;;  %v15232_v14 = vadd.f32 %v15231_v45, %v15191_v12 }
 0x8aa   : > { %v15233_v61 = vpop.f32.mrf.mxu0 }
 0x8ab   : > { %v15274_v10 = vpop.f32.mrf.mxu1  ;;  %v15273_v58 = vadd.f32 %v15272_v40, %v15232_v14 }
 0x8ac   : > { %v15234_v17 = vpop.f32.mrf.mxu0 }
 0x8ad   : > { %v15275_v20 = vpop.f32.mrf.mxu1 }
 0x8e6   : > { %v15311_v24 = vpop.f32.mrf.mxu0 }
 0x8e7   : > { %v15352_v4 = vpop.f32.mrf.mxu1  ;;  %v15312_v32 = vadd.f32 %v15311_v24, %v15271_v41 }
 0x8e8   : > { %v15313_v22 = vpop.f32.mrf.mxu0 }
 0x8e9   : > { %v15354_v34 = vpop.f32.mrf.mxu1  ;;  %v15314_v48 = vadd.f32 %v15313_v22, %v15273_v58  ;;  %v15353_v49 = vadd.f32 %v15352_v4, %v15312_v32 }
 0x8ea   : > { %v15315_v42 = vpop.f32.mrf.mxu0 }
 0x8eb   : > { %v15356_v59 = vpop.f32.mrf.mxu1  ;;  %v15355_v5 = vadd.f32 %v15354_v34, %v15314_v48 }
 0x8ec   : > { %v15316_v27 = vpop.f32.mrf.mxu0 }
 0x8ed   : > { %v15357_v19 = vpop.f32.mrf.mxu1 }
 0x926   : > { %v15393_v51 = vpop.f32.mrf.mxu0 }
 0x927   : > { %v15434_v26 = vpop.f32.mrf.mxu1  ;;  %v15394_v8 = vadd.f32 %v15393_v51, %v15353_v49 }
 0x928   : > { %v15395_v62 = vpop.f32.mrf.mxu0 }
 0x929   : > { %v15436_v29 = vpop.f32.mrf.mxu1  ;;  %v15435_v53 = vadd.f32 %v15434_v26, %v15394_v8  ;;  %v15396_v55 = vadd.f32 %v15395_v62, %v15355_v5 }
 0x92a   : > { %v15397_v3 = vpop.f32.mrf.mxu0 }
 0x92b   : > { %v15438_v31 = vpop.f32.mrf.mxu1  ;;  %v15443_v33 = vadd.f32 %v15435_v53, %v527_v9  ;;  %v15437_v39 = vadd.f32 %v15436_v29, %v15396_v55  ;;  %15452 = sbr.rel (%p18077_p7) target bundleno = 2821 (0xb05), region = 72 }
 0x92c   : > { %v15398_v36 = vpop.f32.mrf.mxu0 }
 0x92d   : > { %v15439_v35 = vpop.f32.mrf.mxu1  ;;  %15447 = vst [vmem:[#allocation2 + $0x18] sm:$0xff] %v15443_v33  ;;  %v15444_v13 = vadd.f32 %v15437_v39, %v528_v2 }
 0x92f   : > { %15448 = vst [vmem:[#allocation2 + $0x8] sm:$0xff] %v15444_v13 }
 0x930   : > { %v15526_v1 = vld [vmem:[#allocation8 + $0xf8] sm:$0xff]  ;;  %v15525_v47 = vld [vmem:[#allocation8 + $0xf0] sm:$0xff]  ;;  %v15524_v21 = vld [vmem:[#allocation8 + $0xe8] sm:$0xff]  ;;  %vm15892_vm6 = vcmask 7168  }
 0x931   : > { %v15590_v46 = vld [vmem:[#allocation8 + $0x2f8] sm:$0xff]  ;;  %15635 = vmatprep.subr.mxu0 %v15526_v1  ;;  %v15589_v37 = vld [vmem:[#allocation8 + $0x2f0] sm:$0xff]  ;;  %v15588_v50 = vld [vmem:[#allocation8 + $0x2e8] sm:$0xff] }
 0x932   : > { %15706 = vmatprep.subr.mxu1 %v15590_v46  ;;  %15636 = vmatpush1.msra.mxu0 %v15525_v47  ;;  %v15523_v60 = vld [vmem:[#allocation8 + $0xe0] sm:$0xff]  ;;  %v15522_v56 = vld [vmem:[#allocation8 + $0xd8] sm:$0xff]  ;;  %v15521_v57 = vld [vmem:[#allocation8 + $0xd0] sm:$0xff] }
 0x933   : > { %15707 = vmatpush1.msra.mxu1 %v15589_v37  ;;  %v15587_v6 = vld [vmem:[#allocation8 + $0x2e0] sm:$0xff]  ;;  %15637 = vmatprep.subr.mxu0 %v15524_v21  ;;  %v15586_v18 = vld [vmem:[#allocation8 + $0x2d8] sm:$0xff]  ;;  %v15585_v11 = vld [vmem:[#allocation8 + $0x2d0] sm:$0xff] }
 0x934   : > { %15708 = vmatprep.subr.mxu1 %v15588_v50  ;;  %15638 = vmatpush1.msra.mxu0 %v15523_v60  ;;  %v15520_v43 = vld [vmem:[#allocation8 + $0xc8] sm:$0xff]  ;;  %v15519_v25 = vld [vmem:[#allocation8 + $0xc0] sm:$0xff]  ;;  %v15518_v23 = vld [vmem:[#allocation8 + $0xb8] sm:$0xff] }
 0x935   : > { %15709 = vmatpush1.msra.mxu1 %v15587_v6  ;;  %v15584_v54 = vld [vmem:[#allocation8 + $0x2c8] sm:$0xff]  ;;  %15639 = vmatprep.subr.mxu0 %v15522_v56  ;;  %v15583_v15 = vld [vmem:[#allocation8 + $0x2c0] sm:$0xff]  ;;  %v15582_v30 = vld [vmem:[#allocation8 + $0x2b8] sm:$0xff] }
 0x936   : > { %15710 = vmatprep.subr.mxu1 %v15586_v18  ;;  %15640 = vmatpush1.msra.mxu0 %v15521_v57  ;;  %v15517_v7 = vld [vmem:[#allocation8 + $0xb0] sm:$0xff]  ;;  %v15516_v28 = vld [vmem:[#allocation8 + $0xa8] sm:$0xff]  ;;  %v15515_v16 = vld [vmem:[#allocation8 + $0xa0] sm:$0xff] }
 0x937   : > { %15711 = vmatpush1.msra.mxu1 %v15585_v11  ;;  %15641 = vmatprep.subr.mxu0 %v15520_v43  ;;  %v15581_v38 = vld [vmem:[#allocation8 + $0x2b0] sm:$0xff]  ;;  %v15580_v12 = vld [vmem:[#allocation8 + $0x2a8] sm:$0xff]  ;;  %v15579_v63 = vld [vmem:[#allocation8 + $0x2a0] sm:$0xff] }
 0x938   : > { %15712 = vmatprep.subr.mxu1 %v15584_v54  ;;  %15642 = vmatpush1.msra.mxu0 %v15519_v25  ;;  %v15514_v52 = vld [vmem:[#allocation8 + $0x98] sm:$0xff]  ;;  %v15513_v0 = vld [vmem:[#allocation8 + $0x90] sm:$0xff]  ;;  %v15512_v40 = vld [vmem:[#allocation8 + $0x88] sm:$0xff] }
 0x939   : > { %15713 = vmatpush1.msra.mxu1 %v15583_v15  ;;  %15643 = vmatprep.subr.mxu0 %v15518_v23  ;;  %v15578_v44 = vld [vmem:[#allocation8 + $0x298] sm:$0xff]  ;;  %v15577_v45 = vld [vmem:[#allocation8 + $0x290] sm:$0xff]  ;;  %v15576_v41 = vld [vmem:[#allocation8 + $0x288] sm:$0xff]  ;;  %v15459_v23 = vlaneseq }
 0x93a   : > { %15714 = vmatprep.subr.mxu1 %v15582_v30  ;;  %15644 = vmatpush1.msra.mxu0 %v15517_v7  ;;  %v15511_v14 = vld [vmem:[#allocation8 + $0x80] sm:$0xff]  ;;  %v15510_v10 = vld [vmem:[#allocation8 + $0x78] sm:$0xff]  ;;  %v15509_v17 = vld [vmem:[#allocation8 + $0x70] sm:$0xff] }
 0x93b   : > { %15715 = vmatpush1.msra.mxu1 %v15581_v38  ;;  %15645 = vmatprep.subr.mxu0 %v15516_v28  ;;  %v15575_v61 = vld [vmem:[#allocation8 + $0x280] sm:$0xff]  ;;  %v15574_v58 = vld [vmem:[#allocation8 + $0x278] sm:$0xff]  ;;  %v15573_v20 = vld [vmem:[#allocation8 + $0x270] sm:$0xff] }
 0x93c   : > { %15716 = vmatprep.subr.mxu1 %v15580_v12  ;;  %15646 = vmatpush1.msra.mxu0 %v15515_v16  ;;  %v15508_v24 = vld [vmem:[#allocation8 + $0x68] sm:$0xff]  ;;  %v15507_v22 = vld [vmem:[#allocation8 + $0x60] sm:$0xff]  ;;  %v15506_v42 = vld [vmem:[#allocation8 + $0x58] sm:$0xff] }
 0x93d   : > { %15717 = vmatpush1.msra.mxu1 %v15579_v63  ;;  %15647 = vmatprep.subr.mxu0 %v15514_v52  ;;  %v15572_v4 = vld [vmem:[#allocation8 + $0x268] sm:$0xff]  ;;  %v15571_v34 = vld [vmem:[#allocation8 + $0x260] sm:$0xff]  ;;  %v15570_v59 = vld [vmem:[#allocation8 + $0x258] sm:$0xff] }
 0x93e   : > { %15718 = vmatprep.subr.mxu1 %v15578_v44  ;;  %15648 = vmatpush1.msra.mxu0 %v15513_v0  ;;  %v15505_v27 = vld [vmem:[#allocation8 + $0x50] sm:$0xff]  ;;  %v15504_v32 = vld [vmem:[#allocation8 + $0x48] sm:$0xff]  ;;  %v15503_v49 = vld [vmem:[#allocation8 + $0x40] sm:$0xff]  ;;  %v24169_v44 = vshrl.u32 %v15459_v23, 7 }
 0x93f   : > { %15719 = vmatpush1.msra.mxu1 %v15577_v45  ;;  %15649 = vmatprep.subr.mxu0 %v15512_v40  ;;  %v15569_v19 = vld [vmem:[#allocation8 + $0x250] sm:$0xff]  ;;  %v15568_v48 = vld [vmem:[#allocation8 + $0x248] sm:$0xff]  ;;  %v15567_v51 = vld [vmem:[#allocation8 + $0x240] sm:$0xff] }
 0x940   : > { %15720 = vmatprep.subr.mxu1 %v15576_v41  ;;  %15650 = vmatpush1.msra.mxu0 %v15511_v14  ;;  %v15502_v26 = vld [vmem:[#allocation8 + $0x38] sm:$0xff]  ;;  %v15501_v8 = vld [vmem:[#allocation8 + $0x30] sm:$0xff]  ;;  %v15500_v62 = vld [vmem:[#allocation8 + $0x28] sm:$0xff] }
 0x941   : > { %15721 = vmatpush1.msra.mxu1 %v15575_v61  ;;  %15651 = vmatprep.subr.mxu0 %v15510_v10  ;;  %v15566_v5 = vld [vmem:[#allocation8 + $0x238] sm:$0xff]  ;;  %v15565_v9 = vld [vmem:[#allocation8 + $0x230] sm:$0xff]  ;;  %v15564_v29 = vld [vmem:[#allocation8 + $0x228] sm:$0xff] }
 0x942   : > { %15722 = vmatprep.subr.mxu1 %v15574_v58  ;;  %15652 = vmatpush1.msra.mxu0 %v15509_v17  ;;  %v15499_v53 = vld [vmem:[#allocation8 + $0x20] sm:$0xff]  ;;  %v15498_v2 = vld [vmem:[#allocation8 + $0x18] sm:$0xff]  ;;  %v15497_v31 = vld [vmem:[#allocation8 + $0x10] sm:$0xff]  ;;  %v15465_v17 = vsub.s32 1, %v24169_v44 }
 0x943   : > { %15723 = vmatpush1.msra.mxu1 %v15573_v20  ;;  %15653 = vmatprep.subr.mxu0 %v15508_v24  ;;  %v15563_v55 = vld [vmem:[#allocation8 + $0x220] sm:$0xff]  ;;  %v15562_v3 = vld [vmem:[#allocation8 + $0x218] sm:$0xff]  ;;  %v15561_v33 = vld [vmem:[#allocation8 + $0x210] sm:$0xff] }
 0x944   : > { %15724 = vmatprep.subr.mxu1 %v15572_v4  ;;  %15654 = vmatpush1.msra.mxu0 %v15507_v22  ;;  %v15496_v39 = vld [vmem:[#allocation8 + $0x8] sm:$0xff]  ;;  %v15495_v35 = vld [vmem:[#allocation8] sm:$0xff]  ;;  %v15558_v1 = vld [vmem:[#allocation8 + $0x1f8] sm:$0xff]  ;;  %v15473_v22 = vsub.s32 3, %v24169_v44 }
 0x945   : > { %15725 = vmatpush1.msra.mxu1 %v15571_v34  ;;  %15655 = vmatprep.subr.mxu0 %v15506_v42  ;;  %v15560_v36 = vld [vmem:[#allocation8 + $0x208] sm:$0xff]  ;;  %v15559_v13 = vld [vmem:[#allocation8 + $0x200] sm:$0xff]  ;;  %v15622_v46 = vld [vmem:[#allocation8 + $0x3f8] sm:$0xff] }
 0x946   : > { %15726 = vmatprep.subr.mxu1 %v15570_v59  ;;  %15656 = vmatpush1.msra.mxu0 %v15505_v27  ;;  %v15557_v47 = vld [vmem:[#allocation8 + $0x1f0] sm:$0xff]  ;;  %v15556_v21 = vld [vmem:[#allocation8 + $0x1e8] sm:$0xff]  ;;  %v15555_v60 = vld [vmem:[#allocation8 + $0x1e0] sm:$0xff]  ;;  %v15461_v59 = vsub.s32 0, %v24169_v44  ;;  %v15469_v27 = vsub.s32 2, %v24169_v44 }
 0x947   : > { %15727 = vmatpush1.msra.mxu1 %v15569_v19  ;;  %15657 = vmatprep.subr.mxu0 %v15504_v32  ;;  %v15621_v37 = vld [vmem:[#allocation8 + $0x3f0] sm:$0xff]  ;;  %v15620_v50 = vld [vmem:[#allocation8 + $0x3e8] sm:$0xff]  ;;  %v15619_v6 = vld [vmem:[#allocation8 + $0x3e0] sm:$0xff] }
 0x948   : > { %15728 = vmatprep.subr.mxu1 %v15568_v48  ;;  %15658 = vmatpush1.msra.mxu0 %v15503_v49  ;;  %v15554_v56 = vld [vmem:[#allocation8 + $0x1d8] sm:$0xff]  ;;  %v15553_v57 = vld [vmem:[#allocation8 + $0x1d0] sm:$0xff]  ;;  %v15552_v43 = vld [vmem:[#allocation8 + $0x1c8] sm:$0xff] }
 0x949   : > { %15729 = vmatpush1.msra.mxu1 %v15567_v51  ;;  %15659 = vmatprep.subr.mxu0 %v15502_v26  ;;  %v15618_v18 = vld [vmem:[#allocation8 + $0x3d8] sm:$0xff]  ;;  %v15617_v11 = vld [vmem:[#allocation8 + $0x3d0] sm:$0xff]  ;;  %v15616_v54 = vld [vmem:[#allocation8 + $0x3c8] sm:$0xff] }
 0x94a   : > { %15730 = vmatprep.subr.mxu1 %v15566_v5  ;;  %15660 = vmatpush1.msra.mxu0 %v15501_v8  ;;  %v15551_v25 = vld [vmem:[#allocation8 + $0x1c0] sm:$0xff]  ;;  %v15550_v30 = vld [vmem:[#allocation8 + $0x1b8] sm:$0xff]  ;;  %v15549_v38 = vld [vmem:[#allocation8 + $0x1b0] sm:$0xff] }
 0x94b   : > { %15731 = vmatpush1.msra.mxu1 %v15565_v9  ;;  %15661 = vmatprep.subr.mxu0 %v15500_v62  ;;  %v15615_v15 = vld [vmem:[#allocation8 + $0x3c0] sm:$0xff]  ;;  %v15614_v7 = vld [vmem:[#allocation8 + $0x3b8] sm:$0xff]  ;;  %v15613_v28 = vld [vmem:[#allocation8 + $0x3b0] sm:$0xff] }
 0x94c   : > { %15732 = vmatprep.subr.mxu1 %v15564_v29  ;;  %15662 = vmatpush1.msra.mxu0 %v15499_v53  ;;  %v15548_v12 = vld [vmem:[#allocation8 + $0x1a8] sm:$0xff]  ;;  %v15547_v63 = vld [vmem:[#allocation8 + $0x1a0] sm:$0xff]  ;;  %v15546_v0 = vld [vmem:[#allocation8 + $0x198] sm:$0xff] }
 0x94d   : > { %15733 = vmatpush1.msra.mxu1 %v15563_v55  ;;  %15663 = vmatprep.subr.mxu0 %v15498_v2  ;;  %v15612_v16 = vld [vmem:[#allocation8 + $0x3a8] sm:$0xff]  ;;  %v15611_v52 = vld [vmem:[#allocation8 + $0x3a0] sm:$0xff]  ;;  %v15610_v45 = vld [vmem:[#allocation8 + $0x398] sm:$0xff] }
 0x94e   : > { %15734 = vmatprep.subr.mxu1 %v15562_v3  ;;  %15664 = vmatpush1.msra.mxu0 %v15497_v31  ;;  %v15545_v40 = vld [vmem:[#allocation8 + $0x190] sm:$0xff]  ;;  %v15544_v14 = vld [vmem:[#allocation8 + $0x188] sm:$0xff]  ;;  %v15543_v10 = vld [vmem:[#allocation8 + $0x180] sm:$0xff] }
 0x94f   : > { %15735 = vmatpush1.msra.mxu1 %v15561_v33  ;;  %15665 = vmatprep.subr.mxu0 %v15496_v39  ;;  %v15609_v41 = vld [vmem:[#allocation8 + $0x390] sm:$0xff]  ;;  %v15608_v61 = vld [vmem:[#allocation8 + $0x388] sm:$0xff]  ;;  %v15607_v58 = vld [vmem:[#allocation8 + $0x380] sm:$0xff] }
 0x950   : > { %15736 = vmatprep.subr.mxu1 %v15560_v36  ;;  %15666 = vmatpush1.msra.mxu0 %v15495_v35  ;;  %v15542_v20 = vld [vmem:[#allocation8 + $0x178] sm:$0xff]  ;;  %v15541_v34 = vld [vmem:[#allocation8 + $0x170] sm:$0xff]  ;;  %v15540_v19 = vld [vmem:[#allocation8 + $0x168] sm:$0xff] }
 0x951   : > { %15737 = vmatpush1.msra.mxu1 %v15559_v13  ;;  %15667 = vmatprep.subr.mxu0 %v15558_v1  ;;  %v15606_v24 = vld [vmem:[#allocation8 + $0x378] sm:$0xff]  ;;  %v15605_v42 = vld [vmem:[#allocation8 + $0x370] sm:$0xff]  ;;  %v15604_v32 = vld [vmem:[#allocation8 + $0x368] sm:$0xff] }
 0x952   : > { %15738 = vmatprep.subr.mxu1 %v15622_v46  ;;  %15668 = vmatpush2.msra.mxu0 %v15557_v47  ;;  %v15457_v4 = vld [vmem:[#allocation6] sm:$0xf]  ;;  %v15539_v48 = vld [vmem:[#allocation8 + $0x160] sm:$0xff]  ;;  %v15537_v8 = vld [vmem:[#allocation8 + $0x150] sm:$0xff] }
 0x953   : > { %15739 = vmatpush2.msra.mxu1 %v15621_v37  ;;  %15669 = vmatprep.subr.mxu0 %v15556_v21  ;;  %v15603_v49 = vld [vmem:[#allocation8 + $0x360] sm:$0xff]  ;;  %v15538_v51 = vld [vmem:[#allocation8 + $0x158] sm:$0xff]  ;;  %v15466_v26 = vrot.slane %v15457_v4, %v15465_v17  ;;  %v15474_v62 = vrot.slane %v15457_v4, %v15473_v22  ;;  %v15601_v29 = vld [vmem:[#allocation8 + $0x350] sm:$0xff]  ;;  %v15462_v2 = vrot.slane %v15457_v4, %v15461_v59 }
 0x954   : > { %15740 = vmatprep.subr.mxu1 %v15620_v50  ;;  %15670 = vmatpush2.msra.mxu0 %v15555_v60  ;;  %v15602_v5 = vld [vmem:[#allocation8 + $0x358] sm:$0xff]  ;;  %v15536_v53 = vld [vmem:[#allocation8 + $0x148] sm:$0xff]  ;;  %v15470_v3 = vrot.slane %v15457_v4, %v15469_v27  ;;  %v15535_v36 = vld [vmem:[#allocation8 + $0x140] sm:$0xff] }
 0x955   : > { %15741 = vmatpush2.msra.mxu1 %v15619_v6  ;;  %15671 = vmatprep.subr.mxu0 %v15554_v56  ;;  %v15454_v9 = vld [vmem:[#allocation2] sm:$0xff]  ;;  %v15456_v55 = vld [vmem:[#allocation2 + $0x8] sm:$0xff]  ;;  %v15453_v33 = vld [vmem:[#allocation2 + $0x10] sm:$0xff] }
 0x956   : > { %15742 = vmatprep.subr.mxu1 %v15618_v18  ;;  %15672 = vmatpush2.msra.mxu0 %v15553_v57  ;;  %v15600_v31 = vld [vmem:[#allocation8 + $0x348] sm:$0xff]  ;;  %v15455_v39 = vld [vmem:[#allocation2 + $0x18] sm:$0xff]  ;;  %v15599_v35 = vld [vmem:[#allocation8 + $0x340] sm:$0xff]  ;;  %v15480_v13 = vadd.f32 %v15466_v26, %v15454_v9  ;;  %v15482_v47 = vadd.f32 %v15474_v62, %v15456_v55  ;;  %v15479_v50 = vadd.f32 %v15462_v2, %v15453_v33 }
 0x957   : > { %15743 = vmatpush2.msra.mxu1 %v15617_v11  ;;  %15673 = vmatprep.subr.mxu0 %v15552_v43  ;;  %v15534_v1 = vld [vmem:[#allocation8 + $0x138] sm:$0xff]  ;;  %v15533_v37 = vld [vmem:[#allocation8 + $0x130] sm:$0xff]  ;;  %v15481_v60 = vadd.f32 %v15470_v3, %v15455_v39  ;;  %v15532_v6 = vld [vmem:[#allocation8 + $0x128] sm:$0xff] }
 0x958   : > { %15744 = vmatprep.subr.mxu1 %v15616_v54  ;;  %15674 = vmatpush2.msra.mxu0 %v15551_v25  ;;  %v15598_v46 = vld [vmem:[#allocation8 + $0x338] sm:$0xff]  ;;  %v15597_v21 = vld [vmem:[#allocation8 + $0x330] sm:$0xff]  ;;  %v15596_v56 = vld [vmem:[#allocation8 + $0x328] sm:$0xff]  ;;  %v15488_v11 = vmul.f32 0.2, %v15480_v13  ;;  %vm15484_vm0 = vcmp.gt.f32.partialorder %v15480_v13, 0.0 }
 0x959   : > { %15745 = vmatpush2.msra.mxu1 %v15615_v15  ;;  %15675 = vmatprep.subr.mxu0 %v15550_v30  ;;  %v15531_v18 = vld [vmem:[#allocation8 + $0x120] sm:$0xff]  ;;  %v15530_v43 = vld [vmem:[#allocation8 + $0x118] sm:$0xff]  ;;  %v15529_v25 = vld [vmem:[#allocation8 + $0x110] sm:$0xff]  ;;  %v15490_v15 = vmul.f32 0.2, %v15482_v47  ;;  %vm15486_vm1 = vcmp.gt.f32.partialorder %v15482_v47, 0.0 }
 0x95a   : > { %15746 = vmatprep.subr.mxu1 %v15614_v7  ;;  %15676 = vmatpush2.msra.mxu0 %v15549_v38  ;;  %v15595_v57 = vld [vmem:[#allocation8 + $0x320] sm:$0xff]  ;;  %v15594_v54 = vld [vmem:[#allocation8 + $0x318] sm:$0xff]  ;;  %v15593_v23 = vld [vmem:[#allocation8 + $0x310] sm:$0xff]  ;;  %v15487_v30 = vmul.f32 0.2, %v15479_v50  ;;  %vm15483_vm2 = vcmp.gt.f32.partialorder %v15479_v50, 0.0 }
 0x95b   : > { %15747 = vmatpush2.msra.mxu1 %v15613_v28  ;;  %15677 = vmatprep.subr.mxu0 %v15548_v12  ;;  %v15489_v7 = vmul.f32 0.2, %v15481_v60  ;;  %v15528_v38 = vld [vmem:[#allocation8 + $0x108] sm:$0xff]  ;;  %vm15485_vm3 = vcmp.gt.f32.partialorder %v15481_v60, 0.0  ;;  %v15527_v12 = vld [vmem:[#allocation8 + $0x100] sm:$0xff]  ;;  %v15810_v4 = vld [vmem:[%s24307_s5 + $0xd8] sm:$0xff] }
 0x95c   : > { %15748 = vmatprep.subr.mxu1 %v15612_v16  ;;  %15678 = vmatpush2.msra.mxu0 %v15547_v63  ;;  %v15592_v28 = vld [vmem:[#allocation8 + $0x308] sm:$0xff]  ;;  %v15492_v16 = vsel %vm15484_vm0, %v15480_v13, %v15488_v11  ;;  %v15591_v63 = vld [vmem:[#allocation8 + $0x300] sm:$0xff]  ;;  %v15794_v22 = vld [vmem:[%s24307_s5 + $0x58] sm:$0xff] }
 0x95d   : > { %15749 = vmatpush2.msra.mxu1 %v15611_v52  ;;  %15679 = vmatprep.subr.mxu0 %v15546_v0  ;;  %v15494_v52 = vsel %vm15486_vm1, %v15482_v47, %v15490_v15  ;;  %v15491_v0 = vsel %vm15483_vm2, %v15479_v50, %v15487_v30  ;;  %v15808_v27 = vld [vmem:[%s24307_s5 + $0xc8] sm:$0xff]  ;;  %v15805_v26 = vld [vmem:[%s24307_s5 + $0xb0] sm:$0xff]  ;;  %v15803_v62 = vld [vmem:[%s24307_s5 + $0xa0] sm:$0xff] }
 0x95e   : > { %15750 = vmatprep.subr.mxu1 %v15610_v45  ;;  %15680 = vmatpush2.msra.mxu0 %v15545_v40  ;;  %v15493_v45 = vsel %vm15485_vm3, %v15481_v60, %v15489_v7  ;;  %v15814_v40 = vld [vmem:[%s24307_s5 + $0xf8] sm:$0xff]  ;;  %v15788_v9 = vld [vmem:[%s24307_s5 + $0x28] sm:$0xff]  ;;  %v15801_v2 = vld [vmem:[%s24307_s5 + $0x90] sm:$0xff] }
 0x95f   : > { %15751 = vmatpush2.msra.mxu1 %v15609_v41  ;;  %15681 = vmatprep.subr.mxu0 %v15544_v14  ;;  %v15798_v41 = vld [vmem:[%s24307_s5 + $0x78] sm:$0xff]  ;;  %v15813_v14 = vld [vmem:[%s24307_s5 + $0xf0] sm:$0xff]  ;;  %v15784_v33 = vld [vmem:[%s24307_s5 + $0x8] sm:$0xff] }
 0x960   : > { %15752 = vmatprep.subr.mxu1 %v15608_v61  ;;  %15682 = vmatpush2.msra.mxu0 %v15543_v10  ;;  %v15797_v61 = vld [vmem:[%s24307_s5 + $0x70] sm:$0xff]  ;;  %v15812_v10 = vld [vmem:[%s24307_s5 + $0xe8] sm:$0xff]  ;;  %v15786_v55 = vld [vmem:[%s24307_s5 + $0x18] sm:$0xff] }
 0x961   : > { %15753 = vmatpush2.msra.mxu1 %v15607_v58  ;;  %15683 = vmatprep.subr.mxu0 %v15542_v20  ;;  %v15796_v58 = vld [vmem:[%s24307_s5 + $0x68] sm:$0xff]  ;;  %v15811_v20 = vld [vmem:[%s24307_s5 + $0xe0] sm:$0xff]  ;;  %v15785_v3 = vld [vmem:[%s24307_s5 + $0x10] sm:$0xff] }
 0x962   : > { %15754 = vmatprep.subr.mxu1 %v15606_v24  ;;  %15684 = vmatpush2.msra.mxu0 %v15541_v34  ;;  %v15795_v24 = vld [vmem:[%s24307_s5 + $0x60] sm:$0xff]  ;;  %v15809_v34 = vld [vmem:[%s24307_s5 + $0xd0] sm:$0xff] }
 0x963   : > { %15755 = vmatpush2.msra.mxu1 %v15605_v42  ;;  %15685 = vmatprep.subr.mxu0 %v15540_v19  ;;  %v15793_v42 = vld [vmem:[%s24307_s5 + $0x50] sm:$0xff]  ;;  %v15792_v19 = vld [vmem:[%s24307_s5 + $0x48] sm:$0xff]  ;;  %v15799_v39 = vld [vmem:[%s24307_s5 + $0x80] sm:$0xff] }
 0x964   : > { %15756 = vmatprep.subr.mxu1 %v15604_v32  ;;  %15686 = vmatpush2.msra.mxu0 %v15539_v48  ;;  %v15807_v32 = vld [vmem:[%s24307_s5 + $0xc0] sm:$0xff] }
 0x965   : > { %15757 = vmatpush2.msra.mxu1 %v15603_v49  ;;  %15687 = vmatprep.subr.mxu0 %v15538_v51  ;;  %v15791_v48 = vld [vmem:[%s24307_s5 + $0x40] sm:$0xff]  ;;  %v15806_v49 = vld [vmem:[%s24307_s5 + $0xb8] sm:$0xff] }
 0x966   : > { %15758 = vmatprep.subr.mxu1 %v15602_v5  ;;  %15688 = vmatpush2.msra.mxu0 %v15537_v8  ;;  %v15790_v51 = vld [vmem:[%s24307_s5 + $0x38] sm:$0xff]  ;;  %v15789_v5 = vld [vmem:[%s24307_s5 + $0x30] sm:$0xff]  ;;  %v15804_v8 = vld [vmem:[%s24307_s5 + $0xa8] sm:$0xff] }
 0x967   : > { %15759 = vmatpush2.msra.mxu1 %v15601_v29  ;;  %15689 = vmatprep.subr.mxu0 %v15536_v53  ;;  %v15787_v29 = vld [vmem:[%s24307_s5 + $0x20] sm:$0xff]  ;;  %v15802_v53 = vld [vmem:[%s24307_s5 + $0x98] sm:$0xff] }
 0x968   : > { %15760 = vmatprep.subr.mxu1 %v15600_v31  ;;  %15690 = vmatpush2.msra.mxu0 %v15535_v36  ;;  %v15800_v31 = vld [vmem:[%s24307_s5 + $0x88] sm:$0xff]  ;;  %v15783_v36 = vld [vmem:[%s24307_s5] sm:$0xff] }
 0x969   : > { %15761 = vmatpush2.msra.mxu1 %v15599_v35  ;;  %15691 = vmatprep.subr.mxu0 %v15534_v1  ;;  %v15623_v35 = vld [vmem:[#allocation9] sm:$0x3] }
 0x96a   : > { %15762 = vmatprep.subr.mxu1 %v15598_v46  ;;  %15692 = vmatpush2.msra.mxu0 %v15533_v37  ;;  %v15628_v13 = vrot.slane %v15623_v35, %v15461_v59  ;;  %v15632_v1 = vrot.slane %v15623_v35, %v15465_v17 }
 0x96b   : > { %15763 = vmatpush2.msra.mxu1 %v15597_v21  ;;  %15693 = vmatprep.subr.mxu0 %v15532_v6 }
 0x96c   : > { %15764 = vmatprep.subr.mxu1 %v15596_v56  ;;  %15694 = vmatpush2.msra.mxu0 %v15531_v18 }
 0x96d   : > { %15765 = vmatpush2.msra.mxu1 %v15595_v57  ;;  %15695 = vmatprep.subr.mxu0 %v15530_v43 }
 0x96e   : > { %15766 = vmatprep.subr.mxu1 %v15594_v54  ;;  %15696 = vmatpush2.msra.mxu0 %v15529_v25  ;;  %v18078_v54 = vld [vmem:[#allocation3] ss:$0 sm:$0xff] }
 0x96f   : > { %15767 = vmatpush2.msra.mxu1 %v15593_v23  ;;  %15697 = vmatprep.subr.mxu0 %v15528_v38 }
 0x970   : > { %15768 = vmatprep.subr.mxu1 %v15592_v28  ;;  %15698 = vmatpush2.msra.mxu0 %v15527_v12 }
 0x971   : > { %15699 = vmatprep.mubr.f32.mxu0 %v15492_v16  ;;  %15769 = vmatpush2.msra.mxu1 %v15591_v63 }
 0x972   : > { %15770 = vmatprep.mubr.f32.mxu1 %v15494_v52  ;;  %15700 = vmatmul.mubr.f32.vlgmr.msra.gmra.mxu0 %v15491_v0 }
 0x973   : > { %15771 = vmatmul.mubr.f32.vlgmr.msra.gmra.mxu1 %v15493_v45  ;;  %18084 = vmatprep.subr.mxu0 %v15814_v40 }
 0x974   : > { %18085 = vmatpush3.msra.mxu0 %v15798_v41 }
 0x975   : > { %18086 = vmatprep.subr.mxu0 %v15813_v14 }
 0x976   : > { %18087 = vmatpush3.msra.mxu0 %v15797_v61 }
 0x977   : > { %18088 = vmatprep.subr.mxu0 %v15812_v10 }
 0x978   : > { %18089 = vmatpush3.msra.mxu0 %v15796_v58 }
 0x979   : > { %18090 = vmatprep.subr.mxu0 %v15811_v20 }
 0x97a   : > { %18091 = vmatpush3.msra.mxu0 %v15795_v24 }
 0x97b   : > { %18092 = vmatprep.subr.mxu0 %v15810_v4 }
 0x97c   : > { %18093 = vmatpush3.msra.mxu0 %v15794_v22 }
 0x97d   : > { %18094 = vmatprep.subr.mxu0 %v15809_v34 }
 0x97e   : > { %18095 = vmatpush3.msra.mxu0 %v15793_v42 }
 0x97f   : > { %18096 = vmatprep.subr.mxu0 %v15808_v27 }
 0x980   : > { %18097 = vmatpush3.msra.mxu0 %v15792_v19 }
 0x981   : > { %18098 = vmatprep.subr.mxu0 %v15807_v32 }
 0x982   : > { %18099 = vmatpush3.msra.mxu0 %v15791_v48 }
 0x983   : > { %18100 = vmatprep.subr.mxu0 %v15806_v49 }
 0x984   : > { %18101 = vmatpush3.msra.mxu0 %v15790_v51 }
 0x985   : > { %18102 = vmatprep.subr.mxu0 %v15805_v26 }
 0x986   : > { %18103 = vmatpush3.msra.mxu0 %v15789_v5 }
 0x987   : > { %18104 = vmatprep.subr.mxu0 %v15804_v8 }
 0x988   : > { %18105 = vmatpush3.msra.mxu0 %v15788_v9 }
 0x989   : > { %18106 = vmatprep.subr.mxu0 %v15803_v62 }
 0x98a   : > { %18107 = vmatpush3.msra.mxu0 %v15787_v29 }
 0x98b   : > { %18108 = vmatprep.subr.mxu0 %v15802_v53 }
 0x98c   : > { %18109 = vmatpush3.msra.mxu0 %v15786_v55 }
 0x98d   : > { %18110 = vmatprep.subr.mxu0 %v15801_v2 }
 0x98e   : > { %18111 = vmatpush3.msra.mxu0 %v15785_v3 }
 0x98f   : > { %18112 = vmatprep.subr.mxu0 %v15800_v31 }
 0x990   : > { %18113 = vmatpush3.msra.mxu0 %v15784_v33 }
 0x991   : > { %18114 = vmatprep.subr.mxu0 %v15799_v39 }
 0x992   : > { %18115 = vmatpush3.msra.mxu0 %v15783_v36 }
 0xa32   : > { %v15701_v46 = vpop.f32.mrf.mxu0 }
 0xa33   : > { %v15772_v47 = vpop.f32.mrf.mxu1  ;;  %v15702_v37 = vadd.f32 %v15701_v46, %v15628_v13 }
 0xa34   : > { %v15703_v21 = vpop.f32.mrf.mxu0 }
 0xa35   : > { %v15773_v50 = vadd.f32 %v15772_v47, %v15702_v37  ;;  %v15704_v60 = vadd.f32 %v15703_v21, %v15632_v1  ;;  %v15774_v6 = vpop.f32.mrf.mxu1 }
 0xa37   : > { %v15775_v56 = vadd.f32 %v15774_v6, %v15704_v60  ;;  %v15779_v18 = vmul.f32 0.2, %v15773_v50  ;;  %vm15777_vm4 = vcmp.gt.f32.partialorder %v15773_v50, 0.0 }
 0xa39   : > { %v15780_v57 = vmul.f32 0.2, %v15775_v56  ;;  %vm15778_vm5 = vcmp.gt.f32.partialorder %v15775_v56, 0.0  ;;  %v15781_v43 = vsel %vm15777_vm4, %v15773_v50, %v15779_v18 }
 0xa3b   : > { %v15782_v11 = vsel %vm15778_vm5, %v15775_v56, %v15780_v57 }
 0xa3c   : > { %15886 = vmatprep.mubr.f32.mxu0 %v15782_v11 }
 0xa3d   : > { %15887 = vmatmul.mubr.f32.vlgmr.msra.gmra.mxu0 %v15781_v43 }
 0xafd   : > { %v18116_v59 = vpop.f32.mrf.mxu0 }
 0xaff   : > { %v18117_v44 = vpop.f32.mrf.mxu0 }
 0xb00   : > { %v18118_v17 = vadd.f32 %v18117_v44, %v18116_v59 }
 0xb02   : > { %v15889_v25 = vadd.f32 %v18118_v17, %v18078_v54 }
 0xb04   : > { %15893 = vst.msk [vmem:[%s24309_s7] sm:$0xff] %vm15892_vm6, %v15889_v25 }
 0xb05 PF: > { %s24_s8 = sadd.s32 1, %s21444_s8   ;;  %s24381_s26 = smov %s21428_s27 }
 0xb06   : > { %p21_p11 = scmp.ge.s32.totalorder %s24_s8, 8   ;;  %s24382_s27 = smov %s21432_s28 }
 0xb07   : > { %s24383_s28 = smov %s21592_s25  ;;  %s24384_s29 = smov %s21440_s30 }
 0xb08   : > { %s24385_s30 = smov %s24387_s14  ;;  %23 = sbr.rel (!%p21_p11) target bundleno = 9 (0x9), region = 111 }
 0xb0d   :  { %15913 = vsyncpa [#allocation5], 1 }
 0xb0e   :  { %15915 = vsyncpa [#allocation5 + $0x1], 1 }
 0xb0f   :  { %15916 = vsyncpa [#allocation7], 1 }
 0xb10   :  { %15917 = vsyncpa [#allocation10], 1 }

</bundles_post_ra>
